<compile_context>
chip_gen: v7x
topology: tpu7x:2x2x1
jax: 0.10.0
libtpu: 0.0.40
codegen_flags: <defaults>
</compile_context>

<pallas_src>
import math

import jax
import jax.numpy as jnp
from jax.experimental import pallas as pl
from jax.experimental.pallas import tpu as pltpu

_BN_EPS = 1e-5
_SOFTPLUS_THRESHOLD = 20.0  # torch.nn.Softplus default threshold
_LANE = 128                 # lane width; gc5 output is padded to this for a dense store
_N_STAGES = 4               # gc1..gc4, each followed by an HGCN_layer (3 inner GCN blocks)


def _softplus(x):
    # torch.nn.Softplus(beta=1, threshold=20): x > 20 -> x, else log1p(exp(x))
    safe_x = jnp.minimum(x, _SOFTPLUS_THRESHOLD)
    return jnp.where(x > _SOFTPLUS_THRESHOLD, x, jnp.log1p(jnp.exp(safe_x)))


def _make_fused_kernel(batch, n_nodes, n_prefetch):
    """Entire HGCNNet forward in one kernel body (statically unrolled, 17 GCN blocks).

    Ref layout (positional):
      inputs : x(B*N,1024) f32, hb(B*N,B*N) f32, gamma(16,N,1), beta(16,N,1),
               w0 (VMEM-resident gc1 weight), w1..w16 (HBM, memory_space=ANY)
      outputs: out (B*N, _LANE) f32
      scratch: 16 VMEM weight buffers (one per prefetched weight), DMA sem array (16,)
    """
    B, N = batch, n_nodes

    def kernel(*refs):
        x_ref, hb_ref, gamma_ref, beta_ref, w0_ref = refs[0:5]
        whbm = refs[5:5 + n_prefetch]                       # HBM weight refs (w1..w16)
        out_ref = refs[5 + n_prefetch]                      # (B*N, _LANE) f32
        wvmem = refs[6 + n_prefetch:6 + 2 * n_prefetch]     # VMEM scratch per weight
        sem = refs[6 + 2 * n_prefetch]                      # DMA semaphores (n_prefetch,)

        # ---- kick off all later-stage weight DMAs; they hide under compute ----
        copies = [pltpu.make_async_copy(whbm[i], wvmem[i], sem.at[i])
                  for i in range(n_prefetch)]
        for cp in copies:          # issued in usage order -> earliest-needed lands first
            cp.start()

        hb = hb_ref[...]           # (B*N, B*N) f32 block-diagonal I_B (x) H, loaded once

        def get_w(wi):
            if wi == 0:
                return w0_ref                      # gc1 weight: staged by Pallas prologue
            copies[wi - 1].wait()                  # first use of a prefetched weight
            return wvmem[wi - 1]

        def gcn(x_flat, wi):
            # GraphConvolution: (I_B (x) H) @ (X @ W); both dots on the MXU, M = B*N.
            w = get_w(wi)[...]
            support = jnp.dot(x_flat.astype(w.dtype), w,
                              preferred_element_type=jnp.float32)      # (B*N, Cout) f32
            return jnp.dot(hb, support, preferred_element_type=jnp.float32)

        def bn(y, idx):
            # nn.BatchNorm1d(img_len) on (B, img_len, C), training-mode batch stats,
            # folded to a single scale/shift:  y*scale + shift,
            #   scale = gamma * rsqrt(var + eps),  shift = beta - mean * scale.
            # y is flat (B*N, C); per-node stats reduce over (batch, channel).
            C = y.shape[-1]
            inv_cnt = 1.0 / float(B * C)
            row_s = jnp.sum(y, axis=-1, keepdims=True)          # (B*N, 1)
            row_ss = jnp.sum(y * y, axis=-1, keepdims=True)     # (B*N, 1)
            s_node = row_s[0:N]
            ss_node = row_ss[0:N]
            for b in range(1, B):                               # tiny sublane slices
                s_node = s_node + row_s[b * N:(b + 1) * N]
                ss_node = ss_node + row_ss[b * N:(b + 1) * N]
            mean = s_node * inv_cnt                             # (N, 1)
            var = jnp.maximum(ss_node * inv_cnt - mean * mean, 0.0)
            scale = gamma_ref[idx] * jax.lax.rsqrt(var + _BN_EPS)   # (N, 1)
            shift = beta_ref[idx] - mean * scale                    # (N, 1)
            scale_rows = jnp.concatenate([scale] * B, axis=0)       # (B*N, 1)
            shift_rows = jnp.concatenate([shift] * B, axis=0)
            return y * scale_rows + shift_rows                      # single fused apply

        x = x_ref[...]                 # (B*N, 1024) f32
        wi = 0                         # weight index (17 total)
        bni = 0                        # BN index     (16 total)
        for _ in range(_N_STAGES):
            # gc_i -> bn_i -> softplus
            x = _softplus(bn(gcn(x, wi), bni))
            wi += 1
            bni += 1
            # HGCN_layer_i: 3x [ gc -> bn -> softplus(layer_input + .) ]
            feat = x
            for _ in range(3):
                x = _softplus(feat + bn(gcn(x, wi), bni))
                wi += 1
                bni += 1
        # gc5 (lane-padded weight, no BN) -> softplus; single dense store.
        out_ref[...] = _softplus(gcn(x, wi))

    return kernel


# ----------------------------- parameter setup ------------------------------

def _xavier_normal(key, fan_in, fan_out):
    std = math.sqrt(2.0 / (fan_in + fan_out))
    return std * jax.random.normal(key, (fan_in, fan_out), dtype=jnp.float32)


def init_params(key, img_len, matmul_dtype=jnp.bfloat16):
    """Shapes match HGCNNet.__init__: gc 1024->512->256->128->32->1, 4 HGCN_layers.

    Weights are stored in `matmul_dtype` (bf16 halves MXU weight staging and weight
    DMA; harmless on v5e); BN params stay f32 and all elementwise math is f32.
    """
    stage_dims = [(1024, 512), (512, 256), (256, 128), (128, 32)]
    weights = []
    n_bn = 0
    for cin, cout in stage_dims:
        key, k = jax.random.split(key)
        weights.append(_xavier_normal(k, cin, cout))        # stage gc_i
        n_bn += 1
        for _ in range(3):                                   # HGCN_layer_i: 3x GCN(cout,cout)
            key, k = jax.random.split(key)
            weights.append(_xavier_normal(k, cout, cout))
            n_bn += 1
    key, k = jax.random.split(key)
    w5 = _xavier_normal(k, 32, 1)                            # gc5
    # Lane-pad gc5's (32, 1) weight to (32, _LANE) so the single output store is dense;
    # the wrapper slices the first channel back out.
    w5 = jnp.pad(w5, ((0, 0), (0, _LANE - 1)))
    weights.append(w5)

    weights = [w.astype(matmul_dtype) for w in weights]
    gamma = jnp.ones((n_bn, img_len, 1), jnp.float32)        # BN weight = 1 (torch default)
    beta = jnp.zeros((n_bn, img_len, 1), jnp.float32)        # BN bias   = 0
    return {"weights": weights, "gamma": gamma, "beta": beta}


# ------------------------------- forward pass -------------------------------

def hgcnnet_forward(feature, H, params):
    """Full HGCNNet forward as a single fused pallas_call with weight-DMA overlap."""
    B, N, Cin = feature.shape
    x_flat = feature.reshape(B * N, Cin)                     # fold batch into MXU M dim
    # Block-diagonal adjacency I_B (x) H so graph mixing is one (B*N,B*N)@(B*N,C) MXU dot.
    hb = jnp.kron(jnp.eye(B, dtype=jnp.float32), H.astype(jnp.float32))

    weights = params["weights"]
    w0, w_rest = weights[0], list(weights[1:])
    n_prefetch = len(w_rest)

    vspec = pl.BlockSpec(memory_space=pltpu.MemorySpace.VMEM)
    anyspec = pl.BlockSpec(memory_space=pl.ANY)              # stay in HBM; kernel prefetches
    in_specs = [vspec] * 5 + [anyspec] * n_prefetch
    scratch_shapes = [pltpu.VMEM(w.shape, w.dtype) for w in w_rest] + \
                     [pltpu.SemaphoreType.DMA((n_prefetch,))]

    out_flat = pl.pallas_call(
        _make_fused_kernel(B, N, n_prefetch),
        out_shape=jax.ShapeDtypeStruct((B * N, _LANE), jnp.float32),
        in_specs=in_specs,
        out_specs=vspec,
        scratch_shapes=scratch_shapes,
        compiler_params=pltpu.CompilerParams(
            # Resident data < 8 MiB; 48 MiB leaves headroom and is safe on v7x (64 MiB/TC).
            vmem_limit_bytes=48 * 1024 * 1024,
        ),
    )(x_flat, hb, params["gamma"], params["beta"], w0, *w_rest)

    return out_flat[:, :1].reshape(B, N, 1)   # slice lane-padded gc5 output back to C=1


# ----------------------------------- main ------------------------------------

if __name__ == "__main__":
    B = 2          # batch
    N = 8          # img_len (number of graph nodes)

    key = jax.random.PRNGKey(0)
    k_feat, k_adj, k_par = jax.random.split(key, 3)

    feature = jax.random.normal(k_feat, (B, N, 1024), dtype=jnp.float32)
    H = jax.random.uniform(k_adj, (N, N), dtype=jnp.float32) / N   # normalized-ish adjacency

    params = init_params(k_par, N)

    out = hgcnnet_forward(feature, H, params)
    out = jax.block_until_ready(out)

    assert out.shape == (B, N, 1), out.shape
    assert bool(jnp.all(jnp.isfinite(out)))
    print("KERNEL_OK")
</pallas_src>

<mosaic_0001>
module attributes {stable_mosaic.version = 11 : i64} {
  func.func @kernel(%arg0: memref<16x1024xf32, #tpu.memory_space<vmem>>, %arg1: memref<16x16xf32, #tpu.memory_space<vmem>>, %arg2: memref<16x8x1xf32, #tpu.memory_space<vmem>>, %arg3: memref<16x8x1xf32, #tpu.memory_space<vmem>>, %arg4: memref<1024x512xbf16, #tpu.memory_space<vmem>>, %arg5: memref<512x512xbf16, #tpu.memory_space<any>>, %arg6: memref<512x512xbf16, #tpu.memory_space<any>>, %arg7: memref<512x512xbf16, #tpu.memory_space<any>>, %arg8: memref<512x256xbf16, #tpu.memory_space<any>>, %arg9: memref<256x256xbf16, #tpu.memory_space<any>>, %arg10: memref<256x256xbf16, #tpu.memory_space<any>>, %arg11: memref<256x256xbf16, #tpu.memory_space<any>>, %arg12: memref<256x128xbf16, #tpu.memory_space<any>>, %arg13: memref<128x128xbf16, #tpu.memory_space<any>>, %arg14: memref<128x128xbf16, #tpu.memory_space<any>>, %arg15: memref<128x128xbf16, #tpu.memory_space<any>>, %arg16: memref<128x32xbf16, #tpu.memory_space<any>>, %arg17: memref<32x32xbf16, #tpu.memory_space<any>>, %arg18: memref<32x32xbf16, #tpu.memory_space<any>>, %arg19: memref<32x32xbf16, #tpu.memory_space<any>>, %arg20: memref<32x128xbf16, #tpu.memory_space<any>>, %arg21: memref<16x128xf32, #tpu.memory_space<vmem>>, %arg22: memref<512x512xbf16, #tpu.memory_space<vmem>>, %arg23: memref<512x512xbf16, #tpu.memory_space<vmem>>, %arg24: memref<512x512xbf16, #tpu.memory_space<vmem>>, %arg25: memref<512x256xbf16, #tpu.memory_space<vmem>>, %arg26: memref<256x256xbf16, #tpu.memory_space<vmem>>, %arg27: memref<256x256xbf16, #tpu.memory_space<vmem>>, %arg28: memref<256x256xbf16, #tpu.memory_space<vmem>>, %arg29: memref<256x128xbf16, #tpu.memory_space<vmem>>, %arg30: memref<128x128xbf16, #tpu.memory_space<vmem>>, %arg31: memref<128x128xbf16, #tpu.memory_space<vmem>>, %arg32: memref<128x128xbf16, #tpu.memory_space<vmem>>, %arg33: memref<128x32xbf16, #tpu.memory_space<vmem>>, %arg34: memref<32x32xbf16, #tpu.memory_space<vmem>>, %arg35: memref<32x32xbf16, #tpu.memory_space<vmem>>, %arg36: memref<32x32xbf16, #tpu.memory_space<vmem>>, %arg37: memref<32x128xbf16, #tpu.memory_space<vmem>>, %arg38: memref<16x!tpu.dma_semaphore, #tpu.memory_space<semaphore_mem>>) attributes {dimension_semantics = [], scalar_prefetch = 0 : i64, scratch_operands = 17 : i64, tpu.core_type = #tpu.core_type<tc>} {
    %c0_i32 = arith.constant 0 : i32
    %0 = tpu.memref_slice %arg38[%c0_i32] : memref<16x!tpu.dma_semaphore, #tpu.memory_space<semaphore_mem>> -> memref<1x!tpu.dma_semaphore, #tpu.memory_space<semaphore_mem>>
    %1 = tpu.memref_squeeze %0 : memref<1x!tpu.dma_semaphore, #tpu.memory_space<semaphore_mem>> -> memref<!tpu.dma_semaphore, #tpu.memory_space<semaphore_mem>>
    tpu.enqueue_dma source(%arg5 : memref<512x512xbf16, #tpu.memory_space<any>>) target(%arg22 : memref<512x512xbf16, #tpu.memory_space<vmem>>) target_semaphore(%1 : memref<!tpu.dma_semaphore, #tpu.memory_space<semaphore_mem>>)
    %c1_i32 = arith.constant 1 : i32
    %2 = tpu.memref_slice %arg38[%c1_i32] : memref<16x!tpu.dma_semaphore, #tpu.memory_space<semaphore_mem>> -> memref<1x!tpu.dma_semaphore, #tpu.memory_space<semaphore_mem>>
    %3 = tpu.memref_squeeze %2 : memref<1x!tpu.dma_semaphore, #tpu.memory_space<semaphore_mem>> -> memref<!tpu.dma_semaphore, #tpu.memory_space<semaphore_mem>>
    tpu.enqueue_dma source(%arg6 : memref<512x512xbf16, #tpu.memory_space<any>>) target(%arg23 : memref<512x512xbf16, #tpu.memory_space<vmem>>) target_semaphore(%3 : memref<!tpu.dma_semaphore, #tpu.memory_space<semaphore_mem>>)
    %c2_i32 = arith.constant 2 : i32
    %4 = tpu.memref_slice %arg38[%c2_i32] : memref<16x!tpu.dma_semaphore, #tpu.memory_space<semaphore_mem>> -> memref<1x!tpu.dma_semaphore, #tpu.memory_space<semaphore_mem>>
    %5 = tpu.memref_squeeze %4 : memref<1x!tpu.dma_semaphore, #tpu.memory_space<semaphore_mem>> -> memref<!tpu.dma_semaphore, #tpu.memory_space<semaphore_mem>>
    tpu.enqueue_dma source(%arg7 : memref<512x512xbf16, #tpu.memory_space<any>>) target(%arg24 : memref<512x512xbf16, #tpu.memory_space<vmem>>) target_semaphore(%5 : memref<!tpu.dma_semaphore, #tpu.memory_space<semaphore_mem>>)
    %c3_i32 = arith.constant 3 : i32
    %6 = tpu.memref_slice %arg38[%c3_i32] : memref<16x!tpu.dma_semaphore, #tpu.memory_space<semaphore_mem>> -> memref<1x!tpu.dma_semaphore, #tpu.memory_space<semaphore_mem>>
    %7 = tpu.memref_squeeze %6 : memref<1x!tpu.dma_semaphore, #tpu.memory_space<semaphore_mem>> -> memref<!tpu.dma_semaphore, #tpu.memory_space<semaphore_mem>>
    tpu.enqueue_dma source(%arg8 : memref<512x256xbf16, #tpu.memory_space<any>>) target(%arg25 : memref<512x256xbf16, #tpu.memory_space<vmem>>) target_semaphore(%7 : memref<!tpu.dma_semaphore, #tpu.memory_space<semaphore_mem>>)
    %c4_i32 = arith.constant 4 : i32
    %8 = tpu.memref_slice %arg38[%c4_i32] : memref<16x!tpu.dma_semaphore, #tpu.memory_space<semaphore_mem>> -> memref<1x!tpu.dma_semaphore, #tpu.memory_space<semaphore_mem>>
    %9 = tpu.memref_squeeze %8 : memref<1x!tpu.dma_semaphore, #tpu.memory_space<semaphore_mem>> -> memref<!tpu.dma_semaphore, #tpu.memory_space<semaphore_mem>>
    tpu.enqueue_dma source(%arg9 : memref<256x256xbf16, #tpu.memory_space<any>>) target(%arg26 : memref<256x256xbf16, #tpu.memory_space<vmem>>) target_semaphore(%9 : memref<!tpu.dma_semaphore, #tpu.memory_space<semaphore_mem>>)
    %c5_i32 = arith.constant 5 : i32
    %10 = tpu.memref_slice %arg38[%c5_i32] : memref<16x!tpu.dma_semaphore, #tpu.memory_space<semaphore_mem>> -> memref<1x!tpu.dma_semaphore, #tpu.memory_space<semaphore_mem>>
    %11 = tpu.memref_squeeze %10 : memref<1x!tpu.dma_semaphore, #tpu.memory_space<semaphore_mem>> -> memref<!tpu.dma_semaphore, #tpu.memory_space<semaphore_mem>>
    tpu.enqueue_dma source(%arg10 : memref<256x256xbf16, #tpu.memory_space<any>>) target(%arg27 : memref<256x256xbf16, #tpu.memory_space<vmem>>) target_semaphore(%11 : memref<!tpu.dma_semaphore, #tpu.memory_space<semaphore_mem>>)
    %c6_i32 = arith.constant 6 : i32
    %12 = tpu.memref_slice %arg38[%c6_i32] : memref<16x!tpu.dma_semaphore, #tpu.memory_space<semaphore_mem>> -> memref<1x!tpu.dma_semaphore, #tpu.memory_space<semaphore_mem>>
    %13 = tpu.memref_squeeze %12 : memref<1x!tpu.dma_semaphore, #tpu.memory_space<semaphore_mem>> -> memref<!tpu.dma_semaphore, #tpu.memory_space<semaphore_mem>>
    tpu.enqueue_dma source(%arg11 : memref<256x256xbf16, #tpu.memory_space<any>>) target(%arg28 : memref<256x256xbf16, #tpu.memory_space<vmem>>) target_semaphore(%13 : memref<!tpu.dma_semaphore, #tpu.memory_space<semaphore_mem>>)
    %c7_i32 = arith.constant 7 : i32
    %14 = tpu.memref_slice %arg38[%c7_i32] : memref<16x!tpu.dma_semaphore, #tpu.memory_space<semaphore_mem>> -> memref<1x!tpu.dma_semaphore, #tpu.memory_space<semaphore_mem>>
    %15 = tpu.memref_squeeze %14 : memref<1x!tpu.dma_semaphore, #tpu.memory_space<semaphore_mem>> -> memref<!tpu.dma_semaphore, #tpu.memory_space<semaphore_mem>>
    tpu.enqueue_dma source(%arg12 : memref<256x128xbf16, #tpu.memory_space<any>>) target(%arg29 : memref<256x128xbf16, #tpu.memory_space<vmem>>) target_semaphore(%15 : memref<!tpu.dma_semaphore, #tpu.memory_space<semaphore_mem>>)
    %c8_i32 = arith.constant 8 : i32
    %16 = tpu.memref_slice %arg38[%c8_i32] : memref<16x!tpu.dma_semaphore, #tpu.memory_space<semaphore_mem>> -> memref<1x!tpu.dma_semaphore, #tpu.memory_space<semaphore_mem>>
    %17 = tpu.memref_squeeze %16 : memref<1x!tpu.dma_semaphore, #tpu.memory_space<semaphore_mem>> -> memref<!tpu.dma_semaphore, #tpu.memory_space<semaphore_mem>>
    tpu.enqueue_dma source(%arg13 : memref<128x128xbf16, #tpu.memory_space<any>>) target(%arg30 : memref<128x128xbf16, #tpu.memory_space<vmem>>) target_semaphore(%17 : memref<!tpu.dma_semaphore, #tpu.memory_space<semaphore_mem>>)
    %c9_i32 = arith.constant 9 : i32
    %18 = tpu.memref_slice %arg38[%c9_i32] : memref<16x!tpu.dma_semaphore, #tpu.memory_space<semaphore_mem>> -> memref<1x!tpu.dma_semaphore, #tpu.memory_space<semaphore_mem>>
    %19 = tpu.memref_squeeze %18 : memref<1x!tpu.dma_semaphore, #tpu.memory_space<semaphore_mem>> -> memref<!tpu.dma_semaphore, #tpu.memory_space<semaphore_mem>>
    tpu.enqueue_dma source(%arg14 : memref<128x128xbf16, #tpu.memory_space<any>>) target(%arg31 : memref<128x128xbf16, #tpu.memory_space<vmem>>) target_semaphore(%19 : memref<!tpu.dma_semaphore, #tpu.memory_space<semaphore_mem>>)
    %c10_i32 = arith.constant 10 : i32
    %20 = tpu.memref_slice %arg38[%c10_i32] : memref<16x!tpu.dma_semaphore, #tpu.memory_space<semaphore_mem>> -> memref<1x!tpu.dma_semaphore, #tpu.memory_space<semaphore_mem>>
    %21 = tpu.memref_squeeze %20 : memref<1x!tpu.dma_semaphore, #tpu.memory_space<semaphore_mem>> -> memref<!tpu.dma_semaphore, #tpu.memory_space<semaphore_mem>>
    tpu.enqueue_dma source(%arg15 : memref<128x128xbf16, #tpu.memory_space<any>>) target(%arg32 : memref<128x128xbf16, #tpu.memory_space<vmem>>) target_semaphore(%21 : memref<!tpu.dma_semaphore, #tpu.memory_space<semaphore_mem>>)
    %c11_i32 = arith.constant 11 : i32
    %22 = tpu.memref_slice %arg38[%c11_i32] : memref<16x!tpu.dma_semaphore, #tpu.memory_space<semaphore_mem>> -> memref<1x!tpu.dma_semaphore, #tpu.memory_space<semaphore_mem>>
    %23 = tpu.memref_squeeze %22 : memref<1x!tpu.dma_semaphore, #tpu.memory_space<semaphore_mem>> -> memref<!tpu.dma_semaphore, #tpu.memory_space<semaphore_mem>>
    tpu.enqueue_dma source(%arg16 : memref<128x32xbf16, #tpu.memory_space<any>>) target(%arg33 : memref<128x32xbf16, #tpu.memory_space<vmem>>) target_semaphore(%23 : memref<!tpu.dma_semaphore, #tpu.memory_space<semaphore_mem>>)
    %c12_i32 = arith.constant 12 : i32
    %24 = tpu.memref_slice %arg38[%c12_i32] : memref<16x!tpu.dma_semaphore, #tpu.memory_space<semaphore_mem>> -> memref<1x!tpu.dma_semaphore, #tpu.memory_space<semaphore_mem>>
    %25 = tpu.memref_squeeze %24 : memref<1x!tpu.dma_semaphore, #tpu.memory_space<semaphore_mem>> -> memref<!tpu.dma_semaphore, #tpu.memory_space<semaphore_mem>>
    tpu.enqueue_dma source(%arg17 : memref<32x32xbf16, #tpu.memory_space<any>>) target(%arg34 : memref<32x32xbf16, #tpu.memory_space<vmem>>) target_semaphore(%25 : memref<!tpu.dma_semaphore, #tpu.memory_space<semaphore_mem>>)
    %c13_i32 = arith.constant 13 : i32
    %26 = tpu.memref_slice %arg38[%c13_i32] : memref<16x!tpu.dma_semaphore, #tpu.memory_space<semaphore_mem>> -> memref<1x!tpu.dma_semaphore, #tpu.memory_space<semaphore_mem>>
    %27 = tpu.memref_squeeze %26 : memref<1x!tpu.dma_semaphore, #tpu.memory_space<semaphore_mem>> -> memref<!tpu.dma_semaphore, #tpu.memory_space<semaphore_mem>>
    tpu.enqueue_dma source(%arg18 : memref<32x32xbf16, #tpu.memory_space<any>>) target(%arg35 : memref<32x32xbf16, #tpu.memory_space<vmem>>) target_semaphore(%27 : memref<!tpu.dma_semaphore, #tpu.memory_space<semaphore_mem>>)
    %c14_i32 = arith.constant 14 : i32
    %28 = tpu.memref_slice %arg38[%c14_i32] : memref<16x!tpu.dma_semaphore, #tpu.memory_space<semaphore_mem>> -> memref<1x!tpu.dma_semaphore, #tpu.memory_space<semaphore_mem>>
    %29 = tpu.memref_squeeze %28 : memref<1x!tpu.dma_semaphore, #tpu.memory_space<semaphore_mem>> -> memref<!tpu.dma_semaphore, #tpu.memory_space<semaphore_mem>>
    tpu.enqueue_dma source(%arg19 : memref<32x32xbf16, #tpu.memory_space<any>>) target(%arg36 : memref<32x32xbf16, #tpu.memory_space<vmem>>) target_semaphore(%29 : memref<!tpu.dma_semaphore, #tpu.memory_space<semaphore_mem>>)
    %c15_i32 = arith.constant 15 : i32
    %30 = tpu.memref_slice %arg38[%c15_i32] : memref<16x!tpu.dma_semaphore, #tpu.memory_space<semaphore_mem>> -> memref<1x!tpu.dma_semaphore, #tpu.memory_space<semaphore_mem>>
    %31 = tpu.memref_squeeze %30 : memref<1x!tpu.dma_semaphore, #tpu.memory_space<semaphore_mem>> -> memref<!tpu.dma_semaphore, #tpu.memory_space<semaphore_mem>>
    tpu.enqueue_dma source(%arg20 : memref<32x128xbf16, #tpu.memory_space<any>>) target(%arg37 : memref<32x128xbf16, #tpu.memory_space<vmem>>) target_semaphore(%31 : memref<!tpu.dma_semaphore, #tpu.memory_space<semaphore_mem>>)
    %c0 = arith.constant 0 : index
    %c0_0 = arith.constant 0 : index
    %32 = vector.load %arg1[%c0, %c0_0] : memref<16x16xf32, #tpu.memory_space<vmem>>, vector<16x16xf32>
    %c0_1 = arith.constant 0 : index
    %c0_2 = arith.constant 0 : index
    %33 = vector.load %arg0[%c0_1, %c0_2] : memref<16x1024xf32, #tpu.memory_space<vmem>>, vector<16x1024xf32>
    %c0_3 = arith.constant 0 : index
    %c0_4 = arith.constant 0 : index
    %34 = vector.load %arg4[%c0_3, %c0_4] : memref<1024x512xbf16, #tpu.memory_space<vmem>>, vector<1024x512xbf16>
    %35 = arith.truncf %33 : vector<16x1024xf32> to vector<16x1024xbf16>
    %cst = arith.constant dense<0.000000e+00> : vector<16x512xf32>
    %36 = tpu.matmul %35, %34, %cst {dimension_numbers = #tpu.dot_dimension_numbers<[1], [0], [0], [1], [0, 0, 1, 1], [], []>} : vector<16x1024xbf16>, vector<1024x512xbf16>, vector<16x512xf32> -> vector<16x512xf32>
    %cst_5 = arith.constant dense<0.000000e+00> : vector<16x512xf32>
    %37 = tpu.matmul %32, %36, %cst_5 {dimension_numbers = #tpu.dot_dimension_numbers<[1], [0], [0], [1], [0, 0, 1, 1], [], []>} : vector<16x16xf32>, vector<16x512xf32>, vector<16x512xf32> -> vector<16x512xf32>
    %cst_6 = arith.constant dense<0.000000e+00> : vector<16xf32>
    %38 = vector.multi_reduction <add>, %37, %cst_6 [1] : vector<16x512xf32> to vector<16xf32>
    %39 = vector.shape_cast %38 : vector<16xf32> to vector<16x1xf32>
    %40 = arith.mulf %37, %37 : vector<16x512xf32>
    %cst_7 = arith.constant dense<0.000000e+00> : vector<16xf32>
    %41 = vector.multi_reduction <add>, %40, %cst_7 [1] : vector<16x512xf32> to vector<16xf32>
    %42 = vector.shape_cast %41 : vector<16xf32> to vector<16x1xf32>
    %43 = vector.extract_strided_slice %39 {offsets = [0, 0], sizes = [8, 1], strides = [1, 1]} : vector<16x1xf32> to vector<8x1xf32>
    %44 = vector.extract_strided_slice %42 {offsets = [0, 0], sizes = [8, 1], strides = [1, 1]} : vector<16x1xf32> to vector<8x1xf32>
    %45 = vector.extract_strided_slice %39 {offsets = [8, 0], sizes = [8, 1], strides = [1, 1]} : vector<16x1xf32> to vector<8x1xf32>
    %46 = arith.addf %43, %45 : vector<8x1xf32>
    %47 = vector.extract_strided_slice %42 {offsets = [8, 0], sizes = [8, 1], strides = [1, 1]} : vector<16x1xf32> to vector<8x1xf32>
    %48 = arith.addf %44, %47 : vector<8x1xf32>
    %cst_8 = arith.constant 9.765625E-4 : f32
    %49 = vector.broadcast %cst_8 : f32 to vector<8x1xf32>
    %50 = arith.mulf %46, %49 : vector<8x1xf32>
    %cst_9 = arith.constant 9.765625E-4 : f32
    %51 = vector.broadcast %cst_9 : f32 to vector<8x1xf32>
    %52 = arith.mulf %48, %51 : vector<8x1xf32>
    %53 = arith.mulf %50, %50 : vector<8x1xf32>
    %54 = arith.subf %52, %53 : vector<8x1xf32>
    %cst_10 = arith.constant 0.000000e+00 : f32
    %55 = vector.broadcast %cst_10 : f32 to vector<8x1xf32>
    %56 = arith.maximumf %54, %55 : vector<8x1xf32>
    %c0_11 = arith.constant 0 : index
    %c0_12 = arith.constant 0 : index
    %c0_13 = arith.constant 0 : index
    %57 = vector.load %arg2[%c0_11, %c0_12, %c0_13] : memref<16x8x1xf32, #tpu.memory_space<vmem>>, vector<1x8x1xf32>
    %58 = vector.shape_cast %57 : vector<1x8x1xf32> to vector<8x1xf32>
    %cst_14 = arith.constant 9.99999974E-6 : f32
    %59 = vector.broadcast %cst_14 : f32 to vector<8x1xf32>
    %60 = arith.addf %56, %59 : vector<8x1xf32>
    %61 = math.rsqrt %60 : vector<8x1xf32>
    %62 = arith.mulf %58, %61 : vector<8x1xf32>
    %c0_15 = arith.constant 0 : index
    %c0_16 = arith.constant 0 : index
    %c0_17 = arith.constant 0 : index
    %63 = vector.load %arg3[%c0_15, %c0_16, %c0_17] : memref<16x8x1xf32, #tpu.memory_space<vmem>>, vector<1x8x1xf32>
    %64 = vector.shape_cast %63 : vector<1x8x1xf32> to vector<8x1xf32>
    %65 = arith.mulf %50, %62 : vector<8x1xf32>
    %66 = arith.subf %64, %65 : vector<8x1xf32>
    %67 = tpu.concatenate %62, %62 in 0 : vector<8x1xf32>, vector<8x1xf32> -> vector<16x1xf32>
    %68 = tpu.concatenate %66, %66 in 0 : vector<8x1xf32>, vector<8x1xf32> -> vector<16x1xf32>
    %69 = vector.broadcast %67 : vector<16x1xf32> to vector<16x512xf32>
    %70 = arith.mulf %37, %69 : vector<16x512xf32>
    %71 = vector.broadcast %68 : vector<16x1xf32> to vector<16x512xf32>
    %72 = arith.addf %70, %71 : vector<16x512xf32>
    %cst_18 = arith.constant 2.000000e+01 : f32
    %73 = vector.broadcast %cst_18 : f32 to vector<16x512xf32>
    %74 = arith.minimumf %72, %73 : vector<16x512xf32>
    %cst_19 = arith.constant 2.000000e+01 : f32
    %75 = vector.broadcast %cst_19 : f32 to vector<16x512xf32>
    %76 = arith.cmpf ogt, %72, %75 : vector<16x512xf32>
    %77 = math.exp %74 : vector<16x512xf32>
    %78 = math.log1p %77 : vector<16x512xf32>
    %79 = arith.select %76, %72, %78 : vector<16x512xi1>, vector<16x512xf32>
    %c0_i32_20 = arith.constant 0 : i32
    %80 = tpu.memref_slice %arg38[%c0_i32_20] : memref<16x!tpu.dma_semaphore, #tpu.memory_space<semaphore_mem>> -> memref<1x!tpu.dma_semaphore, #tpu.memory_space<semaphore_mem>>
    %81 = tpu.memref_squeeze %80 : memref<1x!tpu.dma_semaphore, #tpu.memory_space<semaphore_mem>> -> memref<!tpu.dma_semaphore, #tpu.memory_space<semaphore_mem>>
    tpu.wait_dma2 semaphore(%81 : memref<!tpu.dma_semaphore, #tpu.memory_space<semaphore_mem>>) src(%arg5 : memref<512x512xbf16, #tpu.memory_space<any>>) dst(%arg22 : memref<512x512xbf16, #tpu.memory_space<vmem>>)
    %c0_21 = arith.constant 0 : index
    %c0_22 = arith.constant 0 : index
    %82 = vector.load %arg22[%c0_21, %c0_22] : memref<512x512xbf16, #tpu.memory_space<vmem>>, vector<512x512xbf16>
    %83 = arith.truncf %79 : vector<16x512xf32> to vector<16x512xbf16>
    %cst_23 = arith.constant dense<0.000000e+00> : vector<16x512xf32>
    %84 = tpu.matmul %83, %82, %cst_23 {dimension_numbers = #tpu.dot_dimension_numbers<[1], [0], [0], [1], [0, 0, 1, 1], [], []>} : vector<16x512xbf16>, vector<512x512xbf16>, vector<16x512xf32> -> vector<16x512xf32>
    %cst_24 = arith.constant dense<0.000000e+00> : vector<16x512xf32>
    %85 = tpu.matmul %32, %84, %cst_24 {dimension_numbers = #tpu.dot_dimension_numbers<[1], [0], [0], [1], [0, 0, 1, 1], [], []>} : vector<16x16xf32>, vector<16x512xf32>, vector<16x512xf32> -> vector<16x512xf32>
    %cst_25 = arith.constant dense<0.000000e+00> : vector<16xf32>
    %86 = vector.multi_reduction <add>, %85, %cst_25 [1] : vector<16x512xf32> to vector<16xf32>
    %87 = vector.shape_cast %86 : vector<16xf32> to vector<16x1xf32>
    %88 = arith.mulf %85, %85 : vector<16x512xf32>
    %cst_26 = arith.constant dense<0.000000e+00> : vector<16xf32>
    %89 = vector.multi_reduction <add>, %88, %cst_26 [1] : vector<16x512xf32> to vector<16xf32>
    %90 = vector.shape_cast %89 : vector<16xf32> to vector<16x1xf32>
    %91 = vector.extract_strided_slice %87 {offsets = [0, 0], sizes = [8, 1], strides = [1, 1]} : vector<16x1xf32> to vector<8x1xf32>
    %92 = vector.extract_strided_slice %90 {offsets = [0, 0], sizes = [8, 1], strides = [1, 1]} : vector<16x1xf32> to vector<8x1xf32>
    %93 = vector.extract_strided_slice %87 {offsets = [8, 0], sizes = [8, 1], strides = [1, 1]} : vector<16x1xf32> to vector<8x1xf32>
    %94 = arith.addf %91, %93 : vector<8x1xf32>
    %95 = vector.extract_strided_slice %90 {offsets = [8, 0], sizes = [8, 1], strides = [1, 1]} : vector<16x1xf32> to vector<8x1xf32>
    %96 = arith.addf %92, %95 : vector<8x1xf32>
    %cst_27 = arith.constant 9.765625E-4 : f32
    %97 = vector.broadcast %cst_27 : f32 to vector<8x1xf32>
    %98 = arith.mulf %94, %97 : vector<8x1xf32>
    %cst_28 = arith.constant 9.765625E-4 : f32
    %99 = vector.broadcast %cst_28 : f32 to vector<8x1xf32>
    %100 = arith.mulf %96, %99 : vector<8x1xf32>
    %101 = arith.mulf %98, %98 : vector<8x1xf32>
    %102 = arith.subf %100, %101 : vector<8x1xf32>
    %cst_29 = arith.constant 0.000000e+00 : f32
    %103 = vector.broadcast %cst_29 : f32 to vector<8x1xf32>
    %104 = arith.maximumf %102, %103 : vector<8x1xf32>
    %c1 = arith.constant 1 : index
    %c0_30 = arith.constant 0 : index
    %c0_31 = arith.constant 0 : index
    %105 = vector.load %arg2[%c1, %c0_30, %c0_31] : memref<16x8x1xf32, #tpu.memory_space<vmem>>, vector<1x8x1xf32>
    %106 = vector.shape_cast %105 : vector<1x8x1xf32> to vector<8x1xf32>
    %cst_32 = arith.constant 9.99999974E-6 : f32
    %107 = vector.broadcast %cst_32 : f32 to vector<8x1xf32>
    %108 = arith.addf %104, %107 : vector<8x1xf32>
    %109 = math.rsqrt %108 : vector<8x1xf32>
    %110 = arith.mulf %106, %109 : vector<8x1xf32>
    %c1_33 = arith.constant 1 : index
    %c0_34 = arith.constant 0 : index
    %c0_35 = arith.constant 0 : index
    %111 = vector.load %arg3[%c1_33, %c0_34, %c0_35] : memref<16x8x1xf32, #tpu.memory_space<vmem>>, vector<1x8x1xf32>
    %112 = vector.shape_cast %111 : vector<1x8x1xf32> to vector<8x1xf32>
    %113 = arith.mulf %98, %110 : vector<8x1xf32>
    %114 = arith.subf %112, %113 : vector<8x1xf32>
    %115 = tpu.concatenate %110, %110 in 0 : vector<8x1xf32>, vector<8x1xf32> -> vector<16x1xf32>
    %116 = tpu.concatenate %114, %114 in 0 : vector<8x1xf32>, vector<8x1xf32> -> vector<16x1xf32>
    %117 = vector.broadcast %115 : vector<16x1xf32> to vector<16x512xf32>
    %118 = arith.mulf %85, %117 : vector<16x512xf32>
    %119 = vector.broadcast %116 : vector<16x1xf32> to vector<16x512xf32>
    %120 = arith.addf %118, %119 : vector<16x512xf32>
    %121 = arith.addf %79, %120 : vector<16x512xf32>
    %cst_36 = arith.constant 2.000000e+01 : f32
    %122 = vector.broadcast %cst_36 : f32 to vector<16x512xf32>
    %123 = arith.minimumf %121, %122 : vector<16x512xf32>
    %cst_37 = arith.constant 2.000000e+01 : f32
    %124 = vector.broadcast %cst_37 : f32 to vector<16x512xf32>
    %125 = arith.cmpf ogt, %121, %124 : vector<16x512xf32>
    %126 = math.exp %123 : vector<16x512xf32>
    %127 = math.log1p %126 : vector<16x512xf32>
    %128 = arith.select %125, %121, %127 : vector<16x512xi1>, vector<16x512xf32>
    %c1_i32_38 = arith.constant 1 : i32
    %129 = tpu.memref_slice %arg38[%c1_i32_38] : memref<16x!tpu.dma_semaphore, #tpu.memory_space<semaphore_mem>> -> memref<1x!tpu.dma_semaphore, #tpu.memory_space<semaphore_mem>>
    %130 = tpu.memref_squeeze %129 : memref<1x!tpu.dma_semaphore, #tpu.memory_space<semaphore_mem>> -> memref<!tpu.dma_semaphore, #tpu.memory_space<semaphore_mem>>
    tpu.wait_dma2 semaphore(%130 : memref<!tpu.dma_semaphore, #tpu.memory_space<semaphore_mem>>) src(%arg6 : memref<512x512xbf16, #tpu.memory_space<any>>) dst(%arg23 : memref<512x512xbf16, #tpu.memory_space<vmem>>)
    %c0_39 = arith.constant 0 : index
    %c0_40 = arith.constant 0 : index
    %131 = vector.load %arg23[%c0_39, %c0_40] : memref<512x512xbf16, #tpu.memory_space<vmem>>, vector<512x512xbf16>
    %132 = arith.truncf %128 : vector<16x512xf32> to vector<16x512xbf16>
    %cst_41 = arith.constant dense<0.000000e+00> : vector<16x512xf32>
    %133 = tpu.matmul %132, %131, %cst_41 {dimension_numbers = #tpu.dot_dimension_numbers<[1], [0], [0], [1], [0, 0, 1, 1], [], []>} : vector<16x512xbf16>, vector<512x512xbf16>, vector<16x512xf32> -> vector<16x512xf32>
    %cst_42 = arith.constant dense<0.000000e+00> : vector<16x512xf32>
    %134 = tpu.matmul %32, %133, %cst_42 {dimension_numbers = #tpu.dot_dimension_numbers<[1], [0], [0], [1], [0, 0, 1, 1], [], []>} : vector<16x16xf32>, vector<16x512xf32>, vector<16x512xf32> -> vector<16x512xf32>
    %cst_43 = arith.constant dense<0.000000e+00> : vector<16xf32>
    %135 = vector.multi_reduction <add>, %134, %cst_43 [1] : vector<16x512xf32> to vector<16xf32>
    %136 = vector.shape_cast %135 : vector<16xf32> to vector<16x1xf32>
    %137 = arith.mulf %134, %134 : vector<16x512xf32>
    %cst_44 = arith.constant dense<0.000000e+00> : vector<16xf32>
    %138 = vector.multi_reduction <add>, %137, %cst_44 [1] : vector<16x512xf32> to vector<16xf32>
    %139 = vector.shape_cast %138 : vector<16xf32> to vector<16x1xf32>
    %140 = vector.extract_strided_slice %136 {offsets = [0, 0], sizes = [8, 1], strides = [1, 1]} : vector<16x1xf32> to vector<8x1xf32>
    %141 = vector.extract_strided_slice %139 {offsets = [0, 0], sizes = [8, 1], strides = [1, 1]} : vector<16x1xf32> to vector<8x1xf32>
    %142 = vector.extract_strided_slice %136 {offsets = [8, 0], sizes = [8, 1], strides = [1, 1]} : vector<16x1xf32> to vector<8x1xf32>
    %143 = arith.addf %140, %142 : vector<8x1xf32>
    %144 = vector.extract_strided_slice %139 {offsets = [8, 0], sizes = [8, 1], strides = [1, 1]} : vector<16x1xf32> to vector<8x1xf32>
    %145 = arith.addf %141, %144 : vector<8x1xf32>
    %cst_45 = arith.constant 9.765625E-4 : f32
    %146 = vector.broadcast %cst_45 : f32 to vector<8x1xf32>
    %147 = arith.mulf %143, %146 : vector<8x1xf32>
    %cst_46 = arith.constant 9.765625E-4 : f32
    %148 = vector.broadcast %cst_46 : f32 to vector<8x1xf32>
    %149 = arith.mulf %145, %148 : vector<8x1xf32>
    %150 = arith.mulf %147, %147 : vector<8x1xf32>
    %151 = arith.subf %149, %150 : vector<8x1xf32>
    %cst_47 = arith.constant 0.000000e+00 : f32
    %152 = vector.broadcast %cst_47 : f32 to vector<8x1xf32>
    %153 = arith.maximumf %151, %152 : vector<8x1xf32>
    %c2 = arith.constant 2 : index
    %c0_48 = arith.constant 0 : index
    %c0_49 = arith.constant 0 : index
    %154 = vector.load %arg2[%c2, %c0_48, %c0_49] : memref<16x8x1xf32, #tpu.memory_space<vmem>>, vector<1x8x1xf32>
    %155 = vector.shape_cast %154 : vector<1x8x1xf32> to vector<8x1xf32>
    %cst_50 = arith.constant 9.99999974E-6 : f32
    %156 = vector.broadcast %cst_50 : f32 to vector<8x1xf32>
    %157 = arith.addf %153, %156 : vector<8x1xf32>
    %158 = math.rsqrt %157 : vector<8x1xf32>
    %159 = arith.mulf %155, %158 : vector<8x1xf32>
    %c2_51 = arith.constant 2 : index
    %c0_52 = arith.constant 0 : index
    %c0_53 = arith.constant 0 : index
    %160 = vector.load %arg3[%c2_51, %c0_52, %c0_53] : memref<16x8x1xf32, #tpu.memory_space<vmem>>, vector<1x8x1xf32>
    %161 = vector.shape_cast %160 : vector<1x8x1xf32> to vector<8x1xf32>
    %162 = arith.mulf %147, %159 : vector<8x1xf32>
    %163 = arith.subf %161, %162 : vector<8x1xf32>
    %164 = tpu.concatenate %159, %159 in 0 : vector<8x1xf32>, vector<8x1xf32> -> vector<16x1xf32>
    %165 = tpu.concatenate %163, %163 in 0 : vector<8x1xf32>, vector<8x1xf32> -> vector<16x1xf32>
    %166 = vector.broadcast %164 : vector<16x1xf32> to vector<16x512xf32>
    %167 = arith.mulf %134, %166 : vector<16x512xf32>
    %168 = vector.broadcast %165 : vector<16x1xf32> to vector<16x512xf32>
    %169 = arith.addf %167, %168 : vector<16x512xf32>
    %170 = arith.addf %79, %169 : vector<16x512xf32>
    %cst_54 = arith.constant 2.000000e+01 : f32
    %171 = vector.broadcast %cst_54 : f32 to vector<16x512xf32>
    %172 = arith.minimumf %170, %171 : vector<16x512xf32>
    %cst_55 = arith.constant 2.000000e+01 : f32
    %173 = vector.broadcast %cst_55 : f32 to vector<16x512xf32>
    %174 = arith.cmpf ogt, %170, %173 : vector<16x512xf32>
    %175 = math.exp %172 : vector<16x512xf32>
    %176 = math.log1p %175 : vector<16x512xf32>
    %177 = arith.select %174, %170, %176 : vector<16x512xi1>, vector<16x512xf32>
    %c2_i32_56 = arith.constant 2 : i32
    %178 = tpu.memref_slice %arg38[%c2_i32_56] : memref<16x!tpu.dma_semaphore, #tpu.memory_space<semaphore_mem>> -> memref<1x!tpu.dma_semaphore, #tpu.memory_space<semaphore_mem>>
    %179 = tpu.memref_squeeze %178 : memref<1x!tpu.dma_semaphore, #tpu.memory_space<semaphore_mem>> -> memref<!tpu.dma_semaphore, #tpu.memory_space<semaphore_mem>>
    tpu.wait_dma2 semaphore(%179 : memref<!tpu.dma_semaphore, #tpu.memory_space<semaphore_mem>>) src(%arg7 : memref<512x512xbf16, #tpu.memory_space<any>>) dst(%arg24 : memref<512x512xbf16, #tpu.memory_space<vmem>>)
    %c0_57 = arith.constant 0 : index
    %c0_58 = arith.constant 0 : index
    %180 = vector.load %arg24[%c0_57, %c0_58] : memref<512x512xbf16, #tpu.memory_space<vmem>>, vector<512x512xbf16>
    %181 = arith.truncf %177 : vector<16x512xf32> to vector<16x512xbf16>
    %cst_59 = arith.constant dense<0.000000e+00> : vector<16x512xf32>
    %182 = tpu.matmul %181, %180, %cst_59 {dimension_numbers = #tpu.dot_dimension_numbers<[1], [0], [0], [1], [0, 0, 1, 1], [], []>} : vector<16x512xbf16>, vector<512x512xbf16>, vector<16x512xf32> -> vector<16x512xf32>
    %cst_60 = arith.constant dense<0.000000e+00> : vector<16x512xf32>
    %183 = tpu.matmul %32, %182, %cst_60 {dimension_numbers = #tpu.dot_dimension_numbers<[1], [0], [0], [1], [0, 0, 1, 1], [], []>} : vector<16x16xf32>, vector<16x512xf32>, vector<16x512xf32> -> vector<16x512xf32>
    %cst_61 = arith.constant dense<0.000000e+00> : vector<16xf32>
    %184 = vector.multi_reduction <add>, %183, %cst_61 [1] : vector<16x512xf32> to vector<16xf32>
    %185 = vector.shape_cast %184 : vector<16xf32> to vector<16x1xf32>
    %186 = arith.mulf %183, %183 : vector<16x512xf32>
    %cst_62 = arith.constant dense<0.000000e+00> : vector<16xf32>
    %187 = vector.multi_reduction <add>, %186, %cst_62 [1] : vector<16x512xf32> to vector<16xf32>
    %188 = vector.shape_cast %187 : vector<16xf32> to vector<16x1xf32>
    %189 = vector.extract_strided_slice %185 {offsets = [0, 0], sizes = [8, 1], strides = [1, 1]} : vector<16x1xf32> to vector<8x1xf32>
    %190 = vector.extract_strided_slice %188 {offsets = [0, 0], sizes = [8, 1], strides = [1, 1]} : vector<16x1xf32> to vector<8x1xf32>
    %191 = vector.extract_strided_slice %185 {offsets = [8, 0], sizes = [8, 1], strides = [1, 1]} : vector<16x1xf32> to vector<8x1xf32>
    %192 = arith.addf %189, %191 : vector<8x1xf32>
    %193 = vector.extract_strided_slice %188 {offsets = [8, 0], sizes = [8, 1], strides = [1, 1]} : vector<16x1xf32> to vector<8x1xf32>
    %194 = arith.addf %190, %193 : vector<8x1xf32>
    %cst_63 = arith.constant 9.765625E-4 : f32
    %195 = vector.broadcast %cst_63 : f32 to vector<8x1xf32>
    %196 = arith.mulf %192, %195 : vector<8x1xf32>
    %cst_64 = arith.constant 9.765625E-4 : f32
    %197 = vector.broadcast %cst_64 : f32 to vector<8x1xf32>
    %198 = arith.mulf %194, %197 : vector<8x1xf32>
    %199 = arith.mulf %196, %196 : vector<8x1xf32>
    %200 = arith.subf %198, %199 : vector<8x1xf32>
    %cst_65 = arith.constant 0.000000e+00 : f32
    %201 = vector.broadcast %cst_65 : f32 to vector<8x1xf32>
    %202 = arith.maximumf %200, %201 : vector<8x1xf32>
    %c3 = arith.constant 3 : index
    %c0_66 = arith.constant 0 : index
    %c0_67 = arith.constant 0 : index
    %203 = vector.load %arg2[%c3, %c0_66, %c0_67] : memref<16x8x1xf32, #tpu.memory_space<vmem>>, vector<1x8x1xf32>
    %204 = vector.shape_cast %203 : vector<1x8x1xf32> to vector<8x1xf32>
    %cst_68 = arith.constant 9.99999974E-6 : f32
    %205 = vector.broadcast %cst_68 : f32 to vector<8x1xf32>
    %206 = arith.addf %202, %205 : vector<8x1xf32>
    %207 = math.rsqrt %206 : vector<8x1xf32>
    %208 = arith.mulf %204, %207 : vector<8x1xf32>
    %c3_69 = arith.constant 3 : index
    %c0_70 = arith.constant 0 : index
    %c0_71 = arith.constant 0 : index
    %209 = vector.load %arg3[%c3_69, %c0_70, %c0_71] : memref<16x8x1xf32, #tpu.memory_space<vmem>>, vector<1x8x1xf32>
    %210 = vector.shape_cast %209 : vector<1x8x1xf32> to vector<8x1xf32>
    %211 = arith.mulf %196, %208 : vector<8x1xf32>
    %212 = arith.subf %210, %211 : vector<8x1xf32>
    %213 = tpu.concatenate %208, %208 in 0 : vector<8x1xf32>, vector<8x1xf32> -> vector<16x1xf32>
    %214 = tpu.concatenate %212, %212 in 0 : vector<8x1xf32>, vector<8x1xf32> -> vector<16x1xf32>
    %215 = vector.broadcast %213 : vector<16x1xf32> to vector<16x512xf32>
    %216 = arith.mulf %183, %215 : vector<16x512xf32>
    %217 = vector.broadcast %214 : vector<16x1xf32> to vector<16x512xf32>
    %218 = arith.addf %216, %217 : vector<16x512xf32>
    %219 = arith.addf %79, %218 : vector<16x512xf32>
    %cst_72 = arith.constant 2.000000e+01 : f32
    %220 = vector.broadcast %cst_72 : f32 to vector<16x512xf32>
    %221 = arith.minimumf %219, %220 : vector<16x512xf32>
    %cst_73 = arith.constant 2.000000e+01 : f32
    %222 = vector.broadcast %cst_73 : f32 to vector<16x512xf32>
    %223 = arith.cmpf ogt, %219, %222 : vector<16x512xf32>
    %224 = math.exp %221 : vector<16x512xf32>
    %225 = math.log1p %224 : vector<16x512xf32>
    %226 = arith.select %223, %219, %225 : vector<16x512xi1>, vector<16x512xf32>
    %c3_i32_74 = arith.constant 3 : i32
    %227 = tpu.memref_slice %arg38[%c3_i32_74] : memref<16x!tpu.dma_semaphore, #tpu.memory_space<semaphore_mem>> -> memref<1x!tpu.dma_semaphore, #tpu.memory_space<semaphore_mem>>
    %228 = tpu.memref_squeeze %227 : memref<1x!tpu.dma_semaphore, #tpu.memory_space<semaphore_mem>> -> memref<!tpu.dma_semaphore, #tpu.memory_space<semaphore_mem>>
    tpu.wait_dma2 semaphore(%228 : memref<!tpu.dma_semaphore, #tpu.memory_space<semaphore_mem>>) src(%arg8 : memref<512x256xbf16, #tpu.memory_space<any>>) dst(%arg25 : memref<512x256xbf16, #tpu.memory_space<vmem>>)
    %c0_75 = arith.constant 0 : index
    %c0_76 = arith.constant 0 : index
    %229 = vector.load %arg25[%c0_75, %c0_76] : memref<512x256xbf16, #tpu.memory_space<vmem>>, vector<512x256xbf16>
    %230 = arith.truncf %226 : vector<16x512xf32> to vector<16x512xbf16>
    %cst_77 = arith.constant dense<0.000000e+00> : vector<16x256xf32>
    %231 = tpu.matmul %230, %229, %cst_77 {dimension_numbers = #tpu.dot_dimension_numbers<[1], [0], [0], [1], [0, 0, 1, 1], [], []>} : vector<16x512xbf16>, vector<512x256xbf16>, vector<16x256xf32> -> vector<16x256xf32>
    %cst_78 = arith.constant dense<0.000000e+00> : vector<16x256xf32>
    %232 = tpu.matmul %32, %231, %cst_78 {dimension_numbers = #tpu.dot_dimension_numbers<[1], [0], [0], [1], [0, 0, 1, 1], [], []>} : vector<16x16xf32>, vector<16x256xf32>, vector<16x256xf32> -> vector<16x256xf32>
    %cst_79 = arith.constant dense<0.000000e+00> : vector<16xf32>
    %233 = vector.multi_reduction <add>, %232, %cst_79 [1] : vector<16x256xf32> to vector<16xf32>
    %234 = vector.shape_cast %233 : vector<16xf32> to vector<16x1xf32>
    %235 = arith.mulf %232, %232 : vector<16x256xf32>
    %cst_80 = arith.constant dense<0.000000e+00> : vector<16xf32>
    %236 = vector.multi_reduction <add>, %235, %cst_80 [1] : vector<16x256xf32> to vector<16xf32>
    %237 = vector.shape_cast %236 : vector<16xf32> to vector<16x1xf32>
    %238 = vector.extract_strided_slice %234 {offsets = [0, 0], sizes = [8, 1], strides = [1, 1]} : vector<16x1xf32> to vector<8x1xf32>
    %239 = vector.extract_strided_slice %237 {offsets = [0, 0], sizes = [8, 1], strides = [1, 1]} : vector<16x1xf32> to vector<8x1xf32>
    %240 = vector.extract_strided_slice %234 {offsets = [8, 0], sizes = [8, 1], strides = [1, 1]} : vector<16x1xf32> to vector<8x1xf32>
    %241 = arith.addf %238, %240 : vector<8x1xf32>
    %242 = vector.extract_strided_slice %237 {offsets = [8, 0], sizes = [8, 1], strides = [1, 1]} : vector<16x1xf32> to vector<8x1xf32>
    %243 = arith.addf %239, %242 : vector<8x1xf32>
    %cst_81 = arith.constant 0.001953125 : f32
    %244 = vector.broadcast %cst_81 : f32 to vector<8x1xf32>
    %245 = arith.mulf %241, %244 : vector<8x1xf32>
    %cst_82 = arith.constant 0.001953125 : f32
    %246 = vector.broadcast %cst_82 : f32 to vector<8x1xf32>
    %247 = arith.mulf %243, %246 : vector<8x1xf32>
    %248 = arith.mulf %245, %245 : vector<8x1xf32>
    %249 = arith.subf %247, %248 : vector<8x1xf32>
    %cst_83 = arith.constant 0.000000e+00 : f32
    %250 = vector.broadcast %cst_83 : f32 to vector<8x1xf32>
    %251 = arith.maximumf %249, %250 : vector<8x1xf32>
    %c4 = arith.constant 4 : index
    %c0_84 = arith.constant 0 : index
    %c0_85 = arith.constant 0 : index
    %252 = vector.load %arg2[%c4, %c0_84, %c0_85] : memref<16x8x1xf32, #tpu.memory_space<vmem>>, vector<1x8x1xf32>
    %253 = vector.shape_cast %252 : vector<1x8x1xf32> to vector<8x1xf32>
    %cst_86 = arith.constant 9.99999974E-6 : f32
    %254 = vector.broadcast %cst_86 : f32 to vector<8x1xf32>
    %255 = arith.addf %251, %254 : vector<8x1xf32>
    %256 = math.rsqrt %255 : vector<8x1xf32>
    %257 = arith.mulf %253, %256 : vector<8x1xf32>
    %c4_87 = arith.constant 4 : index
    %c0_88 = arith.constant 0 : index
    %c0_89 = arith.constant 0 : index
    %258 = vector.load %arg3[%c4_87, %c0_88, %c0_89] : memref<16x8x1xf32, #tpu.memory_space<vmem>>, vector<1x8x1xf32>
    %259 = vector.shape_cast %258 : vector<1x8x1xf32> to vector<8x1xf32>
    %260 = arith.mulf %245, %257 : vector<8x1xf32>
    %261 = arith.subf %259, %260 : vector<8x1xf32>
    %262 = tpu.concatenate %257, %257 in 0 : vector<8x1xf32>, vector<8x1xf32> -> vector<16x1xf32>
    %263 = tpu.concatenate %261, %261 in 0 : vector<8x1xf32>, vector<8x1xf32> -> vector<16x1xf32>
    %264 = vector.broadcast %262 : vector<16x1xf32> to vector<16x256xf32>
    %265 = arith.mulf %232, %264 : vector<16x256xf32>
    %266 = vector.broadcast %263 : vector<16x1xf32> to vector<16x256xf32>
    %267 = arith.addf %265, %266 : vector<16x256xf32>
    %cst_90 = arith.constant 2.000000e+01 : f32
    %268 = vector.broadcast %cst_90 : f32 to vector<16x256xf32>
    %269 = arith.minimumf %267, %268 : vector<16x256xf32>
    %cst_91 = arith.constant 2.000000e+01 : f32
    %270 = vector.broadcast %cst_91 : f32 to vector<16x256xf32>
    %271 = arith.cmpf ogt, %267, %270 : vector<16x256xf32>
    %272 = math.exp %269 : vector<16x256xf32>
    %273 = math.log1p %272 : vector<16x256xf32>
    %274 = arith.select %271, %267, %273 : vector<16x256xi1>, vector<16x256xf32>
    %c4_i32_92 = arith.constant 4 : i32
    %275 = tpu.memref_slice %arg38[%c4_i32_92] : memref<16x!tpu.dma_semaphore, #tpu.memory_space<semaphore_mem>> -> memref<1x!tpu.dma_semaphore, #tpu.memory_space<semaphore_mem>>
    %276 = tpu.memref_squeeze %275 : memref<1x!tpu.dma_semaphore, #tpu.memory_space<semaphore_mem>> -> memref<!tpu.dma_semaphore, #tpu.memory_space<semaphore_mem>>
    tpu.wait_dma2 semaphore(%276 : memref<!tpu.dma_semaphore, #tpu.memory_space<semaphore_mem>>) src(%arg9 : memref<256x256xbf16, #tpu.memory_space<any>>) dst(%arg26 : memref<256x256xbf16, #tpu.memory_space<vmem>>)
    %c0_93 = arith.constant 0 : index
    %c0_94 = arith.constant 0 : index
    %277 = vector.load %arg26[%c0_93, %c0_94] : memref<256x256xbf16, #tpu.memory_space<vmem>>, vector<256x256xbf16>
    %278 = arith.truncf %274 : vector<16x256xf32> to vector<16x256xbf16>
    %cst_95 = arith.constant dense<0.000000e+00> : vector<16x256xf32>
    %279 = tpu.matmul %278, %277, %cst_95 {dimension_numbers = #tpu.dot_dimension_numbers<[1], [0], [0], [1], [0, 0, 1, 1], [], []>} : vector<16x256xbf16>, vector<256x256xbf16>, vector<16x256xf32> -> vector<16x256xf32>
    %cst_96 = arith.constant dense<0.000000e+00> : vector<16x256xf32>
    %280 = tpu.matmul %32, %279, %cst_96 {dimension_numbers = #tpu.dot_dimension_numbers<[1], [0], [0], [1], [0, 0, 1, 1], [], []>} : vector<16x16xf32>, vector<16x256xf32>, vector<16x256xf32> -> vector<16x256xf32>
    %cst_97 = arith.constant dense<0.000000e+00> : vector<16xf32>
    %281 = vector.multi_reduction <add>, %280, %cst_97 [1] : vector<16x256xf32> to vector<16xf32>
    %282 = vector.shape_cast %281 : vector<16xf32> to vector<16x1xf32>
    %283 = arith.mulf %280, %280 : vector<16x256xf32>
    %cst_98 = arith.constant dense<0.000000e+00> : vector<16xf32>
    %284 = vector.multi_reduction <add>, %283, %cst_98 [1] : vector<16x256xf32> to vector<16xf32>
    %285 = vector.shape_cast %284 : vector<16xf32> to vector<16x1xf32>
    %286 = vector.extract_strided_slice %282 {offsets = [0, 0], sizes = [8, 1], strides = [1, 1]} : vector<16x1xf32> to vector<8x1xf32>
    %287 = vector.extract_strided_slice %285 {offsets = [0, 0], sizes = [8, 1], strides = [1, 1]} : vector<16x1xf32> to vector<8x1xf32>
    %288 = vector.extract_strided_slice %282 {offsets = [8, 0], sizes = [8, 1], strides = [1, 1]} : vector<16x1xf32> to vector<8x1xf32>
    %289 = arith.addf %286, %288 : vector<8x1xf32>
    %290 = vector.extract_strided_slice %285 {offsets = [8, 0], sizes = [8, 1], strides = [1, 1]} : vector<16x1xf32> to vector<8x1xf32>
    %291 = arith.addf %287, %290 : vector<8x1xf32>
    %cst_99 = arith.constant 0.001953125 : f32
    %292 = vector.broadcast %cst_99 : f32 to vector<8x1xf32>
    %293 = arith.mulf %289, %292 : vector<8x1xf32>
    %cst_100 = arith.constant 0.001953125 : f32
    %294 = vector.broadcast %cst_100 : f32 to vector<8x1xf32>
    %295 = arith.mulf %291, %294 : vector<8x1xf32>
    %296 = arith.mulf %293, %293 : vector<8x1xf32>
    %297 = arith.subf %295, %296 : vector<8x1xf32>
    %cst_101 = arith.constant 0.000000e+00 : f32
    %298 = vector.broadcast %cst_101 : f32 to vector<8x1xf32>
    %299 = arith.maximumf %297, %298 : vector<8x1xf32>
    %c5 = arith.constant 5 : index
    %c0_102 = arith.constant 0 : index
    %c0_103 = arith.constant 0 : index
    %300 = vector.load %arg2[%c5, %c0_102, %c0_103] : memref<16x8x1xf32, #tpu.memory_space<vmem>>, vector<1x8x1xf32>
    %301 = vector.shape_cast %300 : vector<1x8x1xf32> to vector<8x1xf32>
    %cst_104 = arith.constant 9.99999974E-6 : f32
    %302 = vector.broadcast %cst_104 : f32 to vector<8x1xf32>
    %303 = arith.addf %299, %302 : vector<8x1xf32>
    %304 = math.rsqrt %303 : vector<8x1xf32>
    %305 = arith.mulf %301, %304 : vector<8x1xf32>
    %c5_105 = arith.constant 5 : index
    %c0_106 = arith.constant 0 : index
    %c0_107 = arith.constant 0 : index
    %306 = vector.load %arg3[%c5_105, %c0_106, %c0_107] : memref<16x8x1xf32, #tpu.memory_space<vmem>>, vector<1x8x1xf32>
    %307 = vector.shape_cast %306 : vector<1x8x1xf32> to vector<8x1xf32>
    %308 = arith.mulf %293, %305 : vector<8x1xf32>
    %309 = arith.subf %307, %308 : vector<8x1xf32>
    %310 = tpu.concatenate %305, %305 in 0 : vector<8x1xf32>, vector<8x1xf32> -> vector<16x1xf32>
    %311 = tpu.concatenate %309, %309 in 0 : vector<8x1xf32>, vector<8x1xf32> -> vector<16x1xf32>
    %312 = vector.broadcast %310 : vector<16x1xf32> to vector<16x256xf32>
    %313 = arith.mulf %280, %312 : vector<16x256xf32>
    %314 = vector.broadcast %311 : vector<16x1xf32> to vector<16x256xf32>
    %315 = arith.addf %313, %314 : vector<16x256xf32>
    %316 = arith.addf %274, %315 : vector<16x256xf32>
    %cst_108 = arith.constant 2.000000e+01 : f32
    %317 = vector.broadcast %cst_108 : f32 to vector<16x256xf32>
    %318 = arith.minimumf %316, %317 : vector<16x256xf32>
    %cst_109 = arith.constant 2.000000e+01 : f32
    %319 = vector.broadcast %cst_109 : f32 to vector<16x256xf32>
    %320 = arith.cmpf ogt, %316, %319 : vector<16x256xf32>
    %321 = math.exp %318 : vector<16x256xf32>
    %322 = math.log1p %321 : vector<16x256xf32>
    %323 = arith.select %320, %316, %322 : vector<16x256xi1>, vector<16x256xf32>
    %c5_i32_110 = arith.constant 5 : i32
    %324 = tpu.memref_slice %arg38[%c5_i32_110] : memref<16x!tpu.dma_semaphore, #tpu.memory_space<semaphore_mem>> -> memref<1x!tpu.dma_semaphore, #tpu.memory_space<semaphore_mem>>
    %325 = tpu.memref_squeeze %324 : memref<1x!tpu.dma_semaphore, #tpu.memory_space<semaphore_mem>> -> memref<!tpu.dma_semaphore, #tpu.memory_space<semaphore_mem>>
    tpu.wait_dma2 semaphore(%325 : memref<!tpu.dma_semaphore, #tpu.memory_space<semaphore_mem>>) src(%arg10 : memref<256x256xbf16, #tpu.memory_space<any>>) dst(%arg27 : memref<256x256xbf16, #tpu.memory_space<vmem>>)
    %c0_111 = arith.constant 0 : index
    %c0_112 = arith.constant 0 : index
    %326 = vector.load %arg27[%c0_111, %c0_112] : memref<256x256xbf16, #tpu.memory_space<vmem>>, vector<256x256xbf16>
    %327 = arith.truncf %323 : vector<16x256xf32> to vector<16x256xbf16>
    %cst_113 = arith.constant dense<0.000000e+00> : vector<16x256xf32>
    %328 = tpu.matmul %327, %326, %cst_113 {dimension_numbers = #tpu.dot_dimension_numbers<[1], [0], [0], [1], [0, 0, 1, 1], [], []>} : vector<16x256xbf16>, vector<256x256xbf16>, vector<16x256xf32> -> vector<16x256xf32>
    %cst_114 = arith.constant dense<0.000000e+00> : vector<16x256xf32>
    %329 = tpu.matmul %32, %328, %cst_114 {dimension_numbers = #tpu.dot_dimension_numbers<[1], [0], [0], [1], [0, 0, 1, 1], [], []>} : vector<16x16xf32>, vector<16x256xf32>, vector<16x256xf32> -> vector<16x256xf32>
    %cst_115 = arith.constant dense<0.000000e+00> : vector<16xf32>
    %330 = vector.multi_reduction <add>, %329, %cst_115 [1] : vector<16x256xf32> to vector<16xf32>
    %331 = vector.shape_cast %330 : vector<16xf32> to vector<16x1xf32>
    %332 = arith.mulf %329, %329 : vector<16x256xf32>
    %cst_116 = arith.constant dense<0.000000e+00> : vector<16xf32>
    %333 = vector.multi_reduction <add>, %332, %cst_116 [1] : vector<16x256xf32> to vector<16xf32>
    %334 = vector.shape_cast %333 : vector<16xf32> to vector<16x1xf32>
    %335 = vector.extract_strided_slice %331 {offsets = [0, 0], sizes = [8, 1], strides = [1, 1]} : vector<16x1xf32> to vector<8x1xf32>
    %336 = vector.extract_strided_slice %334 {offsets = [0, 0], sizes = [8, 1], strides = [1, 1]} : vector<16x1xf32> to vector<8x1xf32>
    %337 = vector.extract_strided_slice %331 {offsets = [8, 0], sizes = [8, 1], strides = [1, 1]} : vector<16x1xf32> to vector<8x1xf32>
    %338 = arith.addf %335, %337 : vector<8x1xf32>
    %339 = vector.extract_strided_slice %334 {offsets = [8, 0], sizes = [8, 1], strides = [1, 1]} : vector<16x1xf32> to vector<8x1xf32>
    %340 = arith.addf %336, %339 : vector<8x1xf32>
    %cst_117 = arith.constant 0.001953125 : f32
    %341 = vector.broadcast %cst_117 : f32 to vector<8x1xf32>
    %342 = arith.mulf %338, %341 : vector<8x1xf32>
    %cst_118 = arith.constant 0.001953125 : f32
    %343 = vector.broadcast %cst_118 : f32 to vector<8x1xf32>
    %344 = arith.mulf %340, %343 : vector<8x1xf32>
    %345 = arith.mulf %342, %342 : vector<8x1xf32>
    %346 = arith.subf %344, %345 : vector<8x1xf32>
    %cst_119 = arith.constant 0.000000e+00 : f32
    %347 = vector.broadcast %cst_119 : f32 to vector<8x1xf32>
    %348 = arith.maximumf %346, %347 : vector<8x1xf32>
    %c6 = arith.constant 6 : index
    %c0_120 = arith.constant 0 : index
    %c0_121 = arith.constant 0 : index
    %349 = vector.load %arg2[%c6, %c0_120, %c0_121] : memref<16x8x1xf32, #tpu.memory_space<vmem>>, vector<1x8x1xf32>
    %350 = vector.shape_cast %349 : vector<1x8x1xf32> to vector<8x1xf32>
    %cst_122 = arith.constant 9.99999974E-6 : f32
    %351 = vector.broadcast %cst_122 : f32 to vector<8x1xf32>
    %352 = arith.addf %348, %351 : vector<8x1xf32>
    %353 = math.rsqrt %352 : vector<8x1xf32>
    %354 = arith.mulf %350, %353 : vector<8x1xf32>
    %c6_123 = arith.constant 6 : index
    %c0_124 = arith.constant 0 : index
    %c0_125 = arith.constant 0 : index
    %355 = vector.load %arg3[%c6_123, %c0_124, %c0_125] : memref<16x8x1xf32, #tpu.memory_space<vmem>>, vector<1x8x1xf32>
    %356 = vector.shape_cast %355 : vector<1x8x1xf32> to vector<8x1xf32>
    %357 = arith.mulf %342, %354 : vector<8x1xf32>
    %358 = arith.subf %356, %357 : vector<8x1xf32>
    %359 = tpu.concatenate %354, %354 in 0 : vector<8x1xf32>, vector<8x1xf32> -> vector<16x1xf32>
    %360 = tpu.concatenate %358, %358 in 0 : vector<8x1xf32>, vector<8x1xf32> -> vector<16x1xf32>
    %361 = vector.broadcast %359 : vector<16x1xf32> to vector<16x256xf32>
    %362 = arith.mulf %329, %361 : vector<16x256xf32>
    %363 = vector.broadcast %360 : vector<16x1xf32> to vector<16x256xf32>
    %364 = arith.addf %362, %363 : vector<16x256xf32>
    %365 = arith.addf %274, %364 : vector<16x256xf32>
    %cst_126 = arith.constant 2.000000e+01 : f32
    %366 = vector.broadcast %cst_126 : f32 to vector<16x256xf32>
    %367 = arith.minimumf %365, %366 : vector<16x256xf32>
    %cst_127 = arith.constant 2.000000e+01 : f32
    %368 = vector.broadcast %cst_127 : f32 to vector<16x256xf32>
    %369 = arith.cmpf ogt, %365, %368 : vector<16x256xf32>
    %370 = math.exp %367 : vector<16x256xf32>
    %371 = math.log1p %370 : vector<16x256xf32>
    %372 = arith.select %369, %365, %371 : vector<16x256xi1>, vector<16x256xf32>
    %c6_i32_128 = arith.constant 6 : i32
    %373 = tpu.memref_slice %arg38[%c6_i32_128] : memref<16x!tpu.dma_semaphore, #tpu.memory_space<semaphore_mem>> -> memref<1x!tpu.dma_semaphore, #tpu.memory_space<semaphore_mem>>
    %374 = tpu.memref_squeeze %373 : memref<1x!tpu.dma_semaphore, #tpu.memory_space<semaphore_mem>> -> memref<!tpu.dma_semaphore, #tpu.memory_space<semaphore_mem>>
    tpu.wait_dma2 semaphore(%374 : memref<!tpu.dma_semaphore, #tpu.memory_space<semaphore_mem>>) src(%arg11 : memref<256x256xbf16, #tpu.memory_space<any>>) dst(%arg28 : memref<256x256xbf16, #tpu.memory_space<vmem>>)
    %c0_129 = arith.constant 0 : index
    %c0_130 = arith.constant 0 : index
    %375 = vector.load %arg28[%c0_129, %c0_130] : memref<256x256xbf16, #tpu.memory_space<vmem>>, vector<256x256xbf16>
    %376 = arith.truncf %372 : vector<16x256xf32> to vector<16x256xbf16>
    %cst_131 = arith.constant dense<0.000000e+00> : vector<16x256xf32>
    %377 = tpu.matmul %376, %375, %cst_131 {dimension_numbers = #tpu.dot_dimension_numbers<[1], [0], [0], [1], [0, 0, 1, 1], [], []>} : vector<16x256xbf16>, vector<256x256xbf16>, vector<16x256xf32> -> vector<16x256xf32>
    %cst_132 = arith.constant dense<0.000000e+00> : vector<16x256xf32>
    %378 = tpu.matmul %32, %377, %cst_132 {dimension_numbers = #tpu.dot_dimension_numbers<[1], [0], [0], [1], [0, 0, 1, 1], [], []>} : vector<16x16xf32>, vector<16x256xf32>, vector<16x256xf32> -> vector<16x256xf32>
    %cst_133 = arith.constant dense<0.000000e+00> : vector<16xf32>
    %379 = vector.multi_reduction <add>, %378, %cst_133 [1] : vector<16x256xf32> to vector<16xf32>
    %380 = vector.shape_cast %379 : vector<16xf32> to vector<16x1xf32>
    %381 = arith.mulf %378, %378 : vector<16x256xf32>
    %cst_134 = arith.constant dense<0.000000e+00> : vector<16xf32>
    %382 = vector.multi_reduction <add>, %381, %cst_134 [1] : vector<16x256xf32> to vector<16xf32>
    %383 = vector.shape_cast %382 : vector<16xf32> to vector<16x1xf32>
    %384 = vector.extract_strided_slice %380 {offsets = [0, 0], sizes = [8, 1], strides = [1, 1]} : vector<16x1xf32> to vector<8x1xf32>
    %385 = vector.extract_strided_slice %383 {offsets = [0, 0], sizes = [8, 1], strides = [1, 1]} : vector<16x1xf32> to vector<8x1xf32>
    %386 = vector.extract_strided_slice %380 {offsets = [8, 0], sizes = [8, 1], strides = [1, 1]} : vector<16x1xf32> to vector<8x1xf32>
    %387 = arith.addf %384, %386 : vector<8x1xf32>
    %388 = vector.extract_strided_slice %383 {offsets = [8, 0], sizes = [8, 1], strides = [1, 1]} : vector<16x1xf32> to vector<8x1xf32>
    %389 = arith.addf %385, %388 : vector<8x1xf32>
    %cst_135 = arith.constant 0.001953125 : f32
    %390 = vector.broadcast %cst_135 : f32 to vector<8x1xf32>
    %391 = arith.mulf %387, %390 : vector<8x1xf32>
    %cst_136 = arith.constant 0.001953125 : f32
    %392 = vector.broadcast %cst_136 : f32 to vector<8x1xf32>
    %393 = arith.mulf %389, %392 : vector<8x1xf32>
    %394 = arith.mulf %391, %391 : vector<8x1xf32>
    %395 = arith.subf %393, %394 : vector<8x1xf32>
    %cst_137 = arith.constant 0.000000e+00 : f32
    %396 = vector.broadcast %cst_137 : f32 to vector<8x1xf32>
    %397 = arith.maximumf %395, %396 : vector<8x1xf32>
    %c7 = arith.constant 7 : index
    %c0_138 = arith.constant 0 : index
    %c0_139 = arith.constant 0 : index
    %398 = vector.load %arg2[%c7, %c0_138, %c0_139] : memref<16x8x1xf32, #tpu.memory_space<vmem>>, vector<1x8x1xf32>
    %399 = vector.shape_cast %398 : vector<1x8x1xf32> to vector<8x1xf32>
    %cst_140 = arith.constant 9.99999974E-6 : f32
    %400 = vector.broadcast %cst_140 : f32 to vector<8x1xf32>
    %401 = arith.addf %397, %400 : vector<8x1xf32>
    %402 = math.rsqrt %401 : vector<8x1xf32>
    %403 = arith.mulf %399, %402 : vector<8x1xf32>
    %c7_141 = arith.constant 7 : index
    %c0_142 = arith.constant 0 : index
    %c0_143 = arith.constant 0 : index
    %404 = vector.load %arg3[%c7_141, %c0_142, %c0_143] : memref<16x8x1xf32, #tpu.memory_space<vmem>>, vector<1x8x1xf32>
    %405 = vector.shape_cast %404 : vector<1x8x1xf32> to vector<8x1xf32>
    %406 = arith.mulf %391, %403 : vector<8x1xf32>
    %407 = arith.subf %405, %406 : vector<8x1xf32>
    %408 = tpu.concatenate %403, %403 in 0 : vector<8x1xf32>, vector<8x1xf32> -> vector<16x1xf32>
    %409 = tpu.concatenate %407, %407 in 0 : vector<8x1xf32>, vector<8x1xf32> -> vector<16x1xf32>
    %410 = vector.broadcast %408 : vector<16x1xf32> to vector<16x256xf32>
    %411 = arith.mulf %378, %410 : vector<16x256xf32>
    %412 = vector.broadcast %409 : vector<16x1xf32> to vector<16x256xf32>
    %413 = arith.addf %411, %412 : vector<16x256xf32>
    %414 = arith.addf %274, %413 : vector<16x256xf32>
    %cst_144 = arith.constant 2.000000e+01 : f32
    %415 = vector.broadcast %cst_144 : f32 to vector<16x256xf32>
    %416 = arith.minimumf %414, %415 : vector<16x256xf32>
    %cst_145 = arith.constant 2.000000e+01 : f32
    %417 = vector.broadcast %cst_145 : f32 to vector<16x256xf32>
    %418 = arith.cmpf ogt, %414, %417 : vector<16x256xf32>
    %419 = math.exp %416 : vector<16x256xf32>
    %420 = math.log1p %419 : vector<16x256xf32>
    %421 = arith.select %418, %414, %420 : vector<16x256xi1>, vector<16x256xf32>
    %c7_i32_146 = arith.constant 7 : i32
    %422 = tpu.memref_slice %arg38[%c7_i32_146] : memref<16x!tpu.dma_semaphore, #tpu.memory_space<semaphore_mem>> -> memref<1x!tpu.dma_semaphore, #tpu.memory_space<semaphore_mem>>
    %423 = tpu.memref_squeeze %422 : memref<1x!tpu.dma_semaphore, #tpu.memory_space<semaphore_mem>> -> memref<!tpu.dma_semaphore, #tpu.memory_space<semaphore_mem>>
    tpu.wait_dma2 semaphore(%423 : memref<!tpu.dma_semaphore, #tpu.memory_space<semaphore_mem>>) src(%arg12 : memref<256x128xbf16, #tpu.memory_space<any>>) dst(%arg29 : memref<256x128xbf16, #tpu.memory_space<vmem>>)
    %c0_147 = arith.constant 0 : index
    %c0_148 = arith.constant 0 : index
    %424 = vector.load %arg29[%c0_147, %c0_148] : memref<256x128xbf16, #tpu.memory_space<vmem>>, vector<256x128xbf16>
    %425 = arith.truncf %421 : vector<16x256xf32> to vector<16x256xbf16>
    %cst_149 = arith.constant dense<0.000000e+00> : vector<16x128xf32>
    %426 = tpu.matmul %425, %424, %cst_149 {dimension_numbers = #tpu.dot_dimension_numbers<[1], [0], [0], [1], [0, 0, 1, 1], [], []>} : vector<16x256xbf16>, vector<256x128xbf16>, vector<16x128xf32> -> vector<16x128xf32>
    %cst_150 = arith.constant dense<0.000000e+00> : vector<16x128xf32>
    %427 = tpu.matmul %32, %426, %cst_150 {dimension_numbers = #tpu.dot_dimension_numbers<[1], [0], [0], [1], [0, 0, 1, 1], [], []>} : vector<16x16xf32>, vector<16x128xf32>, vector<16x128xf32> -> vector<16x128xf32>
    %cst_151 = arith.constant dense<0.000000e+00> : vector<16xf32>
    %428 = vector.multi_reduction <add>, %427, %cst_151 [1] : vector<16x128xf32> to vector<16xf32>
    %429 = vector.shape_cast %428 : vector<16xf32> to vector<16x1xf32>
    %430 = arith.mulf %427, %427 : vector<16x128xf32>
    %cst_152 = arith.constant dense<0.000000e+00> : vector<16xf32>
    %431 = vector.multi_reduction <add>, %430, %cst_152 [1] : vector<16x128xf32> to vector<16xf32>
    %432 = vector.shape_cast %431 : vector<16xf32> to vector<16x1xf32>
    %433 = vector.extract_strided_slice %429 {offsets = [0, 0], sizes = [8, 1], strides = [1, 1]} : vector<16x1xf32> to vector<8x1xf32>
    %434 = vector.extract_strided_slice %432 {offsets = [0, 0], sizes = [8, 1], strides = [1, 1]} : vector<16x1xf32> to vector<8x1xf32>
    %435 = vector.extract_strided_slice %429 {offsets = [8, 0], sizes = [8, 1], strides = [1, 1]} : vector<16x1xf32> to vector<8x1xf32>
    %436 = arith.addf %433, %435 : vector<8x1xf32>
    %437 = vector.extract_strided_slice %432 {offsets = [8, 0], sizes = [8, 1], strides = [1, 1]} : vector<16x1xf32> to vector<8x1xf32>
    %438 = arith.addf %434, %437 : vector<8x1xf32>
    %cst_153 = arith.constant 3.906250e-03 : f32
    %439 = vector.broadcast %cst_153 : f32 to vector<8x1xf32>
    %440 = arith.mulf %436, %439 : vector<8x1xf32>
    %cst_154 = arith.constant 3.906250e-03 : f32
    %441 = vector.broadcast %cst_154 : f32 to vector<8x1xf32>
    %442 = arith.mulf %438, %441 : vector<8x1xf32>
    %443 = arith.mulf %440, %440 : vector<8x1xf32>
    %444 = arith.subf %442, %443 : vector<8x1xf32>
    %cst_155 = arith.constant 0.000000e+00 : f32
    %445 = vector.broadcast %cst_155 : f32 to vector<8x1xf32>
    %446 = arith.maximumf %444, %445 : vector<8x1xf32>
    %c8 = arith.constant 8 : index
    %c0_156 = arith.constant 0 : index
    %c0_157 = arith.constant 0 : index
    %447 = vector.load %arg2[%c8, %c0_156, %c0_157] : memref<16x8x1xf32, #tpu.memory_space<vmem>>, vector<1x8x1xf32>
    %448 = vector.shape_cast %447 : vector<1x8x1xf32> to vector<8x1xf32>
    %cst_158 = arith.constant 9.99999974E-6 : f32
    %449 = vector.broadcast %cst_158 : f32 to vector<8x1xf32>
    %450 = arith.addf %446, %449 : vector<8x1xf32>
    %451 = math.rsqrt %450 : vector<8x1xf32>
    %452 = arith.mulf %448, %451 : vector<8x1xf32>
    %c8_159 = arith.constant 8 : index
    %c0_160 = arith.constant 0 : index
    %c0_161 = arith.constant 0 : index
    %453 = vector.load %arg3[%c8_159, %c0_160, %c0_161] : memref<16x8x1xf32, #tpu.memory_space<vmem>>, vector<1x8x1xf32>
    %454 = vector.shape_cast %453 : vector<1x8x1xf32> to vector<8x1xf32>
    %455 = arith.mulf %440, %452 : vector<8x1xf32>
    %456 = arith.subf %454, %455 : vector<8x1xf32>
    %457 = tpu.concatenate %452, %452 in 0 : vector<8x1xf32>, vector<8x1xf32> -> vector<16x1xf32>
    %458 = tpu.concatenate %456, %456 in 0 : vector<8x1xf32>, vector<8x1xf32> -> vector<16x1xf32>
    %459 = vector.broadcast %457 : vector<16x1xf32> to vector<16x128xf32>
    %460 = arith.mulf %427, %459 : vector<16x128xf32>
    %461 = vector.broadcast %458 : vector<16x1xf32> to vector<16x128xf32>
    %462 = arith.addf %460, %461 : vector<16x128xf32>
    %cst_162 = arith.constant 2.000000e+01 : f32
    %463 = vector.broadcast %cst_162 : f32 to vector<16x128xf32>
    %464 = arith.minimumf %462, %463 : vector<16x128xf32>
    %cst_163 = arith.constant 2.000000e+01 : f32
    %465 = vector.broadcast %cst_163 : f32 to vector<16x128xf32>
    %466 = arith.cmpf ogt, %462, %465 : vector<16x128xf32>
    %467 = math.exp %464 : vector<16x128xf32>
    %468 = math.log1p %467 : vector<16x128xf32>
    %469 = arith.select %466, %462, %468 : vector<16x128xi1>, vector<16x128xf32>
    %c8_i32_164 = arith.constant 8 : i32
    %470 = tpu.memref_slice %arg38[%c8_i32_164] : memref<16x!tpu.dma_semaphore, #tpu.memory_space<semaphore_mem>> -> memref<1x!tpu.dma_semaphore, #tpu.memory_space<semaphore_mem>>
    %471 = tpu.memref_squeeze %470 : memref<1x!tpu.dma_semaphore, #tpu.memory_space<semaphore_mem>> -> memref<!tpu.dma_semaphore, #tpu.memory_space<semaphore_mem>>
    tpu.wait_dma2 semaphore(%471 : memref<!tpu.dma_semaphore, #tpu.memory_space<semaphore_mem>>) src(%arg13 : memref<128x128xbf16, #tpu.memory_space<any>>) dst(%arg30 : memref<128x128xbf16, #tpu.memory_space<vmem>>)
    %c0_165 = arith.constant 0 : index
    %c0_166 = arith.constant 0 : index
    %472 = vector.load %arg30[%c0_165, %c0_166] : memref<128x128xbf16, #tpu.memory_space<vmem>>, vector<128x128xbf16>
    %473 = arith.truncf %469 : vector<16x128xf32> to vector<16x128xbf16>
    %cst_167 = arith.constant dense<0.000000e+00> : vector<16x128xf32>
    %474 = tpu.matmul %473, %472, %cst_167 {dimension_numbers = #tpu.dot_dimension_numbers<[1], [0], [0], [1], [0, 0, 1, 1], [], []>} : vector<16x128xbf16>, vector<128x128xbf16>, vector<16x128xf32> -> vector<16x128xf32>
    %cst_168 = arith.constant dense<0.000000e+00> : vector<16x128xf32>
    %475 = tpu.matmul %32, %474, %cst_168 {dimension_numbers = #tpu.dot_dimension_numbers<[1], [0], [0], [1], [0, 0, 1, 1], [], []>} : vector<16x16xf32>, vector<16x128xf32>, vector<16x128xf32> -> vector<16x128xf32>
    %cst_169 = arith.constant dense<0.000000e+00> : vector<16xf32>
    %476 = vector.multi_reduction <add>, %475, %cst_169 [1] : vector<16x128xf32> to vector<16xf32>
    %477 = vector.shape_cast %476 : vector<16xf32> to vector<16x1xf32>
    %478 = arith.mulf %475, %475 : vector<16x128xf32>
    %cst_170 = arith.constant dense<0.000000e+00> : vector<16xf32>
    %479 = vector.multi_reduction <add>, %478, %cst_170 [1] : vector<16x128xf32> to vector<16xf32>
    %480 = vector.shape_cast %479 : vector<16xf32> to vector<16x1xf32>
    %481 = vector.extract_strided_slice %477 {offsets = [0, 0], sizes = [8, 1], strides = [1, 1]} : vector<16x1xf32> to vector<8x1xf32>
    %482 = vector.extract_strided_slice %480 {offsets = [0, 0], sizes = [8, 1], strides = [1, 1]} : vector<16x1xf32> to vector<8x1xf32>
    %483 = vector.extract_strided_slice %477 {offsets = [8, 0], sizes = [8, 1], strides = [1, 1]} : vector<16x1xf32> to vector<8x1xf32>
    %484 = arith.addf %481, %483 : vector<8x1xf32>
    %485 = vector.extract_strided_slice %480 {offsets = [8, 0], sizes = [8, 1], strides = [1, 1]} : vector<16x1xf32> to vector<8x1xf32>
    %486 = arith.addf %482, %485 : vector<8x1xf32>
    %cst_171 = arith.constant 3.906250e-03 : f32
    %487 = vector.broadcast %cst_171 : f32 to vector<8x1xf32>
    %488 = arith.mulf %484, %487 : vector<8x1xf32>
    %cst_172 = arith.constant 3.906250e-03 : f32
    %489 = vector.broadcast %cst_172 : f32 to vector<8x1xf32>
    %490 = arith.mulf %486, %489 : vector<8x1xf32>
    %491 = arith.mulf %488, %488 : vector<8x1xf32>
    %492 = arith.subf %490, %491 : vector<8x1xf32>
    %cst_173 = arith.constant 0.000000e+00 : f32
    %493 = vector.broadcast %cst_173 : f32 to vector<8x1xf32>
    %494 = arith.maximumf %492, %493 : vector<8x1xf32>
    %c9 = arith.constant 9 : index
    %c0_174 = arith.constant 0 : index
    %c0_175 = arith.constant 0 : index
    %495 = vector.load %arg2[%c9, %c0_174, %c0_175] : memref<16x8x1xf32, #tpu.memory_space<vmem>>, vector<1x8x1xf32>
    %496 = vector.shape_cast %495 : vector<1x8x1xf32> to vector<8x1xf32>
    %cst_176 = arith.constant 9.99999974E-6 : f32
    %497 = vector.broadcast %cst_176 : f32 to vector<8x1xf32>
    %498 = arith.addf %494, %497 : vector<8x1xf32>
    %499 = math.rsqrt %498 : vector<8x1xf32>
    %500 = arith.mulf %496, %499 : vector<8x1xf32>
    %c9_177 = arith.constant 9 : index
    %c0_178 = arith.constant 0 : index
    %c0_179 = arith.constant 0 : index
    %501 = vector.load %arg3[%c9_177, %c0_178, %c0_179] : memref<16x8x1xf32, #tpu.memory_space<vmem>>, vector<1x8x1xf32>
    %502 = vector.shape_cast %501 : vector<1x8x1xf32> to vector<8x1xf32>
    %503 = arith.mulf %488, %500 : vector<8x1xf32>
    %504 = arith.subf %502, %503 : vector<8x1xf32>
    %505 = tpu.concatenate %500, %500 in 0 : vector<8x1xf32>, vector<8x1xf32> -> vector<16x1xf32>
    %506 = tpu.concatenate %504, %504 in 0 : vector<8x1xf32>, vector<8x1xf32> -> vector<16x1xf32>
    %507 = vector.broadcast %505 : vector<16x1xf32> to vector<16x128xf32>
    %508 = arith.mulf %475, %507 : vector<16x128xf32>
    %509 = vector.broadcast %506 : vector<16x1xf32> to vector<16x128xf32>
    %510 = arith.addf %508, %509 : vector<16x128xf32>
    %511 = arith.addf %469, %510 : vector<16x128xf32>
    %cst_180 = arith.constant 2.000000e+01 : f32
    %512 = vector.broadcast %cst_180 : f32 to vector<16x128xf32>
    %513 = arith.minimumf %511, %512 : vector<16x128xf32>
    %cst_181 = arith.constant 2.000000e+01 : f32
    %514 = vector.broadcast %cst_181 : f32 to vector<16x128xf32>
    %515 = arith.cmpf ogt, %511, %514 : vector<16x128xf32>
    %516 = math.exp %513 : vector<16x128xf32>
    %517 = math.log1p %516 : vector<16x128xf32>
    %518 = arith.select %515, %511, %517 : vector<16x128xi1>, vector<16x128xf32>
    %c9_i32_182 = arith.constant 9 : i32
    %519 = tpu.memref_slice %arg38[%c9_i32_182] : memref<16x!tpu.dma_semaphore, #tpu.memory_space<semaphore_mem>> -> memref<1x!tpu.dma_semaphore, #tpu.memory_space<semaphore_mem>>
    %520 = tpu.memref_squeeze %519 : memref<1x!tpu.dma_semaphore, #tpu.memory_space<semaphore_mem>> -> memref<!tpu.dma_semaphore, #tpu.memory_space<semaphore_mem>>
    tpu.wait_dma2 semaphore(%520 : memref<!tpu.dma_semaphore, #tpu.memory_space<semaphore_mem>>) src(%arg14 : memref<128x128xbf16, #tpu.memory_space<any>>) dst(%arg31 : memref<128x128xbf16, #tpu.memory_space<vmem>>)
    %c0_183 = arith.constant 0 : index
    %c0_184 = arith.constant 0 : index
    %521 = vector.load %arg31[%c0_183, %c0_184] : memref<128x128xbf16, #tpu.memory_space<vmem>>, vector<128x128xbf16>
    %522 = arith.truncf %518 : vector<16x128xf32> to vector<16x128xbf16>
    %cst_185 = arith.constant dense<0.000000e+00> : vector<16x128xf32>
    %523 = tpu.matmul %522, %521, %cst_185 {dimension_numbers = #tpu.dot_dimension_numbers<[1], [0], [0], [1], [0, 0, 1, 1], [], []>} : vector<16x128xbf16>, vector<128x128xbf16>, vector<16x128xf32> -> vector<16x128xf32>
    %cst_186 = arith.constant dense<0.000000e+00> : vector<16x128xf32>
    %524 = tpu.matmul %32, %523, %cst_186 {dimension_numbers = #tpu.dot_dimension_numbers<[1], [0], [0], [1], [0, 0, 1, 1], [], []>} : vector<16x16xf32>, vector<16x128xf32>, vector<16x128xf32> -> vector<16x128xf32>
    %cst_187 = arith.constant dense<0.000000e+00> : vector<16xf32>
    %525 = vector.multi_reduction <add>, %524, %cst_187 [1] : vector<16x128xf32> to vector<16xf32>
    %526 = vector.shape_cast %525 : vector<16xf32> to vector<16x1xf32>
    %527 = arith.mulf %524, %524 : vector<16x128xf32>
    %cst_188 = arith.constant dense<0.000000e+00> : vector<16xf32>
    %528 = vector.multi_reduction <add>, %527, %cst_188 [1] : vector<16x128xf32> to vector<16xf32>
    %529 = vector.shape_cast %528 : vector<16xf32> to vector<16x1xf32>
    %530 = vector.extract_strided_slice %526 {offsets = [0, 0], sizes = [8, 1], strides = [1, 1]} : vector<16x1xf32> to vector<8x1xf32>
    %531 = vector.extract_strided_slice %529 {offsets = [0, 0], sizes = [8, 1], strides = [1, 1]} : vector<16x1xf32> to vector<8x1xf32>
    %532 = vector.extract_strided_slice %526 {offsets = [8, 0], sizes = [8, 1], strides = [1, 1]} : vector<16x1xf32> to vector<8x1xf32>
    %533 = arith.addf %530, %532 : vector<8x1xf32>
    %534 = vector.extract_strided_slice %529 {offsets = [8, 0], sizes = [8, 1], strides = [1, 1]} : vector<16x1xf32> to vector<8x1xf32>
    %535 = arith.addf %531, %534 : vector<8x1xf32>
    %cst_189 = arith.constant 3.906250e-03 : f32
    %536 = vector.broadcast %cst_189 : f32 to vector<8x1xf32>
    %537 = arith.mulf %533, %536 : vector<8x1xf32>
    %cst_190 = arith.constant 3.906250e-03 : f32
    %538 = vector.broadcast %cst_190 : f32 to vector<8x1xf32>
    %539 = arith.mulf %535, %538 : vector<8x1xf32>
    %540 = arith.mulf %537, %537 : vector<8x1xf32>
    %541 = arith.subf %539, %540 : vector<8x1xf32>
    %cst_191 = arith.constant 0.000000e+00 : f32
    %542 = vector.broadcast %cst_191 : f32 to vector<8x1xf32>
    %543 = arith.maximumf %541, %542 : vector<8x1xf32>
    %c10 = arith.constant 10 : index
    %c0_192 = arith.constant 0 : index
    %c0_193 = arith.constant 0 : index
    %544 = vector.load %arg2[%c10, %c0_192, %c0_193] : memref<16x8x1xf32, #tpu.memory_space<vmem>>, vector<1x8x1xf32>
    %545 = vector.shape_cast %544 : vector<1x8x1xf32> to vector<8x1xf32>
    %cst_194 = arith.constant 9.99999974E-6 : f32
    %546 = vector.broadcast %cst_194 : f32 to vector<8x1xf32>
    %547 = arith.addf %543, %546 : vector<8x1xf32>
    %548 = math.rsqrt %547 : vector<8x1xf32>
    %549 = arith.mulf %545, %548 : vector<8x1xf32>
    %c10_195 = arith.constant 10 : index
    %c0_196 = arith.constant 0 : index
    %c0_197 = arith.constant 0 : index
    %550 = vector.load %arg3[%c10_195, %c0_196, %c0_197] : memref<16x8x1xf32, #tpu.memory_space<vmem>>, vector<1x8x1xf32>
    %551 = vector.shape_cast %550 : vector<1x8x1xf32> to vector<8x1xf32>
    %552 = arith.mulf %537, %549 : vector<8x1xf32>
    %553 = arith.subf %551, %552 : vector<8x1xf32>
    %554 = tpu.concatenate %549, %549 in 0 : vector<8x1xf32>, vector<8x1xf32> -> vector<16x1xf32>
    %555 = tpu.concatenate %553, %553 in 0 : vector<8x1xf32>, vector<8x1xf32> -> vector<16x1xf32>
    %556 = vector.broadcast %554 : vector<16x1xf32> to vector<16x128xf32>
    %557 = arith.mulf %524, %556 : vector<16x128xf32>
    %558 = vector.broadcast %555 : vector<16x1xf32> to vector<16x128xf32>
    %559 = arith.addf %557, %558 : vector<16x128xf32>
    %560 = arith.addf %469, %559 : vector<16x128xf32>
    %cst_198 = arith.constant 2.000000e+01 : f32
    %561 = vector.broadcast %cst_198 : f32 to vector<16x128xf32>
    %562 = arith.minimumf %560, %561 : vector<16x128xf32>
    %cst_199 = arith.constant 2.000000e+01 : f32
    %563 = vector.broadcast %cst_199 : f32 to vector<16x128xf32>
    %564 = arith.cmpf ogt, %560, %563 : vector<16x128xf32>
    %565 = math.exp %562 : vector<16x128xf32>
    %566 = math.log1p %565 : vector<16x128xf32>
    %567 = arith.select %564, %560, %566 : vector<16x128xi1>, vector<16x128xf32>
    %c10_i32_200 = arith.constant 10 : i32
    %568 = tpu.memref_slice %arg38[%c10_i32_200] : memref<16x!tpu.dma_semaphore, #tpu.memory_space<semaphore_mem>> -> memref<1x!tpu.dma_semaphore, #tpu.memory_space<semaphore_mem>>
    %569 = tpu.memref_squeeze %568 : memref<1x!tpu.dma_semaphore, #tpu.memory_space<semaphore_mem>> -> memref<!tpu.dma_semaphore, #tpu.memory_space<semaphore_mem>>
    tpu.wait_dma2 semaphore(%569 : memref<!tpu.dma_semaphore, #tpu.memory_space<semaphore_mem>>) src(%arg15 : memref<128x128xbf16, #tpu.memory_space<any>>) dst(%arg32 : memref<128x128xbf16, #tpu.memory_space<vmem>>)
    %c0_201 = arith.constant 0 : index
    %c0_202 = arith.constant 0 : index
    %570 = vector.load %arg32[%c0_201, %c0_202] : memref<128x128xbf16, #tpu.memory_space<vmem>>, vector<128x128xbf16>
    %571 = arith.truncf %567 : vector<16x128xf32> to vector<16x128xbf16>
    %cst_203 = arith.constant dense<0.000000e+00> : vector<16x128xf32>
    %572 = tpu.matmul %571, %570, %cst_203 {dimension_numbers = #tpu.dot_dimension_numbers<[1], [0], [0], [1], [0, 0, 1, 1], [], []>} : vector<16x128xbf16>, vector<128x128xbf16>, vector<16x128xf32> -> vector<16x128xf32>
    %cst_204 = arith.constant dense<0.000000e+00> : vector<16x128xf32>
    %573 = tpu.matmul %32, %572, %cst_204 {dimension_numbers = #tpu.dot_dimension_numbers<[1], [0], [0], [1], [0, 0, 1, 1], [], []>} : vector<16x16xf32>, vector<16x128xf32>, vector<16x128xf32> -> vector<16x128xf32>
    %cst_205 = arith.constant dense<0.000000e+00> : vector<16xf32>
    %574 = vector.multi_reduction <add>, %573, %cst_205 [1] : vector<16x128xf32> to vector<16xf32>
    %575 = vector.shape_cast %574 : vector<16xf32> to vector<16x1xf32>
    %576 = arith.mulf %573, %573 : vector<16x128xf32>
    %cst_206 = arith.constant dense<0.000000e+00> : vector<16xf32>
    %577 = vector.multi_reduction <add>, %576, %cst_206 [1] : vector<16x128xf32> to vector<16xf32>
    %578 = vector.shape_cast %577 : vector<16xf32> to vector<16x1xf32>
    %579 = vector.extract_strided_slice %575 {offsets = [0, 0], sizes = [8, 1], strides = [1, 1]} : vector<16x1xf32> to vector<8x1xf32>
    %580 = vector.extract_strided_slice %578 {offsets = [0, 0], sizes = [8, 1], strides = [1, 1]} : vector<16x1xf32> to vector<8x1xf32>
    %581 = vector.extract_strided_slice %575 {offsets = [8, 0], sizes = [8, 1], strides = [1, 1]} : vector<16x1xf32> to vector<8x1xf32>
    %582 = arith.addf %579, %581 : vector<8x1xf32>
    %583 = vector.extract_strided_slice %578 {offsets = [8, 0], sizes = [8, 1], strides = [1, 1]} : vector<16x1xf32> to vector<8x1xf32>
    %584 = arith.addf %580, %583 : vector<8x1xf32>
    %cst_207 = arith.constant 3.906250e-03 : f32
    %585 = vector.broadcast %cst_207 : f32 to vector<8x1xf32>
    %586 = arith.mulf %582, %585 : vector<8x1xf32>
    %cst_208 = arith.constant 3.906250e-03 : f32
    %587 = vector.broadcast %cst_208 : f32 to vector<8x1xf32>
    %588 = arith.mulf %584, %587 : vector<8x1xf32>
    %589 = arith.mulf %586, %586 : vector<8x1xf32>
    %590 = arith.subf %588, %589 : vector<8x1xf32>
    %cst_209 = arith.constant 0.000000e+00 : f32
    %591 = vector.broadcast %cst_209 : f32 to vector<8x1xf32>
    %592 = arith.maximumf %590, %591 : vector<8x1xf32>
    %c11 = arith.constant 11 : index
    %c0_210 = arith.constant 0 : index
    %c0_211 = arith.constant 0 : index
    %593 = vector.load %arg2[%c11, %c0_210, %c0_211] : memref<16x8x1xf32, #tpu.memory_space<vmem>>, vector<1x8x1xf32>
    %594 = vector.shape_cast %593 : vector<1x8x1xf32> to vector<8x1xf32>
    %cst_212 = arith.constant 9.99999974E-6 : f32
    %595 = vector.broadcast %cst_212 : f32 to vector<8x1xf32>
    %596 = arith.addf %592, %595 : vector<8x1xf32>
    %597 = math.rsqrt %596 : vector<8x1xf32>
    %598 = arith.mulf %594, %597 : vector<8x1xf32>
    %c11_213 = arith.constant 11 : index
    %c0_214 = arith.constant 0 : index
    %c0_215 = arith.constant 0 : index
    %599 = vector.load %arg3[%c11_213, %c0_214, %c0_215] : memref<16x8x1xf32, #tpu.memory_space<vmem>>, vector<1x8x1xf32>
    %600 = vector.shape_cast %599 : vector<1x8x1xf32> to vector<8x1xf32>
    %601 = arith.mulf %586, %598 : vector<8x1xf32>
    %602 = arith.subf %600, %601 : vector<8x1xf32>
    %603 = tpu.concatenate %598, %598 in 0 : vector<8x1xf32>, vector<8x1xf32> -> vector<16x1xf32>
    %604 = tpu.concatenate %602, %602 in 0 : vector<8x1xf32>, vector<8x1xf32> -> vector<16x1xf32>
    %605 = vector.broadcast %603 : vector<16x1xf32> to vector<16x128xf32>
    %606 = arith.mulf %573, %605 : vector<16x128xf32>
    %607 = vector.broadcast %604 : vector<16x1xf32> to vector<16x128xf32>
    %608 = arith.addf %606, %607 : vector<16x128xf32>
    %609 = arith.addf %469, %608 : vector<16x128xf32>
    %cst_216 = arith.constant 2.000000e+01 : f32
    %610 = vector.broadcast %cst_216 : f32 to vector<16x128xf32>
    %611 = arith.minimumf %609, %610 : vector<16x128xf32>
    %cst_217 = arith.constant 2.000000e+01 : f32
    %612 = vector.broadcast %cst_217 : f32 to vector<16x128xf32>
    %613 = arith.cmpf ogt, %609, %612 : vector<16x128xf32>
    %614 = math.exp %611 : vector<16x128xf32>
    %615 = math.log1p %614 : vector<16x128xf32>
    %616 = arith.select %613, %609, %615 : vector<16x128xi1>, vector<16x128xf32>
    %c11_i32_218 = arith.constant 11 : i32
    %617 = tpu.memref_slice %arg38[%c11_i32_218] : memref<16x!tpu.dma_semaphore, #tpu.memory_space<semaphore_mem>> -> memref<1x!tpu.dma_semaphore, #tpu.memory_space<semaphore_mem>>
    %618 = tpu.memref_squeeze %617 : memref<1x!tpu.dma_semaphore, #tpu.memory_space<semaphore_mem>> -> memref<!tpu.dma_semaphore, #tpu.memory_space<semaphore_mem>>
    tpu.wait_dma2 semaphore(%618 : memref<!tpu.dma_semaphore, #tpu.memory_space<semaphore_mem>>) src(%arg16 : memref<128x32xbf16, #tpu.memory_space<any>>) dst(%arg33 : memref<128x32xbf16, #tpu.memory_space<vmem>>)
    %c0_219 = arith.constant 0 : index
    %c0_220 = arith.constant 0 : index
    %619 = vector.load %arg33[%c0_219, %c0_220] : memref<128x32xbf16, #tpu.memory_space<vmem>>, vector<128x32xbf16>
    %620 = arith.truncf %616 : vector<16x128xf32> to vector<16x128xbf16>
    %cst_221 = arith.constant dense<0.000000e+00> : vector<16x32xf32>
    %621 = tpu.matmul %620, %619, %cst_221 {dimension_numbers = #tpu.dot_dimension_numbers<[1], [0], [0], [1], [0, 0, 1, 1], [], []>} : vector<16x128xbf16>, vector<128x32xbf16>, vector<16x32xf32> -> vector<16x32xf32>
    %cst_222 = arith.constant dense<0.000000e+00> : vector<16x32xf32>
    %622 = tpu.matmul %32, %621, %cst_222 {dimension_numbers = #tpu.dot_dimension_numbers<[1], [0], [0], [1], [0, 0, 1, 1], [], []>} : vector<16x16xf32>, vector<16x32xf32>, vector<16x32xf32> -> vector<16x32xf32>
    %cst_223 = arith.constant dense<0.000000e+00> : vector<16xf32>
    %623 = vector.multi_reduction <add>, %622, %cst_223 [1] : vector<16x32xf32> to vector<16xf32>
    %624 = vector.shape_cast %623 : vector<16xf32> to vector<16x1xf32>
    %625 = arith.mulf %622, %622 : vector<16x32xf32>
    %cst_224 = arith.constant dense<0.000000e+00> : vector<16xf32>
    %626 = vector.multi_reduction <add>, %625, %cst_224 [1] : vector<16x32xf32> to vector<16xf32>
    %627 = vector.shape_cast %626 : vector<16xf32> to vector<16x1xf32>
    %628 = vector.extract_strided_slice %624 {offsets = [0, 0], sizes = [8, 1], strides = [1, 1]} : vector<16x1xf32> to vector<8x1xf32>
    %629 = vector.extract_strided_slice %627 {offsets = [0, 0], sizes = [8, 1], strides = [1, 1]} : vector<16x1xf32> to vector<8x1xf32>
    %630 = vector.extract_strided_slice %624 {offsets = [8, 0], sizes = [8, 1], strides = [1, 1]} : vector<16x1xf32> to vector<8x1xf32>
    %631 = arith.addf %628, %630 : vector<8x1xf32>
    %632 = vector.extract_strided_slice %627 {offsets = [8, 0], sizes = [8, 1], strides = [1, 1]} : vector<16x1xf32> to vector<8x1xf32>
    %633 = arith.addf %629, %632 : vector<8x1xf32>
    %cst_225 = arith.constant 1.562500e-02 : f32
    %634 = vector.broadcast %cst_225 : f32 to vector<8x1xf32>
    %635 = arith.mulf %631, %634 : vector<8x1xf32>
    %cst_226 = arith.constant 1.562500e-02 : f32
    %636 = vector.broadcast %cst_226 : f32 to vector<8x1xf32>
    %637 = arith.mulf %633, %636 : vector<8x1xf32>
    %638 = arith.mulf %635, %635 : vector<8x1xf32>
    %639 = arith.subf %637, %638 : vector<8x1xf32>
    %cst_227 = arith.constant 0.000000e+00 : f32
    %640 = vector.broadcast %cst_227 : f32 to vector<8x1xf32>
    %641 = arith.maximumf %639, %640 : vector<8x1xf32>
    %c12 = arith.constant 12 : index
    %c0_228 = arith.constant 0 : index
    %c0_229 = arith.constant 0 : index
    %642 = vector.load %arg2[%c12, %c0_228, %c0_229] : memref<16x8x1xf32, #tpu.memory_space<vmem>>, vector<1x8x1xf32>
    %643 = vector.shape_cast %642 : vector<1x8x1xf32> to vector<8x1xf32>
    %cst_230 = arith.constant 9.99999974E-6 : f32
    %644 = vector.broadcast %cst_230 : f32 to vector<8x1xf32>
    %645 = arith.addf %641, %644 : vector<8x1xf32>
    %646 = math.rsqrt %645 : vector<8x1xf32>
    %647 = arith.mulf %643, %646 : vector<8x1xf32>
    %c12_231 = arith.constant 12 : index
    %c0_232 = arith.constant 0 : index
    %c0_233 = arith.constant 0 : index
    %648 = vector.load %arg3[%c12_231, %c0_232, %c0_233] : memref<16x8x1xf32, #tpu.memory_space<vmem>>, vector<1x8x1xf32>
    %649 = vector.shape_cast %648 : vector<1x8x1xf32> to vector<8x1xf32>
    %650 = arith.mulf %635, %647 : vector<8x1xf32>
    %651 = arith.subf %649, %650 : vector<8x1xf32>
    %652 = tpu.concatenate %647, %647 in 0 : vector<8x1xf32>, vector<8x1xf32> -> vector<16x1xf32>
    %653 = tpu.concatenate %651, %651 in 0 : vector<8x1xf32>, vector<8x1xf32> -> vector<16x1xf32>
    %654 = vector.broadcast %652 : vector<16x1xf32> to vector<16x32xf32>
    %655 = arith.mulf %622, %654 : vector<16x32xf32>
    %656 = vector.broadcast %653 : vector<16x1xf32> to vector<16x32xf32>
    %657 = arith.addf %655, %656 : vector<16x32xf32>
    %cst_234 = arith.constant 2.000000e+01 : f32
    %658 = vector.broadcast %cst_234 : f32 to vector<16x32xf32>
    %659 = arith.minimumf %657, %658 : vector<16x32xf32>
    %cst_235 = arith.constant 2.000000e+01 : f32
    %660 = vector.broadcast %cst_235 : f32 to vector<16x32xf32>
    %661 = arith.cmpf ogt, %657, %660 : vector<16x32xf32>
    %662 = math.exp %659 : vector<16x32xf32>
    %663 = math.log1p %662 : vector<16x32xf32>
    %664 = arith.select %661, %657, %663 : vector<16x32xi1>, vector<16x32xf32>
    %c12_i32_236 = arith.constant 12 : i32
    %665 = tpu.memref_slice %arg38[%c12_i32_236] : memref<16x!tpu.dma_semaphore, #tpu.memory_space<semaphore_mem>> -> memref<1x!tpu.dma_semaphore, #tpu.memory_space<semaphore_mem>>
    %666 = tpu.memref_squeeze %665 : memref<1x!tpu.dma_semaphore, #tpu.memory_space<semaphore_mem>> -> memref<!tpu.dma_semaphore, #tpu.memory_space<semaphore_mem>>
    tpu.wait_dma2 semaphore(%666 : memref<!tpu.dma_semaphore, #tpu.memory_space<semaphore_mem>>) src(%arg17 : memref<32x32xbf16, #tpu.memory_space<any>>) dst(%arg34 : memref<32x32xbf16, #tpu.memory_space<vmem>>)
    %c0_237 = arith.constant 0 : index
    %c0_238 = arith.constant 0 : index
    %667 = vector.load %arg34[%c0_237, %c0_238] : memref<32x32xbf16, #tpu.memory_space<vmem>>, vector<32x32xbf16>
    %668 = arith.truncf %664 : vector<16x32xf32> to vector<16x32xbf16>
    %cst_239 = arith.constant dense<0.000000e+00> : vector<16x32xf32>
    %669 = tpu.matmul %668, %667, %cst_239 {dimension_numbers = #tpu.dot_dimension_numbers<[1], [0], [0], [1], [0, 0, 1, 1], [], []>} : vector<16x32xbf16>, vector<32x32xbf16>, vector<16x32xf32> -> vector<16x32xf32>
    %cst_240 = arith.constant dense<0.000000e+00> : vector<16x32xf32>
    %670 = tpu.matmul %32, %669, %cst_240 {dimension_numbers = #tpu.dot_dimension_numbers<[1], [0], [0], [1], [0, 0, 1, 1], [], []>} : vector<16x16xf32>, vector<16x32xf32>, vector<16x32xf32> -> vector<16x32xf32>
    %cst_241 = arith.constant dense<0.000000e+00> : vector<16xf32>
    %671 = vector.multi_reduction <add>, %670, %cst_241 [1] : vector<16x32xf32> to vector<16xf32>
    %672 = vector.shape_cast %671 : vector<16xf32> to vector<16x1xf32>
    %673 = arith.mulf %670, %670 : vector<16x32xf32>
    %cst_242 = arith.constant dense<0.000000e+00> : vector<16xf32>
    %674 = vector.multi_reduction <add>, %673, %cst_242 [1] : vector<16x32xf32> to vector<16xf32>
    %675 = vector.shape_cast %674 : vector<16xf32> to vector<16x1xf32>
    %676 = vector.extract_strided_slice %672 {offsets = [0, 0], sizes = [8, 1], strides = [1, 1]} : vector<16x1xf32> to vector<8x1xf32>
    %677 = vector.extract_strided_slice %675 {offsets = [0, 0], sizes = [8, 1], strides = [1, 1]} : vector<16x1xf32> to vector<8x1xf32>
    %678 = vector.extract_strided_slice %672 {offsets = [8, 0], sizes = [8, 1], strides = [1, 1]} : vector<16x1xf32> to vector<8x1xf32>
    %679 = arith.addf %676, %678 : vector<8x1xf32>
    %680 = vector.extract_strided_slice %675 {offsets = [8, 0], sizes = [8, 1], strides = [1, 1]} : vector<16x1xf32> to vector<8x1xf32>
    %681 = arith.addf %677, %680 : vector<8x1xf32>
    %cst_243 = arith.constant 1.562500e-02 : f32
    %682 = vector.broadcast %cst_243 : f32 to vector<8x1xf32>
    %683 = arith.mulf %679, %682 : vector<8x1xf32>
    %cst_244 = arith.constant 1.562500e-02 : f32
    %684 = vector.broadcast %cst_244 : f32 to vector<8x1xf32>
    %685 = arith.mulf %681, %684 : vector<8x1xf32>
    %686 = arith.mulf %683, %683 : vector<8x1xf32>
    %687 = arith.subf %685, %686 : vector<8x1xf32>
    %cst_245 = arith.constant 0.000000e+00 : f32
    %688 = vector.broadcast %cst_245 : f32 to vector<8x1xf32>
    %689 = arith.maximumf %687, %688 : vector<8x1xf32>
    %c13 = arith.constant 13 : index
    %c0_246 = arith.constant 0 : index
    %c0_247 = arith.constant 0 : index
    %690 = vector.load %arg2[%c13, %c0_246, %c0_247] : memref<16x8x1xf32, #tpu.memory_space<vmem>>, vector<1x8x1xf32>
    %691 = vector.shape_cast %690 : vector<1x8x1xf32> to vector<8x1xf32>
    %cst_248 = arith.constant 9.99999974E-6 : f32
    %692 = vector.broadcast %cst_248 : f32 to vector<8x1xf32>
    %693 = arith.addf %689, %692 : vector<8x1xf32>
    %694 = math.rsqrt %693 : vector<8x1xf32>
    %695 = arith.mulf %691, %694 : vector<8x1xf32>
    %c13_249 = arith.constant 13 : index
    %c0_250 = arith.constant 0 : index
    %c0_251 = arith.constant 0 : index
    %696 = vector.load %arg3[%c13_249, %c0_250, %c0_251] : memref<16x8x1xf32, #tpu.memory_space<vmem>>, vector<1x8x1xf32>
    %697 = vector.shape_cast %696 : vector<1x8x1xf32> to vector<8x1xf32>
    %698 = arith.mulf %683, %695 : vector<8x1xf32>
    %699 = arith.subf %697, %698 : vector<8x1xf32>
    %700 = tpu.concatenate %695, %695 in 0 : vector<8x1xf32>, vector<8x1xf32> -> vector<16x1xf32>
    %701 = tpu.concatenate %699, %699 in 0 : vector<8x1xf32>, vector<8x1xf32> -> vector<16x1xf32>
    %702 = vector.broadcast %700 : vector<16x1xf32> to vector<16x32xf32>
    %703 = arith.mulf %670, %702 : vector<16x32xf32>
    %704 = vector.broadcast %701 : vector<16x1xf32> to vector<16x32xf32>
    %705 = arith.addf %703, %704 : vector<16x32xf32>
    %706 = arith.addf %664, %705 : vector<16x32xf32>
    %cst_252 = arith.constant 2.000000e+01 : f32
    %707 = vector.broadcast %cst_252 : f32 to vector<16x32xf32>
    %708 = arith.minimumf %706, %707 : vector<16x32xf32>
    %cst_253 = arith.constant 2.000000e+01 : f32
    %709 = vector.broadcast %cst_253 : f32 to vector<16x32xf32>
    %710 = arith.cmpf ogt, %706, %709 : vector<16x32xf32>
    %711 = math.exp %708 : vector<16x32xf32>
    %712 = math.log1p %711 : vector<16x32xf32>
    %713 = arith.select %710, %706, %712 : vector<16x32xi1>, vector<16x32xf32>
    %c13_i32_254 = arith.constant 13 : i32
    %714 = tpu.memref_slice %arg38[%c13_i32_254] : memref<16x!tpu.dma_semaphore, #tpu.memory_space<semaphore_mem>> -> memref<1x!tpu.dma_semaphore, #tpu.memory_space<semaphore_mem>>
    %715 = tpu.memref_squeeze %714 : memref<1x!tpu.dma_semaphore, #tpu.memory_space<semaphore_mem>> -> memref<!tpu.dma_semaphore, #tpu.memory_space<semaphore_mem>>
    tpu.wait_dma2 semaphore(%715 : memref<!tpu.dma_semaphore, #tpu.memory_space<semaphore_mem>>) src(%arg18 : memref<32x32xbf16, #tpu.memory_space<any>>) dst(%arg35 : memref<32x32xbf16, #tpu.memory_space<vmem>>)
    %c0_255 = arith.constant 0 : index
    %c0_256 = arith.constant 0 : index
    %716 = vector.load %arg35[%c0_255, %c0_256] : memref<32x32xbf16, #tpu.memory_space<vmem>>, vector<32x32xbf16>
    %717 = arith.truncf %713 : vector<16x32xf32> to vector<16x32xbf16>
    %cst_257 = arith.constant dense<0.000000e+00> : vector<16x32xf32>
    %718 = tpu.matmul %717, %716, %cst_257 {dimension_numbers = #tpu.dot_dimension_numbers<[1], [0], [0], [1], [0, 0, 1, 1], [], []>} : vector<16x32xbf16>, vector<32x32xbf16>, vector<16x32xf32> -> vector<16x32xf32>
    %cst_258 = arith.constant dense<0.000000e+00> : vector<16x32xf32>
    %719 = tpu.matmul %32, %718, %cst_258 {dimension_numbers = #tpu.dot_dimension_numbers<[1], [0], [0], [1], [0, 0, 1, 1], [], []>} : vector<16x16xf32>, vector<16x32xf32>, vector<16x32xf32> -> vector<16x32xf32>
    %cst_259 = arith.constant dense<0.000000e+00> : vector<16xf32>
    %720 = vector.multi_reduction <add>, %719, %cst_259 [1] : vector<16x32xf32> to vector<16xf32>
    %721 = vector.shape_cast %720 : vector<16xf32> to vector<16x1xf32>
    %722 = arith.mulf %719, %719 : vector<16x32xf32>
    %cst_260 = arith.constant dense<0.000000e+00> : vector<16xf32>
    %723 = vector.multi_reduction <add>, %722, %cst_260 [1] : vector<16x32xf32> to vector<16xf32>
    %724 = vector.shape_cast %723 : vector<16xf32> to vector<16x1xf32>
    %725 = vector.extract_strided_slice %721 {offsets = [0, 0], sizes = [8, 1], strides = [1, 1]} : vector<16x1xf32> to vector<8x1xf32>
    %726 = vector.extract_strided_slice %724 {offsets = [0, 0], sizes = [8, 1], strides = [1, 1]} : vector<16x1xf32> to vector<8x1xf32>
    %727 = vector.extract_strided_slice %721 {offsets = [8, 0], sizes = [8, 1], strides = [1, 1]} : vector<16x1xf32> to vector<8x1xf32>
    %728 = arith.addf %725, %727 : vector<8x1xf32>
    %729 = vector.extract_strided_slice %724 {offsets = [8, 0], sizes = [8, 1], strides = [1, 1]} : vector<16x1xf32> to vector<8x1xf32>
    %730 = arith.addf %726, %729 : vector<8x1xf32>
    %cst_261 = arith.constant 1.562500e-02 : f32
    %731 = vector.broadcast %cst_261 : f32 to vector<8x1xf32>
    %732 = arith.mulf %728, %731 : vector<8x1xf32>
    %cst_262 = arith.constant 1.562500e-02 : f32
    %733 = vector.broadcast %cst_262 : f32 to vector<8x1xf32>
    %734 = arith.mulf %730, %733 : vector<8x1xf32>
    %735 = arith.mulf %732, %732 : vector<8x1xf32>
    %736 = arith.subf %734, %735 : vector<8x1xf32>
    %cst_263 = arith.constant 0.000000e+00 : f32
    %737 = vector.broadcast %cst_263 : f32 to vector<8x1xf32>
    %738 = arith.maximumf %736, %737 : vector<8x1xf32>
    %c14 = arith.constant 14 : index
    %c0_264 = arith.constant 0 : index
    %c0_265 = arith.constant 0 : index
    %739 = vector.load %arg2[%c14, %c0_264, %c0_265] : memref<16x8x1xf32, #tpu.memory_space<vmem>>, vector<1x8x1xf32>
    %740 = vector.shape_cast %739 : vector<1x8x1xf32> to vector<8x1xf32>
    %cst_266 = arith.constant 9.99999974E-6 : f32
    %741 = vector.broadcast %cst_266 : f32 to vector<8x1xf32>
    %742 = arith.addf %738, %741 : vector<8x1xf32>
    %743 = math.rsqrt %742 : vector<8x1xf32>
    %744 = arith.mulf %740, %743 : vector<8x1xf32>
    %c14_267 = arith.constant 14 : index
    %c0_268 = arith.constant 0 : index
    %c0_269 = arith.constant 0 : index
    %745 = vector.load %arg3[%c14_267, %c0_268, %c0_269] : memref<16x8x1xf32, #tpu.memory_space<vmem>>, vector<1x8x1xf32>
    %746 = vector.shape_cast %745 : vector<1x8x1xf32> to vector<8x1xf32>
    %747 = arith.mulf %732, %744 : vector<8x1xf32>
    %748 = arith.subf %746, %747 : vector<8x1xf32>
    %749 = tpu.concatenate %744, %744 in 0 : vector<8x1xf32>, vector<8x1xf32> -> vector<16x1xf32>
    %750 = tpu.concatenate %748, %748 in 0 : vector<8x1xf32>, vector<8x1xf32> -> vector<16x1xf32>
    %751 = vector.broadcast %749 : vector<16x1xf32> to vector<16x32xf32>
    %752 = arith.mulf %719, %751 : vector<16x32xf32>
    %753 = vector.broadcast %750 : vector<16x1xf32> to vector<16x32xf32>
    %754 = arith.addf %752, %753 : vector<16x32xf32>
    %755 = arith.addf %664, %754 : vector<16x32xf32>
    %cst_270 = arith.constant 2.000000e+01 : f32
    %756 = vector.broadcast %cst_270 : f32 to vector<16x32xf32>
    %757 = arith.minimumf %755, %756 : vector<16x32xf32>
    %cst_271 = arith.constant 2.000000e+01 : f32
    %758 = vector.broadcast %cst_271 : f32 to vector<16x32xf32>
    %759 = arith.cmpf ogt, %755, %758 : vector<16x32xf32>
    %760 = math.exp %757 : vector<16x32xf32>
    %761 = math.log1p %760 : vector<16x32xf32>
    %762 = arith.select %759, %755, %761 : vector<16x32xi1>, vector<16x32xf32>
    %c14_i32_272 = arith.constant 14 : i32
    %763 = tpu.memref_slice %arg38[%c14_i32_272] : memref<16x!tpu.dma_semaphore, #tpu.memory_space<semaphore_mem>> -> memref<1x!tpu.dma_semaphore, #tpu.memory_space<semaphore_mem>>
    %764 = tpu.memref_squeeze %763 : memref<1x!tpu.dma_semaphore, #tpu.memory_space<semaphore_mem>> -> memref<!tpu.dma_semaphore, #tpu.memory_space<semaphore_mem>>
    tpu.wait_dma2 semaphore(%764 : memref<!tpu.dma_semaphore, #tpu.memory_space<semaphore_mem>>) src(%arg19 : memref<32x32xbf16, #tpu.memory_space<any>>) dst(%arg36 : memref<32x32xbf16, #tpu.memory_space<vmem>>)
    %c0_273 = arith.constant 0 : index
    %c0_274 = arith.constant 0 : index
    %765 = vector.load %arg36[%c0_273, %c0_274] : memref<32x32xbf16, #tpu.memory_space<vmem>>, vector<32x32xbf16>
    %766 = arith.truncf %762 : vector<16x32xf32> to vector<16x32xbf16>
    %cst_275 = arith.constant dense<0.000000e+00> : vector<16x32xf32>
    %767 = tpu.matmul %766, %765, %cst_275 {dimension_numbers = #tpu.dot_dimension_numbers<[1], [0], [0], [1], [0, 0, 1, 1], [], []>} : vector<16x32xbf16>, vector<32x32xbf16>, vector<16x32xf32> -> vector<16x32xf32>
    %cst_276 = arith.constant dense<0.000000e+00> : vector<16x32xf32>
    %768 = tpu.matmul %32, %767, %cst_276 {dimension_numbers = #tpu.dot_dimension_numbers<[1], [0], [0], [1], [0, 0, 1, 1], [], []>} : vector<16x16xf32>, vector<16x32xf32>, vector<16x32xf32> -> vector<16x32xf32>
    %cst_277 = arith.constant dense<0.000000e+00> : vector<16xf32>
    %769 = vector.multi_reduction <add>, %768, %cst_277 [1] : vector<16x32xf32> to vector<16xf32>
    %770 = vector.shape_cast %769 : vector<16xf32> to vector<16x1xf32>
    %771 = arith.mulf %768, %768 : vector<16x32xf32>
    %cst_278 = arith.constant dense<0.000000e+00> : vector<16xf32>
    %772 = vector.multi_reduction <add>, %771, %cst_278 [1] : vector<16x32xf32> to vector<16xf32>
    %773 = vector.shape_cast %772 : vector<16xf32> to vector<16x1xf32>
    %774 = vector.extract_strided_slice %770 {offsets = [0, 0], sizes = [8, 1], strides = [1, 1]} : vector<16x1xf32> to vector<8x1xf32>
    %775 = vector.extract_strided_slice %773 {offsets = [0, 0], sizes = [8, 1], strides = [1, 1]} : vector<16x1xf32> to vector<8x1xf32>
    %776 = vector.extract_strided_slice %770 {offsets = [8, 0], sizes = [8, 1], strides = [1, 1]} : vector<16x1xf32> to vector<8x1xf32>
    %777 = arith.addf %774, %776 : vector<8x1xf32>
    %778 = vector.extract_strided_slice %773 {offsets = [8, 0], sizes = [8, 1], strides = [1, 1]} : vector<16x1xf32> to vector<8x1xf32>
    %779 = arith.addf %775, %778 : vector<8x1xf32>
    %cst_279 = arith.constant 1.562500e-02 : f32
    %780 = vector.broadcast %cst_279 : f32 to vector<8x1xf32>
    %781 = arith.mulf %777, %780 : vector<8x1xf32>
    %cst_280 = arith.constant 1.562500e-02 : f32
    %782 = vector.broadcast %cst_280 : f32 to vector<8x1xf32>
    %783 = arith.mulf %779, %782 : vector<8x1xf32>
    %784 = arith.mulf %781, %781 : vector<8x1xf32>
    %785 = arith.subf %783, %784 : vector<8x1xf32>
    %cst_281 = arith.constant 0.000000e+00 : f32
    %786 = vector.broadcast %cst_281 : f32 to vector<8x1xf32>
    %787 = arith.maximumf %785, %786 : vector<8x1xf32>
    %c15 = arith.constant 15 : index
    %c0_282 = arith.constant 0 : index
    %c0_283 = arith.constant 0 : index
    %788 = vector.load %arg2[%c15, %c0_282, %c0_283] : memref<16x8x1xf32, #tpu.memory_space<vmem>>, vector<1x8x1xf32>
    %789 = vector.shape_cast %788 : vector<1x8x1xf32> to vector<8x1xf32>
    %cst_284 = arith.constant 9.99999974E-6 : f32
    %790 = vector.broadcast %cst_284 : f32 to vector<8x1xf32>
    %791 = arith.addf %787, %790 : vector<8x1xf32>
    %792 = math.rsqrt %791 : vector<8x1xf32>
    %793 = arith.mulf %789, %792 : vector<8x1xf32>
    %c15_285 = arith.constant 15 : index
    %c0_286 = arith.constant 0 : index
    %c0_287 = arith.constant 0 : index
    %794 = vector.load %arg3[%c15_285, %c0_286, %c0_287] : memref<16x8x1xf32, #tpu.memory_space<vmem>>, vector<1x8x1xf32>
    %795 = vector.shape_cast %794 : vector<1x8x1xf32> to vector<8x1xf32>
    %796 = arith.mulf %781, %793 : vector<8x1xf32>
    %797 = arith.subf %795, %796 : vector<8x1xf32>
    %798 = tpu.concatenate %793, %793 in 0 : vector<8x1xf32>, vector<8x1xf32> -> vector<16x1xf32>
    %799 = tpu.concatenate %797, %797 in 0 : vector<8x1xf32>, vector<8x1xf32> -> vector<16x1xf32>
    %800 = vector.broadcast %798 : vector<16x1xf32> to vector<16x32xf32>
    %801 = arith.mulf %768, %800 : vector<16x32xf32>
    %802 = vector.broadcast %799 : vector<16x1xf32> to vector<16x32xf32>
    %803 = arith.addf %801, %802 : vector<16x32xf32>
    %804 = arith.addf %664, %803 : vector<16x32xf32>
    %cst_288 = arith.constant 2.000000e+01 : f32
    %805 = vector.broadcast %cst_288 : f32 to vector<16x32xf32>
    %806 = arith.minimumf %804, %805 : vector<16x32xf32>
    %cst_289 = arith.constant 2.000000e+01 : f32
    %807 = vector.broadcast %cst_289 : f32 to vector<16x32xf32>
    %808 = arith.cmpf ogt, %804, %807 : vector<16x32xf32>
    %809 = math.exp %806 : vector<16x32xf32>
    %810 = math.log1p %809 : vector<16x32xf32>
    %811 = arith.select %808, %804, %810 : vector<16x32xi1>, vector<16x32xf32>
    %c15_i32_290 = arith.constant 15 : i32
    %812 = tpu.memref_slice %arg38[%c15_i32_290] : memref<16x!tpu.dma_semaphore, #tpu.memory_space<semaphore_mem>> -> memref<1x!tpu.dma_semaphore, #tpu.memory_space<semaphore_mem>>
    %813 = tpu.memref_squeeze %812 : memref<1x!tpu.dma_semaphore, #tpu.memory_space<semaphore_mem>> -> memref<!tpu.dma_semaphore, #tpu.memory_space<semaphore_mem>>
    tpu.wait_dma2 semaphore(%813 : memref<!tpu.dma_semaphore, #tpu.memory_space<semaphore_mem>>) src(%arg20 : memref<32x128xbf16, #tpu.memory_space<any>>) dst(%arg37 : memref<32x128xbf16, #tpu.memory_space<vmem>>)
    %c0_291 = arith.constant 0 : index
    %c0_292 = arith.constant 0 : index
    %814 = vector.load %arg37[%c0_291, %c0_292] : memref<32x128xbf16, #tpu.memory_space<vmem>>, vector<32x128xbf16>
    %815 = arith.truncf %811 : vector<16x32xf32> to vector<16x32xbf16>
    %cst_293 = arith.constant dense<0.000000e+00> : vector<16x128xf32>
    %816 = tpu.matmul %815, %814, %cst_293 {dimension_numbers = #tpu.dot_dimension_numbers<[1], [0], [0], [1], [0, 0, 1, 1], [], []>} : vector<16x32xbf16>, vector<32x128xbf16>, vector<16x128xf32> -> vector<16x128xf32>
    %cst_294 = arith.constant dense<0.000000e+00> : vector<16x128xf32>
    %817 = tpu.matmul %32, %816, %cst_294 {dimension_numbers = #tpu.dot_dimension_numbers<[1], [0], [0], [1], [0, 0, 1, 1], [], []>} : vector<16x16xf32>, vector<16x128xf32>, vector<16x128xf32> -> vector<16x128xf32>
    %cst_295 = arith.constant 2.000000e+01 : f32
    %818 = vector.broadcast %cst_295 : f32 to vector<16x128xf32>
    %819 = arith.minimumf %817, %818 : vector<16x128xf32>
    %cst_296 = arith.constant 2.000000e+01 : f32
    %820 = vector.broadcast %cst_296 : f32 to vector<16x128xf32>
    %821 = arith.cmpf ogt, %817, %820 : vector<16x128xf32>
    %822 = math.exp %819 : vector<16x128xf32>
    %823 = math.log1p %822 : vector<16x128xf32>
    %824 = arith.select %821, %817, %823 : vector<16x128xi1>, vector<16x128xf32>
    %c0_297 = arith.constant 0 : index
    %c0_298 = arith.constant 0 : index
    %825 = vector.load %arg21[%c0_297, %c0_298] : memref<16x128xf32, #tpu.memory_space<vmem>>, vector<16x128xf32>
    tpu.vector_store %arg21[%c0_297, %c0_298], %824 {strides = array<i32>} : memref<16x128xf32, #tpu.memory_space<vmem>>, vector<16x128xf32>,
    return
  }
}

</mosaic_0001>

<bundles_post_ra>
// kernel: tpu_custom_call.1
= control target key start
LH: loop header
LB: loop body
LE: loop exit
PB: predicated region body
PF: predicated region fallthrough
CT: control target
= control target key end

     0   :  { %s11399_s0 = inlined_call_operand.vmem [shape: f32[16,1024], index: 0, kind: input, shape index: {}]   ;;  %s11400_s1 = inlined_call_operand.hbm [shape: f32[16,16], index: 1, kind: input, shape index: {}]   ;;  %s11401_s2 = inlined_call_operand.vmem [shape: f32[16,8,1], index: 2, kind: input, shape index: {}]   ;;  %s11402_s3 = inlined_call_operand.vmem [shape: f32[16,8,1], index: 3, kind: input, shape index: {}]   ;;  %s11403_s4 = inlined_call_operand.hbm [shape: bf16[1024,512], index: 4, kind: input, shape index: {}]   ;;  %s11404_s5 = inlined_call_operand.hbm [shape: bf16[512,512], index: 5, kind: input, shape index: {}]   ;;  %s11405_s6 = inlined_call_operand.hbm [shape: bf16[512,512], index: 6, kind: input, shape index: {}]   ;;  %s11406_s7 = inlined_call_operand.hbm [shape: bf16[512,512], index: 7, kind: input, shape index: {}]   ;;  %s11407_s8 = inlined_call_operand.hbm [shape: bf16[512,256], index: 8, kind: input, shape index: {}]   ;;  %s11408_s9 = inlined_call_operand.vmem [shape: bf16[256,256], index: 9, kind: input, shape index: {}]   ;;  %s11409_s10 = inlined_call_operand.hbm [shape: bf16[256,256], index: 10, kind: input, shape index: {}]   ;;  %s11410_s11 = inlined_call_operand.hbm [shape: bf16[256,256], index: 11, kind: input, shape index: {}]   ;;  %s11411_s12 = inlined_call_operand.hbm [shape: bf16[256,128], index: 12, kind: input, shape index: {}]   ;;  %s11412_s13 = inlined_call_operand.hbm [shape: bf16[128,128], index: 13, kind: input, shape index: {}]   ;;  %s11413_s14 = inlined_call_operand.hbm [shape: bf16[128,128], index: 14, kind: input, shape index: {}]   ;;  %s11414_s15 = inlined_call_operand.hbm [shape: bf16[128,128], index: 15, kind: input, shape index: {}]   ;;  %s11415_s16 = inlined_call_operand.vmem [shape: bf16[128,32], index: 16, kind: input, shape index: {}]   ;;  %s11416_s17 = inlined_call_operand.vmem [shape: bf16[32,32], index: 17, kind: input, shape index: {}]   ;;  %s11417_s18 = inlined_call_operand.vmem [shape: bf16[32,32], index: 18, kind: input, shape index: {}]   ;;  %s11418_s19 = inlined_call_operand.hbm [shape: bf16[32,32], index: 19, kind: input, shape index: {}]   ;;  %s11419_s20 = inlined_call_operand.hbm [shape: bf16[32,128], index: 20, kind: input, shape index: {}]   ;;  %s11420_s21 = inlined_call_operand.hbm [shape: f32[16,128], index: 21, kind: output, shape index: {}]  }
   0x1   :  { %11429 = sst [smem:[#allocation74_spill]] %s11399_s0 }
   0x2   :  { %11430 = sst [smem:[#allocation75_spill]] %s11400_s1 }
   0x3   :  { %11431 = sst [smem:[#allocation76_spill]] %s11401_s2 }
   0x4   :  { %11432 = sst [smem:[#allocation77_spill]] %s11402_s3 }
   0x5   :  { %11433 = sst [smem:[#allocation78_spill]] %s11403_s4 }
   0x6   :  { %11434 = sst [smem:[#allocation79_spill]] %s11404_s5 }
   0x7   :  { %11435 = sst [smem:[#allocation80_spill]] %s11419_s20 }
   0x8   :  { %11436 = sst [smem:[#allocation81_spill]] %s11420_s21 }
   0x9   :  { %26 = vsyncpa [#allocation20], 0 }
   0xa   :  { %27 = vsyncpa [#allocation23], 0 }
   0xb   :  { %28 = vsyncpa [#allocation21], 0  ;;  %s9817_s2 = smov [#allocation19]   ;;  %s11437_s3 = sld [smem:[#allocation75_spill]] }
   0xc   :  { %s36_s25 = sshll.u32 %s9817_s2, 4  ;;  %s37_s25 = int_to_ptr.vmem [resolvable:$true] %s36_s25 }
  0x11   :  { %s9581_s28 = scalar_lea.hbm %s11437_s3, 256 }
  0x12   :  { %p9582_p0 = scmp.ne.s32.totalorder %s11437_s3, %s9581_s28  ;;  %p9585_p1 = scmp.lt.u32.totalorder %s9581_s28, %s11437_s3 }
  0x14   :  { %p9587_p2 = pnand %p9585_p1, %p9582_p0 }
  0x16   :  { %9590 = shalt.err (!%p9587_p2)
}
  0x17   :  { %s9591_s5 = scalar_lea.vmem %s37_s25, 256  ;;  %p9596_p4 = scmp.lt.s32.totalorder %s37_s25, %s37_s25 }
  0x18   :  { %p9592_p3 = scmp.ne.s32.totalorder %s37_s25, %s9591_s5  ;;  %p9597_p5 = scmp.lt.s32.totalorder %s9591_s5, %s9591_s5 }
  0x1a   :  { %p9598_p6 = por %p9597_p5, %p9596_p4 }
  0x1c   :  { %p9599_p7 = pnand %p9598_p6, %p9592_p3 }
  0x1e   :  { %9602 = shalt.err (!%p9599_p7)
}
  0x1f   :  { %s9818_s22 = smov 128   ;;  %s11428_s23 = smov 8  }
  0x20   :  { %42 = dma.hbm_to_vmem [thread:$0]  %s11437_s3, 256, %s37_s25, [#allocation20], %s9818_s22, %s9818_s22, %s11428_s23  }
  0x21   :  { %s9820_s2 = smov [#allocation22]   ;;  %s11438_s29 = sld [smem:[#allocation78_spill]] }
  0x22   :  { %s52_s26 = sshll.u32 %s9820_s2, 4  ;;  %s53_s26 = int_to_ptr.vmem [resolvable:$true] %s52_s26 }
  0x27   :  { %s9603_s0 = scalar_lea.hbm %s11438_s29, 32768 }
  0x28   :  { %p9604_p8 = scmp.ne.s32.totalorder %s11438_s29, %s9603_s0  ;;  %p9607_p9 = scmp.lt.u32.totalorder %s9603_s0, %s11438_s29 }
  0x2a   :  { %p9609_p10 = pnand %p9607_p9, %p9604_p8 }
  0x2c   :  { %9612 = shalt.err (!%p9609_p10)
}
  0x2d   :  { %s9613_s20 = scalar_lea.vmem %s53_s26, 32768  ;;  %p9618_p12 = scmp.lt.s32.totalorder %s53_s26, %s53_s26 }
  0x2e   :  { %p9614_p11 = scmp.ne.s32.totalorder %s53_s26, %s9613_s20  ;;  %p9619_p13 = scmp.lt.s32.totalorder %s9613_s20, %s9613_s20 }
  0x30   :  { %p9620_p0 = por %p9619_p13, %p9618_p12 }
  0x32   :  { %p9621_p1 = pnand %p9620_p0, %p9614_p11 }
  0x34   :  { %9624 = shalt.err (!%p9621_p1)
}
  0x35   :  { %s9821_s25 = smov 256   ;;  %s9822_s3 = smov 16  }
  0x36   :  { %58 = dma.hbm_to_vmem [thread:$0]  %s11438_s29, 32768, %s53_s26, [#allocation23], %s9821_s25, %s9821_s25, %s9822_s3  }
  0x37   :  { %9779 = dma.done.wait [#allocation20], 256  }
  0x38   :  { %9780 = vsyncadd [#allocation20], 4294967040 }
  0x39   :  { %9781 = dma.done.wait [#allocation23], 32768  }
  0x3a   :  { %9782 = vsyncadd [#allocation23], 4294934528  ;;  %s70_s21 = sld [smem:[#allocation0]]   ;;  %s9823_s2 = smov 512  }
  0x3b   :  { %82 = sst [smem:[#allocation26]] %s9823_s2  ;;  %s9824_s20 = smov 4  }
  0x3c   :  { %84 = sst [smem:[#allocation26 + $0x1]] %s9823_s2  ;;  %s9825_s27 = smov 64  }
  0x3d   :  { %86 = sst [smem:[#allocation26 + $0x2]] %s9824_s20  ;;  %s9826_s28 = smov [#allocation2]  }
  0x3e   :  { %88 = sst [smem:[#allocation26 + $0x3]] %s9825_s27  ;;  %s78_s26 = sshll.u32 %s9826_s28, 4  ;;  %s79_s26 = int_to_ptr.vmem [resolvable:$true] %s78_s26 }
  0x3f   :  { %90 = sst [smem:[#allocation26 + $0x4]] %s9818_s22  ;;  %s9827_s29 = smov 2  }
  0x40   :  { %92 = sst [smem:[#allocation26 + $0x5]] %s9827_s29  ;;  %s8054_s0 = sshll.u32 %s70_s21, 26 }
  0x41   :  { %94 = sst [smem:[#allocation26 + $0x6]] %s9821_s25  ;;  %s10001_s4 = sadd.s32 134217728, %s8054_s0 }
  0x42   :  { %96 = sst [smem:[#allocation26 + $0x7]] %s9825_s27  ;;  %s9828_s30 = smov [#allocation18]  }
  0x43   :  { %98 = sst [smem:[#allocation26 + $0x8]] %s9824_s20  ;;  %s9829_s5 = smov [#allocation25]  }
  0x44   :  { %s11439_s24 = sld [smem:[#allocation79_spill]]  ;;  %s9830_s21 = smov [#allocation3]  }
  0x45   :  { %s113_s28 = sshll.u32 %s9830_s21, 4  ;;  %s9832_s0 = smov [#allocation27]   ;;  %s114_s28 = int_to_ptr.vmem [resolvable:$true] %s113_s28 }
  0x46   :  { %s9833_s3 = smov [#allocation4]  }
  0x47   :  { %s148_s1 = sshll.u32 %s9833_s3, 4  ;;  %s149_s1 = int_to_ptr.vmem [resolvable:$true] %s148_s1 }
  0x4a   :  { %100 = dma.general %s11439_s24, 16384, %s79_s26, %s9828_s30, %s9829_s5, [#allocation26], %s10001_s4, 0  }
  0x4b   :  { %117 = sst [smem:[#allocation28]] %s9823_s2  ;;  %s9831_s26 = smov [#allocation18 + $0x1]  }
  0x4c   :  { %119 = sst [smem:[#allocation28 + $0x1]] %s9823_s2  ;;  %s9835_s24 = smov [#allocation29]  }
  0x4d   :  { %121 = sst [smem:[#allocation28 + $0x2]] %s9824_s20 }
  0x4e   :  { %123 = sst [smem:[#allocation28 + $0x3]] %s9825_s27 }
  0x4f   :  { %125 = sst [smem:[#allocation28 + $0x4]] %s9818_s22 }
  0x50   :  { %127 = sst [smem:[#allocation28 + $0x5]] %s9827_s29 }
  0x51   :  { %129 = sst [smem:[#allocation28 + $0x6]] %s9821_s25 }
  0x52   :  { %131 = sst [smem:[#allocation28 + $0x7]] %s9825_s27 }
  0x53   :  { %133 = sst [smem:[#allocation28 + $0x8]] %s9824_s20 }
  0x54   :  { %135 = dma.general %s11405_s6, 16384, %s114_s28, %s9831_s26, %s9832_s0, [#allocation28], %s10001_s4, 0  }
  0x55   :  { %152 = sst [smem:[#allocation30]] %s9823_s2  ;;  %s9834_s6 = smov [#allocation18 + $0x2]  }
  0x56   :  { %154 = sst [smem:[#allocation30 + $0x1]] %s9823_s2  ;;  %s9836_s28 = smov [#allocation5]  }
  0x57   :  { %156 = sst [smem:[#allocation30 + $0x2]] %s9824_s20  ;;  %s183_s26 = sshll.u32 %s9836_s28, 4  ;;  %s184_s26 = int_to_ptr.vmem [resolvable:$true] %s183_s26 }
  0x58   :  { %158 = sst [smem:[#allocation30 + $0x3]] %s9825_s27  ;;  %s9838_s0 = smov [#allocation31]  }
  0x59   :  { %160 = sst [smem:[#allocation30 + $0x4]] %s9818_s22 }
  0x5a   :  { %162 = sst [smem:[#allocation30 + $0x5]] %s9827_s29 }
  0x5b   :  { %164 = sst [smem:[#allocation30 + $0x6]] %s9821_s25 }
  0x5c   :  { %166 = sst [smem:[#allocation30 + $0x7]] %s9825_s27 }
  0x5d   :  { %168 = sst [smem:[#allocation30 + $0x8]] %s9824_s20 }
  0x5e   :  { %170 = dma.general %s11406_s7, 16384, %s149_s1, %s9834_s6, %s9835_s24, [#allocation30], %s10001_s4, 0  }
  0x5f   :  { %187 = sst [smem:[#allocation32]] %s9821_s25  ;;  %s9837_s7 = smov [#allocation18 + $0x3]  }
  0x60   :  { %189 = sst [smem:[#allocation32 + $0x1]] %s9821_s25 }
  0x61   :  { %191 = sst [smem:[#allocation32 + $0x2]] %s9827_s29 }
  0x62   :  { %193 = sst [smem:[#allocation32 + $0x3]] %s9825_s27 }
  0x63   :  { %195 = sst [smem:[#allocation32 + $0x4]] %s9818_s22 }
  0x64   :  { %197 = sst [smem:[#allocation32 + $0x5]] %s9827_s29 }
  0x65   :  { %199 = sst [smem:[#allocation32 + $0x6]] %s9818_s22 }
  0x66   :  { %201 = sst [smem:[#allocation32 + $0x7]] %s9825_s27 }
  0x67   :  { %203 = sst [smem:[#allocation32 + $0x8]] %s9824_s20 }
  0x68   :  { %205 = dma.general %s11407_s8, 8192, %s184_s26, %s9837_s7, %s9838_s0, [#allocation32], %s10001_s4, 0  }
  0x69   :  { %v224_v0 = vld [vmem:[%s11408_s9] sm:$0xf]  ;;  %v226_v1 = vld [vmem:[%s11408_s9 + $0x8] sm:$0xf]  ;;  %v228_v2 = vld [vmem:[%s11408_s9 + $0x4] sm:$0xf] }
  0x6a   :  { %225 = vst [vmem:[#allocation6] sm:$0xf] %v224_v0  ;;  %227 = vst [vmem:[#allocation6 + $0x4] sm:$0xf] %v226_v1  ;;  %v230_v3 = vld [vmem:[%s11408_s9 + $0xc] sm:$0xff]   ;;  %v238_v6 = vld [vmem:[%s11408_s9 + $0x1c] sm:$0xff]  }
  0x6b   :  { %229 = vst [vmem:[#allocation6 + $0x8] sm:$0xf] %v228_v2  ;;  %v234_v4 = vld [vmem:[%s11408_s9 + $0x18] sm:$0xf]  ;;  %v236_v5 = vld [vmem:[%s11408_s9 + $0x14] sm:$0xf] }
  0x6c   :  { %231 = vst [vmem:[#allocation6 + $0xc] sm:$0xff] %v230_v3   ;;  %235 = vst [vmem:[#allocation6 + $0x14] sm:$0xf] %v234_v4  ;;  %v242_v7 = vld [vmem:[%s11408_s9 + $0x28] sm:$0xf]  ;;  %v246_v9 = vld [vmem:[%s11408_s9 + $0x2c] sm:$0xff]  }
  0x6d   :  { %237 = vst [vmem:[#allocation6 + $0x18] sm:$0xf] %v236_v5  ;;  %v244_v8 = vld [vmem:[%s11408_s9 + $0x24] sm:$0xf]  ;;  %239 = vst [vmem:[#allocation6 + $0x1c] sm:$0xff] %v238_v6   ;;  %v254_v12 = vld [vmem:[%s11408_s9 + $0x3c] sm:$0xff]  }
  0x6e   :  { %243 = vst [vmem:[#allocation6 + $0x24] sm:$0xf] %v242_v7  ;;  %245 = vst [vmem:[#allocation6 + $0x28] sm:$0xf] %v244_v8  ;;  %v250_v10 = vld [vmem:[%s11408_s9 + $0x38] sm:$0xf] }
  0x6f   :  { %v252_v11 = vld [vmem:[%s11408_s9 + $0x34] sm:$0xf]  ;;  %247 = vst [vmem:[#allocation6 + $0x2c] sm:$0xff] %v246_v9   ;;  %251 = vst [vmem:[#allocation6 + $0x34] sm:$0xf] %v250_v10  ;;  %v262_v15 = vld [vmem:[%s11408_s9 + $0x4c] sm:$0xff]  }
  0x70   :  { %253 = vst [vmem:[#allocation6 + $0x38] sm:$0xf] %v252_v11  ;;  %v258_v13 = vld [vmem:[%s11408_s9 + $0x48] sm:$0xf]  ;;  %v260_v14 = vld [vmem:[%s11408_s9 + $0x44] sm:$0xf] }
  0x71   :  { %255 = vst [vmem:[#allocation6 + $0x3c] sm:$0xff] %v254_v12   ;;  %259 = vst [vmem:[#allocation6 + $0x44] sm:$0xf] %v258_v13  ;;  %v266_v16 = vld [vmem:[%s11408_s9 + $0x58] sm:$0xf]  ;;  %v270_v18 = vld [vmem:[%s11408_s9 + $0x5c] sm:$0xff]  }
  0x72   :  { %261 = vst [vmem:[#allocation6 + $0x48] sm:$0xf] %v260_v14  ;;  %v268_v17 = vld [vmem:[%s11408_s9 + $0x54] sm:$0xf]  ;;  %263 = vst [vmem:[#allocation6 + $0x4c] sm:$0xff] %v262_v15   ;;  %v278_v21 = vld [vmem:[%s11408_s9 + $0x6c] sm:$0xff]  }
  0x73   :  { %267 = vst [vmem:[#allocation6 + $0x54] sm:$0xf] %v266_v16  ;;  %269 = vst [vmem:[#allocation6 + $0x58] sm:$0xf] %v268_v17  ;;  %v274_v19 = vld [vmem:[%s11408_s9 + $0x68] sm:$0xf] }
  0x74   :  { %v276_v20 = vld [vmem:[%s11408_s9 + $0x64] sm:$0xf]  ;;  %271 = vst [vmem:[#allocation6 + $0x5c] sm:$0xff] %v270_v18   ;;  %275 = vst [vmem:[#allocation6 + $0x64] sm:$0xf] %v274_v19  ;;  %v286_v24 = vld [vmem:[%s11408_s9 + $0x7c] sm:$0xff]  }
  0x75   :  { %277 = vst [vmem:[#allocation6 + $0x68] sm:$0xf] %v276_v20  ;;  %v282_v22 = vld [vmem:[%s11408_s9 + $0x78] sm:$0xf]  ;;  %v284_v23 = vld [vmem:[%s11408_s9 + $0x74] sm:$0xf] }
  0x76   :  { %279 = vst [vmem:[#allocation6 + $0x6c] sm:$0xff] %v278_v21   ;;  %283 = vst [vmem:[#allocation6 + $0x74] sm:$0xf] %v282_v22  ;;  %v290_v25 = vld [vmem:[%s11408_s9 + $0x88] sm:$0xf]  ;;  %v294_v27 = vld [vmem:[%s11408_s9 + $0x8c] sm:$0xff]  }
  0x77   :  { %285 = vst [vmem:[#allocation6 + $0x78] sm:$0xf] %v284_v23  ;;  %v292_v26 = vld [vmem:[%s11408_s9 + $0x84] sm:$0xf]  ;;  %287 = vst [vmem:[#allocation6 + $0x7c] sm:$0xff] %v286_v24   ;;  %v302_v30 = vld [vmem:[%s11408_s9 + $0x9c] sm:$0xff]  }
  0x78   :  { %291 = vst [vmem:[#allocation6 + $0x84] sm:$0xf] %v290_v25  ;;  %293 = vst [vmem:[#allocation6 + $0x88] sm:$0xf] %v292_v26  ;;  %v298_v28 = vld [vmem:[%s11408_s9 + $0x98] sm:$0xf] }
  0x79   :  { %v300_v29 = vld [vmem:[%s11408_s9 + $0x94] sm:$0xf]  ;;  %295 = vst [vmem:[#allocation6 + $0x8c] sm:$0xff] %v294_v27   ;;  %299 = vst [vmem:[#allocation6 + $0x94] sm:$0xf] %v298_v28  ;;  %v310_v33 = vld [vmem:[%s11408_s9 + $0xac] sm:$0xff]  }
  0x7a   :  { %301 = vst [vmem:[#allocation6 + $0x98] sm:$0xf] %v300_v29  ;;  %v306_v31 = vld [vmem:[%s11408_s9 + $0xa8] sm:$0xf]  ;;  %v308_v32 = vld [vmem:[%s11408_s9 + $0xa4] sm:$0xf] }
  0x7b   :  { %303 = vst [vmem:[#allocation6 + $0x9c] sm:$0xff] %v302_v30   ;;  %307 = vst [vmem:[#allocation6 + $0xa4] sm:$0xf] %v306_v31  ;;  %v314_v34 = vld [vmem:[%s11408_s9 + $0xb8] sm:$0xf]  ;;  %v318_v36 = vld [vmem:[%s11408_s9 + $0xbc] sm:$0xff]  }
  0x7c   :  { %309 = vst [vmem:[#allocation6 + $0xa8] sm:$0xf] %v308_v32  ;;  %v316_v35 = vld [vmem:[%s11408_s9 + $0xb4] sm:$0xf]  ;;  %311 = vst [vmem:[#allocation6 + $0xac] sm:$0xff] %v310_v33   ;;  %v326_v39 = vld [vmem:[%s11408_s9 + $0xcc] sm:$0xff]  }
  0x7d   :  { %315 = vst [vmem:[#allocation6 + $0xb4] sm:$0xf] %v314_v34  ;;  %317 = vst [vmem:[#allocation6 + $0xb8] sm:$0xf] %v316_v35  ;;  %v322_v37 = vld [vmem:[%s11408_s9 + $0xc8] sm:$0xf] }
  0x7e   :  { %v324_v38 = vld [vmem:[%s11408_s9 + $0xc4] sm:$0xf]  ;;  %319 = vst [vmem:[#allocation6 + $0xbc] sm:$0xff] %v318_v36   ;;  %323 = vst [vmem:[#allocation6 + $0xc4] sm:$0xf] %v322_v37  ;;  %v334_v42 = vld [vmem:[%s11408_s9 + $0xdc] sm:$0xff]  }
  0x7f   :  { %325 = vst [vmem:[#allocation6 + $0xc8] sm:$0xf] %v324_v38  ;;  %v330_v40 = vld [vmem:[%s11408_s9 + $0xd8] sm:$0xf]  ;;  %v332_v41 = vld [vmem:[%s11408_s9 + $0xd4] sm:$0xf] }
  0x80   :  { %327 = vst [vmem:[#allocation6 + $0xcc] sm:$0xff] %v326_v39   ;;  %331 = vst [vmem:[#allocation6 + $0xd4] sm:$0xf] %v330_v40  ;;  %v338_v43 = vld [vmem:[%s11408_s9 + $0xe8] sm:$0xf]  ;;  %v342_v45 = vld [vmem:[%s11408_s9 + $0xec] sm:$0xff]  }
  0x81   :  { %333 = vst [vmem:[#allocation6 + $0xd8] sm:$0xf] %v332_v41  ;;  %v340_v44 = vld [vmem:[%s11408_s9 + $0xe4] sm:$0xf]  ;;  %335 = vst [vmem:[#allocation6 + $0xdc] sm:$0xff] %v334_v42  }
  0x82   :  { %339 = vst [vmem:[#allocation6 + $0xe4] sm:$0xf] %v338_v43  ;;  %341 = vst [vmem:[#allocation6 + $0xe8] sm:$0xf] %v340_v44  ;;  %v346_v46 = vld [vmem:[%s11408_s9 + $0xf8] sm:$0xf] }
  0x83   :  { %v348_v47 = vld [vmem:[%s11408_s9 + $0xf4] sm:$0xf]  ;;  %343 = vst [vmem:[#allocation6 + $0xec] sm:$0xff] %v342_v45   ;;  %347 = vst [vmem:[#allocation6 + $0xf4] sm:$0xf] %v346_v46 }
  0x84   :  { %349 = vst [vmem:[#allocation6 + $0xf8] sm:$0xf] %v348_v47  ;;  %v350_v48 = vld [vmem:[%s11408_s9 + $0xfc] sm:$0xf] }
  0x85   :  { %351 = vst [vmem:[#allocation6 + $0xfc] sm:$0xf] %v350_v48 }
  0x86   :  { %510 = vsyncadd [#allocation18 + $0x4], 4096  ;;  %527 = sst [smem:[#allocation35]] %s9821_s25  ;;  %s9839_s3 = smov [#allocation7]  }
  0x87   :  { %s523_s1 = sshll.u32 %s9839_s3, 4  ;;  %529 = sst [smem:[#allocation35 + $0x1]] %s9821_s25  ;;  %s524_s1 = int_to_ptr.vmem [resolvable:$true] %s523_s1 }
  0x88   :  { %531 = sst [smem:[#allocation35 + $0x2]] %s9827_s29  ;;  %s9840_s9 = smov [#allocation8]  }
  0x89   :  { %533 = sst [smem:[#allocation35 + $0x3]] %s9825_s27  ;;  %s10202_s23 = sshll.u32 %s9840_s9, 4  ;;  %s559_s23 = int_to_ptr.vmem [resolvable:$true] %s10202_s23 }
  0x8a   :  { %535 = sst [smem:[#allocation35 + $0x4]] %s9818_s22  ;;  %s9841_s6 = smov [#allocation18 + $0x5]  }
  0x8b   :  { %537 = sst [smem:[#allocation35 + $0x5]] %s9827_s29  ;;  %s9842_s24 = smov [#allocation34]  }
  0x8c   :  { %539 = sst [smem:[#allocation35 + $0x6]] %s9818_s22  ;;  %s9843_s28 = smov [#allocation9]  }
  0x8d   :  { %541 = sst [smem:[#allocation35 + $0x7]] %s9825_s27  ;;  %s589_s8 = sshll.u32 %s9843_s28, 4  ;;  %s590_s8 = int_to_ptr.vmem [resolvable:$true] %s589_s8 }
  0x8e   :  { %543 = sst [smem:[#allocation35 + $0x8]] %s9824_s20  ;;  %s9844_s26 = smov [#allocation10]  }
  0x8f   :  { %545 = dma.general %s11409_s10, 4096, %s524_s1, %s9841_s6, %s9842_s24, [#allocation35], %s10001_s4, 0  }
  0x90   :  { %562 = sst [smem:[#allocation37]] %s9821_s25  ;;  %s601_s7 = sshll.u32 %s9844_s26, 4  ;;  %s10218_s7 = int_to_ptr.vmem [resolvable:$true] %s601_s7 }
  0x91   :  { %564 = sst [smem:[#allocation37 + $0x1]] %s9821_s25  ;;  %s9845_s10 = smov [#allocation11]  }
  0x92   :  { %566 = sst [smem:[#allocation37 + $0x2]] %s9827_s29  ;;  %s10222_s25 = sshll.u32 %s9845_s10, 4  ;;  %s614_s25 = int_to_ptr.vmem [resolvable:$true] %s10222_s25 }
  0x93   :  { %568 = sst [smem:[#allocation37 + $0x3]] %s9825_s27  ;;  %s9846_s0 = smov [#allocation18 + $0x6]  }
  0x94   :  { %570 = sst [smem:[#allocation37 + $0x4]] %s9818_s22  ;;  %s9847_s30 = smov [#allocation36]  }
  0x95   :  { %572 = sst [smem:[#allocation37 + $0x5]] %s9827_s29  ;;  %s9625_s9 = scalar_lea.hbm %s11411_s12, 2048 }
  0x96   :  { %574 = sst [smem:[#allocation37 + $0x6]] %s9818_s22  ;;  %p9626_p2 = scmp.ne.s32.totalorder %s11411_s12, %s9625_s9 }
  0x97   :  { %576 = sst [smem:[#allocation37 + $0x7]] %s9825_s27  ;;  %p9629_p3 = scmp.lt.u32.totalorder %s9625_s9, %s11411_s12 }
  0x98   :  { %578 = sst [smem:[#allocation37 + $0x8]] %s9824_s20 }
  0x99   :  { %580 = dma.general %s11410_s11, 4096, %s559_s23, %s9846_s0, %s9847_s30, [#allocation37], %s10001_s4, 0  }
  0x9a   :  { %p9631_p4 = pnand %p9629_p3, %p9626_p2 }
  0x9c   :  { %9634 = shalt.err (!%p9631_p4)  }
  0x9d   :  { %s9635_s20 = scalar_lea.vmem %s590_s8, 2048  ;;  %p9640_p6 = scmp.lt.s32.totalorder %s590_s8, %s590_s8 }
  0x9e   :  { %p9636_p5 = scmp.ne.s32.totalorder %s590_s8, %s9635_s20  ;;  %p9641_p7 = scmp.lt.s32.totalorder %s9635_s20, %s9635_s20 }
  0xa0   :  { %p9642_p8 = por %p9641_p7, %p9640_p6 }
  0xa2   :  { %p9643_p9 = pnand %p9642_p8, %p9636_p5 }
  0xa4   :  { %9646 = shalt.err (!%p9643_p9)  }
  0xa5   :  { %592 = dma.hbm_to_vmem [thread:$0]  %s11411_s12, 2048, %s590_s8, [#allocation18 + $0x7] }
  0xa6   :  { %s9647_s28 = scalar_lea.hbm %s11412_s13, 1024 }
  0xa7   :  { %p9648_p10 = scmp.ne.s32.totalorder %s11412_s13, %s9647_s28  ;;  %p9651_p11 = scmp.lt.u32.totalorder %s9647_s28, %s11412_s13 }
  0xa9   :  { %p9653_p12 = pnand %p9651_p11, %p9648_p10 }
  0xab   :  { %9656 = shalt.err (!%p9653_p12)  }
  0xac   :  { %s9657_s5 = scalar_lea.vmem %s10218_s7, 1024  ;;  %p9662_p0 = scmp.lt.s32.totalorder %s10218_s7, %s10218_s7 }
  0xad   :  { %p9658_p13 = scmp.ne.s32.totalorder %s10218_s7, %s9657_s5  ;;  %p9663_p1 = scmp.lt.s32.totalorder %s9657_s5, %s9657_s5 }
  0xaf   :  { %p9664_p2 = por %p9663_p1, %p9662_p0 }
  0xb1   :  { %p9665_p3 = pnand %p9664_p2, %p9658_p13 }
  0xb3   :  { %9668 = shalt.err (!%p9665_p3)  }
  0xb4   :  { %604 = dma.hbm_to_vmem [thread:$0]  %s11412_s13, 1024, %s10218_s7, [#allocation18 + $0x8] }
  0xb5   :  { %s9669_s1 = scalar_lea.hbm %s11413_s14, 1024 }
  0xb6   :  { %p9670_p4 = scmp.ne.s32.totalorder %s11413_s14, %s9669_s1  ;;  %p9673_p5 = scmp.lt.u32.totalorder %s9669_s1, %s11413_s14 }
  0xb8   :  { %p9675_p6 = pnand %p9673_p5, %p9670_p4 }
  0xba   :  { %9678 = shalt.err (!%p9675_p6)  }
  0xbb   :  { %s9679_s2 = scalar_lea.vmem %s614_s25, 1024  ;;  %p9684_p8 = scmp.lt.s32.totalorder %s614_s25, %s614_s25 }
  0xbc   :  { %p9680_p7 = scmp.ne.s32.totalorder %s614_s25, %s9679_s2  ;;  %p9685_p9 = scmp.lt.s32.totalorder %s9679_s2, %s9679_s2 }
  0xbe   :  { %p9686_p10 = por %p9685_p9, %p9684_p8 }
  0xc0   :  { %p9687_p11 = pnand %p9686_p10, %p9680_p7 }
  0xc2   :  { %9690 = shalt.err (!%p9687_p11)  }
  0xc3   :  { %616 = dma.hbm_to_vmem [thread:$0]  %s11413_s14, 1024, %s614_s25, [#allocation18 + $0x9]  ;;  %v10273_v49 = vld [vmem:[%s11415_s16] sm:$0xff]  ;;  %v10278_v50 = vld [vmem:[%s11415_s16 + $0x8] sm:$0xff]  ;;  %v10283_v51 = vld [vmem:[%s11415_s16 + $0x10] sm:$0xff] }
  0xc4   :  { %s9848_s20 = smov [#allocation12]   ;;  %s9691_s25 = scalar_lea.hbm %s11414_s15, 1024 }
  0xc5   :  { %s625_s11 = sshll.u32 %s9848_s20, 4  ;;  %p9692_p12 = scmp.ne.s32.totalorder %s11414_s15, %s9691_s25  ;;  %s626_s11 = int_to_ptr.vmem [resolvable:$true] %s625_s11 }
  0xc6   :  { %p9695_p13 = scmp.lt.u32.totalorder %s9691_s25, %s11414_s15 }
  0xc8   :  { %p9697_p0 = pnand %p9695_p13, %p9692_p12 }
  0xca   :  { %9700 = shalt.err (!%p9697_p0)  }
  0xcb   :  { %s9701_s3 = scalar_lea.vmem %s626_s11, 1024  ;;  %p9706_p2 = scmp.lt.s32.totalorder %s626_s11, %s626_s11 }
  0xcc   :  { %p9702_p1 = scmp.ne.s32.totalorder %s626_s11, %s9701_s3  ;;  %p9707_p3 = scmp.lt.s32.totalorder %s9701_s3, %s9701_s3 }
  0xce   :  { %p9708_p4 = por %p9707_p3, %p9706_p2 }
  0xd0   :  { %p9709_p5 = pnand %p9708_p4, %p9702_p1 }
  0xd2   :  { %9712 = shalt.err (!%p9709_p5)  }
  0xd3   :  { %628 = dma.hbm_to_vmem [thread:$0]  %s11414_s15, 1024, %s626_s11, [#allocation18 + $0xa]  ;;  %v10300_v52 = vld [vmem:[%s11415_s16 + $0x18] sm:$0xff]  ;;  %v10305_v53 = vld [vmem:[%s11415_s16 + $0x20] sm:$0xff]  ;;  %v10310_v54 = vld [vmem:[%s11415_s16 + $0x28] sm:$0xff] }
  0xd4   :  { %v10315_v55 = vld [vmem:[%s11415_s16 + $0x30] sm:$0xff]  ;;  %v10320_v56 = vld [vmem:[%s11415_s16 + $0x38] sm:$0xff] }
  0xd5   :  { %685 = vsyncadd [#allocation18 + $0xb], 1024  ;;  %v10325_v57 = vld [vmem:[%s11416_s17] sm:$0xff]  ;;  %v10330_v58 = vld [vmem:[%s11416_s17 + $0x8] sm:$0xff] }
  0xd6   :  { %730 = vsyncadd [#allocation18 + $0xc], 256  ;;  %v10335_v59 = vld [vmem:[%s11417_s18] sm:$0xff]  ;;  %v10340_v60 = vld [vmem:[%s11417_s18 + $0x8] sm:$0xff]  ;;  %s11440_s14 = sld [smem:[#allocation74_spill]] }
  0xd7   :  { %v8871_v61 = vld [vmem:[#allocation22 + $0x4] ss:$16 sps:$4 sm:$0xff]   ;;  %v8873_v62 = vld [vmem:[#allocation22 + $0xc] ss:$16 sps:$4 sm:$0xff]   ;;  %v8875_v63 = vld [vmem:[#allocation22] ss:$16 sps:$4 sm:$0xff]  }
  0xd8   :  { %2362 = vmatprep.subr.bf16.mxu0 %v8871_v61  ;;  %v8876_v0 = vld [vmem:[#allocation22 + $0x8] ss:$16 sps:$4 sm:$0xff]   ;;  %2534 = vmatprep.subr.bf16.mxu1 %v8873_v62  ;;  %v8877_v1 = vld [vmem:[#allocation22 + $0x24] ss:$16 sps:$4 sm:$0xff]   ;;  %v8879_v2 = vld [vmem:[#allocation22 + $0x2c] ss:$16 sps:$4 sm:$0xff]  }
  0xd9   :  { %2363 = vmatpush1.bf16.msra.mxu0 %v8875_v63  ;;  %2535 = vmatpush1.bf16.msra.mxu1 %v8876_v0  ;;  %v8881_v3 = vld [vmem:[#allocation22 + $0x20] ss:$16 sps:$4 sm:$0xff]   ;;  %v8882_v4 = vld [vmem:[#allocation22 + $0x28] ss:$16 sps:$4 sm:$0xff]   ;;  %v8883_v5 = vld [vmem:[#allocation22 + $0x44] ss:$16 sps:$4 sm:$0xff]  }
  0xda   :  { %2364 = vmatprep.subr.bf16.mxu0 %v8877_v1  ;;  %2536 = vmatprep.subr.bf16.mxu1 %v8879_v2  ;;  %v8885_v6 = vld [vmem:[#allocation22 + $0x4c] ss:$16 sps:$4 sm:$0xff]   ;;  %v8887_v7 = vld [vmem:[#allocation22 + $0x40] ss:$16 sps:$4 sm:$0xff]   ;;  %v8888_v8 = vld [vmem:[#allocation22 + $0x48] ss:$16 sps:$4 sm:$0xff]  }
  0xdb   :  { %v8889_v9 = vld [vmem:[#allocation22 + $0x64] ss:$16 sps:$4 sm:$0xff]   ;;  %v8891_v10 = vld [vmem:[#allocation22 + $0x6c] ss:$16 sps:$4 sm:$0xff]   ;;  %v8893_v11 = vld [vmem:[#allocation22 + $0x60] ss:$16 sps:$4 sm:$0xff]  }
  0xdc   :  { %v8894_v12 = vld [vmem:[#allocation22 + $0x68] ss:$16 sps:$4 sm:$0xff]   ;;  %v8895_v13 = vld [vmem:[#allocation22 + $0x84] ss:$16 sps:$4 sm:$0xff]   ;;  %v8897_v14 = vld [vmem:[#allocation22 + $0x8c] ss:$16 sps:$4 sm:$0xff]  }
  0xdd   :  { %2365 = vmatpush1.bf16.msra.mxu0 %v8881_v3  ;;  %2537 = vmatpush1.bf16.msra.mxu1 %v8882_v4  ;;  %v8899_v15 = vld [vmem:[#allocation22 + $0x80] ss:$16 sps:$4 sm:$0xff]   ;;  %v8900_v16 = vld [vmem:[#allocation22 + $0x88] ss:$16 sps:$4 sm:$0xff]   ;;  %v8901_v17 = vld [vmem:[#allocation22 + $0xa4] ss:$16 sps:$4 sm:$0xff]  }
  0xde   :  { %2366 = vmatprep.subr.bf16.mxu0 %v8883_v5  ;;  %2538 = vmatprep.subr.bf16.mxu1 %v8885_v6  ;;  %v8903_v18 = vld [vmem:[#allocation22 + $0xac] ss:$16 sps:$4 sm:$0xff]   ;;  %v8905_v19 = vld [vmem:[#allocation22 + $0xa0] ss:$16 sps:$4 sm:$0xff]   ;;  %v8906_v20 = vld [vmem:[#allocation22 + $0xa8] ss:$16 sps:$4 sm:$0xff]  }
  0xdf   :  { %v8907_v21 = vld [vmem:[#allocation22 + $0xc4] ss:$16 sps:$4 sm:$0xff]   ;;  %v8909_v22 = vld [vmem:[#allocation22 + $0xcc] ss:$16 sps:$4 sm:$0xff]   ;;  %v8911_v23 = vld [vmem:[#allocation22 + $0xc0] ss:$16 sps:$4 sm:$0xff]  }
  0xe0   :  { %v8912_v24 = vld [vmem:[#allocation22 + $0xc8] ss:$16 sps:$4 sm:$0xff]   ;;  %v8913_v25 = vld [vmem:[#allocation22 + $0xe4] ss:$16 sps:$4 sm:$0xff]   ;;  %v8915_v26 = vld [vmem:[#allocation22 + $0xec] ss:$16 sps:$4 sm:$0xff]  }
  0xe1   :  { %2367 = vmatpush1.bf16.msra.mxu0 %v8887_v7  ;;  %2539 = vmatpush1.bf16.msra.mxu1 %v8888_v8  ;;  %v8917_v27 = vld [vmem:[#allocation22 + $0xe0] ss:$16 sps:$4 sm:$0xff]   ;;  %v8918_v28 = vld [vmem:[#allocation22 + $0xe8] ss:$16 sps:$4 sm:$0xff]   ;;  %v8919_v29 = vld [vmem:[#allocation22 + $0x104] ss:$16 sps:$4 sm:$0xff]  }
  0xe2   :  { %2368 = vmatprep.subr.bf16.mxu0 %v8889_v9  ;;  %2540 = vmatprep.subr.bf16.mxu1 %v8891_v10  ;;  %v8921_v30 = vld [vmem:[#allocation22 + $0x10c] ss:$16 sps:$4 sm:$0xff]   ;;  %v8923_v31 = vld [vmem:[#allocation22 + $0x100] ss:$16 sps:$4 sm:$0xff]   ;;  %v8924_v32 = vld [vmem:[#allocation22 + $0x108] ss:$16 sps:$4 sm:$0xff]  }
  0xe3   :  { %v8925_v33 = vld [vmem:[#allocation22 + $0x124] ss:$16 sps:$4 sm:$0xff]   ;;  %v8927_v34 = vld [vmem:[#allocation22 + $0x12c] ss:$16 sps:$4 sm:$0xff]   ;;  %v8929_v35 = vld [vmem:[#allocation22 + $0x120] ss:$16 sps:$4 sm:$0xff]  }
  0xe4   :  { %v8930_v36 = vld [vmem:[#allocation22 + $0x128] ss:$16 sps:$4 sm:$0xff]   ;;  %v8931_v37 = vld [vmem:[#allocation22 + $0x144] ss:$16 sps:$4 sm:$0xff]   ;;  %v8933_v38 = vld [vmem:[#allocation22 + $0x14c] ss:$16 sps:$4 sm:$0xff]  }
  0xe5   :  { %2369 = vmatpush1.bf16.msra.mxu0 %v8893_v11  ;;  %2541 = vmatpush1.bf16.msra.mxu1 %v8894_v12  ;;  %v8935_v39 = vld [vmem:[#allocation22 + $0x140] ss:$16 sps:$4 sm:$0xff]   ;;  %v8936_v40 = vld [vmem:[#allocation22 + $0x148] ss:$16 sps:$4 sm:$0xff]   ;;  %v8937_v41 = vld [vmem:[#allocation22 + $0x164] ss:$16 sps:$4 sm:$0xff]  }
  0xe6   :  { %2370 = vmatprep.subr.bf16.mxu0 %v8895_v13  ;;  %2542 = vmatprep.subr.bf16.mxu1 %v8897_v14  ;;  %v8939_v42 = vld [vmem:[#allocation22 + $0x16c] ss:$16 sps:$4 sm:$0xff]   ;;  %v8941_v45 = vld [vmem:[#allocation22 + $0x160] ss:$16 sps:$4 sm:$0xff]   ;;  %v8942_v46 = vld [vmem:[#allocation22 + $0x168] ss:$16 sps:$4 sm:$0xff]  }
  0xe7   :  { %v803_v43 = vld [vmem:[%s11440_s14 + $0x8] sm:$0xff]  ;;  %v8943_v48 = vld [vmem:[#allocation22 + $0x184] ss:$16 sps:$4 sm:$0xff]   ;;  %v8947_v62 = vld [vmem:[#allocation22 + $0x180] ss:$16 sps:$4 sm:$0xff]  }
  0xe8   :  { %v811_v44 = vld [vmem:[%s11440_s14 + $0x48] sm:$0xff]  ;;  %v8949_v0 = vld [vmem:[#allocation22 + $0x1a4] ss:$16 sps:$4 sm:$0xff]   ;;  %v8953_v2 = vld [vmem:[#allocation22 + $0x1a0] ss:$16 sps:$4 sm:$0xff]  }
  0xe9   :  { %2371 = vmatpush1.bf16.msra.mxu0 %v8899_v15  ;;  %2543 = vmatpush1.bf16.msra.mxu1 %v8900_v16  ;;  %v1075_v47 = vpack.c.bf16 %v811_v44, %v803_v43  ;;  %v8945_v61 = vld [vmem:[#allocation22 + $0x18c] ss:$16 sps:$4 sm:$0xff]   ;;  %v8948_v63 = vld [vmem:[#allocation22 + $0x188] ss:$16 sps:$4 sm:$0xff]   ;;  %v8955_v4 = vld [vmem:[#allocation22 + $0x1c4] ss:$16 sps:$4 sm:$0xff]  }
  0xea   :  { %2372 = vmatprep.subr.bf16.mxu0 %v8901_v17  ;;  %2544 = vmatprep.subr.bf16.mxu1 %v8903_v18  ;;  %v8951_v1 = vld [vmem:[#allocation22 + $0x1ac] ss:$16 sps:$4 sm:$0xff]   ;;  %v8954_v3 = vld [vmem:[#allocation22 + $0x1a8] ss:$16 sps:$4 sm:$0xff]   ;;  %v8959_v6 = vld [vmem:[#allocation22 + $0x1c0] ss:$16 sps:$4 sm:$0xff]  }
  0xeb   :  { %2394 = vmatprep.mubr.bf16.mxu0 %v1075_v47  ;;  %2566 = vmatprep.mubr.bf16.mxu1 %v1075_v47  ;;  %v8957_v5 = vld [vmem:[#allocation22 + $0x1cc] ss:$16 sps:$4 sm:$0xff]   ;;  %v8960_v7 = vld [vmem:[#allocation22 + $0x1c8] ss:$16 sps:$4 sm:$0xff]   ;;  %v8961_v8 = vld [vmem:[#allocation22 + $0x1e4] ss:$16 sps:$4 sm:$0xff]  }
  0xec   :  { %v8963_v9 = vld [vmem:[#allocation22 + $0x1ec] ss:$16 sps:$4 sm:$0xff]   ;;  %v8965_v10 = vld [vmem:[#allocation22 + $0x1e0] ss:$16 sps:$4 sm:$0xff]   ;;  %v8966_v11 = vld [vmem:[#allocation22 + $0x1e8] ss:$16 sps:$4 sm:$0xff]  }
  0xed   :  { %2373 = vmatpush1.bf16.msra.mxu0 %v8905_v19  ;;  %2545 = vmatpush1.bf16.msra.mxu1 %v8906_v20  ;;  %v8969_v12 = vld [vmem:[#allocation22 + $0x204] ss:$16 sps:$4 sm:$0xff]   ;;  %v8972_v15 = vld [vmem:[#allocation22 + $0x20c] ss:$16 sps:$4 sm:$0xff]   ;;  %v8967_v16 = vld [vmem:[#allocation22 + $0x200] ss:$16 sps:$4 sm:$0xff]  }
  0xee   :  { %2374 = vmatprep.subr.bf16.mxu0 %v8907_v21  ;;  %2546 = vmatprep.subr.bf16.mxu1 %v8909_v22  ;;  %v802_v13 = vld [vmem:[%s11440_s14] sm:$0xff]  ;;  %v8970_v17 = vld [vmem:[#allocation22 + $0x208] ss:$16 sps:$4 sm:$0xff]   ;;  %v8978_v20 = vld [vmem:[#allocation22 + $0x22c] ss:$16 sps:$4 sm:$0xff]  }
  0xef   :  { %v810_v14 = vld [vmem:[%s11440_s14 + $0x40] sm:$0xff]  ;;  %v8976_v22 = vld [vmem:[#allocation22 + $0x228] ss:$16 sps:$4 sm:$0xff]   ;;  %v9014_v47 = vld [vmem:[#allocation22 + $0x2ec] ss:$16 sps:$4 sm:$0xff]  }
  0xf0   :  { %v1074_v18 = vpack.c.bf16 %v810_v14, %v802_v13  ;;  %v8975_v19 = vld [vmem:[#allocation22 + $0x224] ss:$16 sps:$4 sm:$0xff]   ;;  %v8973_v21 = vld [vmem:[#allocation22 + $0x220] ss:$16 sps:$4 sm:$0xff]   ;;  %v9006_v44 = vld [vmem:[#allocation22 + $0x2c8] ss:$16 sps:$4 sm:$0xff]  }
  0xf1   :  { %2375 = vmatpush1.bf16.msra.mxu0 %v8911_v23  ;;  %2547 = vmatpush1.bf16.msra.mxu1 %v8912_v24  ;;  %v8981_v23 = vld [vmem:[#allocation22 + $0x244] ss:$16 sps:$4 sm:$0xff]   ;;  %v8984_v24 = vld [vmem:[#allocation22 + $0x24c] ss:$16 sps:$4 sm:$0xff]   ;;  %v9003_v43 = vld [vmem:[#allocation22 + $0x2c0] ss:$16 sps:$4 sm:$0xff]  }
  0xf2   :  { %2376 = vmatprep.subr.bf16.mxu0 %v8913_v25  ;;  %2548 = vmatprep.subr.bf16.mxu1 %v8915_v26  ;;  %v8979_v25 = vld [vmem:[#allocation22 + $0x240] ss:$16 sps:$4 sm:$0xff]   ;;  %v8982_v26 = vld [vmem:[#allocation22 + $0x248] ss:$16 sps:$4 sm:$0xff]   ;;  %v9041_v14 = vld [vmem:[#allocation22 + $0x384] ss:$16 sps:$4 sm:$0xff]  }
  0xf3   :  { %v9036_v13 = vld [vmem:[#allocation22 + $0x368] ss:$16 sps:$4 sm:$0xff]  }
  0xf5   :  { %2377 = vmatpush1.bf16.msra.mxu0 %v8917_v27  ;;  %2549 = vmatpush1.bf16.msra.mxu1 %v8918_v28  ;;  %v8987_v27 = vld [vmem:[#allocation22 + $0x264] ss:$16 sps:$4 sm:$0xff]   ;;  %v8990_v28 = vld [vmem:[#allocation22 + $0x26c] ss:$16 sps:$4 sm:$0xff]  }
  0xf6   :  { %2378 = vmatprep.subr.bf16.mxu0 %v8919_v29  ;;  %2550 = vmatprep.subr.bf16.mxu1 %v8921_v30  ;;  %v8985_v29 = vld [vmem:[#allocation22 + $0x260] ss:$16 sps:$4 sm:$0xff]   ;;  %v8988_v30 = vld [vmem:[#allocation22 + $0x268] ss:$16 sps:$4 sm:$0xff]  }
  0xf9   :  { %2379 = vmatpush1.bf16.msra.mxu0 %v8923_v31  ;;  %2551 = vmatpush1.bf16.msra.mxu1 %v8924_v32  ;;  %v8993_v31 = vld [vmem:[#allocation22 + $0x284] ss:$16 sps:$4 sm:$0xff]   ;;  %v8996_v32 = vld [vmem:[#allocation22 + $0x28c] ss:$16 sps:$4 sm:$0xff]  }
  0xfa   :  { %2380 = vmatprep.subr.bf16.mxu0 %v8925_v33  ;;  %2552 = vmatprep.subr.bf16.mxu1 %v8927_v34  ;;  %v8991_v33 = vld [vmem:[#allocation22 + $0x280] ss:$16 sps:$4 sm:$0xff]   ;;  %v8994_v34 = vld [vmem:[#allocation22 + $0x288] ss:$16 sps:$4 sm:$0xff]  }
  0xfd   :  { %2381 = vmatpush1.bf16.msra.mxu0 %v8929_v35  ;;  %2553 = vmatpush1.bf16.msra.mxu1 %v8930_v36  ;;  %v8999_v35 = vld [vmem:[#allocation22 + $0x2a4] ss:$16 sps:$4 sm:$0xff]   ;;  %v9002_v36 = vld [vmem:[#allocation22 + $0x2ac] ss:$16 sps:$4 sm:$0xff]  }
  0xfe   :  { %2382 = vmatprep.subr.bf16.mxu0 %v8931_v37  ;;  %2554 = vmatprep.subr.bf16.mxu1 %v8933_v38  ;;  %v8997_v37 = vld [vmem:[#allocation22 + $0x2a0] ss:$16 sps:$4 sm:$0xff]   ;;  %v9000_v38 = vld [vmem:[#allocation22 + $0x2a8] ss:$16 sps:$4 sm:$0xff]  }
 0x101   :  { %2383 = vmatpush1.bf16.msra.mxu0 %v8935_v39  ;;  %2555 = vmatpush1.bf16.msra.mxu1 %v8936_v40  ;;  %v9005_v39 = vld [vmem:[#allocation22 + $0x2c4] ss:$16 sps:$4 sm:$0xff]   ;;  %v9008_v40 = vld [vmem:[#allocation22 + $0x2cc] ss:$16 sps:$4 sm:$0xff]  }
 0x102   :  { %2384 = vmatprep.subr.bf16.mxu0 %v8937_v41  ;;  %2556 = vmatprep.subr.bf16.mxu1 %v8939_v42  ;;  %v805_v41 = vld [vmem:[%s11440_s14 + $0x18] sm:$0xff] }
 0x103   :  { %v813_v42 = vld [vmem:[%s11440_s14 + $0x58] sm:$0xff] }
 0x105   :  { %2385 = vmatpush1.bf16.msra.mxu0 %v8941_v45  ;;  %2557 = vmatpush1.bf16.msra.mxu1 %v8942_v46  ;;  %v1077_v45 = vpack.c.bf16 %v813_v42, %v805_v41  ;;  %v9011_v46 = vld [vmem:[#allocation22 + $0x2e4] ss:$16 sps:$4 sm:$0xff]   ;;  %v9069_v41 = vld [vmem:[#allocation22 + $0x420] ss:$16 sps:$4 sm:$0xff]   ;;  %v9072_v42 = vld [vmem:[#allocation22 + $0x428] ss:$16 sps:$4 sm:$0xff]  }
 0x106   :  { %2386 = vmatprep.subr.bf16.mxu0 %v8943_v48  ;;  %2558 = vmatprep.subr.bf16.mxu1 %v8945_v61  ;;  %v9009_v48 = vld [vmem:[#allocation22 + $0x2e0] ss:$16 sps:$4 sm:$0xff]   ;;  %v9012_v61 = vld [vmem:[#allocation22 + $0x2e8] ss:$16 sps:$4 sm:$0xff]  }
 0x109   :  { %2387 = vmatpush1.bf16.msra.mxu0 %v8947_v62  ;;  %2559 = vmatpush1.bf16.msra.mxu1 %v8948_v63  ;;  %v9017_v62 = vld [vmem:[#allocation22 + $0x304] ss:$16 sps:$4 sm:$0xff]   ;;  %v9020_v63 = vld [vmem:[#allocation22 + $0x30c] ss:$16 sps:$4 sm:$0xff]  }
 0x10a   :  { %2388 = vmatprep.subr.bf16.mxu0 %v8949_v0  ;;  %2560 = vmatprep.subr.bf16.mxu1 %v8951_v1  ;;  %v9015_v0 = vld [vmem:[#allocation22 + $0x300] ss:$16 sps:$4 sm:$0xff]   ;;  %v9018_v1 = vld [vmem:[#allocation22 + $0x308] ss:$16 sps:$4 sm:$0xff]  }
 0x10d   :  { %2389 = vmatpush1.bf16.msra.mxu0 %v8953_v2  ;;  %2561 = vmatpush1.bf16.msra.mxu1 %v8954_v3  ;;  %v9023_v2 = vld [vmem:[#allocation22 + $0x324] ss:$16 sps:$4 sm:$0xff]   ;;  %v9026_v3 = vld [vmem:[#allocation22 + $0x32c] ss:$16 sps:$4 sm:$0xff]  }
 0x10e   :  { %2390 = vmatprep.subr.bf16.mxu0 %v8955_v4  ;;  %2562 = vmatprep.subr.bf16.mxu1 %v8957_v5  ;;  %v9021_v4 = vld [vmem:[#allocation22 + $0x320] ss:$16 sps:$4 sm:$0xff]   ;;  %v9024_v5 = vld [vmem:[#allocation22 + $0x328] ss:$16 sps:$4 sm:$0xff]  }
 0x111   :  { %2391 = vmatpush1.bf16.msra.mxu0 %v8959_v6  ;;  %2563 = vmatpush1.bf16.msra.mxu1 %v8960_v7  ;;  %v9029_v6 = vld [vmem:[#allocation22 + $0x344] ss:$16 sps:$4 sm:$0xff]   ;;  %v9032_v7 = vld [vmem:[#allocation22 + $0x34c] ss:$16 sps:$4 sm:$0xff]  }
 0x112   :  { %2392 = vmatprep.subr.bf16.mxu0 %v8961_v8  ;;  %2564 = vmatprep.subr.bf16.mxu1 %v8963_v9  ;;  %v9027_v8 = vld [vmem:[#allocation22 + $0x340] ss:$16 sps:$4 sm:$0xff]   ;;  %v9030_v9 = vld [vmem:[#allocation22 + $0x348] ss:$16 sps:$4 sm:$0xff]  }
 0x115   :  { %2393 = vmatpush1.bf16.msra.mxu0 %v8965_v10  ;;  %2565 = vmatpush1.bf16.msra.mxu1 %v8966_v11  ;;  %v9035_v10 = vld [vmem:[#allocation22 + $0x364] ss:$16 sps:$4 sm:$0xff]   ;;  %v9038_v11 = vld [vmem:[#allocation22 + $0x36c] ss:$16 sps:$4 sm:$0xff]  }
 0x116   :  { %2405 = vmatprep.subr.bf16.mxu0 %v8969_v12  ;;  %2577 = vmatprep.subr.bf16.mxu1 %v8972_v15  ;;  %v9033_v12 = vld [vmem:[#allocation22 + $0x360] ss:$16 sps:$4 sm:$0xff]   ;;  %v9044_v15 = vld [vmem:[#allocation22 + $0x38c] ss:$16 sps:$4 sm:$0xff]  }
 0x118   :  { %2395 = vmatmul.mubr.bf16.vlgmr.msra.gmra.mrb[0].mxu0 %v1074_v18  ;;  %2567 = vmatmul.mubr.bf16.vlgmr.msra.gmra.mrb[0].mxu1 %v1074_v18  ;;  %v9047_v18 = vld [vmem:[#allocation22 + $0x3a4] ss:$16 sps:$4 sm:$0xff]  }
 0x119   :  { %2406 = vmatpush1.bf16.msra.mxu0 %v8967_v16  ;;  %2578 = vmatpush1.bf16.msra.mxu1 %v8970_v17  ;;  %v9039_v16 = vld [vmem:[#allocation22 + $0x380] ss:$16 sps:$4 sm:$0xff]   ;;  %v9042_v17 = vld [vmem:[#allocation22 + $0x388] ss:$16 sps:$4 sm:$0xff]  }
 0x11a   :  { %2407 = vmatprep.subr.bf16.mxu0 %v8975_v19  ;;  %2579 = vmatprep.subr.bf16.mxu1 %v8978_v20  ;;  %v9050_v19 = vld [vmem:[#allocation22 + $0x3ac] ss:$16 sps:$4 sm:$0xff]   ;;  %v9045_v20 = vld [vmem:[#allocation22 + $0x3a0] ss:$16 sps:$4 sm:$0xff]  }
 0x11b   :  { %2437 = vmatprep.mubr.bf16.mxu0 %v1077_v45  ;;  %2609 = vmatprep.mubr.bf16.mxu1 %v1077_v45  ;;  %v9080_v45 = vld [vmem:[#allocation22 + $0x44c] ss:$16 sps:$4 sm:$0xff]  }
 0x11d   :  { %2408 = vmatpush1.bf16.msra.mxu0 %v8973_v21  ;;  %2580 = vmatpush1.bf16.msra.mxu1 %v8976_v22  ;;  %v9048_v21 = vld [vmem:[#allocation22 + $0x3a8] ss:$16 sps:$4 sm:$0xff]   ;;  %v9053_v22 = vld [vmem:[#allocation22 + $0x3c4] ss:$16 sps:$4 sm:$0xff]  }
 0x11e   :  { %2409 = vmatprep.subr.bf16.mxu0 %v8981_v23  ;;  %2581 = vmatprep.subr.bf16.mxu1 %v8984_v24  ;;  %v9056_v23 = vld [vmem:[#allocation22 + $0x3cc] ss:$16 sps:$4 sm:$0xff]   ;;  %v9051_v24 = vld [vmem:[#allocation22 + $0x3c0] ss:$16 sps:$4 sm:$0xff]  }
 0x121   :  { %2410 = vmatpush1.bf16.msra.mxu0 %v8979_v25  ;;  %2582 = vmatpush1.bf16.msra.mxu1 %v8982_v26  ;;  %v9054_v25 = vld [vmem:[#allocation22 + $0x3c8] ss:$16 sps:$4 sm:$0xff]   ;;  %v9059_v26 = vld [vmem:[#allocation22 + $0x3e4] ss:$16 sps:$4 sm:$0xff]  }
 0x122   :  { %2411 = vmatprep.subr.bf16.mxu0 %v8987_v27  ;;  %2583 = vmatprep.subr.bf16.mxu1 %v8990_v28  ;;  %v9062_v27 = vld [vmem:[#allocation22 + $0x3ec] ss:$16 sps:$4 sm:$0xff]   ;;  %v9057_v28 = vld [vmem:[#allocation22 + $0x3e0] ss:$16 sps:$4 sm:$0xff]  }
 0x125   :  { %2412 = vmatpush1.bf16.msra.mxu0 %v8985_v29  ;;  %2584 = vmatpush1.bf16.msra.mxu1 %v8988_v30  ;;  %v9060_v29 = vld [vmem:[#allocation22 + $0x3e8] ss:$16 sps:$4 sm:$0xff]   ;;  %v9065_v30 = vld [vmem:[#allocation22 + $0x404] ss:$16 sps:$4 sm:$0xff]  }
 0x126   :  { %2413 = vmatprep.subr.bf16.mxu0 %v8993_v31  ;;  %2585 = vmatprep.subr.bf16.mxu1 %v8996_v32  ;;  %v804_v31 = vld [vmem:[%s11440_s14 + $0x10] sm:$0xff] }
 0x127   :  { %v812_v32 = vld [vmem:[%s11440_s14 + $0x50] sm:$0xff] }
 0x129   :  { %2414 = vmatpush1.bf16.msra.mxu0 %v8991_v33  ;;  %2586 = vmatpush1.bf16.msra.mxu1 %v8994_v34  ;;  %v9068_v33 = vld [vmem:[#allocation22 + $0x40c] ss:$16 sps:$4 sm:$0xff]   ;;  %v9063_v34 = vld [vmem:[#allocation22 + $0x400] ss:$16 sps:$4 sm:$0xff]  }
 0x12a   :  { %2415 = vmatprep.subr.bf16.mxu0 %v8999_v35  ;;  %2587 = vmatprep.subr.bf16.mxu1 %v9002_v36  ;;  %v9066_v35 = vld [vmem:[#allocation22 + $0x408] ss:$16 sps:$4 sm:$0xff]   ;;  %v1076_v36 = vpack.c.bf16 %v812_v32, %v804_v31  ;;  %v9137_v32 = vld [vmem:[#allocation22 + $0x584] ss:$16 sps:$4 sm:$0xff]  }
 0x12b   :  { %v9132_v31 = vld [vmem:[#allocation22 + $0x568] ss:$16 sps:$4 sm:$0xff]  }
 0x12d   :  { %2416 = vmatpush1.bf16.msra.mxu0 %v8997_v37  ;;  %2588 = vmatpush1.bf16.msra.mxu1 %v9000_v38  ;;  %v9071_v37 = vld [vmem:[#allocation22 + $0x424] ss:$16 sps:$4 sm:$0xff]   ;;  %v9074_v38 = vld [vmem:[#allocation22 + $0x42c] ss:$16 sps:$4 sm:$0xff]  }
 0x12e   :  { %2417 = vmatprep.subr.bf16.mxu0 %v9005_v39  ;;  %2589 = vmatprep.subr.bf16.mxu1 %v9008_v40  ;;  %v807_v39 = vld [vmem:[%s11440_s14 + $0x28] sm:$0xff] }
 0x12f   :  { %v815_v40 = vld [vmem:[%s11440_s14 + $0x68] sm:$0xff] }
 0x131   :  { %2418 = vmatpush1.bf16.msra.mxu0 %v9003_v43  ;;  %2590 = vmatpush1.bf16.msra.mxu1 %v9006_v44  ;;  %v1079_v43 = vpack.c.bf16 %v815_v40, %v807_v39  ;;  %v9077_v44 = vld [vmem:[#allocation22 + $0x444] ss:$16 sps:$4 sm:$0xff]  }
 0x132   :  { %2419 = vmatprep.subr.bf16.mxu0 %v9011_v46  ;;  %2591 = vmatprep.subr.bf16.mxu1 %v9014_v47  ;;  %v9075_v46 = vld [vmem:[#allocation22 + $0x440] ss:$16 sps:$4 sm:$0xff]   ;;  %v9078_v47 = vld [vmem:[#allocation22 + $0x448] ss:$16 sps:$4 sm:$0xff]  }
 0x135   :  { %2420 = vmatpush1.bf16.msra.mxu0 %v9009_v48  ;;  %2592 = vmatpush1.bf16.msra.mxu1 %v9012_v61  ;;  %v9083_v48 = vld [vmem:[#allocation22 + $0x464] ss:$16 sps:$4 sm:$0xff]   ;;  %v9086_v61 = vld [vmem:[#allocation22 + $0x46c] ss:$16 sps:$4 sm:$0xff]  }
 0x136   :  { %2421 = vmatprep.subr.bf16.mxu0 %v9017_v62  ;;  %2593 = vmatprep.subr.bf16.mxu1 %v9020_v63  ;;  %v9081_v62 = vld [vmem:[#allocation22 + $0x460] ss:$16 sps:$4 sm:$0xff]   ;;  %v9084_v63 = vld [vmem:[#allocation22 + $0x468] ss:$16 sps:$4 sm:$0xff]  }
 0x139   :  { %2422 = vmatpush1.bf16.msra.mxu0 %v9015_v0  ;;  %2594 = vmatpush1.bf16.msra.mxu1 %v9018_v1  ;;  %v9089_v0 = vld [vmem:[#allocation22 + $0x484] ss:$16 sps:$4 sm:$0xff]   ;;  %v9092_v1 = vld [vmem:[#allocation22 + $0x48c] ss:$16 sps:$4 sm:$0xff]  }
 0x13a   :  { %2423 = vmatprep.subr.bf16.mxu0 %v9023_v2  ;;  %2595 = vmatprep.subr.bf16.mxu1 %v9026_v3  ;;  %v9087_v2 = vld [vmem:[#allocation22 + $0x480] ss:$16 sps:$4 sm:$0xff]   ;;  %v9090_v3 = vld [vmem:[#allocation22 + $0x488] ss:$16 sps:$4 sm:$0xff]  }
 0x13d   :  { %2424 = vmatpush1.bf16.msra.mxu0 %v9021_v4  ;;  %2596 = vmatpush1.bf16.msra.mxu1 %v9024_v5  ;;  %v9095_v4 = vld [vmem:[#allocation22 + $0x4a4] ss:$16 sps:$4 sm:$0xff]   ;;  %v9098_v5 = vld [vmem:[#allocation22 + $0x4ac] ss:$16 sps:$4 sm:$0xff]  }
 0x13e   :  { %2425 = vmatprep.subr.bf16.mxu0 %v9029_v6  ;;  %2597 = vmatprep.subr.bf16.mxu1 %v9032_v7  ;;  %v9093_v6 = vld [vmem:[#allocation22 + $0x4a0] ss:$16 sps:$4 sm:$0xff]   ;;  %v9096_v7 = vld [vmem:[#allocation22 + $0x4a8] ss:$16 sps:$4 sm:$0xff]  }
 0x141   :  { %2426 = vmatpush1.bf16.msra.mxu0 %v9027_v8  ;;  %2598 = vmatpush1.bf16.msra.mxu1 %v9030_v9  ;;  %v9101_v8 = vld [vmem:[#allocation22 + $0x4c4] ss:$16 sps:$4 sm:$0xff]   ;;  %v9104_v9 = vld [vmem:[#allocation22 + $0x4cc] ss:$16 sps:$4 sm:$0xff]  }
 0x142   :  { %2427 = vmatprep.subr.bf16.mxu0 %v9035_v10  ;;  %2599 = vmatprep.subr.bf16.mxu1 %v9038_v11  ;;  %v9099_v10 = vld [vmem:[#allocation22 + $0x4c0] ss:$16 sps:$4 sm:$0xff]   ;;  %v9102_v11 = vld [vmem:[#allocation22 + $0x4c8] ss:$16 sps:$4 sm:$0xff]  }
 0x145   :  { %2428 = vmatpush1.bf16.msra.mxu0 %v9033_v12  ;;  %2600 = vmatpush1.bf16.msra.mxu1 %v9036_v13  ;;  %v9107_v12 = vld [vmem:[#allocation22 + $0x4e4] ss:$16 sps:$4 sm:$0xff]   ;;  %v9110_v13 = vld [vmem:[#allocation22 + $0x4ec] ss:$16 sps:$4 sm:$0xff]  }
 0x146   :  { %2429 = vmatprep.subr.bf16.mxu0 %v9041_v14  ;;  %2601 = vmatprep.subr.bf16.mxu1 %v9044_v15  ;;  %v9105_v14 = vld [vmem:[#allocation22 + $0x4e0] ss:$16 sps:$4 sm:$0xff]   ;;  %v9108_v15 = vld [vmem:[#allocation22 + $0x4e8] ss:$16 sps:$4 sm:$0xff]  }
 0x149   :  { %2430 = vmatpush1.bf16.msra.mxu0 %v9039_v16  ;;  %2602 = vmatpush1.bf16.msra.mxu1 %v9042_v17  ;;  %v9113_v16 = vld [vmem:[#allocation22 + $0x504] ss:$16 sps:$4 sm:$0xff]   ;;  %v9116_v17 = vld [vmem:[#allocation22 + $0x50c] ss:$16 sps:$4 sm:$0xff]  }
 0x14a   :  { %2431 = vmatprep.subr.bf16.mxu0 %v9047_v18  ;;  %2603 = vmatprep.subr.bf16.mxu1 %v9050_v19  ;;  %v9111_v18 = vld [vmem:[#allocation22 + $0x500] ss:$16 sps:$4 sm:$0xff]   ;;  %v9114_v19 = vld [vmem:[#allocation22 + $0x508] ss:$16 sps:$4 sm:$0xff]  }
 0x14d   :  { %2432 = vmatpush1.bf16.msra.mxu0 %v9045_v20  ;;  %2604 = vmatpush1.bf16.msra.mxu1 %v9048_v21  ;;  %v9119_v20 = vld [vmem:[#allocation22 + $0x524] ss:$16 sps:$4 sm:$0xff]   ;;  %v9122_v21 = vld [vmem:[#allocation22 + $0x52c] ss:$16 sps:$4 sm:$0xff]  }
 0x14e   :  { %2433 = vmatprep.subr.bf16.mxu0 %v9053_v22  ;;  %2605 = vmatprep.subr.bf16.mxu1 %v9056_v23  ;;  %v9117_v22 = vld [vmem:[#allocation22 + $0x520] ss:$16 sps:$4 sm:$0xff]   ;;  %v9120_v23 = vld [vmem:[#allocation22 + $0x528] ss:$16 sps:$4 sm:$0xff]  }
 0x151   :  { %2434 = vmatpush1.bf16.msra.mxu0 %v9051_v24  ;;  %2606 = vmatpush1.bf16.msra.mxu1 %v9054_v25  ;;  %v9125_v24 = vld [vmem:[#allocation22 + $0x544] ss:$16 sps:$4 sm:$0xff]   ;;  %v9128_v25 = vld [vmem:[#allocation22 + $0x54c] ss:$16 sps:$4 sm:$0xff]  }
 0x152   :  { %2435 = vmatprep.subr.bf16.mxu0 %v9059_v26  ;;  %2607 = vmatprep.subr.bf16.mxu1 %v9062_v27  ;;  %v9123_v26 = vld [vmem:[#allocation22 + $0x540] ss:$16 sps:$4 sm:$0xff]   ;;  %v9126_v27 = vld [vmem:[#allocation22 + $0x548] ss:$16 sps:$4 sm:$0xff]  }
 0x155   :  { %2436 = vmatpush1.bf16.msra.mxu0 %v9057_v28  ;;  %2608 = vmatpush1.bf16.msra.mxu1 %v9060_v29  ;;  %v9131_v28 = vld [vmem:[#allocation22 + $0x564] ss:$16 sps:$4 sm:$0xff]   ;;  %v9134_v29 = vld [vmem:[#allocation22 + $0x56c] ss:$16 sps:$4 sm:$0xff]  }
 0x156   :  { %2448 = vmatprep.subr.bf16.mxu0 %v9065_v30  ;;  %2620 = vmatprep.subr.bf16.mxu1 %v9068_v33  ;;  %v9129_v30 = vld [vmem:[#allocation22 + $0x560] ss:$16 sps:$4 sm:$0xff]   ;;  %v9140_v33 = vld [vmem:[#allocation22 + $0x58c] ss:$16 sps:$4 sm:$0xff]  }
 0x158   :  { %2438 = vmatmul.mubr.bf16.vlgmr.msra.gmra.mrb[0].mxu0 %v1076_v36  ;;  %2610 = vmatmul.mubr.bf16.vlgmr.msra.gmra.mrb[0].mxu1 %v1076_v36 }
 0x159   :  { %2449 = vmatpush1.bf16.msra.mxu0 %v9063_v34  ;;  %2621 = vmatpush1.bf16.msra.mxu1 %v9066_v35  ;;  %v9135_v34 = vld [vmem:[#allocation22 + $0x580] ss:$16 sps:$4 sm:$0xff]   ;;  %v9138_v35 = vld [vmem:[#allocation22 + $0x588] ss:$16 sps:$4 sm:$0xff]  }
 0x15a   :  { %2450 = vmatprep.subr.bf16.mxu0 %v9071_v37  ;;  %2622 = vmatprep.subr.bf16.mxu1 %v9074_v38 }
 0x15b   :  { %2480 = vmatprep.mubr.bf16.mxu0 %v1079_v43  ;;  %2652 = vmatprep.mubr.bf16.mxu1 %v1079_v43 }
 0x15d   :  { %2451 = vmatpush1.bf16.msra.mxu0 %v9069_v41  ;;  %2623 = vmatpush1.bf16.msra.mxu1 %v9072_v42 }
 0x15e   :  { %2452 = vmatprep.subr.bf16.mxu0 %v9077_v44  ;;  %2624 = vmatprep.subr.bf16.mxu1 %v9080_v45 }
 0x161   :  { %2453 = vmatpush1.bf16.msra.mxu0 %v9075_v46  ;;  %2625 = vmatpush1.bf16.msra.mxu1 %v9078_v47 }
 0x162   :  { %2454 = vmatprep.subr.bf16.mxu0 %v9083_v48  ;;  %2626 = vmatprep.subr.bf16.mxu1 %v9086_v61 }
 0x165   :  { %2455 = vmatpush1.bf16.msra.mxu0 %v9081_v62  ;;  %2627 = vmatpush1.bf16.msra.mxu1 %v9084_v63 }
 0x166   :  { %2456 = vmatprep.subr.bf16.mxu0 %v9089_v0  ;;  %2628 = vmatprep.subr.bf16.mxu1 %v9092_v1 }
 0x169   :  { %2457 = vmatpush1.bf16.msra.mxu0 %v9087_v2  ;;  %2629 = vmatpush1.bf16.msra.mxu1 %v9090_v3 }
 0x16a   :  { %2458 = vmatprep.subr.bf16.mxu0 %v9095_v4  ;;  %2630 = vmatprep.subr.bf16.mxu1 %v9098_v5 }
 0x16d   :  { %2459 = vmatpush1.bf16.msra.mxu0 %v9093_v6  ;;  %2631 = vmatpush1.bf16.msra.mxu1 %v9096_v7 }
 0x16e   :  { %2460 = vmatprep.subr.bf16.mxu0 %v9101_v8  ;;  %2632 = vmatprep.subr.bf16.mxu1 %v9104_v9 }
 0x171   :  { %2461 = vmatpush1.bf16.msra.mxu0 %v9099_v10  ;;  %2633 = vmatpush1.bf16.msra.mxu1 %v9102_v11 }
 0x172   :  { %2462 = vmatprep.subr.bf16.mxu0 %v9107_v12  ;;  %2634 = vmatprep.subr.bf16.mxu1 %v9110_v13 }
 0x175   :  { %2463 = vmatpush1.bf16.msra.mxu0 %v9105_v14  ;;  %2635 = vmatpush1.bf16.msra.mxu1 %v9108_v15 }
 0x176   :  { %2464 = vmatprep.subr.bf16.mxu0 %v9113_v16  ;;  %2636 = vmatprep.subr.bf16.mxu1 %v9116_v17 }
 0x179   :  { %2465 = vmatpush1.bf16.msra.mxu0 %v9111_v18  ;;  %2637 = vmatpush1.bf16.msra.mxu1 %v9114_v19 }
 0x17a   :  { %2466 = vmatprep.subr.bf16.mxu0 %v9119_v20  ;;  %2638 = vmatprep.subr.bf16.mxu1 %v9122_v21 }
 0x17d   :  { %2467 = vmatpush1.bf16.msra.mxu0 %v9117_v22  ;;  %2639 = vmatpush1.bf16.msra.mxu1 %v9120_v23 }
 0x17e   :  { %2468 = vmatprep.subr.bf16.mxu0 %v9125_v24  ;;  %2640 = vmatprep.subr.bf16.mxu1 %v9128_v25 }
 0x181   :  { %2469 = vmatpush1.bf16.msra.mxu0 %v9123_v26  ;;  %2641 = vmatpush1.bf16.msra.mxu1 %v9126_v27 }
 0x182   :  { %2470 = vmatprep.subr.bf16.mxu0 %v9131_v28  ;;  %2642 = vmatprep.subr.bf16.mxu1 %v9134_v29 }
 0x185   :  { %2471 = vmatpush1.bf16.msra.mxu0 %v9129_v30  ;;  %2643 = vmatpush1.bf16.msra.mxu1 %v9132_v31 }
 0x186   :  { %775 = vsyncadd [#allocation18 + $0xd], 256  ;;  %2472 = vmatprep.subr.bf16.mxu0 %v9137_v32  ;;  %2644 = vmatprep.subr.bf16.mxu1 %v9140_v33  ;;  %v9143_v36 = vld [vmem:[#allocation22 + $0x5a4] ss:$16 sps:$4 sm:$0xff]   ;;  %v9146_v37 = vld [vmem:[#allocation22 + $0x5ac] ss:$16 sps:$4 sm:$0xff]  }
 0x187   :  { %v9141_v38 = vld [vmem:[#allocation22 + $0x5a0] ss:$16 sps:$4 sm:$0xff]   ;;  %v9144_v39 = vld [vmem:[#allocation22 + $0x5a8] ss:$16 sps:$4 sm:$0xff]   ;;  %v9149_v40 = vld [vmem:[#allocation22 + $0x5c4] ss:$16 sps:$4 sm:$0xff]  }
 0x188   :  { %v9152_v41 = vld [vmem:[#allocation22 + $0x5cc] ss:$16 sps:$4 sm:$0xff]   ;;  %v9147_v42 = vld [vmem:[#allocation22 + $0x5c0] ss:$16 sps:$4 sm:$0xff]   ;;  %v9150_v43 = vld [vmem:[#allocation22 + $0x5c8] ss:$16 sps:$4 sm:$0xff]  }
 0x189   :  { %2473 = vmatpush1.bf16.msra.mxu0 %v9135_v34  ;;  %2645 = vmatpush1.bf16.msra.mxu1 %v9138_v35  ;;  %v9155_v44 = vld [vmem:[#allocation22 + $0x5e4] ss:$16 sps:$4 sm:$0xff]   ;;  %v9158_v45 = vld [vmem:[#allocation22 + $0x5ec] ss:$16 sps:$4 sm:$0xff]   ;;  %v9153_v46 = vld [vmem:[#allocation22 + $0x5e0] ss:$16 sps:$4 sm:$0xff]  }
 0x18a   :  { %2474 = vmatprep.subr.bf16.mxu0 %v9143_v36  ;;  %2646 = vmatprep.subr.bf16.mxu1 %v9146_v37  ;;  %v9156_v47 = vld [vmem:[#allocation22 + $0x5e8] ss:$16 sps:$4 sm:$0xff]   ;;  %v806_v48 = vld [vmem:[%s11440_s14 + $0x20] sm:$0xff]  ;;  %v9164_v63 = vld [vmem:[#allocation22 + $0x60c] ss:$16 sps:$4 sm:$0xff]   ;;  %vm2706_vm0 = vcmask 130048  }
 0x18b   :  { %v814_v61 = vld [vmem:[%s11440_s14 + $0x60] sm:$0xff]  ;;  %v809_v1 = vld [vmem:[%s11440_s14 + $0x38] sm:$0xff]  ;;  %s11441_s12 = sld [smem:[#allocation76_spill]]  ;;  %s11442_s29 = sld [smem:[#allocation77_spill]] }
 0x18c   :  { %v9161_v62 = vld [vmem:[#allocation22 + $0x604] ss:$16 sps:$4 sm:$0xff]   ;;  %v1078_v0 = vpack.c.bf16 %v814_v61, %v806_v48  ;;  %v817_v2 = vld [vmem:[%s11440_s14 + $0x78] sm:$0xff]  ;;  %v9159_v3 = vld [vmem:[#allocation22 + $0x600] ss:$16 sps:$4 sm:$0xff]   ;;  %s9851_s1 = smov [#allocation16]  }
 0x18d   :  { %2475 = vmatpush1.bf16.msra.mxu0 %v9141_v38  ;;  %2647 = vmatpush1.bf16.msra.mxu1 %v9144_v39  ;;  %v9162_v4 = vld [vmem:[#allocation22 + $0x608] ss:$16 sps:$4 sm:$0xff]   ;;  %v9167_v5 = vld [vmem:[#allocation22 + $0x624] ss:$16 sps:$4 sm:$0xff]   ;;  %v9170_v6 = vld [vmem:[#allocation22 + $0x62c] ss:$16 sps:$4 sm:$0xff]   ;;  %v1081_v7 = vpack.c.bf16 %v817_v2, %v809_v1 }
 0x18e   :  { %2476 = vmatprep.subr.bf16.mxu0 %v9149_v40  ;;  %2648 = vmatprep.subr.bf16.mxu1 %v9152_v41  ;;  %v9165_v8 = vld [vmem:[#allocation22 + $0x620] ss:$16 sps:$4 sm:$0xff]   ;;  %v9168_v9 = vld [vmem:[#allocation22 + $0x628] ss:$16 sps:$4 sm:$0xff]   ;;  %v9173_v10 = vld [vmem:[#allocation22 + $0x644] ss:$16 sps:$4 sm:$0xff]  }
 0x18f   :  { %v9176_v11 = vld [vmem:[#allocation22 + $0x64c] ss:$16 sps:$4 sm:$0xff]   ;;  %v9171_v12 = vld [vmem:[#allocation22 + $0x640] ss:$16 sps:$4 sm:$0xff]   ;;  %v9174_v13 = vld [vmem:[#allocation22 + $0x648] ss:$16 sps:$4 sm:$0xff]  }
 0x190   :  { %v9179_v14 = vld [vmem:[#allocation22 + $0x664] ss:$16 sps:$4 sm:$0xff]   ;;  %v9182_v15 = vld [vmem:[#allocation22 + $0x66c] ss:$16 sps:$4 sm:$0xff]   ;;  %v9177_v16 = vld [vmem:[#allocation22 + $0x660] ss:$16 sps:$4 sm:$0xff]  }
 0x191   :  { %2477 = vmatpush1.bf16.msra.mxu0 %v9147_v42  ;;  %2649 = vmatpush1.bf16.msra.mxu1 %v9150_v43  ;;  %v9180_v17 = vld [vmem:[#allocation22 + $0x668] ss:$16 sps:$4 sm:$0xff]   ;;  %v9185_v18 = vld [vmem:[#allocation22 + $0x684] ss:$16 sps:$4 sm:$0xff]   ;;  %v9188_v19 = vld [vmem:[#allocation22 + $0x68c] ss:$16 sps:$4 sm:$0xff]  }
 0x192   :  { %2478 = vmatprep.subr.bf16.mxu0 %v9155_v44  ;;  %2650 = vmatprep.subr.bf16.mxu1 %v9158_v45  ;;  %v9183_v20 = vld [vmem:[#allocation22 + $0x680] ss:$16 sps:$4 sm:$0xff]   ;;  %v9186_v21 = vld [vmem:[#allocation22 + $0x688] ss:$16 sps:$4 sm:$0xff]   ;;  %v9191_v22 = vld [vmem:[#allocation22 + $0x6a4] ss:$16 sps:$4 sm:$0xff]  }
 0x193   :  { %v9194_v23 = vld [vmem:[#allocation22 + $0x6ac] ss:$16 sps:$4 sm:$0xff]   ;;  %v9189_v24 = vld [vmem:[#allocation22 + $0x6a0] ss:$16 sps:$4 sm:$0xff]   ;;  %v9192_v25 = vld [vmem:[#allocation22 + $0x6a8] ss:$16 sps:$4 sm:$0xff]  }
 0x194   :  { %v9197_v26 = vld [vmem:[#allocation22 + $0x6c4] ss:$16 sps:$4 sm:$0xff]   ;;  %v9200_v27 = vld [vmem:[#allocation22 + $0x6cc] ss:$16 sps:$4 sm:$0xff]   ;;  %v9195_v28 = vld [vmem:[#allocation22 + $0x6c0] ss:$16 sps:$4 sm:$0xff]  }
 0x195   :  { %2479 = vmatpush1.bf16.msra.mxu0 %v9153_v46  ;;  %2651 = vmatpush1.bf16.msra.mxu1 %v9156_v47  ;;  %v9198_v29 = vld [vmem:[#allocation22 + $0x6c8] ss:$16 sps:$4 sm:$0xff]   ;;  %v9203_v30 = vld [vmem:[#allocation22 + $0x6e4] ss:$16 sps:$4 sm:$0xff]   ;;  %v9206_v31 = vld [vmem:[#allocation22 + $0x6ec] ss:$16 sps:$4 sm:$0xff]  }
 0x196   :  { %2491 = vmatprep.subr.bf16.mxu0 %v9161_v62  ;;  %2663 = vmatprep.subr.bf16.mxu1 %v9164_v63  ;;  %v9201_v32 = vld [vmem:[#allocation22 + $0x6e0] ss:$16 sps:$4 sm:$0xff]   ;;  %v9204_v33 = vld [vmem:[#allocation22 + $0x6e8] ss:$16 sps:$4 sm:$0xff]   ;;  %v9209_v34 = vld [vmem:[#allocation22 + $0x704] ss:$16 sps:$4 sm:$0xff]  }
 0x197   :  { %v9212_v35 = vld [vmem:[#allocation22 + $0x70c] ss:$16 sps:$4 sm:$0xff]   ;;  %v9207_v36 = vld [vmem:[#allocation22 + $0x700] ss:$16 sps:$4 sm:$0xff]   ;;  %v9210_v37 = vld [vmem:[#allocation22 + $0x708] ss:$16 sps:$4 sm:$0xff]  }
 0x198   :  { %2481 = vmatmul.mubr.bf16.vlgmr.msra.gmra.mrb[0].mxu0 %v1078_v0  ;;  %2653 = vmatmul.mubr.bf16.vlgmr.msra.gmra.mrb[0].mxu1 %v1078_v0  ;;  %v9215_v38 = vld [vmem:[#allocation22 + $0x724] ss:$16 sps:$4 sm:$0xff]   ;;  %v9218_v39 = vld [vmem:[#allocation22 + $0x72c] ss:$16 sps:$4 sm:$0xff]   ;;  %v9213_v40 = vld [vmem:[#allocation22 + $0x720] ss:$16 sps:$4 sm:$0xff]  }
 0x199   :  { %2492 = vmatpush1.bf16.msra.mxu0 %v9159_v3  ;;  %2664 = vmatpush1.bf16.msra.mxu1 %v9162_v4  ;;  %v9216_v41 = vld [vmem:[#allocation22 + $0x728] ss:$16 sps:$4 sm:$0xff]   ;;  %v9221_v42 = vld [vmem:[#allocation22 + $0x744] ss:$16 sps:$4 sm:$0xff]   ;;  %v9224_v43 = vld [vmem:[#allocation22 + $0x74c] ss:$16 sps:$4 sm:$0xff]  }
 0x19a   :  { %2493 = vmatprep.subr.bf16.mxu0 %v9167_v5  ;;  %2665 = vmatprep.subr.bf16.mxu1 %v9170_v6  ;;  %v9219_v44 = vld [vmem:[#allocation22 + $0x740] ss:$16 sps:$4 sm:$0xff]   ;;  %v9222_v45 = vld [vmem:[#allocation22 + $0x748] ss:$16 sps:$4 sm:$0xff]   ;;  %v9227_v46 = vld [vmem:[#allocation22 + $0x764] ss:$16 sps:$4 sm:$0xff]  }
 0x19b   :  { %2523 = vmatprep.mubr.bf16.mxu0 %v1081_v7  ;;  %2695 = vmatprep.mubr.bf16.mxu1 %v1081_v7  ;;  %v9230_v47 = vld [vmem:[#allocation22 + $0x76c] ss:$16 sps:$4 sm:$0xff]   ;;  %v9225_v48 = vld [vmem:[#allocation22 + $0x760] ss:$16 sps:$4 sm:$0xff]   ;;  %v9228_v61 = vld [vmem:[#allocation22 + $0x768] ss:$16 sps:$4 sm:$0xff]  }
 0x19c   :  { %v9233_v62 = vld [vmem:[#allocation22 + $0x784] ss:$16 sps:$4 sm:$0xff]   ;;  %v9236_v63 = vld [vmem:[#allocation22 + $0x78c] ss:$16 sps:$4 sm:$0xff]   ;;  %v9231_v0 = vld [vmem:[#allocation22 + $0x780] ss:$16 sps:$4 sm:$0xff]  }
 0x19d   :  { %2494 = vmatpush1.bf16.msra.mxu0 %v9165_v8  ;;  %2666 = vmatpush1.bf16.msra.mxu1 %v9168_v9  ;;  %v9234_v1 = vld [vmem:[#allocation22 + $0x788] ss:$16 sps:$4 sm:$0xff]   ;;  %v9239_v2 = vld [vmem:[#allocation22 + $0x7a4] ss:$16 sps:$4 sm:$0xff]   ;;  %v9242_v3 = vld [vmem:[#allocation22 + $0x7ac] ss:$16 sps:$4 sm:$0xff]  }
 0x19e   :  { %2495 = vmatprep.subr.bf16.mxu0 %v9173_v10  ;;  %2667 = vmatprep.subr.bf16.mxu1 %v9176_v11  ;;  %v9237_v4 = vld [vmem:[#allocation22 + $0x7a0] ss:$16 sps:$4 sm:$0xff]   ;;  %v9240_v5 = vld [vmem:[#allocation22 + $0x7a8] ss:$16 sps:$4 sm:$0xff]   ;;  %v9245_v6 = vld [vmem:[#allocation22 + $0x7c4] ss:$16 sps:$4 sm:$0xff]  }
 0x19f   :  { %v9248_v7 = vld [vmem:[#allocation22 + $0x7cc] ss:$16 sps:$4 sm:$0xff]   ;;  %v9243_v8 = vld [vmem:[#allocation22 + $0x7c0] ss:$16 sps:$4 sm:$0xff]   ;;  %v9246_v9 = vld [vmem:[#allocation22 + $0x7c8] ss:$16 sps:$4 sm:$0xff]  }
 0x1a0   :  { %v9251_v10 = vld [vmem:[#allocation22 + $0x7e4] ss:$16 sps:$4 sm:$0xff]   ;;  %v9254_v11 = vld [vmem:[#allocation22 + $0x7ec] ss:$16 sps:$4 sm:$0xff]   ;;  %s784_s9 = sshll.u32 %s9851_s1, 4  ;;  %s9852_s6 = smov [#allocation17]   ;;  %s785_s9 = int_to_ptr.vmem [resolvable:$true] %s784_s9 }
 0x1a1   :  { %2496 = vmatpush1.bf16.msra.mxu0 %v9171_v12  ;;  %2668 = vmatpush1.bf16.msra.mxu1 %v9174_v13  ;;  %v9249_v12 = vld [vmem:[#allocation22 + $0x7e0] ss:$16 sps:$4 sm:$0xff]   ;;  %v9252_v13 = vld [vmem:[#allocation22 + $0x7e8] ss:$16 sps:$4 sm:$0xff]   ;;  %s796_s24 = sshll.u32 %s9852_s6, 4  ;;  %s9713_s13 = scalar_lea.hbm %s11418_s19, 256  ;;  %s797_s24 = int_to_ptr.vmem [resolvable:$true] %s796_s24 }
 0x1a2   :  { %2497 = vmatprep.subr.bf16.mxu0 %v9179_v14  ;;  %2669 = vmatprep.subr.bf16.mxu1 %v9182_v15  ;;  %v808_v14 = vld [vmem:[%s11440_s14 + $0x30] sm:$0xff]  ;;  %p9714_p6 = scmp.ne.s32.totalorder %s11418_s19, %s9713_s13  ;;  %p9717_p7 = scmp.lt.u32.totalorder %s9713_s13, %s11418_s19 }
 0x1a3   :  { %v816_v15 = vld [vmem:[%s11440_s14 + $0x70] sm:$0xff] }
 0x1a4   :  { %p9719_p8 = pnand %p9717_p7, %p9714_p6 }
 0x1a5   :  { %2498 = vmatpush1.bf16.msra.mxu0 %v9177_v16  ;;  %2670 = vmatpush1.bf16.msra.mxu1 %v9180_v17  ;;  %v1080_v16 = vpack.c.bf16 %v816_v15, %v808_v14  ;;  %v9849_v17 = vmov 0.0  }
 0x1a6   :  { %2499 = vmatprep.subr.bf16.mxu0 %v9185_v18  ;;  %2671 = vmatprep.subr.bf16.mxu1 %v9188_v19 }
 0x1a9   :  { %2500 = vmatpush1.bf16.msra.mxu0 %v9183_v20  ;;  %2672 = vmatpush1.bf16.msra.mxu1 %v9186_v21 }
 0x1aa   :  { %2501 = vmatprep.subr.bf16.mxu0 %v9191_v22  ;;  %2673 = vmatprep.subr.bf16.mxu1 %v9194_v23 }
 0x1ad   :  { %2502 = vmatpush1.bf16.msra.mxu0 %v9189_v24  ;;  %2674 = vmatpush1.bf16.msra.mxu1 %v9192_v25 }
 0x1ae   :  { %2503 = vmatprep.subr.bf16.mxu0 %v9197_v26  ;;  %2675 = vmatprep.subr.bf16.mxu1 %v9200_v27 }
 0x1b1   :  { %2504 = vmatpush1.bf16.msra.mxu0 %v9195_v28  ;;  %2676 = vmatpush1.bf16.msra.mxu1 %v9198_v29 }
 0x1b2   :  { %2505 = vmatprep.subr.bf16.mxu0 %v9203_v30  ;;  %2677 = vmatprep.subr.bf16.mxu1 %v9206_v31  ;;  %v10392_v30 = vld [vmem:[#allocation19] sm:$0xff]  ;;  %v10399_v31 = vld [vmem:[#allocation19 + $0x8] sm:$0xff] }
 0x1b5   :  { %2506 = vmatpush1.bf16.msra.mxu0 %v9201_v32  ;;  %2678 = vmatpush1.bf16.msra.mxu1 %v9204_v33 }
 0x1b6   :  { %2507 = vmatprep.subr.bf16.mxu0 %v9209_v34  ;;  %2679 = vmatprep.subr.bf16.mxu1 %v9212_v35 }
 0x1b9   :  { %2508 = vmatpush1.bf16.msra.mxu0 %v9207_v36  ;;  %2680 = vmatpush1.bf16.msra.mxu1 %v9210_v37 }
 0x1ba   :  { %2509 = vmatprep.subr.bf16.mxu0 %v9215_v38  ;;  %2681 = vmatprep.subr.bf16.mxu1 %v9218_v39 }
 0x1bd   :  { %2510 = vmatpush1.bf16.msra.mxu0 %v9213_v40  ;;  %2682 = vmatpush1.bf16.msra.mxu1 %v9216_v41 }
 0x1be   :  { %2511 = vmatprep.subr.bf16.mxu0 %v9221_v42  ;;  %2683 = vmatprep.subr.bf16.mxu1 %v9224_v43 }
 0x1c1   :  { %2512 = vmatpush1.bf16.msra.mxu0 %v9219_v44  ;;  %2684 = vmatpush1.bf16.msra.mxu1 %v9222_v45 }
 0x1c2   :  { %2513 = vmatprep.subr.bf16.mxu0 %v9227_v46  ;;  %2685 = vmatprep.subr.bf16.mxu1 %v9230_v47 }
 0x1c5   :  { %2514 = vmatpush1.bf16.msra.mxu0 %v9225_v48  ;;  %2686 = vmatpush1.bf16.msra.mxu1 %v9228_v61 }
 0x1c6   :  { %2515 = vmatprep.subr.bf16.mxu0 %v9233_v62  ;;  %2687 = vmatprep.subr.bf16.mxu1 %v9236_v63 }
 0x1c9   :  { %2516 = vmatpush1.bf16.msra.mxu0 %v9231_v0  ;;  %2688 = vmatpush1.bf16.msra.mxu1 %v9234_v1 }
 0x1ca   :  { %2517 = vmatprep.subr.bf16.mxu0 %v9239_v2  ;;  %2689 = vmatprep.subr.bf16.mxu1 %v9242_v3 }
 0x1cd   :  { %2518 = vmatpush1.bf16.msra.mxu0 %v9237_v4  ;;  %2690 = vmatpush1.bf16.msra.mxu1 %v9240_v5 }
 0x1ce   :  { %2519 = vmatprep.subr.bf16.mxu0 %v9245_v6  ;;  %2691 = vmatprep.subr.bf16.mxu1 %v9248_v7 }
 0x1d1   :  { %2520 = vmatpush1.bf16.msra.mxu0 %v9243_v8  ;;  %2692 = vmatpush1.bf16.msra.mxu1 %v9246_v9  ;;  %v9850_v8 = vmov 0  }
 0x1d2   :  { %2521 = vmatprep.subr.bf16.mxu0 %v9251_v10  ;;  %2693 = vmatprep.subr.bf16.mxu1 %v9254_v11 }
 0x1d3   :  { %8869 = vset.pattern.permute.xlu0 %v9850_v8  ;;  %8870 = vset.pattern.permute.xlu1 %v9850_v8 }
 0x1d5   :  { %2522 = vmatpush1.bf16.msra.mxu0 %v9249_v12  ;;  %2694 = vmatpush1.bf16.msra.mxu1 %v9252_v13 }
 0x1d8   :  { %2524 = vmatmul.mubr.bf16.vlgmr.msra.gmra.mrb[0].mxu0 %v1080_v16  ;;  %2696 = vmatmul.mubr.bf16.vlgmr.msra.gmra.mrb[0].mxu1 %v1080_v16 }
 0x1d9   :  { %2777 = vmatprep.mubr.f32.mxu0 %v9849_v17  ;;  %2854 = vmatprep.mubr.f32.mxu1 %v9849_v17 }
 0x2ab   :  { %v2525_v18 = vpop.f32.mrb[0].mxu0  ;;  %v2697_v19 = vpop.f32.mrb[0].mxu1 }
 0x2ac   :  { %v2527_v20 = vpop.f32.mrb[1].mxu0  ;;  %v2699_v21 = vpop.f32.mrb[1].mxu1 }
 0x2ad   :  { %v2529_v22 = vpop.f32.mrb[2].mxu0  ;;  %v2701_v23 = vpop.f32.mrb[2].mxu1 }
 0x2ae   :  { %v8697_v24 = vpack.c.bf16 %v2529_v22, %v2525_v18  ;;  %v8701_v25 = vpack.c.bf16 %v2701_v23, %v2697_v19  ;;  %v2531_v26 = vpop.f32.mrb[3].mxu0  ;;  %v2703_v27 = vpop.f32.mrb[3].mxu1  ;;  %v2902_v22 = vld [vmem:[%s11441_s12] sm:$0xff] }
 0x2af   :  { %v8695_v28 = vpack.c.bf16 %v2531_v26, %v2527_v20  ;;  %v8699_v29 = vpack.c.bf16 %v2703_v27, %v2699_v21 }
 0x2b1   :  { %8696 = vmatprep.subr.bf16.mxu0 %v8695_v28  ;;  %8700 = vmatprep.subr.bf16.mxu1 %v8699_v29 }
 0x2b2   :  { %8698 = vmatpush1.bf16.msra.mxu0 %v8697_v24  ;;  %8702 = vmatpush1.bf16.msra.mxu1 %v8701_v25  ;;  %v2906_v25 = vld [vmem:[%s11442_s29] sm:$0xff] }
 0x2b5   :  { %8322 = vmatmul.mubr.msk.f32.vlgmr.msra.gmra.mrb[4].mxu0 %vm2706_vm0, %v10392_v30  ;;  %8324 = vmatmul.mubr.msk.f32.vlgmr.msra.gmra.mrb[4].mxu1 %vm2706_vm0, %v10392_v30 }
 0x2b6   :  { %2783 = vmatprep.mubr.f32.mxu0 %v9849_v17  ;;  %2860 = vmatprep.mubr.f32.mxu1 %v9849_v17 }
 0x2b9   :  { %8323 = vmatmul.mubr.msk.f32.gmra.mrb[6].mxu0 %vm2706_vm0, %v10399_v31  ;;  %8325 = vmatmul.mubr.msk.f32.gmra.mrb[6].mxu1 %vm2706_vm0, %v10399_v31 }
 0x388   :  { %v10406_v32 = vpop.f32.mrb[4].mxu0  ;;  %v10408_v33 = vpop.f32.mrb[4].mxu1 }
 0x389   :  { %v2877_v34 = vmul.f32 %v10406_v32, %v10406_v32  ;;  %v10412_v35 = vpop.f32.mrb[5].mxu0  ;;  %v10414_v36 = vpop.f32.mrb[5].mxu1  ;;  %v2879_v39 = vmul.f32 %v10408_v33, %v10408_v33 }
 0x38a   :  { %v2867_v37 = vadd.f32 %v10412_v35, %v10406_v32  ;;  %v2878_v38 = vmul.f32 %v10412_v35, %v10412_v35  ;;  %v2880_v63 = vmul.f32 %v10414_v36, %v10414_v36 }
 0x38c   :  { %v10422_v40 = vpop.f32.mrb[6].mxu0  ;;  %v10424_v41 = vpop.f32.mrb[6].mxu1  ;;  %v2868_v42 = vadd.f32 %v2867_v37, %v10408_v33  ;;  %v2885_v43 = vadd.f32 %v2878_v38, %v2877_v34 }
 0x38d   :  { %v2881_v44 = vmul.f32 %v10422_v40, %v10422_v40  ;;  %v10429_v45 = vpop.f32.mrb[7].mxu0  ;;  %v10431_v46 = vpop.f32.mrb[7].mxu1  ;;  %v2883_v61 = vmul.f32 %v10424_v41, %v10424_v41 }
 0x38e   :  { %v2872_v47 = vadd.f32 %v10429_v45, %v10422_v40  ;;  %v2882_v48 = vmul.f32 %v10429_v45, %v10429_v45  ;;  %v2869_v62 = vadd.f32 %v2868_v42, %v10414_v36  ;;  %v2886_v0 = vadd.f32 %v2885_v43, %v2879_v39 }
 0x38f   :  { %v2884_v4 = vmul.f32 %v10431_v46, %v10431_v46 }
 0x390   :  { %v2890_v1 = vadd.f32 %v2882_v48, %v2881_v44  ;;  %2870 = vadd.xlane.f32.xlu0 %v2869_v62  ;;  %v2873_v2 = vadd.f32 %v2872_v47, %v10424_v41  ;;  %v2887_v3 = vadd.f32 %v2886_v0, %v2880_v63 }
 0x392   :  { %v2874_v5 = vadd.f32 %v2873_v2, %v10431_v46  ;;  %v2891_v6 = vadd.f32 %v2890_v1, %v2883_v61  ;;  %2888 = vadd.xlane.f32.xlu1 %v2887_v3 }
 0x394   :  { %2875 = vadd.xlane.f32.xlu0 %v2874_v5  ;;  %v2892_v7 = vadd.f32 %v2891_v6, %v2884_v4 }
 0x396   :  { %2893 = vadd.xlane.f32.xlu1 %v2892_v7 }
 0x41d   :  { %v2871_v9 = vpop.xlane.xlu0 %2870 }
 0x41f   :  { %v2889_v10 = vpop.xlane.xlu1 %2888 }
 0x421   :  { %v2876_v11 = vpop.xlane.xlu0 %2875 }
 0x422   :  { %v2895_v12 = vadd.f32 %v2876_v11, %v2871_v9 }
 0x423   :  { %v2894_v14 = vpop.xlane.xlu1 %2893 }
 0x424   :  { %v2897_v13 = vmul.f32 0.0009765625, %v2895_v12  ;;  %v2896_v15 = vadd.f32 %v2894_v14, %v2889_v10 }
 0x426   :  { %v2899_v16 = vmul.f32 %v2897_v13, %v2897_v13  ;;  %v2898_v18 = vmul.f32 0.0009765625, %v2896_v15 }
 0x428   :  { %v2900_v19 = vsub.f32 %v2898_v18, %v2899_v16 }
 0x42a   :  { %v2901_v20 = vmax.f32 %v2900_v19, 0.0 }
 0x42c   :  { %v2903_v21 = vadd.f32 1e-05, %v2901_v20 }
 0x42e   :  { %9255 = vrsqrt.f32 %v2903_v21 }
 0x438   :  { %v9256_v23 = vpop.eup %9255 }
 0x439   :  { %v2905_v24 = vmul.f32 %v9256_v23, %v2902_v22 }
 0x43b   :  { %2911 = vperm.xlu0 %8869, %v2905_v24   ;;  %v2907_v26 = vmul.f32 %v2905_v24, %v2897_v13 }
 0x43d   :  { %v2908_v27 = vsub.f32 %v2906_v25, %v2907_v26 }
 0x43f   :  { %2924 = vperm.xlu1 %8870, %v2908_v27  }
 0x440   :  { %9722 = shalt.err (!%p9719_p8)  }
 0x441   :  { %s9723_s4 = scalar_lea.vmem %s785_s9, 256  ;;  %p9728_p10 = scmp.lt.s32.totalorder %s785_s9, %s785_s9 }
 0x442   :  { %p9724_p9 = scmp.ne.s32.totalorder %s785_s9, %s9723_s4  ;;  %p9729_p11 = scmp.lt.s32.totalorder %s9723_s4, %s9723_s4 }
 0x444   :  { %p9730_p12 = por %p9729_p11, %p9728_p10 }
 0x446   :  { %p9731_p13 = pnand %p9730_p12, %p9724_p9 }
 0x448   :  { %9734 = shalt.err (!%p9731_p13)  }
 0x449   :  { %787 = dma.hbm_to_vmem [thread:$0]  %s11418_s19, 256, %s785_s9, [#allocation18 + $0xe] }
 0x44a   :  { %s11443_s10 = sld [smem:[#allocation80_spill]] }
 0x450   :  { %s9735_s0 = scalar_lea.hbm %s11443_s10, 256 }
 0x451   :  { %p9736_p0 = scmp.ne.s32.totalorder %s11443_s10, %s9735_s0  ;;  %p9739_p1 = scmp.lt.u32.totalorder %s9735_s0, %s11443_s10 }
 0x453   :  { %p9741_p2 = pnand %p9739_p1, %p9736_p0 }
 0x455   :  { %9744 = shalt.err (!%p9741_p2)  }
 0x456   :  { %s9745_s30 = scalar_lea.vmem %s797_s24, 256  ;;  %p9750_p4 = scmp.lt.s32.totalorder %s797_s24, %s797_s24 }
 0x457   :  { %p9746_p3 = scmp.ne.s32.totalorder %s797_s24, %s9745_s30  ;;  %p9751_p5 = scmp.lt.s32.totalorder %s9745_s30, %s9745_s30 }
 0x459   :  { %p9752_p6 = por %p9751_p5, %p9750_p4 }
 0x45b   :  { %p9753_p7 = pnand %p9752_p6, %p9746_p3 }
 0x45d   :  { %9756 = shalt.err (!%p9753_p7)  }
 0x45e   :  { %799 = dma.hbm_to_vmem [thread:$0]  %s11443_s10, 256, %s797_s24, [#allocation18 + $0xf] }
 0x4ba   :  { %v2912_v28 = vpop.permute.xlu0 %2911 }
 0x4bb   :  { %v2914_v29 = vmul.f32 %v2912_v28, %v10406_v32  ;;  %v2915_v34 = vmul.f32 %v2912_v28, %v10412_v35  ;;  %v2916_v37 = vmul.f32 %v2912_v28, %v10408_v33  ;;  %v2917_v38 = vmul.f32 %v2912_v28, %v10414_v36 }
 0x4bc   :  { %v2918_v39 = vmul.f32 %v2912_v28, %v10422_v40  ;;  %v2919_v42 = vmul.f32 %v2912_v28, %v10429_v45  ;;  %v2920_v32 = vmul.f32 %v2912_v28, %v10424_v41  ;;  %v2921_v62 = vmul.f32 %v2912_v28, %v10431_v46 }
 0x4be   :  { %v2925_v43 = vpop.permute.xlu1 %2924 }
 0x4bf   :  { %v10484_v44 = vadd.f32 %v2925_v43, %v2914_v29  ;;  %v10486_v47 = vadd.f32 %v2925_v43, %v2915_v34  ;;  %v10488_v48 = vadd.f32 %v2925_v43, %v2916_v37  ;;  %v10490_v61 = vadd.f32 %v2925_v43, %v2917_v38 }
 0x4c0   :  { %v10493_v35 = vadd.f32 %v2925_v43, %v2918_v39  ;;  %v10495_v33 = vadd.f32 %v2925_v43, %v2919_v42  ;;  %v10501_v63 = vadd.f32 %v2925_v43, %v2920_v32  ;;  %v10505_v2 = vadd.f32 %v2925_v43, %v2921_v62 }
 0x4c1   :  { %v2935_v36 = vmin.f32 %v10484_v44, 20.0  ;;  %v2936_v40 = vmin.f32 %v10486_v47, 20.0  ;;  %v2937_v45 = vmin.f32 %v10488_v48, 20.0  ;;  %v2938_v0 = vmin.f32 %v10490_v61, 20.0 }
 0x4c2   :  { %v2939_v1 = vmin.f32 %v10493_v35, 20.0  ;;  %v2940_v41 = vmin.f32 %v10495_v33, 20.0  ;;  %v2941_v6 = vmin.f32 %v10501_v63, 20.0  ;;  %v2942_v46 = vmin.f32 %v10505_v2, 20.0 }
 0x4c3   :  { %v2951_v3 = vmul.f32 1.442695, %v2935_v36  ;;  %v2953_v4 = vmul.f32 1.442695, %v2936_v40  ;;  %v2955_v5 = vmul.f32 1.442695, %v2937_v45 }
 0x4c4   :  { %v2957_v7 = vmul.f32 1.442695, %v2938_v0  ;;  %v2959_v9 = vmul.f32 1.442695, %v2939_v1  ;;  %v2961_v10 = vmul.f32 1.442695, %v2940_v41 }
 0x4c5   :  { %9257 = vpow2.f32 %v2951_v3  ;;  %v2963_v11 = vmul.f32 1.442695, %v2941_v6  ;;  %v2965_v12 = vmul.f32 1.442695, %v2942_v46  ;;  %vm2943_vm1 = vcmp.gt.f32.partialorder %v10484_v44, 20.0 }
 0x4c6   :  { %9259 = vpow2.f32 %v2953_v4  ;;  %vm2944_vm2 = vcmp.gt.f32.partialorder %v10486_v47, 20.0  ;;  %vm2945_vm3 = vcmp.gt.f32.partialorder %v10488_v48, 20.0  ;;  %vm2946_vm4 = vcmp.gt.f32.partialorder %v10490_v61, 20.0 }
 0x4c7   :  { %9261 = vpow2.f32 %v2955_v5  ;;  %vm2947_vm9 = vcmp.gt.f32.partialorder %v10493_v35, 20.0  ;;  %vm2948_vm12 = vcmp.gt.f32.partialorder %v10495_v33, 20.0  ;;  %vm2949_vm13 = vcmp.gt.f32.partialorder %v10501_v63, 20.0 }
 0x4c8   :  { %9263 = vpow2.f32 %v2957_v7 }
 0x4c9   :  { %9265 = vpow2.f32 %v2959_v9 }
 0x4ca   :  { %9267 = vpow2.f32 %v2961_v10 }
 0x4cb   :  { %9269 = vpow2.f32 %v2963_v11 }
 0x4cc   :  { %9271 = vpow2.f32 %v2965_v12 }
 0x4cf   :  { %v9258_v13 = vpop.eup %9257 }
 0x4d0   :  { %v9260_v14 = vpop.eup %9259  ;;  %v2967_v15 = vadd.f32 1.0, %v9258_v13  ;;  %v2970_v22 = vmul.f32 -0.5, %v9258_v13  ;;  %v2973_v34 = vand.u32 2147483647, %v9258_v13 }
 0x4d1   :  { %v9262_v16 = vpop.eup %9261  ;;  %v2976_v18 = vadd.f32 1.0, %v9260_v14  ;;  %v2979_v23 = vmul.f32 -0.5, %v9260_v14  ;;  %v2982_v37 = vand.u32 2147483647, %v9260_v14 }
 0x4d2   :  { %v10510_v19 = vpop.eup %9263  ;;  %9273 = vlog2.f32 %v2967_v15  ;;  %v2985_v20 = vadd.f32 1.0, %v9262_v16  ;;  %v2988_v27 = vmul.f32 -0.5, %v9262_v16  ;;  %v2971_v29 = vadd.f32 1.0, %v2970_v22 }
 0x4d3   :  { %v10512_v21 = vpop.eup %9265  ;;  %9275 = vlog2.f32 %v2976_v18  ;;  %v2994_v24 = vadd.f32 1.0, %v10510_v19  ;;  %v2980_v39 = vadd.f32 1.0, %v2979_v23  ;;  %v2997_v42 = vmul.f32 -0.5, %v10510_v19 }
 0x4d4   :  { %9277 = vlog2.f32 %v2985_v20  ;;  %v10515_v25 = vpop.eup %9267  ;;  %v3003_v28 = vadd.f32 1.0, %v10512_v21  ;;  %v2989_v36 = vadd.f32 1.0, %v2988_v27  ;;  %v2991_v40 = vand.u32 2147483647, %v9262_v16 }
 0x4d5   :  { %v10517_v26 = vpop.eup %9269  ;;  %9279 = vlog2.f32 %v2994_v24  ;;  %v3012_v43 = vadd.f32 1.0, %v10515_v25  ;;  %vm10529_vm5 = vcmp.lt.f32.partialorder %v2973_v34, 0.0004427343  ;;  %v3006_v62 = vmul.f32 -0.5, %v10512_v21 }
 0x4d6   :  { %v10520_v38 = vpop.eup %9271  ;;  %9281 = vlog2.f32 %v3003_v28  ;;  %v3021_v32 = vadd.f32 1.0, %v10517_v26  ;;  %v2972_v41 = vmul.f32 %v9258_v13, %v2971_v29  ;;  %v2981_v3 = vmul.f32 %v9260_v14, %v2980_v39 }
 0x4d7   :  { %9283 = vlog2.f32 %v3012_v43  ;;  %v3030_v0 = vadd.f32 1.0, %v10520_v38  ;;  %vm10535_vm6 = vcmp.lt.f32.partialorder %v2982_v37, 0.0004427343  ;;  %v2998_v5 = vadd.f32 1.0, %v2997_v42 }
 0x4d8   :  { %9285 = vlog2.f32 %v3021_v32  ;;  %v3000_v9 = vand.u32 2147483647, %v10510_v19  ;;  %v3015_v46 = vmul.f32 -0.5, %v10515_v25  ;;  %v2990_v12 = vmul.f32 %v9262_v16, %v2989_v36 }
 0x4d9   :  { %9287 = vlog2.f32 %v3030_v0  ;;  %vm10541_vm7 = vcmp.lt.f32.partialorder %v2991_v40, 0.0004427343  ;;  %v3024_v13 = vmul.f32 -0.5, %v10517_v26  ;;  %v3007_v20 = vadd.f32 1.0, %v3006_v62 }
 0x4da   :  { %v3009_v22 = vand.u32 2147483647, %v10512_v21  ;;  %v2999_v27 = vmul.f32 %v10510_v19, %v2998_v5  ;;  %v3033_v16 = vmul.f32 -0.5, %v10520_v38  ;;  %v3016_v37 = vadd.f32 1.0, %v3015_v46 }
 0x4db   :  { %vm3001_vm8 = vcmp.lt.f32.partialorder %v3000_v9, 0.0004427343  ;;  %v3018_v19 = vand.u32 2147483647, %v10515_v25  ;;  %v3025_v43 = vadd.f32 1.0, %v3024_v13  ;;  %v3008_v40 = vmul.f32 %v10512_v21, %v3007_v20 }
 0x4dc   :  { %v9274_v1 = vpop.eup %9273  ;;  %v3027_v45 = vand.u32 2147483647, %v10517_v26  ;;  %vm3010_vm10 = vcmp.lt.f32.partialorder %v3009_v22, 0.0004427343  ;;  %v3036_v4 = vand.u32 2147483647, %v10520_v38 }
 0x4dd   :  { %v9276_v6 = vpop.eup %9275  ;;  %v2969_v7 = vmul.f32 0.6931472, %v9274_v1  ;;  %vm3019_vm11 = vcmp.lt.f32.partialorder %v3018_v19, 0.0004427343  ;;  %v3026_v5 = vmul.f32 %v10517_v26, %v3025_v43 }
 0x4de   :  { %v9278_v10 = vpop.eup %9277  ;;  %v2978_v11 = vmul.f32 0.6931472, %v9276_v6  ;;  %vm3028_vm14 = vcmp.lt.f32.partialorder %v3027_v45, 0.0004427343  ;;  %vm3037_vm15 = vcmp.lt.f32.partialorder %v3036_v4, 0.0004427343 }
 0x4df   :  { %v2975_v14 = vsel %vm10529_vm5, %v2972_v41, %v2969_v7  ;;  %v2987_v18 = vmul.f32 0.6931472, %v9278_v10  ;;  %v9280_v23 = vpop.eup %9279 }
 0x4e0   :  { %v2984_v24 = vsel %vm10535_vm6, %v2981_v3, %v2978_v11  ;;  %v10556_v28 = vsel %vm2943_vm1, %v10484_v44, %v2975_v14  ;;  %v2996_v34 = vmul.f32 0.6931472, %v9280_v23  ;;  %v9282_v42 = vpop.eup %9281  ;;  %v3017_v3 = vmul.f32 %v10515_v25, %v3016_v37 }
 0x4e1   :  { %v2993_v29 = vsel %vm10541_vm7, %v2990_v12, %v2987_v18  ;;  %v10563_v39 = vsel %vm2944_vm2, %v10486_v47, %v2984_v24  ;;  %v3005_v36 = vmul.f32 0.6931472, %v9282_v42  ;;  %v9284_v62 = vpop.eup %9283  ;;  %v3034_v47 = vadd.f32 1.0, %v3033_v16 }
 0x4e2   :  { %v10569_v44 = vsel %vm2945_vm3, %v10488_v48, %v2993_v29  ;;  %v3002_v32 = vsel %vm3001_vm8, %v2999_v27, %v2996_v34  ;;  %v9286_v1 = vpop.eup %9285  ;;  %v3014_v48 = vmul.f32 0.6931472, %v9284_v62  ;;  %vm2950_vm1 = vcmp.gt.f32.partialorder %v10505_v2, 20.0 }
 0x4e3   :  { %v10577_v0 = vsel %vm2946_vm4, %v10490_v61, %v3002_v32  ;;  %v3011_v41 = vsel %vm3010_vm10, %v3008_v40, %v3005_v36  ;;  %v3023_v21 = vmul.f32 0.6931472, %v9286_v1  ;;  %v9288_v7 = vpop.eup %9287  ;;  %v3035_v25 = vmul.f32 %v10520_v38, %v3034_v47 }
 0x4e4   :  { %v10583_v6 = vsel %vm2947_vm9, %v10493_v35, %v3011_v41  ;;  %v3020_v61 = vsel %vm3019_vm11, %v3017_v3, %v3014_v48  ;;  %v3032_v46 = vmul.f32 0.6931472, %v9288_v7 }
 0x4e5   :  { %v3029_v9 = vsel %vm3028_vm14, %v3026_v5, %v3023_v21  ;;  %v10589_v10 = vsel %vm2948_vm12, %v10495_v33, %v3020_v61 }
 0x4e6   :  { %v10592_v26 = vsel %vm2949_vm13, %v10501_v63, %v3029_v9  ;;  %v3038_v35 = vsel %vm3037_vm15, %v3035_v25, %v3032_v46 }
 0x4e7   :  { %v10596_v11 = vsel %vm2950_vm1, %v10505_v2, %v3038_v35 }
 0x4e8   :  { %9783 = dma.done.wait [#allocation18], 16384 }
 0x4e9   :  { %9784 = vsyncadd [#allocation18], 4294950912  ;;  %v3180_v12 = vpack.c.bf16 %v10589_v10, %v10563_v39  ;;  %9289 = vset.pattern.permute.xlu0 %v9850_v8  ;;  %9290 = vset.pattern.permute.xlu1 %v9850_v8  ;;  %v3052_v33 = vld [vmem:[#allocation2 + $0x8] sm:$0xff]  ;;  %v3054_v63 = vld [vmem:[#allocation2 + $0x18] sm:$0xff] }
 0x4ea   :  { %v3051_v38 = vld [vmem:[#allocation2] sm:$0xff]  ;;  %3183 = vmatprep.subr.bf16.mxu0 %v3052_v33  ;;  %3269 = vmatprep.subr.bf16.mxu1 %v3054_v63  ;;  %v3053_v15 = vld [vmem:[#allocation2 + $0x10] sm:$0xff]  ;;  %v3056_v13 = vld [vmem:[#allocation2 + $0x28] sm:$0xff] }
 0x4eb   :  { %3215 = vmatprep.mubr.bf16.mxu0 %v3180_v12  ;;  %3301 = vmatprep.mubr.bf16.mxu1 %v3180_v12  ;;  %v3058_v2 = vld [vmem:[#allocation2 + $0x38] sm:$0xff]  ;;  %v3055_v14 = vld [vmem:[#allocation2 + $0x20] sm:$0xff]  ;;  %v3057_v18 = vld [vmem:[#allocation2 + $0x30] sm:$0xff] }
 0x4ec   :  { %3184 = vmatpush1.bf16.msra.mxu0 %v3051_v38  ;;  %3270 = vmatpush1.bf16.msra.mxu1 %v3053_v15  ;;  %v3060_v20 = vld [vmem:[#allocation2 + $0x48] sm:$0xff]  ;;  %v3062_v22 = vld [vmem:[#allocation2 + $0x58] sm:$0xff]  ;;  %v3059_v23 = vld [vmem:[#allocation2 + $0x40] sm:$0xff] }
 0x4ed   :  { %3185 = vmatprep.subr.bf16.mxu0 %v3056_v13  ;;  %3271 = vmatprep.subr.bf16.mxu1 %v3058_v2  ;;  %v3061_v24 = vld [vmem:[#allocation2 + $0x50] sm:$0xff]  ;;  %v3064_v27 = vld [vmem:[#allocation2 + $0x68] sm:$0xff]  ;;  %v3066_v16 = vld [vmem:[#allocation2 + $0x78] sm:$0xff] }
 0x4ee   :  { %v3063_v29 = vld [vmem:[#allocation2 + $0x60] sm:$0xff]  ;;  %v3065_v34 = vld [vmem:[#allocation2 + $0x70] sm:$0xff]  ;;  %v3068_v37 = vld [vmem:[#allocation2 + $0x88] sm:$0xff] }
 0x4ef   :  { %v3070_v42 = vld [vmem:[#allocation2 + $0x98] sm:$0xff]  ;;  %v3067_v19 = vld [vmem:[#allocation2 + $0x80] sm:$0xff]  ;;  %v3069_v43 = vld [vmem:[#allocation2 + $0x90] sm:$0xff] }
 0x4f0   :  { %3186 = vmatpush1.bf16.msra.mxu0 %v3055_v14  ;;  %3272 = vmatpush1.bf16.msra.mxu1 %v3057_v18  ;;  %v3072_v32 = vld [vmem:[#allocation2 + $0xa8] sm:$0xff]  ;;  %v3074_v36 = vld [vmem:[#allocation2 + $0xb8] sm:$0xff]  ;;  %v3071_v40 = vld [vmem:[#allocation2 + $0xa0] sm:$0xff] }
 0x4f1   :  { %3187 = vmatprep.subr.bf16.mxu0 %v3060_v20  ;;  %3273 = vmatprep.subr.bf16.mxu1 %v3062_v22  ;;  %v3073_v45 = vld [vmem:[#allocation2 + $0xb0] sm:$0xff]  ;;  %v3076_v62 = vld [vmem:[#allocation2 + $0xc8] sm:$0xff]  ;;  %v3078_v47 = vld [vmem:[#allocation2 + $0xd8] sm:$0xff] }
 0x4f2   :  { %v3075_v1 = vld [vmem:[#allocation2 + $0xc0] sm:$0xff]  ;;  %v3077_v41 = vld [vmem:[#allocation2 + $0xd0] sm:$0xff]  ;;  %v3080_v48 = vld [vmem:[#allocation2 + $0xe8] sm:$0xff] }
 0x4f3   :  { %v3082_v3 = vld [vmem:[#allocation2 + $0xf8] sm:$0xff]  ;;  %v3079_v4 = vld [vmem:[#allocation2 + $0xe0] sm:$0xff]  ;;  %v3081_v21 = vld [vmem:[#allocation2 + $0xf0] sm:$0xff] }
 0x4f4   :  { %3188 = vmatpush1.bf16.msra.mxu0 %v3059_v23  ;;  %3274 = vmatpush1.bf16.msra.mxu1 %v3061_v24  ;;  %v3084_v5 = vld [vmem:[#allocation2 + $0x108] sm:$0xff]  ;;  %v3086_v7 = vld [vmem:[#allocation2 + $0x118] sm:$0xff]  ;;  %v3083_v61 = vld [vmem:[#allocation2 + $0x100] sm:$0xff] }
 0x4f5   :  { %3189 = vmatprep.subr.bf16.mxu0 %v3064_v27  ;;  %3275 = vmatprep.subr.bf16.mxu1 %v3066_v16  ;;  %v3085_v9 = vld [vmem:[#allocation2 + $0x110] sm:$0xff]  ;;  %v3088_v46 = vld [vmem:[#allocation2 + $0x128] sm:$0xff]  ;;  %v3090_v25 = vld [vmem:[#allocation2 + $0x138] sm:$0xff] }
 0x4f6   :  { %v3087_v35 = vld [vmem:[#allocation2 + $0x120] sm:$0xff]  ;;  %v3089_v12 = vld [vmem:[#allocation2 + $0x130] sm:$0xff]  ;;  %v3092_v33 = vld [vmem:[#allocation2 + $0x148] sm:$0xff] }
 0x4f7   :  { %v3094_v63 = vld [vmem:[#allocation2 + $0x158] sm:$0xff]  ;;  %v3091_v38 = vld [vmem:[#allocation2 + $0x140] sm:$0xff]  ;;  %v3093_v15 = vld [vmem:[#allocation2 + $0x150] sm:$0xff] }
 0x4f8   :  { %3190 = vmatpush1.bf16.msra.mxu0 %v3063_v29  ;;  %3276 = vmatpush1.bf16.msra.mxu1 %v3065_v34  ;;  %v3096_v13 = vld [vmem:[#allocation2 + $0x168] sm:$0xff]  ;;  %v3098_v2 = vld [vmem:[#allocation2 + $0x178] sm:$0xff]  ;;  %v3095_v14 = vld [vmem:[#allocation2 + $0x160] sm:$0xff] }
 0x4f9   :  { %3191 = vmatprep.subr.bf16.mxu0 %v3068_v37  ;;  %3277 = vmatprep.subr.bf16.mxu1 %v3070_v42  ;;  %v3097_v18 = vld [vmem:[#allocation2 + $0x170] sm:$0xff]  ;;  %v3100_v20 = vld [vmem:[#allocation2 + $0x188] sm:$0xff]  ;;  %v3102_v22 = vld [vmem:[#allocation2 + $0x198] sm:$0xff] }
 0x4fa   :  { %v3099_v23 = vld [vmem:[#allocation2 + $0x180] sm:$0xff]  ;;  %v3101_v24 = vld [vmem:[#allocation2 + $0x190] sm:$0xff]  ;;  %v3104_v27 = vld [vmem:[#allocation2 + $0x1a8] sm:$0xff] }
 0x4fb   :  { %v3106_v16 = vld [vmem:[#allocation2 + $0x1b8] sm:$0xff]  ;;  %v3103_v29 = vld [vmem:[#allocation2 + $0x1a0] sm:$0xff]  ;;  %v3105_v34 = vld [vmem:[#allocation2 + $0x1b0] sm:$0xff] }
 0x4fc   :  { %3192 = vmatpush1.bf16.msra.mxu0 %v3067_v19  ;;  %3278 = vmatpush1.bf16.msra.mxu1 %v3069_v43  ;;  %v3108_v37 = vld [vmem:[#allocation2 + $0x1c8] sm:$0xff]  ;;  %v3110_v42 = vld [vmem:[#allocation2 + $0x1d8] sm:$0xff]  ;;  %v3107_v19 = vld [vmem:[#allocation2 + $0x1c0] sm:$0xff] }
 0x4fd   :  { %3193 = vmatprep.subr.bf16.mxu0 %v3072_v32  ;;  %3279 = vmatprep.subr.bf16.mxu1 %v3074_v36  ;;  %v3109_v43 = vld [vmem:[#allocation2 + $0x1d0] sm:$0xff]  ;;  %v3112_v32 = vld [vmem:[#allocation2 + $0x1e8] sm:$0xff]  ;;  %v3114_v36 = vld [vmem:[#allocation2 + $0x1f8] sm:$0xff] }
 0x500   :  { %3194 = vmatpush1.bf16.msra.mxu0 %v3071_v40  ;;  %3280 = vmatpush1.bf16.msra.mxu1 %v3073_v45  ;;  %v3111_v40 = vld [vmem:[#allocation2 + $0x1e0] sm:$0xff]  ;;  %v3113_v45 = vld [vmem:[#allocation2 + $0x1f0] sm:$0xff] }
 0x501   :  { %3195 = vmatprep.subr.bf16.mxu0 %v3076_v62  ;;  %3281 = vmatprep.subr.bf16.mxu1 %v3078_v47  ;;  %v3116_v62 = vld [vmem:[#allocation2 + $0x208] sm:$0xff]  ;;  %v3118_v47 = vld [vmem:[#allocation2 + $0x218] sm:$0xff] }
 0x504   :  { %3196 = vmatpush1.bf16.msra.mxu0 %v3075_v1  ;;  %3282 = vmatpush1.bf16.msra.mxu1 %v3077_v41  ;;  %v3179_v1 = vpack.c.bf16 %v10583_v6, %v10556_v28  ;;  %v3115_v41 = vld [vmem:[#allocation2 + $0x200] sm:$0xff] }
 0x505   :  { %3197 = vmatprep.subr.bf16.mxu0 %v3080_v48  ;;  %3283 = vmatprep.subr.bf16.mxu1 %v3082_v3  ;;  %v3117_v48 = vld [vmem:[#allocation2 + $0x210] sm:$0xff]  ;;  %v3120_v3 = vld [vmem:[#allocation2 + $0x228] sm:$0xff] }
 0x508   :  { %3198 = vmatpush1.bf16.msra.mxu0 %v3079_v4  ;;  %3284 = vmatpush1.bf16.msra.mxu1 %v3081_v21  ;;  %v3122_v4 = vld [vmem:[#allocation2 + $0x238] sm:$0xff]  ;;  %v3182_v21 = vpack.c.bf16 %v10596_v11, %v10577_v0 }
 0x509   :  { %3199 = vmatprep.subr.bf16.mxu0 %v3084_v5  ;;  %3285 = vmatprep.subr.bf16.mxu1 %v3086_v7  ;;  %v3119_v5 = vld [vmem:[#allocation2 + $0x220] sm:$0xff]  ;;  %v3121_v7 = vld [vmem:[#allocation2 + $0x230] sm:$0xff] }
 0x50c   :  { %3200 = vmatpush1.bf16.msra.mxu0 %v3083_v61  ;;  %3286 = vmatpush1.bf16.msra.mxu1 %v3085_v9  ;;  %v3124_v61 = vld [vmem:[#allocation2 + $0x248] sm:$0xff]  ;;  %v3126_v9 = vld [vmem:[#allocation2 + $0x258] sm:$0xff] }
 0x50d   :  { %3201 = vmatprep.subr.bf16.mxu0 %v3088_v46  ;;  %3287 = vmatprep.subr.bf16.mxu1 %v3090_v25  ;;  %v3123_v46 = vld [vmem:[#allocation2 + $0x240] sm:$0xff]  ;;  %v3125_v25 = vld [vmem:[#allocation2 + $0x250] sm:$0xff] }
 0x510   :  { %3202 = vmatpush1.bf16.msra.mxu0 %v3087_v35  ;;  %3288 = vmatpush1.bf16.msra.mxu1 %v3089_v12  ;;  %v3128_v35 = vld [vmem:[#allocation2 + $0x268] sm:$0xff]  ;;  %v3130_v12 = vld [vmem:[#allocation2 + $0x278] sm:$0xff] }
 0x511   :  { %3203 = vmatprep.subr.bf16.mxu0 %v3092_v33  ;;  %3289 = vmatprep.subr.bf16.mxu1 %v3094_v63  ;;  %v3127_v33 = vld [vmem:[#allocation2 + $0x260] sm:$0xff]  ;;  %v3129_v63 = vld [vmem:[#allocation2 + $0x270] sm:$0xff] }
 0x514   :  { %3204 = vmatpush1.bf16.msra.mxu0 %v3091_v38  ;;  %3290 = vmatpush1.bf16.msra.mxu1 %v3093_v15  ;;  %v3132_v38 = vld [vmem:[#allocation2 + $0x288] sm:$0xff]  ;;  %v3134_v15 = vld [vmem:[#allocation2 + $0x298] sm:$0xff] }
 0x515   :  { %3205 = vmatprep.subr.bf16.mxu0 %v3096_v13  ;;  %3291 = vmatprep.subr.bf16.mxu1 %v3098_v2  ;;  %v3131_v13 = vld [vmem:[#allocation2 + $0x280] sm:$0xff]  ;;  %v3133_v2 = vld [vmem:[#allocation2 + $0x290] sm:$0xff] }
 0x518   :  { %3206 = vmatpush1.bf16.msra.mxu0 %v3095_v14  ;;  %3292 = vmatpush1.bf16.msra.mxu1 %v3097_v18  ;;  %v3136_v14 = vld [vmem:[#allocation2 + $0x2a8] sm:$0xff]  ;;  %v3138_v18 = vld [vmem:[#allocation2 + $0x2b8] sm:$0xff] }
 0x519   :  { %3207 = vmatprep.subr.bf16.mxu0 %v3100_v20  ;;  %3293 = vmatprep.subr.bf16.mxu1 %v3102_v22  ;;  %v3135_v20 = vld [vmem:[#allocation2 + $0x2a0] sm:$0xff]  ;;  %v3137_v22 = vld [vmem:[#allocation2 + $0x2b0] sm:$0xff] }
 0x51c   :  { %3208 = vmatpush1.bf16.msra.mxu0 %v3099_v23  ;;  %3294 = vmatpush1.bf16.msra.mxu1 %v3101_v24  ;;  %v3140_v23 = vld [vmem:[#allocation2 + $0x2c8] sm:$0xff]  ;;  %v3142_v24 = vld [vmem:[#allocation2 + $0x2d8] sm:$0xff] }
 0x51d   :  { %3209 = vmatprep.subr.bf16.mxu0 %v3104_v27  ;;  %3295 = vmatprep.subr.bf16.mxu1 %v3106_v16  ;;  %v3139_v27 = vld [vmem:[#allocation2 + $0x2c0] sm:$0xff]  ;;  %v3141_v16 = vld [vmem:[#allocation2 + $0x2d0] sm:$0xff] }
 0x520   :  { %3210 = vmatpush1.bf16.msra.mxu0 %v3103_v29  ;;  %3296 = vmatpush1.bf16.msra.mxu1 %v3105_v34  ;;  %v3144_v29 = vld [vmem:[#allocation2 + $0x2e8] sm:$0xff]  ;;  %v3146_v34 = vld [vmem:[#allocation2 + $0x2f8] sm:$0xff] }
 0x521   :  { %3211 = vmatprep.subr.bf16.mxu0 %v3108_v37  ;;  %3297 = vmatprep.subr.bf16.mxu1 %v3110_v42  ;;  %v3143_v37 = vld [vmem:[#allocation2 + $0x2e0] sm:$0xff]  ;;  %v3145_v42 = vld [vmem:[#allocation2 + $0x2f0] sm:$0xff] }
 0x524   :  { %3212 = vmatpush1.bf16.msra.mxu0 %v3107_v19  ;;  %3298 = vmatpush1.bf16.msra.mxu1 %v3109_v43  ;;  %v3148_v19 = vld [vmem:[#allocation2 + $0x308] sm:$0xff]  ;;  %v3150_v43 = vld [vmem:[#allocation2 + $0x318] sm:$0xff] }
 0x525   :  { %3213 = vmatprep.subr.bf16.mxu0 %v3112_v32  ;;  %3299 = vmatprep.subr.bf16.mxu1 %v3114_v36  ;;  %v3147_v32 = vld [vmem:[#allocation2 + $0x300] sm:$0xff]  ;;  %v3149_v36 = vld [vmem:[#allocation2 + $0x310] sm:$0xff] }
 0x528   :  { %3214 = vmatpush1.bf16.msra.mxu0 %v3111_v40  ;;  %3300 = vmatpush1.bf16.msra.mxu1 %v3113_v45  ;;  %v3152_v40 = vld [vmem:[#allocation2 + $0x328] sm:$0xff]  ;;  %v3154_v45 = vld [vmem:[#allocation2 + $0x338] sm:$0xff] }
 0x529   :  { %3226 = vmatprep.subr.bf16.mxu0 %v3116_v62  ;;  %3312 = vmatprep.subr.bf16.mxu1 %v3118_v47  ;;  %v3151_v62 = vld [vmem:[#allocation2 + $0x320] sm:$0xff]  ;;  %v3153_v47 = vld [vmem:[#allocation2 + $0x330] sm:$0xff] }
 0x52b   :  { %3216 = vmatmul.mubr.bf16.vlgmr.msra.gmra.mrb[8].mxu0 %v3179_v1  ;;  %3302 = vmatmul.mubr.bf16.vlgmr.msra.gmra.mrb[8].mxu1 %v3179_v1  ;;  %v3156_v1 = vld [vmem:[#allocation2 + $0x348] sm:$0xff] }
 0x52c   :  { %3227 = vmatpush1.bf16.msra.mxu0 %v3115_v41  ;;  %3313 = vmatpush1.bf16.msra.mxu1 %v3117_v48  ;;  %v3158_v41 = vld [vmem:[#allocation2 + $0x358] sm:$0xff]  ;;  %v3155_v48 = vld [vmem:[#allocation2 + $0x340] sm:$0xff] }
 0x52d   :  { %3228 = vmatprep.subr.bf16.mxu0 %v3120_v3  ;;  %3314 = vmatprep.subr.bf16.mxu1 %v3122_v4  ;;  %v3157_v3 = vld [vmem:[#allocation2 + $0x350] sm:$0xff]  ;;  %v3160_v4 = vld [vmem:[#allocation2 + $0x368] sm:$0xff] }
 0x52e   :  { %3258 = vmatprep.mubr.bf16.mxu0 %v3182_v21  ;;  %3344 = vmatprep.mubr.bf16.mxu1 %v3182_v21  ;;  %v3162_v21 = vld [vmem:[#allocation2 + $0x378] sm:$0xff] }
 0x530   :  { %3229 = vmatpush1.bf16.msra.mxu0 %v3119_v5  ;;  %3315 = vmatpush1.bf16.msra.mxu1 %v3121_v7  ;;  %v3159_v5 = vld [vmem:[#allocation2 + $0x360] sm:$0xff]  ;;  %v3161_v7 = vld [vmem:[#allocation2 + $0x370] sm:$0xff] }
 0x531   :  { %3230 = vmatprep.subr.bf16.mxu0 %v3124_v61  ;;  %3316 = vmatprep.subr.bf16.mxu1 %v3126_v9  ;;  %v3164_v61 = vld [vmem:[#allocation2 + $0x388] sm:$0xff]  ;;  %v3166_v9 = vld [vmem:[#allocation2 + $0x398] sm:$0xff] }
 0x534   :  { %3231 = vmatpush1.bf16.msra.mxu0 %v3123_v46  ;;  %3317 = vmatpush1.bf16.msra.mxu1 %v3125_v25  ;;  %v3163_v46 = vld [vmem:[#allocation2 + $0x380] sm:$0xff]  ;;  %v3165_v25 = vld [vmem:[#allocation2 + $0x390] sm:$0xff] }
 0x535   :  { %3232 = vmatprep.subr.bf16.mxu0 %v3128_v35  ;;  %3318 = vmatprep.subr.bf16.mxu1 %v3130_v12  ;;  %v3168_v35 = vld [vmem:[#allocation2 + $0x3a8] sm:$0xff]  ;;  %v3170_v12 = vld [vmem:[#allocation2 + $0x3b8] sm:$0xff] }
 0x538   :  { %3233 = vmatpush1.bf16.msra.mxu0 %v3127_v33  ;;  %3319 = vmatpush1.bf16.msra.mxu1 %v3129_v63  ;;  %v3167_v33 = vld [vmem:[#allocation2 + $0x3a0] sm:$0xff]  ;;  %v3169_v63 = vld [vmem:[#allocation2 + $0x3b0] sm:$0xff] }
 0x539   :  { %3234 = vmatprep.subr.bf16.mxu0 %v3132_v38  ;;  %3320 = vmatprep.subr.bf16.mxu1 %v3134_v15  ;;  %v3172_v38 = vld [vmem:[#allocation2 + $0x3c8] sm:$0xff]  ;;  %v3174_v15 = vld [vmem:[#allocation2 + $0x3d8] sm:$0xff] }
 0x53c   :  { %3235 = vmatpush1.bf16.msra.mxu0 %v3131_v13  ;;  %3321 = vmatpush1.bf16.msra.mxu1 %v3133_v2  ;;  %v3171_v13 = vld [vmem:[#allocation2 + $0x3c0] sm:$0xff]  ;;  %v3173_v2 = vld [vmem:[#allocation2 + $0x3d0] sm:$0xff] }
 0x53d   :  { %3236 = vmatprep.subr.bf16.mxu0 %v3136_v14  ;;  %3322 = vmatprep.subr.bf16.mxu1 %v3138_v18  ;;  %v3176_v14 = vld [vmem:[#allocation2 + $0x3e8] sm:$0xff]  ;;  %v3178_v18 = vld [vmem:[#allocation2 + $0x3f8] sm:$0xff] }
 0x540   :  { %3237 = vmatpush1.bf16.msra.mxu0 %v3135_v20  ;;  %3323 = vmatpush1.bf16.msra.mxu1 %v3137_v22  ;;  %v3175_v20 = vld [vmem:[#allocation2 + $0x3e0] sm:$0xff]  ;;  %v3177_v22 = vld [vmem:[#allocation2 + $0x3f0] sm:$0xff] }
 0x541   :  { %3238 = vmatprep.subr.bf16.mxu0 %v3140_v23  ;;  %3324 = vmatprep.subr.bf16.mxu1 %v3142_v24  ;;  %v3181_v23 = vpack.c.bf16 %v10592_v26, %v10569_v44 }
 0x544   :  { %3239 = vmatpush1.bf16.msra.mxu0 %v3139_v27  ;;  %3325 = vmatpush1.bf16.msra.mxu1 %v3141_v16 }
 0x545   :  { %3240 = vmatprep.subr.bf16.mxu0 %v3144_v29  ;;  %3326 = vmatprep.subr.bf16.mxu1 %v3146_v34 }
 0x548   :  { %3241 = vmatpush1.bf16.msra.mxu0 %v3143_v37  ;;  %3327 = vmatpush1.bf16.msra.mxu1 %v3145_v42 }
 0x549   :  { %3242 = vmatprep.subr.bf16.mxu0 %v3148_v19  ;;  %3328 = vmatprep.subr.bf16.mxu1 %v3150_v43 }
 0x54c   :  { %3243 = vmatpush1.bf16.msra.mxu0 %v3147_v32  ;;  %3329 = vmatpush1.bf16.msra.mxu1 %v3149_v36 }
 0x54d   :  { %3244 = vmatprep.subr.bf16.mxu0 %v3152_v40  ;;  %3330 = vmatprep.subr.bf16.mxu1 %v3154_v45 }
 0x550   :  { %3245 = vmatpush1.bf16.msra.mxu0 %v3151_v62  ;;  %3331 = vmatpush1.bf16.msra.mxu1 %v3153_v47 }
 0x551   :  { %3246 = vmatprep.subr.bf16.mxu0 %v3156_v1  ;;  %3332 = vmatprep.subr.bf16.mxu1 %v3158_v41 }
 0x554   :  { %3247 = vmatpush1.bf16.msra.mxu0 %v3155_v48  ;;  %3333 = vmatpush1.bf16.msra.mxu1 %v3157_v3 }
 0x555   :  { %3248 = vmatprep.subr.bf16.mxu0 %v3160_v4  ;;  %3334 = vmatprep.subr.bf16.mxu1 %v3162_v21 }
 0x558   :  { %3249 = vmatpush1.bf16.msra.mxu0 %v3159_v5  ;;  %3335 = vmatpush1.bf16.msra.mxu1 %v3161_v7 }
 0x559   :  { %3250 = vmatprep.subr.bf16.mxu0 %v3164_v61  ;;  %3336 = vmatprep.subr.bf16.mxu1 %v3166_v9 }
 0x55c   :  { %3251 = vmatpush1.bf16.msra.mxu0 %v3163_v46  ;;  %3337 = vmatpush1.bf16.msra.mxu1 %v3165_v25 }
 0x55d   :  { %3252 = vmatprep.subr.bf16.mxu0 %v3168_v35  ;;  %3338 = vmatprep.subr.bf16.mxu1 %v3170_v12 }
 0x560   :  { %3253 = vmatpush1.bf16.msra.mxu0 %v3167_v33  ;;  %3339 = vmatpush1.bf16.msra.mxu1 %v3169_v63 }
 0x561   :  { %3254 = vmatprep.subr.bf16.mxu0 %v3172_v38  ;;  %3340 = vmatprep.subr.bf16.mxu1 %v3174_v15 }
 0x564   :  { %3255 = vmatpush1.bf16.msra.mxu0 %v3171_v13  ;;  %3341 = vmatpush1.bf16.msra.mxu1 %v3173_v2 }
 0x565   :  { %3256 = vmatprep.subr.bf16.mxu0 %v3176_v14  ;;  %3342 = vmatprep.subr.bf16.mxu1 %v3178_v18 }
 0x568   :  { %3257 = vmatpush1.bf16.msra.mxu0 %v3175_v20  ;;  %3343 = vmatpush1.bf16.msra.mxu1 %v3177_v22 }
 0x56b   :  { %3259 = vmatmul.mubr.bf16.vlgmr.msra.gmra.mrb[8].mxu0 %v3181_v23  ;;  %3345 = vmatmul.mubr.bf16.vlgmr.msra.gmra.mrb[8].mxu1 %v3181_v23 }
 0x56c   :  { %3419 = vmatprep.mubr.f32.mxu0 %v9849_v17  ;;  %3496 = vmatprep.mubr.f32.mxu1 %v9849_v17 }
 0x63e   :  { %v3260_v24 = vpop.f32.mrb[8].mxu0  ;;  %v3346_v27 = vpop.f32.mrb[8].mxu1 }
 0x63f   :  { %v3262_v16 = vpop.f32.mrb[9].mxu0  ;;  %v3348_v29 = vpop.f32.mrb[9].mxu1 }
 0x640   :  { %v3264_v34 = vpop.f32.mrb[10].mxu0  ;;  %v3350_v37 = vpop.f32.mrb[10].mxu1 }
 0x641   :  { %v8705_v42 = vpack.c.bf16 %v3264_v34, %v3260_v24  ;;  %v8709_v19 = vpack.c.bf16 %v3350_v37, %v3346_v27  ;;  %v3266_v43 = vpop.f32.mrb[11].mxu0  ;;  %v3352_v32 = vpop.f32.mrb[11].mxu1 }
 0x642   :  { %v8703_v36 = vpack.c.bf16 %v3266_v43, %v3262_v16  ;;  %v8707_v40 = vpack.c.bf16 %v3352_v32, %v3348_v29 }
 0x644   :  { %8704 = vmatprep.subr.bf16.mxu0 %v8703_v36  ;;  %8708 = vmatprep.subr.bf16.mxu1 %v8707_v40 }
 0x645   :  { %8706 = vmatpush1.bf16.msra.mxu0 %v8705_v42  ;;  %8710 = vmatpush1.bf16.msra.mxu1 %v8709_v19 }
 0x648   :  { %8326 = vmatmul.mubr.msk.f32.vlgmr.msra.gmra.mrb[12].mxu0 %vm2706_vm0, %v10392_v30  ;;  %8328 = vmatmul.mubr.msk.f32.vlgmr.msra.gmra.mrb[12].mxu1 %vm2706_vm0, %v10392_v30 }
 0x649   :  { %3425 = vmatprep.mubr.f32.mxu0 %v9849_v17  ;;  %3502 = vmatprep.mubr.f32.mxu1 %v9849_v17 }
 0x64c   :  { %8327 = vmatmul.mubr.msk.f32.gmra.mrb[14].mxu0 %vm2706_vm0, %v10399_v31  ;;  %8329 = vmatmul.mubr.msk.f32.gmra.mrb[14].mxu1 %vm2706_vm0, %v10399_v31 }
 0x71b   :  { %v3421_v45 = vpop.f32.mrb[12].mxu0  ;;  %v3498_v62 = vpop.f32.mrb[12].mxu1 }
 0x71c   :  { %v3519_v47 = vmul.f32 %v3421_v45, %v3421_v45  ;;  %v3423_v1 = vpop.f32.mrb[13].mxu0  ;;  %v3500_v41 = vpop.f32.mrb[13].mxu1  ;;  %v3521_v4 = vmul.f32 %v3498_v62, %v3498_v62 }
 0x71d   :  { %v3509_v48 = vadd.f32 %v3423_v1, %v3421_v45  ;;  %v3520_v3 = vmul.f32 %v3423_v1, %v3423_v1  ;;  %v3522_v38 = vmul.f32 %v3500_v41, %v3500_v41 }
 0x71f   :  { %v3427_v21 = vpop.f32.mrb[14].mxu0  ;;  %v3504_v5 = vpop.f32.mrb[14].mxu1  ;;  %v3510_v7 = vadd.f32 %v3509_v48, %v3498_v62  ;;  %v3527_v61 = vadd.f32 %v3520_v3, %v3519_v47  ;;  %v8330_v47 = vld [vmem:[%s11441_s12 + $0x8] sm:$0xff] }
 0x720   :  { %v3523_v9 = vmul.f32 %v3427_v21, %v3427_v21  ;;  %v3429_v46 = vpop.f32.mrb[15].mxu0  ;;  %v3506_v25 = vpop.f32.mrb[15].mxu1  ;;  %v3525_v33 = vmul.f32 %v3504_v5, %v3504_v5 }
 0x721   :  { %v3514_v35 = vadd.f32 %v3429_v46, %v3427_v21  ;;  %v3524_v12 = vmul.f32 %v3429_v46, %v3429_v46  ;;  %v3511_v63 = vadd.f32 %v3510_v7, %v3500_v41  ;;  %v3528_v15 = vadd.f32 %v3527_v61, %v3521_v4  ;;  %v8331_v4 = vld [vmem:[%s11442_s29 + $0x8] sm:$0xff] }
 0x722   :  { %v3526_v18 = vmul.f32 %v3506_v25, %v3506_v25 }
 0x723   :  { %v3532_v13 = vadd.f32 %v3524_v12, %v3523_v9  ;;  %3512 = vadd.xlane.f32.xlu0 %v3511_v63  ;;  %v3515_v2 = vadd.f32 %v3514_v35, %v3504_v5  ;;  %v3529_v14 = vadd.f32 %v3528_v15, %v3522_v38 }
 0x725   :  { %v3516_v20 = vadd.f32 %v3515_v2, %v3506_v25  ;;  %v3533_v22 = vadd.f32 %v3532_v13, %v3525_v33  ;;  %3530 = vadd.xlane.f32.xlu1 %v3529_v14 }
 0x727   :  { %3517 = vadd.xlane.f32.xlu0 %v3516_v20  ;;  %v3534_v23 = vadd.f32 %v3533_v22, %v3526_v18 }
 0x729   :  { %3535 = vadd.xlane.f32.xlu1 %v3534_v23 }
 0x7b0   :  { %v3513_v24 = vpop.xlane.xlu0 %3512 }
 0x7b2   :  { %v3531_v27 = vpop.xlane.xlu1 %3530 }
 0x7b4   :  { %v3518_v16 = vpop.xlane.xlu0 %3517 }
 0x7b5   :  { %v3537_v29 = vadd.f32 %v3518_v16, %v3513_v24 }
 0x7b6   :  { %v3536_v37 = vpop.xlane.xlu1 %3535 }
 0x7b7   :  { %v3539_v34 = vmul.f32 0.0009765625, %v3537_v29  ;;  %v3538_v42 = vadd.f32 %v3536_v37, %v3531_v27 }
 0x7b9   :  { %v3541_v19 = vmul.f32 %v3539_v34, %v3539_v34  ;;  %v3540_v43 = vmul.f32 0.0009765625, %v3538_v42 }
 0x7bb   :  { %v3542_v32 = vsub.f32 %v3540_v43, %v3541_v19 }
 0x7bd   :  { %v3543_v36 = vmax.f32 %v3542_v32, 0.0 }
 0x7bf   :  { %v3546_v40 = vadd.f32 1e-05, %v3543_v36 }
 0x7c1   :  { %9291 = vrsqrt.f32 %v3546_v40 }
 0x7cb   :  { %v9292_v48 = vpop.eup %9291 }
 0x7cc   :  { %v3548_v3 = vmul.f32 %v9292_v48, %v8330_v47 }
 0x7ce   :  { %3555 = vperm.xlu0 %9289, %v3548_v3   ;;  %v3551_v7 = vmul.f32 %v3548_v3, %v3539_v34 }
 0x7d0   :  { %v3552_v61 = vsub.f32 %v8331_v4, %v3551_v7 }
 0x7d2   :  { %3568 = vperm.xlu1 %9290, %v3552_v61  }
 0x84d   :  { %v3556_v9 = vpop.permute.xlu0 %3555 }
 0x84e   :  { %v3558_v35 = vmul.f32 %v3556_v9, %v3421_v45  ;;  %v3559_v12 = vmul.f32 %v3556_v9, %v3423_v1  ;;  %v3560_v33 = vmul.f32 %v3556_v9, %v3498_v62  ;;  %v3561_v63 = vmul.f32 %v3556_v9, %v3500_v41 }
 0x84f   :  { %v3562_v38 = vmul.f32 %v3556_v9, %v3427_v21  ;;  %v3563_v15 = vmul.f32 %v3556_v9, %v3429_v46  ;;  %v3564_v13 = vmul.f32 %v3556_v9, %v3504_v5  ;;  %v3565_v23 = vmul.f32 %v3556_v9, %v3506_v25 }
 0x851   :  { %v3569_v2 = vpop.permute.xlu1 %3568 }
 0x852   :  { %v3571_v14 = vadd.f32 %v3569_v2, %v3558_v35  ;;  %v3572_v18 = vadd.f32 %v3569_v2, %v3559_v12  ;;  %v3573_v20 = vadd.f32 %v3569_v2, %v3560_v33  ;;  %v3574_v22 = vadd.f32 %v3569_v2, %v3561_v63 }
 0x853   :  { %v3575_v24 = vadd.f32 %v3569_v2, %v3562_v38  ;;  %v3576_v27 = vadd.f32 %v3569_v2, %v3563_v15  ;;  %v3577_v16 = vadd.f32 %v3569_v2, %v3564_v13  ;;  %v3578_v41 = vadd.f32 %v3569_v2, %v3565_v23 }
 0x854   :  { %v10627_v29 = vadd.f32 %v3571_v14, %v10556_v28  ;;  %v10630_v45 = vadd.f32 %v3572_v18, %v10563_v39  ;;  %v10633_v62 = vadd.f32 %v3573_v20, %v10569_v44  ;;  %v10636_v1 = vadd.f32 %v3574_v22, %v10577_v0 }
 0x855   :  { %v10639_v21 = vadd.f32 %v3575_v24, %v10583_v6  ;;  %v10642_v5 = vadd.f32 %v3576_v27, %v10589_v10  ;;  %v10648_v37 = vadd.f32 %v3577_v16, %v10592_v26  ;;  %v10653_v43 = vadd.f32 %v3578_v41, %v10596_v11 }
 0x856   :  { %v3587_v46 = vmin.f32 %v10627_v29, 20.0  ;;  %v3588_v25 = vmin.f32 %v10630_v45, 20.0  ;;  %v3589_v34 = vmin.f32 %v10633_v62, 20.0  ;;  %v3590_v42 = vmin.f32 %v10636_v1, 20.0 }
 0x857   :  { %v3591_v19 = vmin.f32 %v10639_v21, 20.0  ;;  %v3592_v32 = vmin.f32 %v10642_v5, 20.0  ;;  %v3593_v48 = vmin.f32 %v10648_v37, 20.0  ;;  %v3594_v7 = vmin.f32 %v10653_v43, 20.0 }
 0x858   :  { %v3603_v36 = vmul.f32 1.442695, %v3587_v46  ;;  %v3605_v40 = vmul.f32 1.442695, %v3588_v25  ;;  %v3607_v47 = vmul.f32 1.442695, %v3589_v34 }
 0x859   :  { %v3609_v3 = vmul.f32 1.442695, %v3590_v42  ;;  %v3611_v4 = vmul.f32 1.442695, %v3591_v19  ;;  %v3613_v61 = vmul.f32 1.442695, %v3592_v32 }
 0x85a   :  { %9293 = vpow2.f32 %v3603_v36  ;;  %v3615_v9 = vmul.f32 1.442695, %v3593_v48  ;;  %v3617_v35 = vmul.f32 1.442695, %v3594_v7  ;;  %vm3595_vm2 = vcmp.gt.f32.partialorder %v10627_v29, 20.0 }
 0x85b   :  { %9295 = vpow2.f32 %v3605_v40  ;;  %vm3596_vm3 = vcmp.gt.f32.partialorder %v10630_v45, 20.0  ;;  %vm3597_vm4 = vcmp.gt.f32.partialorder %v10633_v62, 20.0  ;;  %vm3598_vm5 = vcmp.gt.f32.partialorder %v10636_v1, 20.0 }
 0x85c   :  { %9297 = vpow2.f32 %v3607_v47  ;;  %vm3599_vm10 = vcmp.gt.f32.partialorder %v10639_v21, 20.0  ;;  %vm3600_vm13 = vcmp.gt.f32.partialorder %v10642_v5, 20.0  ;;  %vm3601_vm14 = vcmp.gt.f32.partialorder %v10648_v37, 20.0 }
 0x85d   :  { %9299 = vpow2.f32 %v3609_v3 }
 0x85e   :  { %9301 = vpow2.f32 %v3611_v4 }
 0x85f   :  { %9303 = vpow2.f32 %v3613_v61 }
 0x860   :  { %9305 = vpow2.f32 %v3615_v9 }
 0x861   :  { %9307 = vpow2.f32 %v3617_v35 }
 0x864   :  { %v9294_v12 = vpop.eup %9293 }
 0x865   :  { %v9296_v33 = vpop.eup %9295  ;;  %v3619_v63 = vadd.f32 1.0, %v9294_v12  ;;  %v3622_v18 = vmul.f32 -0.5, %v9294_v12  ;;  %v3625_v46 = vand.u32 2147483647, %v9294_v12 }
 0x866   :  { %v9298_v38 = vpop.eup %9297  ;;  %v3628_v15 = vadd.f32 1.0, %v9296_v33  ;;  %v3631_v20 = vmul.f32 -0.5, %v9296_v33  ;;  %v3634_v25 = vand.u32 2147483647, %v9296_v33 }
 0x867   :  { %v10658_v13 = vpop.eup %9299  ;;  %9309 = vlog2.f32 %v3619_v63  ;;  %v3637_v2 = vadd.f32 1.0, %v9298_v38  ;;  %v3640_v27 = vmul.f32 -0.5, %v9298_v38  ;;  %v3623_v41 = vadd.f32 1.0, %v3622_v18 }
 0x868   :  { %v10660_v14 = vpop.eup %9301  ;;  %9311 = vlog2.f32 %v3628_v15  ;;  %v3646_v22 = vadd.f32 1.0, %v10658_v13  ;;  %v3632_v42 = vadd.f32 1.0, %v3631_v20  ;;  %v3649_v19 = vmul.f32 -0.5, %v10658_v13 }
 0x869   :  { %9313 = vlog2.f32 %v3637_v2  ;;  %v10663_v23 = vpop.eup %9303  ;;  %v3655_v16 = vadd.f32 1.0, %v10660_v14  ;;  %v3641_v40 = vadd.f32 1.0, %v3640_v27  ;;  %v3643_v47 = vand.u32 2147483647, %v9298_v38 }
 0x86a   :  { %v10665_v24 = vpop.eup %9305  ;;  %9315 = vlog2.f32 %v3646_v22  ;;  %v3664_v32 = vadd.f32 1.0, %v10663_v23  ;;  %vm10677_vm6 = vcmp.lt.f32.partialorder %v3625_v46, 0.0004427343  ;;  %v3658_v3 = vmul.f32 -0.5, %v10660_v14 }
 0x86b   :  { %v10668_v34 = vpop.eup %9307  ;;  %9317 = vlog2.f32 %v3655_v16  ;;  %v3673_v36 = vadd.f32 1.0, %v10665_v24  ;;  %v3624_v61 = vmul.f32 %v9294_v12, %v3623_v41  ;;  %v3633_v9 = vmul.f32 %v9296_v33, %v3632_v42 }
 0x86c   :  { %9319 = vlog2.f32 %v3664_v32  ;;  %v3682_v4 = vadd.f32 1.0, %v10668_v34  ;;  %vm10683_vm7 = vcmp.lt.f32.partialorder %v3634_v25, 0.0004427343  ;;  %v3650_v63 = vadd.f32 1.0, %v3649_v19 }
 0x86d   :  { %9321 = vlog2.f32 %v3673_v36  ;;  %v3652_v18 = vand.u32 2147483647, %v10658_v13  ;;  %v3667_v20 = vmul.f32 -0.5, %v10663_v23  ;;  %v3642_v16 = vmul.f32 %v9298_v38, %v3641_v40 }
 0x86e   :  { %9323 = vlog2.f32 %v3682_v4  ;;  %vm10689_vm8 = vcmp.lt.f32.partialorder %v3643_v47, 0.0004427343  ;;  %v3676_v12 = vmul.f32 -0.5, %v10665_v24  ;;  %v3659_v25 = vadd.f32 1.0, %v3658_v3 }
 0x86f   :  { %v3661_v42 = vand.u32 2147483647, %v10660_v14  ;;  %v3651_v36 = vmul.f32 %v10658_v13, %v3650_v63  ;;  %v3685_v38 = vmul.f32 -0.5, %v10668_v34  ;;  %v3668_v3 = vadd.f32 1.0, %v3667_v20 }
 0x870   :  { %vm3653_vm9 = vcmp.lt.f32.partialorder %v3652_v18, 0.0004427343  ;;  %v3670_v13 = vand.u32 2147483647, %v10663_v23  ;;  %v3660_v63 = vmul.f32 %v10660_v14, %v3659_v25 }
 0x871   :  { %v9310_v7 = vpop.eup %9309  ;;  %vm3662_vm11 = vcmp.lt.f32.partialorder %v3661_v42, 0.0004427343 }
 0x872   :  { %v9312_v15 = vpop.eup %9311  ;;  %v3621_v2 = vmul.f32 0.6931472, %v9310_v7  ;;  %vm3671_vm12 = vcmp.lt.f32.partialorder %v3670_v13, 0.0004427343 }
 0x873   :  { %v9314_v22 = vpop.eup %9313  ;;  %v3630_v27 = vmul.f32 0.6931472, %v9312_v15  ;;  %v3679_v15 = vand.u32 2147483647, %v10665_v24 }
 0x874   :  { %v3627_v33 = vsel %vm10677_vm6, %v3624_v61, %v3621_v2  ;;  %v3639_v41 = vmul.f32 0.6931472, %v9314_v22  ;;  %v9316_v19 = vpop.eup %9315  ;;  %v3677_v61 = vadd.f32 1.0, %v3676_v12 }
 0x875   :  { %v3636_v32 = vsel %vm10683_vm7, %v3633_v9, %v3630_v27  ;;  %v10704_v40 = vsel %vm3595_vm2, %v10627_v29, %v3627_v33  ;;  %v3648_v48 = vmul.f32 0.6931472, %v9316_v19  ;;  %v9318_v7 = vpop.eup %9317  ;;  %v3669_v27 = vmul.f32 %v10663_v23, %v3668_v3 }
 0x876   :  { %v3645_v47 = vsel %vm10689_vm8, %v3642_v16, %v3639_v41  ;;  %v3692_v4 = vsel %vm3596_vm3, %v10630_v45, %v3636_v32  ;;  %v3657_v35 = vmul.f32 0.6931472, %v9318_v7  ;;  %v9320_v2 = vpop.eup %9319  ;;  %v3686_v45 = vadd.f32 1.0, %v3685_v38 }
 0x877   :  { %v10715_v9 = vsel %vm3597_vm4, %v10633_v62, %v3645_v47  ;;  %v3654_v29 = vsel %vm3653_vm9, %v3651_v36, %v3648_v48  ;;  %v9322_v20 = vpop.eup %9321  ;;  %v3666_v62 = vmul.f32 0.6931472, %v9320_v2  ;;  %v3688_v16 = vand.u32 2147483647, %v10668_v34 }
 0x878   :  { %v10723_v18 = vsel %vm3598_vm5, %v10636_v1, %v3654_v29  ;;  %v3663_v22 = vsel %vm3662_vm11, %v3660_v63, %v3657_v35  ;;  %v3675_v14 = vmul.f32 0.6931472, %v9322_v20  ;;  %v3678_v46 = vmul.f32 %v10665_v24, %v3677_v61  ;;  %v9324_v33 = vpop.eup %9323 }
 0x879   :  { %v10729_v12 = vsel %vm3599_vm10, %v10639_v21, %v3663_v22  ;;  %v3672_v1 = vsel %vm3671_vm12, %v3669_v27, %v3666_v62  ;;  %vm3680_vm15 = vcmp.lt.f32.partialorder %v3679_v15, 0.0004427343  ;;  %v3684_v25 = vmul.f32 0.6931472, %v9324_v33 }
 0x87a   :  { %v3681_v41 = vsel %vm3680_vm15, %v3678_v46, %v3675_v14  ;;  %v3687_v23 = vmul.f32 %v10668_v34, %v3686_v45  ;;  %v3696_v42 = vsel %vm3600_vm13, %v10642_v5, %v3672_v1  ;;  %vm3689_vm1 = vcmp.lt.f32.partialorder %v3688_v16, 0.0004427343 }
 0x87b   :  { %v10736_v19 = vsel %vm3601_vm14, %v10648_v37, %v3681_v41  ;;  %vm3602_vm2 = vcmp.gt.f32.partialorder %v10653_v43, 20.0 }
 0x87c   :  { %v3690_v21 = vsel %vm3689_vm1, %v3687_v23, %v3684_v25 }
 0x87d   :  { %v10740_v24 = vsel %vm3602_vm2, %v10653_v43, %v3690_v21 }
 0x87e   :  { %9785 = dma.done.wait [#allocation18 + $0x1], 16384 }
 0x87f   :  { %9786 = vsyncadd [#allocation18 + $0x1], 4294950912  ;;  %v3830_v32 = vpack.c.bf16 %v3696_v42, %v3692_v4  ;;  %9325 = vset.pattern.permute.xlu0 %v9850_v8  ;;  %9326 = vset.pattern.permute.xlu1 %v9850_v8  ;;  %v3702_v5 = vld [vmem:[#allocation3 + $0x8] sm:$0xff]  ;;  %v3704_v34 = vld [vmem:[#allocation3 + $0x18] sm:$0xff] }
 0x880   :  { %v3701_v36 = vld [vmem:[#allocation3] sm:$0xff]  ;;  %3833 = vmatprep.subr.bf16.mxu0 %v3702_v5  ;;  %3919 = vmatprep.subr.bf16.mxu1 %v3704_v34  ;;  %v3703_v37 = vld [vmem:[#allocation3 + $0x10] sm:$0xff]  ;;  %v3706_v38 = vld [vmem:[#allocation3 + $0x28] sm:$0xff] }
 0x881   :  { %3865 = vmatprep.mubr.bf16.mxu0 %v3830_v32  ;;  %3951 = vmatprep.mubr.bf16.mxu1 %v3830_v32  ;;  %v3708_v47 = vld [vmem:[#allocation3 + $0x38] sm:$0xff]  ;;  %v3705_v43 = vld [vmem:[#allocation3 + $0x20] sm:$0xff]  ;;  %v3707_v48 = vld [vmem:[#allocation3 + $0x30] sm:$0xff] }
 0x882   :  { %3834 = vmatpush1.bf16.msra.mxu0 %v3701_v36  ;;  %3920 = vmatpush1.bf16.msra.mxu1 %v3703_v37  ;;  %v3710_v3 = vld [vmem:[#allocation3 + $0x48] sm:$0xff]  ;;  %v3712_v4 = vld [vmem:[#allocation3 + $0x58] sm:$0xff]  ;;  %v3709_v7 = vld [vmem:[#allocation3 + $0x40] sm:$0xff] }
 0x883   :  { %3835 = vmatprep.subr.bf16.mxu0 %v3706_v38  ;;  %3921 = vmatprep.subr.bf16.mxu1 %v3708_v47  ;;  %v3711_v13 = vld [vmem:[#allocation3 + $0x50] sm:$0xff]  ;;  %v3714_v61 = vld [vmem:[#allocation3 + $0x68] sm:$0xff]  ;;  %v3716_v29 = vld [vmem:[#allocation3 + $0x78] sm:$0xff] }
 0x884   :  { %v3713_v35 = vld [vmem:[#allocation3 + $0x60] sm:$0xff]  ;;  %v3715_v63 = vld [vmem:[#allocation3 + $0x70] sm:$0xff]  ;;  %v3718_v15 = vld [vmem:[#allocation3 + $0x88] sm:$0xff] }
 0x885   :  { %v3720_v2 = vld [vmem:[#allocation3 + $0x98] sm:$0xff]  ;;  %v3717_v45 = vld [vmem:[#allocation3 + $0x80] sm:$0xff]  ;;  %v3719_v20 = vld [vmem:[#allocation3 + $0x90] sm:$0xff] }
 0x886   :  { %3836 = vmatpush1.bf16.msra.mxu0 %v3705_v43  ;;  %3922 = vmatpush1.bf16.msra.mxu1 %v3707_v48  ;;  %v3722_v22 = vld [vmem:[#allocation3 + $0xa8] sm:$0xff]  ;;  %v3724_v62 = vld [vmem:[#allocation3 + $0xb8] sm:$0xff]  ;;  %v3721_v27 = vld [vmem:[#allocation3 + $0xa0] sm:$0xff] }
 0x887   :  { %3837 = vmatprep.subr.bf16.mxu0 %v3710_v3  ;;  %3923 = vmatprep.subr.bf16.mxu1 %v3712_v4  ;;  %v3723_v16 = vld [vmem:[#allocation3 + $0xb0] sm:$0xff]  ;;  %v3726_v14 = vld [vmem:[#allocation3 + $0xc8] sm:$0xff]  ;;  %v3728_v46 = vld [vmem:[#allocation3 + $0xd8] sm:$0xff] }
 0x888   :  { %v3725_v33 = vld [vmem:[#allocation3 + $0xc0] sm:$0xff]  ;;  %v3727_v1 = vld [vmem:[#allocation3 + $0xd0] sm:$0xff]  ;;  %v3730_v41 = vld [vmem:[#allocation3 + $0xe8] sm:$0xff] }
 0x889   :  { %v3732_v25 = vld [vmem:[#allocation3 + $0xf8] sm:$0xff]  ;;  %v3729_v23 = vld [vmem:[#allocation3 + $0xe0] sm:$0xff]  ;;  %v3731_v42 = vld [vmem:[#allocation3 + $0xf0] sm:$0xff] }
 0x88a   :  { %3838 = vmatpush1.bf16.msra.mxu0 %v3709_v7  ;;  %3924 = vmatpush1.bf16.msra.mxu1 %v3711_v13  ;;  %v3734_v21 = vld [vmem:[#allocation3 + $0x108] sm:$0xff]  ;;  %v3736_v32 = vld [vmem:[#allocation3 + $0x118] sm:$0xff]  ;;  %v3733_v5 = vld [vmem:[#allocation3 + $0x100] sm:$0xff] }
 0x88b   :  { %3839 = vmatprep.subr.bf16.mxu0 %v3714_v61  ;;  %3925 = vmatprep.subr.bf16.mxu1 %v3716_v29  ;;  %v3735_v34 = vld [vmem:[#allocation3 + $0x110] sm:$0xff]  ;;  %v3738_v36 = vld [vmem:[#allocation3 + $0x128] sm:$0xff]  ;;  %v3740_v37 = vld [vmem:[#allocation3 + $0x138] sm:$0xff] }
 0x88c   :  { %v3737_v38 = vld [vmem:[#allocation3 + $0x120] sm:$0xff]  ;;  %v3739_v47 = vld [vmem:[#allocation3 + $0x130] sm:$0xff]  ;;  %v3742_v43 = vld [vmem:[#allocation3 + $0x148] sm:$0xff] }
 0x88d   :  { %v3744_v48 = vld [vmem:[#allocation3 + $0x158] sm:$0xff]  ;;  %v3741_v3 = vld [vmem:[#allocation3 + $0x140] sm:$0xff]  ;;  %v3743_v4 = vld [vmem:[#allocation3 + $0x150] sm:$0xff] }
 0x88e   :  { %3840 = vmatpush1.bf16.msra.mxu0 %v3713_v35  ;;  %3926 = vmatpush1.bf16.msra.mxu1 %v3715_v63  ;;  %v3746_v7 = vld [vmem:[#allocation3 + $0x168] sm:$0xff]  ;;  %v3748_v13 = vld [vmem:[#allocation3 + $0x178] sm:$0xff]  ;;  %v3745_v61 = vld [vmem:[#allocation3 + $0x160] sm:$0xff] }
 0x88f   :  { %3841 = vmatprep.subr.bf16.mxu0 %v3718_v15  ;;  %3927 = vmatprep.subr.bf16.mxu1 %v3720_v2  ;;  %v3747_v29 = vld [vmem:[#allocation3 + $0x170] sm:$0xff]  ;;  %v3750_v35 = vld [vmem:[#allocation3 + $0x188] sm:$0xff]  ;;  %v3752_v63 = vld [vmem:[#allocation3 + $0x198] sm:$0xff] }
 0x890   :  { %v3749_v15 = vld [vmem:[#allocation3 + $0x180] sm:$0xff]  ;;  %v3751_v2 = vld [vmem:[#allocation3 + $0x190] sm:$0xff] }
 0x892   :  { %3842 = vmatpush1.bf16.msra.mxu0 %v3717_v45  ;;  %3928 = vmatpush1.bf16.msra.mxu1 %v3719_v20  ;;  %v3754_v45 = vld [vmem:[#allocation3 + $0x1a8] sm:$0xff]  ;;  %v3756_v20 = vld [vmem:[#allocation3 + $0x1b8] sm:$0xff] }
 0x893   :  { %3843 = vmatprep.subr.bf16.mxu0 %v3722_v22  ;;  %3929 = vmatprep.subr.bf16.mxu1 %v3724_v62  ;;  %v3753_v22 = vld [vmem:[#allocation3 + $0x1a0] sm:$0xff]  ;;  %v3755_v62 = vld [vmem:[#allocation3 + $0x1b0] sm:$0xff] }
 0x896   :  { %3844 = vmatpush1.bf16.msra.mxu0 %v3721_v27  ;;  %3930 = vmatpush1.bf16.msra.mxu1 %v3723_v16  ;;  %v3758_v27 = vld [vmem:[#allocation3 + $0x1c8] sm:$0xff]  ;;  %v3760_v16 = vld [vmem:[#allocation3 + $0x1d8] sm:$0xff] }
 0x897   :  { %3845 = vmatprep.subr.bf16.mxu0 %v3726_v14  ;;  %3931 = vmatprep.subr.bf16.mxu1 %v3728_v46  ;;  %v3757_v14 = vld [vmem:[#allocation3 + $0x1c0] sm:$0xff]  ;;  %v3759_v46 = vld [vmem:[#allocation3 + $0x1d0] sm:$0xff] }
 0x89a   :  { %3846 = vmatpush1.bf16.msra.mxu0 %v3725_v33  ;;  %3932 = vmatpush1.bf16.msra.mxu1 %v3727_v1  ;;  %v3762_v33 = vld [vmem:[#allocation3 + $0x1e8] sm:$0xff]  ;;  %v3764_v1 = vld [vmem:[#allocation3 + $0x1f8] sm:$0xff] }
 0x89b   :  { %3847 = vmatprep.subr.bf16.mxu0 %v3730_v41  ;;  %3933 = vmatprep.subr.bf16.mxu1 %v3732_v25  ;;  %v3761_v41 = vld [vmem:[#allocation3 + $0x1e0] sm:$0xff]  ;;  %v3763_v25 = vld [vmem:[#allocation3 + $0x1f0] sm:$0xff] }
 0x89e   :  { %3848 = vmatpush1.bf16.msra.mxu0 %v3729_v23  ;;  %3934 = vmatpush1.bf16.msra.mxu1 %v3731_v42  ;;  %v3766_v23 = vld [vmem:[#allocation3 + $0x208] sm:$0xff]  ;;  %v3768_v42 = vld [vmem:[#allocation3 + $0x218] sm:$0xff] }
 0x89f   :  { %3849 = vmatprep.subr.bf16.mxu0 %v3734_v21  ;;  %3935 = vmatprep.subr.bf16.mxu1 %v3736_v32  ;;  %v3829_v21 = vpack.c.bf16 %v10729_v12, %v10704_v40  ;;  %v3765_v32 = vld [vmem:[#allocation3 + $0x200] sm:$0xff]  ;;  %v3774_v40 = vld [vmem:[#allocation3 + $0x248] sm:$0xff]  ;;  %v3776_v12 = vld [vmem:[#allocation3 + $0x258] sm:$0xff] }
 0x8a2   :  { %3850 = vmatpush1.bf16.msra.mxu0 %v3733_v5  ;;  %3936 = vmatpush1.bf16.msra.mxu1 %v3735_v34  ;;  %v3767_v5 = vld [vmem:[#allocation3 + $0x210] sm:$0xff]  ;;  %v3770_v34 = vld [vmem:[#allocation3 + $0x228] sm:$0xff] }
 0x8a3   :  { %3851 = vmatprep.subr.bf16.mxu0 %v3738_v36  ;;  %3937 = vmatprep.subr.bf16.mxu1 %v3740_v37  ;;  %v3772_v36 = vld [vmem:[#allocation3 + $0x238] sm:$0xff]  ;;  %v3832_v37 = vpack.c.bf16 %v10740_v24, %v10723_v18  ;;  %v3777_v24 = vld [vmem:[#allocation3 + $0x260] sm:$0xff] }
 0x8a4   :  { %v3780_v18 = vld [vmem:[#allocation3 + $0x278] sm:$0xff] }
 0x8a6   :  { %3852 = vmatpush1.bf16.msra.mxu0 %v3737_v38  ;;  %3938 = vmatpush1.bf16.msra.mxu1 %v3739_v47  ;;  %v3769_v38 = vld [vmem:[#allocation3 + $0x220] sm:$0xff]  ;;  %v3771_v47 = vld [vmem:[#allocation3 + $0x230] sm:$0xff] }
 0x8a7   :  { %3853 = vmatprep.subr.bf16.mxu0 %v3742_v43  ;;  %3939 = vmatprep.subr.bf16.mxu1 %v3744_v48  ;;  %v3773_v43 = vld [vmem:[#allocation3 + $0x240] sm:$0xff]  ;;  %v3775_v48 = vld [vmem:[#allocation3 + $0x250] sm:$0xff] }
 0x8aa   :  { %3854 = vmatpush1.bf16.msra.mxu0 %v3741_v3  ;;  %3940 = vmatpush1.bf16.msra.mxu1 %v3743_v4  ;;  %v3778_v3 = vld [vmem:[#allocation3 + $0x268] sm:$0xff]  ;;  %v3779_v4 = vld [vmem:[#allocation3 + $0x270] sm:$0xff] }
 0x8ab   :  { %3855 = vmatprep.subr.bf16.mxu0 %v3746_v7  ;;  %3941 = vmatprep.subr.bf16.mxu1 %v3748_v13  ;;  %v3782_v7 = vld [vmem:[#allocation3 + $0x288] sm:$0xff]  ;;  %v3784_v13 = vld [vmem:[#allocation3 + $0x298] sm:$0xff] }
 0x8ae   :  { %3856 = vmatpush1.bf16.msra.mxu0 %v3745_v61  ;;  %3942 = vmatpush1.bf16.msra.mxu1 %v3747_v29  ;;  %v3781_v61 = vld [vmem:[#allocation3 + $0x280] sm:$0xff]  ;;  %v3783_v29 = vld [vmem:[#allocation3 + $0x290] sm:$0xff] }
 0x8af   :  { %3857 = vmatprep.subr.bf16.mxu0 %v3750_v35  ;;  %3943 = vmatprep.subr.bf16.mxu1 %v3752_v63  ;;  %v3786_v35 = vld [vmem:[#allocation3 + $0x2a8] sm:$0xff]  ;;  %v3788_v63 = vld [vmem:[#allocation3 + $0x2b8] sm:$0xff] }
 0x8b2   :  { %3858 = vmatpush1.bf16.msra.mxu0 %v3749_v15  ;;  %3944 = vmatpush1.bf16.msra.mxu1 %v3751_v2  ;;  %v3785_v15 = vld [vmem:[#allocation3 + $0x2a0] sm:$0xff]  ;;  %v3787_v2 = vld [vmem:[#allocation3 + $0x2b0] sm:$0xff] }
 0x8b3   :  { %3859 = vmatprep.subr.bf16.mxu0 %v3754_v45  ;;  %3945 = vmatprep.subr.bf16.mxu1 %v3756_v20  ;;  %v3790_v45 = vld [vmem:[#allocation3 + $0x2c8] sm:$0xff]  ;;  %v3792_v20 = vld [vmem:[#allocation3 + $0x2d8] sm:$0xff] }
 0x8b6   :  { %3860 = vmatpush1.bf16.msra.mxu0 %v3753_v22  ;;  %3946 = vmatpush1.bf16.msra.mxu1 %v3755_v62  ;;  %v3789_v22 = vld [vmem:[#allocation3 + $0x2c0] sm:$0xff]  ;;  %v3791_v62 = vld [vmem:[#allocation3 + $0x2d0] sm:$0xff] }
 0x8b7   :  { %3861 = vmatprep.subr.bf16.mxu0 %v3758_v27  ;;  %3947 = vmatprep.subr.bf16.mxu1 %v3760_v16  ;;  %v3794_v27 = vld [vmem:[#allocation3 + $0x2e8] sm:$0xff]  ;;  %v3796_v16 = vld [vmem:[#allocation3 + $0x2f8] sm:$0xff] }
 0x8ba   :  { %3862 = vmatpush1.bf16.msra.mxu0 %v3757_v14  ;;  %3948 = vmatpush1.bf16.msra.mxu1 %v3759_v46  ;;  %v3793_v14 = vld [vmem:[#allocation3 + $0x2e0] sm:$0xff]  ;;  %v3795_v46 = vld [vmem:[#allocation3 + $0x2f0] sm:$0xff] }
 0x8bb   :  { %3863 = vmatprep.subr.bf16.mxu0 %v3762_v33  ;;  %3949 = vmatprep.subr.bf16.mxu1 %v3764_v1  ;;  %v3798_v33 = vld [vmem:[#allocation3 + $0x308] sm:$0xff]  ;;  %v3800_v1 = vld [vmem:[#allocation3 + $0x318] sm:$0xff] }
 0x8be   :  { %3864 = vmatpush1.bf16.msra.mxu0 %v3761_v41  ;;  %3950 = vmatpush1.bf16.msra.mxu1 %v3763_v25  ;;  %v3797_v41 = vld [vmem:[#allocation3 + $0x300] sm:$0xff]  ;;  %v3799_v25 = vld [vmem:[#allocation3 + $0x310] sm:$0xff] }
 0x8bf   :  { %3876 = vmatprep.subr.bf16.mxu0 %v3766_v23  ;;  %3962 = vmatprep.subr.bf16.mxu1 %v3768_v42  ;;  %v3802_v23 = vld [vmem:[#allocation3 + $0x328] sm:$0xff]  ;;  %v3804_v42 = vld [vmem:[#allocation3 + $0x338] sm:$0xff] }
 0x8c1   :  { %3866 = vmatmul.mubr.bf16.vlgmr.msra.gmra.mrb[16].mxu0 %v3829_v21  ;;  %3952 = vmatmul.mubr.bf16.vlgmr.msra.gmra.mrb[16].mxu1 %v3829_v21  ;;  %v3801_v21 = vld [vmem:[#allocation3 + $0x320] sm:$0xff] }
 0x8c2   :  { %3877 = vmatpush1.bf16.msra.mxu0 %v3765_v32  ;;  %3963 = vmatpush1.bf16.msra.mxu1 %v3767_v5  ;;  %v3803_v32 = vld [vmem:[#allocation3 + $0x330] sm:$0xff]  ;;  %v3806_v5 = vld [vmem:[#allocation3 + $0x348] sm:$0xff] }
 0x8c3   :  { %3878 = vmatprep.subr.bf16.mxu0 %v3770_v34  ;;  %3964 = vmatprep.subr.bf16.mxu1 %v3772_v36  ;;  %v3808_v34 = vld [vmem:[#allocation3 + $0x358] sm:$0xff]  ;;  %v3805_v36 = vld [vmem:[#allocation3 + $0x340] sm:$0xff] }
 0x8c4   :  { %3908 = vmatprep.mubr.bf16.mxu0 %v3832_v37  ;;  %3994 = vmatprep.mubr.bf16.mxu1 %v3832_v37  ;;  %v3807_v37 = vld [vmem:[#allocation3 + $0x350] sm:$0xff] }
 0x8c6   :  { %3879 = vmatpush1.bf16.msra.mxu0 %v3769_v38  ;;  %3965 = vmatpush1.bf16.msra.mxu1 %v3771_v47  ;;  %v3810_v38 = vld [vmem:[#allocation3 + $0x368] sm:$0xff]  ;;  %v3812_v47 = vld [vmem:[#allocation3 + $0x378] sm:$0xff] }
 0x8c7   :  { %3880 = vmatprep.subr.bf16.mxu0 %v3774_v40  ;;  %3966 = vmatprep.subr.bf16.mxu1 %v3776_v12  ;;  %v3809_v40 = vld [vmem:[#allocation3 + $0x360] sm:$0xff]  ;;  %v3811_v12 = vld [vmem:[#allocation3 + $0x370] sm:$0xff] }
 0x8ca   :  { %3881 = vmatpush1.bf16.msra.mxu0 %v3773_v43  ;;  %3967 = vmatpush1.bf16.msra.mxu1 %v3775_v48  ;;  %v3814_v43 = vld [vmem:[#allocation3 + $0x388] sm:$0xff]  ;;  %v3816_v48 = vld [vmem:[#allocation3 + $0x398] sm:$0xff] }
 0x8cb   :  { %3882 = vmatprep.subr.bf16.mxu0 %v3778_v3  ;;  %3968 = vmatprep.subr.bf16.mxu1 %v3780_v18  ;;  %v3813_v3 = vld [vmem:[#allocation3 + $0x380] sm:$0xff]  ;;  %v3815_v18 = vld [vmem:[#allocation3 + $0x390] sm:$0xff] }
 0x8ce   :  { %3883 = vmatpush1.bf16.msra.mxu0 %v3777_v24  ;;  %3969 = vmatpush1.bf16.msra.mxu1 %v3779_v4  ;;  %v3818_v24 = vld [vmem:[#allocation3 + $0x3a8] sm:$0xff]  ;;  %v3820_v4 = vld [vmem:[#allocation3 + $0x3b8] sm:$0xff] }
 0x8cf   :  { %3884 = vmatprep.subr.bf16.mxu0 %v3782_v7  ;;  %3970 = vmatprep.subr.bf16.mxu1 %v3784_v13  ;;  %v3817_v7 = vld [vmem:[#allocation3 + $0x3a0] sm:$0xff]  ;;  %v3819_v13 = vld [vmem:[#allocation3 + $0x3b0] sm:$0xff] }
 0x8d2   :  { %3885 = vmatpush1.bf16.msra.mxu0 %v3781_v61  ;;  %3971 = vmatpush1.bf16.msra.mxu1 %v3783_v29  ;;  %v3822_v61 = vld [vmem:[#allocation3 + $0x3c8] sm:$0xff]  ;;  %v3824_v29 = vld [vmem:[#allocation3 + $0x3d8] sm:$0xff] }
 0x8d3   :  { %3886 = vmatprep.subr.bf16.mxu0 %v3786_v35  ;;  %3972 = vmatprep.subr.bf16.mxu1 %v3788_v63  ;;  %v3821_v35 = vld [vmem:[#allocation3 + $0x3c0] sm:$0xff]  ;;  %v3823_v63 = vld [vmem:[#allocation3 + $0x3d0] sm:$0xff] }
 0x8d6   :  { %3887 = vmatpush1.bf16.msra.mxu0 %v3785_v15  ;;  %3973 = vmatpush1.bf16.msra.mxu1 %v3787_v2  ;;  %v3826_v15 = vld [vmem:[#allocation3 + $0x3e8] sm:$0xff]  ;;  %v3828_v2 = vld [vmem:[#allocation3 + $0x3f8] sm:$0xff] }
 0x8d7   :  { %3888 = vmatprep.subr.bf16.mxu0 %v3790_v45  ;;  %3974 = vmatprep.subr.bf16.mxu1 %v3792_v20  ;;  %v3825_v45 = vld [vmem:[#allocation3 + $0x3e0] sm:$0xff]  ;;  %v3827_v20 = vld [vmem:[#allocation3 + $0x3f0] sm:$0xff] }
 0x8da   :  { %3889 = vmatpush1.bf16.msra.mxu0 %v3789_v22  ;;  %3975 = vmatpush1.bf16.msra.mxu1 %v3791_v62  ;;  %v3831_v22 = vpack.c.bf16 %v10736_v19, %v10715_v9 }
 0x8db   :  { %3890 = vmatprep.subr.bf16.mxu0 %v3794_v27  ;;  %3976 = vmatprep.subr.bf16.mxu1 %v3796_v16 }
 0x8de   :  { %3891 = vmatpush1.bf16.msra.mxu0 %v3793_v14  ;;  %3977 = vmatpush1.bf16.msra.mxu1 %v3795_v46 }
 0x8df   :  { %3892 = vmatprep.subr.bf16.mxu0 %v3798_v33  ;;  %3978 = vmatprep.subr.bf16.mxu1 %v3800_v1 }
 0x8e2   :  { %3893 = vmatpush1.bf16.msra.mxu0 %v3797_v41  ;;  %3979 = vmatpush1.bf16.msra.mxu1 %v3799_v25 }
 0x8e3   :  { %3894 = vmatprep.subr.bf16.mxu0 %v3802_v23  ;;  %3980 = vmatprep.subr.bf16.mxu1 %v3804_v42 }
 0x8e6   :  { %3895 = vmatpush1.bf16.msra.mxu0 %v3801_v21  ;;  %3981 = vmatpush1.bf16.msra.mxu1 %v3803_v32 }
 0x8e7   :  { %3896 = vmatprep.subr.bf16.mxu0 %v3806_v5  ;;  %3982 = vmatprep.subr.bf16.mxu1 %v3808_v34 }
 0x8ea   :  { %3897 = vmatpush1.bf16.msra.mxu0 %v3805_v36  ;;  %3983 = vmatpush1.bf16.msra.mxu1 %v3807_v37 }
 0x8eb   :  { %3898 = vmatprep.subr.bf16.mxu0 %v3810_v38  ;;  %3984 = vmatprep.subr.bf16.mxu1 %v3812_v47 }
 0x8ee   :  { %3899 = vmatpush1.bf16.msra.mxu0 %v3809_v40  ;;  %3985 = vmatpush1.bf16.msra.mxu1 %v3811_v12 }
 0x8ef   :  { %3900 = vmatprep.subr.bf16.mxu0 %v3814_v43  ;;  %3986 = vmatprep.subr.bf16.mxu1 %v3816_v48 }
 0x8f2   :  { %3901 = vmatpush1.bf16.msra.mxu0 %v3813_v3  ;;  %3987 = vmatpush1.bf16.msra.mxu1 %v3815_v18 }
 0x8f3   :  { %3902 = vmatprep.subr.bf16.mxu0 %v3818_v24  ;;  %3988 = vmatprep.subr.bf16.mxu1 %v3820_v4 }
 0x8f6   :  { %3903 = vmatpush1.bf16.msra.mxu0 %v3817_v7  ;;  %3989 = vmatpush1.bf16.msra.mxu1 %v3819_v13 }
 0x8f7   :  { %3904 = vmatprep.subr.bf16.mxu0 %v3822_v61  ;;  %3990 = vmatprep.subr.bf16.mxu1 %v3824_v29 }
 0x8fa   :  { %3905 = vmatpush1.bf16.msra.mxu0 %v3821_v35  ;;  %3991 = vmatpush1.bf16.msra.mxu1 %v3823_v63 }
 0x8fb   :  { %3906 = vmatprep.subr.bf16.mxu0 %v3826_v15  ;;  %3992 = vmatprep.subr.bf16.mxu1 %v3828_v2 }
 0x8fe   :  { %3907 = vmatpush1.bf16.msra.mxu0 %v3825_v45  ;;  %3993 = vmatpush1.bf16.msra.mxu1 %v3827_v20 }
 0x901   :  { %3909 = vmatmul.mubr.bf16.vlgmr.msra.gmra.mrb[16].mxu0 %v3831_v22  ;;  %3995 = vmatmul.mubr.bf16.vlgmr.msra.gmra.mrb[16].mxu1 %v3831_v22 }
 0x902   :  { %4069 = vmatprep.mubr.f32.mxu0 %v9849_v17  ;;  %4146 = vmatprep.mubr.f32.mxu1 %v9849_v17 }
 0x9d4   :  { %v3910_v62 = vpop.f32.mrb[16].mxu0  ;;  %v3996_v27 = vpop.f32.mrb[16].mxu1 }
 0x9d5   :  { %v3912_v16 = vpop.f32.mrb[17].mxu0  ;;  %v3998_v14 = vpop.f32.mrb[17].mxu1 }
 0x9d6   :  { %v3914_v46 = vpop.f32.mrb[18].mxu0  ;;  %v4000_v33 = vpop.f32.mrb[18].mxu1 }
 0x9d7   :  { %v8713_v1 = vpack.c.bf16 %v3914_v46, %v3910_v62  ;;  %v8717_v41 = vpack.c.bf16 %v4000_v33, %v3996_v27  ;;  %v3916_v25 = vpop.f32.mrb[19].mxu0  ;;  %v4002_v23 = vpop.f32.mrb[19].mxu1 }
 0x9d8   :  { %v8711_v42 = vpack.c.bf16 %v3916_v25, %v3912_v16  ;;  %v8715_v9 = vpack.c.bf16 %v4002_v23, %v3998_v14 }
 0x9da   :  { %8712 = vmatprep.subr.bf16.mxu0 %v8711_v42  ;;  %8716 = vmatprep.subr.bf16.mxu1 %v8715_v9 }
 0x9db   :  { %8714 = vmatpush1.bf16.msra.mxu0 %v8713_v1  ;;  %8718 = vmatpush1.bf16.msra.mxu1 %v8717_v41 }
 0x9de   :  { %8332 = vmatmul.mubr.msk.f32.vlgmr.msra.gmra.mrb[20].mxu0 %vm2706_vm0, %v10392_v30  ;;  %8334 = vmatmul.mubr.msk.f32.vlgmr.msra.gmra.mrb[20].mxu1 %vm2706_vm0, %v10392_v30 }
 0x9df   :  { %4075 = vmatprep.mubr.f32.mxu0 %v9849_v17  ;;  %4152 = vmatprep.mubr.f32.mxu1 %v9849_v17 }
 0x9e2   :  { %8333 = vmatmul.mubr.msk.f32.gmra.mrb[22].mxu0 %vm2706_vm0, %v10399_v31  ;;  %8335 = vmatmul.mubr.msk.f32.gmra.mrb[22].mxu1 %vm2706_vm0, %v10399_v31 }
 0xab1   :  { %v4071_v19 = vpop.f32.mrb[20].mxu0  ;;  %v4148_v21 = vpop.f32.mrb[20].mxu1 }
 0xab2   :  { %v4169_v32 = vmul.f32 %v4071_v19, %v4071_v19  ;;  %v4073_v5 = vpop.f32.mrb[21].mxu0  ;;  %v4150_v34 = vpop.f32.mrb[21].mxu1  ;;  %v4171_v38 = vmul.f32 %v4148_v21, %v4148_v21 }
 0xab3   :  { %v4159_v36 = vadd.f32 %v4073_v5, %v4071_v19  ;;  %v4170_v37 = vmul.f32 %v4073_v5, %v4073_v5  ;;  %v4172_v61 = vmul.f32 %v4150_v34, %v4150_v34 }
 0xab5   :  { %v4077_v47 = vpop.f32.mrb[22].mxu0  ;;  %v4154_v40 = vpop.f32.mrb[22].mxu1  ;;  %v4160_v12 = vadd.f32 %v4159_v36, %v4148_v21  ;;  %v4177_v43 = vadd.f32 %v4170_v37, %v4169_v32  ;;  %v8336_v32 = vld [vmem:[%s11441_s12 + $0x10] sm:$0xff] }
 0xab6   :  { %v4173_v48 = vmul.f32 %v4077_v47, %v4077_v47  ;;  %v4079_v3 = vpop.f32.mrb[23].mxu0  ;;  %v4156_v18 = vpop.f32.mrb[23].mxu1  ;;  %v4175_v7 = vmul.f32 %v4154_v40, %v4154_v40 }
 0xab7   :  { %v4164_v24 = vadd.f32 %v4079_v3, %v4077_v47  ;;  %v4174_v4 = vmul.f32 %v4079_v3, %v4079_v3  ;;  %v4161_v13 = vadd.f32 %v4160_v12, %v4150_v34  ;;  %v4178_v29 = vadd.f32 %v4177_v43, %v4171_v38  ;;  %v8337_v38 = vld [vmem:[%s11442_s29 + $0x10] sm:$0xff] }
 0xab8   :  { %v4176_v2 = vmul.f32 %v4156_v18, %v4156_v18 }
 0xab9   :  { %v4182_v35 = vadd.f32 %v4174_v4, %v4173_v48  ;;  %4162 = vadd.xlane.f32.xlu0 %v4161_v13  ;;  %v4165_v63 = vadd.f32 %v4164_v24, %v4154_v40  ;;  %v4179_v15 = vadd.f32 %v4178_v29, %v4172_v61 }
 0xabb   :  { %v4166_v45 = vadd.f32 %v4165_v63, %v4156_v18  ;;  %v4183_v20 = vadd.f32 %v4182_v35, %v4175_v7  ;;  %4180 = vadd.xlane.f32.xlu1 %v4179_v15 }
 0xabd   :  { %4167 = vadd.xlane.f32.xlu0 %v4166_v45  ;;  %v4184_v22 = vadd.f32 %v4183_v20, %v4176_v2 }
 0xabf   :  { %4185 = vadd.xlane.f32.xlu1 %v4184_v22 }
 0xb46   :  { %v4163_v62 = vpop.xlane.xlu0 %4162 }
 0xb48   :  { %v4181_v27 = vpop.xlane.xlu1 %4180 }
 0xb4a   :  { %v4168_v16 = vpop.xlane.xlu0 %4167 }
 0xb4b   :  { %v4187_v14 = vadd.f32 %v4168_v16, %v4163_v62 }
 0xb4c   :  { %v4186_v33 = vpop.xlane.xlu1 %4185 }
 0xb4d   :  { %v4189_v46 = vmul.f32 0.0009765625, %v4187_v14  ;;  %v4188_v1 = vadd.f32 %v4186_v33, %v4181_v27 }
 0xb4f   :  { %v4191_v41 = vmul.f32 %v4189_v46, %v4189_v46  ;;  %v4190_v25 = vmul.f32 0.0009765625, %v4188_v1 }
 0xb51   :  { %v4192_v23 = vsub.f32 %v4190_v25, %v4191_v41 }
 0xb53   :  { %v4193_v42 = vmax.f32 %v4192_v23, 0.0 }
 0xb55   :  { %v4196_v9 = vadd.f32 1e-05, %v4193_v42 }
 0xb57   :  { %9327 = vrsqrt.f32 %v4196_v9 }
 0xb61   :  { %v9328_v36 = vpop.eup %9327 }
 0xb62   :  { %v4198_v37 = vmul.f32 %v9328_v36, %v8336_v32 }
 0xb64   :  { %4205 = vperm.xlu0 %9325, %v4198_v37   ;;  %v4201_v12 = vmul.f32 %v4198_v37, %v4189_v46 }
 0xb66   :  { %v4202_v43 = vsub.f32 %v8337_v38, %v4201_v12 }
 0xb68   :  { %4218 = vperm.xlu1 %9326, %v4202_v43  }
 0xbe3   :  { %v4206_v48 = vpop.permute.xlu0 %4205 }
 0xbe4   :  { %v4208_v24 = vmul.f32 %v4206_v48, %v4071_v19  ;;  %v4209_v4 = vmul.f32 %v4206_v48, %v4073_v5  ;;  %v4210_v7 = vmul.f32 %v4206_v48, %v4148_v21  ;;  %v4211_v13 = vmul.f32 %v4206_v48, %v4150_v34 }
 0xbe5   :  { %v4212_v61 = vmul.f32 %v4206_v48, %v4077_v47  ;;  %v4213_v29 = vmul.f32 %v4206_v48, %v4079_v3  ;;  %v4214_v35 = vmul.f32 %v4206_v48, %v4154_v40  ;;  %v4215_v22 = vmul.f32 %v4206_v48, %v4156_v18 }
 0xbe7   :  { %v4219_v63 = vpop.permute.xlu1 %4218 }
 0xbe8   :  { %v4221_v15 = vadd.f32 %v4219_v63, %v4208_v24  ;;  %v4222_v2 = vadd.f32 %v4219_v63, %v4209_v4  ;;  %v4223_v45 = vadd.f32 %v4219_v63, %v4210_v7  ;;  %v4224_v20 = vadd.f32 %v4219_v63, %v4211_v13 }
 0xbe9   :  { %v4225_v62 = vadd.f32 %v4219_v63, %v4212_v61  ;;  %v4226_v27 = vadd.f32 %v4219_v63, %v4213_v29  ;;  %v4227_v16 = vadd.f32 %v4219_v63, %v4214_v35  ;;  %v4228_v34 = vadd.f32 %v4219_v63, %v4215_v22 }
 0xbea   :  { %v10769_v14 = vadd.f32 %v4221_v15, %v10556_v28  ;;  %v10772_v19 = vadd.f32 %v4222_v2, %v10563_v39  ;;  %v10775_v21 = vadd.f32 %v4223_v45, %v10569_v44  ;;  %v10778_v5 = vadd.f32 %v4224_v20, %v10577_v0 }
 0xbeb   :  { %v10781_v47 = vadd.f32 %v4225_v62, %v10583_v6  ;;  %v10784_v40 = vadd.f32 %v4226_v27, %v10589_v10  ;;  %v10790_v33 = vadd.f32 %v4227_v16, %v10592_v26  ;;  %v10795_v25 = vadd.f32 %v4228_v34, %v10596_v11 }
 0xbec   :  { %v4237_v3 = vmin.f32 %v10769_v14, 20.0  ;;  %v4238_v18 = vmin.f32 %v10772_v19, 20.0  ;;  %v4239_v46 = vmin.f32 %v10775_v21, 20.0  ;;  %v4240_v1 = vmin.f32 %v10778_v5, 20.0 }
 0xbed   :  { %v4241_v41 = vmin.f32 %v10781_v47, 20.0  ;;  %v4242_v23 = vmin.f32 %v10784_v40, 20.0  ;;  %v4243_v36 = vmin.f32 %v10790_v33, 20.0  ;;  %v4244_v12 = vmin.f32 %v10795_v25, 20.0 }
 0xbee   :  { %v4253_v42 = vmul.f32 1.442695, %v4237_v3  ;;  %v4255_v9 = vmul.f32 1.442695, %v4238_v18  ;;  %v4257_v32 = vmul.f32 1.442695, %v4239_v46 }
 0xbef   :  { %v4259_v37 = vmul.f32 1.442695, %v4240_v1  ;;  %v4261_v38 = vmul.f32 1.442695, %v4241_v41  ;;  %v4263_v43 = vmul.f32 1.442695, %v4242_v23 }
 0xbf0   :  { %9329 = vpow2.f32 %v4253_v42  ;;  %v4265_v48 = vmul.f32 1.442695, %v4243_v36  ;;  %v4267_v24 = vmul.f32 1.442695, %v4244_v12  ;;  %vm4245_vm3 = vcmp.gt.f32.partialorder %v10769_v14, 20.0 }
 0xbf1   :  { %9331 = vpow2.f32 %v4255_v9  ;;  %vm4246_vm4 = vcmp.gt.f32.partialorder %v10772_v19, 20.0  ;;  %vm4247_vm5 = vcmp.gt.f32.partialorder %v10775_v21, 20.0  ;;  %vm4248_vm6 = vcmp.gt.f32.partialorder %v10778_v5, 20.0 }
 0xbf2   :  { %9333 = vpow2.f32 %v4257_v32  ;;  %vm4249_vm11 = vcmp.gt.f32.partialorder %v10781_v47, 20.0  ;;  %vm4250_vm14 = vcmp.gt.f32.partialorder %v10784_v40, 20.0  ;;  %vm4251_vm15 = vcmp.gt.f32.partialorder %v10790_v33, 20.0 }
 0xbf3   :  { %9335 = vpow2.f32 %v4259_v37 }
 0xbf4   :  { %9337 = vpow2.f32 %v4261_v38 }
 0xbf5   :  { %9339 = vpow2.f32 %v4263_v43 }
 0xbf6   :  { %9341 = vpow2.f32 %v4265_v48 }
 0xbf7   :  { %9343 = vpow2.f32 %v4267_v24 }
 0xbfa   :  { %v9330_v4 = vpop.eup %9329 }
 0xbfb   :  { %v9332_v7 = vpop.eup %9331  ;;  %v4269_v13 = vadd.f32 1.0, %v9330_v4  ;;  %v4272_v2 = vmul.f32 -0.5, %v9330_v4  ;;  %v4275_v3 = vand.u32 2147483647, %v9330_v4 }
 0xbfc   :  { %v9334_v61 = vpop.eup %9333  ;;  %v4278_v29 = vadd.f32 1.0, %v9332_v7  ;;  %v4281_v45 = vmul.f32 -0.5, %v9332_v7  ;;  %v4284_v18 = vand.u32 2147483647, %v9332_v7 }
 0xbfd   :  { %v10800_v35 = vpop.eup %9335  ;;  %9345 = vlog2.f32 %v4269_v13  ;;  %v4287_v63 = vadd.f32 1.0, %v9334_v61  ;;  %v4290_v27 = vmul.f32 -0.5, %v9334_v61  ;;  %v4273_v34 = vadd.f32 1.0, %v4272_v2 }
 0xbfe   :  { %v10802_v15 = vpop.eup %9337  ;;  %9347 = vlog2.f32 %v4278_v29  ;;  %v4296_v20 = vadd.f32 1.0, %v10800_v35  ;;  %v4282_v1 = vadd.f32 1.0, %v4281_v45  ;;  %v4299_v41 = vmul.f32 -0.5, %v10800_v35 }
 0xbff   :  { %9349 = vlog2.f32 %v4287_v63  ;;  %v10805_v22 = vpop.eup %9339  ;;  %v4305_v16 = vadd.f32 1.0, %v10802_v15  ;;  %v4291_v9 = vadd.f32 1.0, %v4290_v27  ;;  %v4293_v32 = vand.u32 2147483647, %v9334_v61 }
 0xc00   :  { %v10807_v62 = vpop.eup %9341  ;;  %9351 = vlog2.f32 %v4296_v20  ;;  %v4314_v23 = vadd.f32 1.0, %v10805_v22  ;;  %vm10819_vm7 = vcmp.lt.f32.partialorder %v4275_v3, 0.0004427343  ;;  %v4308_v37 = vmul.f32 -0.5, %v10802_v15 }
 0xc01   :  { %v10810_v46 = vpop.eup %9343  ;;  %9353 = vlog2.f32 %v4305_v16  ;;  %v4323_v42 = vadd.f32 1.0, %v10807_v62  ;;  %v4274_v43 = vmul.f32 %v9330_v4, %v4273_v34  ;;  %v4283_v48 = vmul.f32 %v9332_v7, %v4282_v1 }
 0xc02   :  { %9355 = vlog2.f32 %v4314_v23  ;;  %v4332_v38 = vadd.f32 1.0, %v10810_v46  ;;  %vm10825_vm8 = vcmp.lt.f32.partialorder %v4284_v18, 0.0004427343  ;;  %v4300_v13 = vadd.f32 1.0, %v4299_v41 }
 0xc03   :  { %9357 = vlog2.f32 %v4323_v42  ;;  %v4302_v2 = vand.u32 2147483647, %v10800_v35  ;;  %v4317_v45 = vmul.f32 -0.5, %v10805_v22  ;;  %v4292_v16 = vmul.f32 %v9334_v61, %v4291_v9 }
 0xc04   :  { %9359 = vlog2.f32 %v4332_v38  ;;  %vm10831_vm9 = vcmp.lt.f32.partialorder %v4293_v32, 0.0004427343  ;;  %v4326_v4 = vmul.f32 -0.5, %v10807_v62  ;;  %v4309_v18 = vadd.f32 1.0, %v4308_v37 }
 0xc05   :  { %v4311_v1 = vand.u32 2147483647, %v10802_v15  ;;  %v4301_v42 = vmul.f32 %v10800_v35, %v4300_v13  ;;  %v4335_v61 = vmul.f32 -0.5, %v10810_v46  ;;  %v4318_v37 = vadd.f32 1.0, %v4317_v45 }
 0xc06   :  { %vm4303_vm10 = vcmp.lt.f32.partialorder %v4302_v2, 0.0004427343  ;;  %v4320_v35 = vand.u32 2147483647, %v10805_v22  ;;  %v4310_v13 = vmul.f32 %v10802_v15, %v4309_v18 }
 0xc07   :  { %v9346_v12 = vpop.eup %9345  ;;  %vm4312_vm12 = vcmp.lt.f32.partialorder %v4311_v1, 0.0004427343 }
 0xc08   :  { %v9348_v29 = vpop.eup %9347  ;;  %v4271_v63 = vmul.f32 0.6931472, %v9346_v12  ;;  %vm4321_vm13 = vcmp.lt.f32.partialorder %v4320_v35, 0.0004427343 }
 0xc09   :  { %v9350_v20 = vpop.eup %9349  ;;  %v4280_v27 = vmul.f32 0.6931472, %v9348_v29  ;;  %v4329_v29 = vand.u32 2147483647, %v10807_v62 }
 0xc0a   :  { %v4277_v7 = vsel %vm10819_vm7, %v4274_v43, %v4271_v63  ;;  %v4289_v34 = vmul.f32 0.6931472, %v9350_v20  ;;  %v9352_v41 = vpop.eup %9351  ;;  %v4327_v43 = vadd.f32 1.0, %v4326_v4 }
 0xc0b   :  { %v4286_v23 = vsel %vm10825_vm8, %v4283_v48, %v4280_v27  ;;  %v10846_v9 = vsel %vm4245_vm3, %v10769_v14, %v4277_v7  ;;  %v4298_v36 = vmul.f32 0.6931472, %v9352_v41  ;;  %v9354_v12 = vpop.eup %9353  ;;  %v4319_v27 = vmul.f32 %v10805_v22, %v4318_v37 }
 0xc0c   :  { %v4295_v32 = vsel %vm10831_vm9, %v4292_v16, %v4289_v34  ;;  %v4342_v38 = vsel %vm4246_vm4, %v10772_v19, %v4286_v23  ;;  %v4307_v24 = vmul.f32 0.6931472, %v9354_v12  ;;  %v9356_v63 = vpop.eup %9355  ;;  %v4336_v19 = vadd.f32 1.0, %v4335_v61 }
 0xc0d   :  { %v10857_v48 = vsel %vm4247_vm5, %v10775_v21, %v4295_v32  ;;  %v4304_v14 = vsel %vm4303_vm10, %v4301_v42, %v4298_v36  ;;  %v9358_v45 = vpop.eup %9357  ;;  %v4316_v21 = vmul.f32 0.6931472, %v9356_v63  ;;  %v4338_v16 = vand.u32 2147483647, %v10810_v46 }
 0xc0e   :  { %v10865_v2 = vsel %vm4248_vm6, %v10778_v5, %v4304_v14  ;;  %v4313_v20 = vsel %vm4312_vm12, %v4310_v13, %v4307_v24  ;;  %v4325_v15 = vmul.f32 0.6931472, %v9358_v45  ;;  %v4328_v3 = vmul.f32 %v10807_v62, %v4327_v43  ;;  %v9360_v7 = vpop.eup %9359 }
 0xc0f   :  { %v10871_v4 = vsel %vm4249_vm11, %v10781_v47, %v4313_v20  ;;  %v4322_v5 = vsel %vm4321_vm13, %v4319_v27, %v4316_v21  ;;  %vm4330_vm1 = vcmp.lt.f32.partialorder %v4329_v29, 0.0004427343  ;;  %v4334_v18 = vmul.f32 0.6931472, %v9360_v7 }
 0xc10   :  { %v4331_v34 = vsel %vm4330_vm1, %v4328_v3, %v4325_v15  ;;  %v4337_v22 = vmul.f32 %v10810_v46, %v4336_v19  ;;  %v4346_v1 = vsel %vm4250_vm14, %v10784_v40, %v4322_v5  ;;  %vm4339_vm2 = vcmp.lt.f32.partialorder %v4338_v16, 0.0004427343 }
 0xc11   :  { %v10878_v41 = vsel %vm4251_vm15, %v10790_v33, %v4331_v34  ;;  %vm4252_vm3 = vcmp.gt.f32.partialorder %v10795_v25, 20.0 }
 0xc12   :  { %v4340_v47 = vsel %vm4339_vm2, %v4337_v22, %v4334_v18 }
 0xc13   :  { %v10882_v62 = vsel %vm4252_vm3, %v10795_v25, %v4340_v47 }
 0xc14   :  { %9787 = dma.done.wait [#allocation18 + $0x2], 16384 }
 0xc15   :  { %9788 = vsyncadd [#allocation18 + $0x2], 4294950912  ;;  %v4480_v23 = vpack.c.bf16 %v4346_v1, %v4342_v38  ;;  %9361 = vset.pattern.permute.xlu0 %v9850_v8  ;;  %9362 = vset.pattern.permute.xlu1 %v9850_v8  ;;  %v4352_v40 = vld [vmem:[#allocation4 + $0x8] sm:$0xff]  ;;  %v4354_v46 = vld [vmem:[#allocation4 + $0x18] sm:$0xff] }
 0xc16   :  { %v4351_v42 = vld [vmem:[#allocation4] sm:$0xff]  ;;  %4483 = vmatprep.subr.bf16.mxu0 %v4352_v40  ;;  %4569 = vmatprep.subr.bf16.mxu1 %v4354_v46  ;;  %v4353_v33 = vld [vmem:[#allocation4 + $0x10] sm:$0xff]  ;;  %v4356_v61 = vld [vmem:[#allocation4 + $0x28] sm:$0xff] }
 0xc17   :  { %4515 = vmatprep.mubr.bf16.mxu0 %v4480_v23  ;;  %4601 = vmatprep.mubr.bf16.mxu1 %v4480_v23  ;;  %v4358_v32 = vld [vmem:[#allocation4 + $0x38] sm:$0xff]  ;;  %v4355_v25 = vld [vmem:[#allocation4 + $0x20] sm:$0xff]  ;;  %v4357_v36 = vld [vmem:[#allocation4 + $0x30] sm:$0xff] }
 0xc18   :  { %4484 = vmatpush1.bf16.msra.mxu0 %v4351_v42  ;;  %4570 = vmatpush1.bf16.msra.mxu1 %v4353_v33  ;;  %v4360_v37 = vld [vmem:[#allocation4 + $0x48] sm:$0xff]  ;;  %v4362_v38 = vld [vmem:[#allocation4 + $0x58] sm:$0xff]  ;;  %v4359_v12 = vld [vmem:[#allocation4 + $0x40] sm:$0xff] }
 0xc19   :  { %4485 = vmatprep.subr.bf16.mxu0 %v4356_v61  ;;  %4571 = vmatprep.subr.bf16.mxu1 %v4358_v32  ;;  %v4361_v35 = vld [vmem:[#allocation4 + $0x50] sm:$0xff]  ;;  %v4364_v43 = vld [vmem:[#allocation4 + $0x68] sm:$0xff]  ;;  %v4366_v14 = vld [vmem:[#allocation4 + $0x78] sm:$0xff] }
 0xc1a   :  { %v4363_v24 = vld [vmem:[#allocation4 + $0x60] sm:$0xff]  ;;  %v4365_v13 = vld [vmem:[#allocation4 + $0x70] sm:$0xff]  ;;  %v4368_v29 = vld [vmem:[#allocation4 + $0x88] sm:$0xff] }
 0xc1b   :  { %v4370_v63 = vld [vmem:[#allocation4 + $0x98] sm:$0xff]  ;;  %v4367_v19 = vld [vmem:[#allocation4 + $0x80] sm:$0xff]  ;;  %v4369_v45 = vld [vmem:[#allocation4 + $0x90] sm:$0xff] }
 0xc1c   :  { %4486 = vmatpush1.bf16.msra.mxu0 %v4355_v25  ;;  %4572 = vmatpush1.bf16.msra.mxu1 %v4357_v36  ;;  %v4372_v20 = vld [vmem:[#allocation4 + $0xa8] sm:$0xff]  ;;  %v4374_v21 = vld [vmem:[#allocation4 + $0xb8] sm:$0xff]  ;;  %v4371_v27 = vld [vmem:[#allocation4 + $0xa0] sm:$0xff] }
 0xc1d   :  { %4487 = vmatprep.subr.bf16.mxu0 %v4360_v37  ;;  %4573 = vmatprep.subr.bf16.mxu1 %v4362_v38  ;;  %v4373_v16 = vld [vmem:[#allocation4 + $0xb0] sm:$0xff]  ;;  %v4376_v15 = vld [vmem:[#allocation4 + $0xc8] sm:$0xff]  ;;  %v4378_v3 = vld [vmem:[#allocation4 + $0xd8] sm:$0xff] }
 0xc1e   :  { %v4375_v7 = vld [vmem:[#allocation4 + $0xc0] sm:$0xff]  ;;  %v4377_v5 = vld [vmem:[#allocation4 + $0xd0] sm:$0xff]  ;;  %v4380_v34 = vld [vmem:[#allocation4 + $0xe8] sm:$0xff] }
 0xc1f   :  { %v4382_v18 = vld [vmem:[#allocation4 + $0xf8] sm:$0xff]  ;;  %v4379_v22 = vld [vmem:[#allocation4 + $0xe0] sm:$0xff]  ;;  %v4381_v1 = vld [vmem:[#allocation4 + $0xf0] sm:$0xff] }
 0xc20   :  { %4488 = vmatpush1.bf16.msra.mxu0 %v4359_v12  ;;  %4574 = vmatpush1.bf16.msra.mxu1 %v4361_v35  ;;  %v4384_v47 = vld [vmem:[#allocation4 + $0x108] sm:$0xff]  ;;  %v4386_v23 = vld [vmem:[#allocation4 + $0x118] sm:$0xff]  ;;  %v4383_v40 = vld [vmem:[#allocation4 + $0x100] sm:$0xff] }
 0xc21   :  { %4489 = vmatprep.subr.bf16.mxu0 %v4364_v43  ;;  %4575 = vmatprep.subr.bf16.mxu1 %v4366_v14  ;;  %v4385_v46 = vld [vmem:[#allocation4 + $0x110] sm:$0xff]  ;;  %v4388_v42 = vld [vmem:[#allocation4 + $0x128] sm:$0xff]  ;;  %v4390_v33 = vld [vmem:[#allocation4 + $0x138] sm:$0xff] }
 0xc22   :  { %v4387_v61 = vld [vmem:[#allocation4 + $0x120] sm:$0xff]  ;;  %v4389_v32 = vld [vmem:[#allocation4 + $0x130] sm:$0xff]  ;;  %v4392_v25 = vld [vmem:[#allocation4 + $0x148] sm:$0xff] }
 0xc23   :  { %v4394_v36 = vld [vmem:[#allocation4 + $0x158] sm:$0xff]  ;;  %v4391_v37 = vld [vmem:[#allocation4 + $0x140] sm:$0xff]  ;;  %v4393_v38 = vld [vmem:[#allocation4 + $0x150] sm:$0xff] }
 0xc24   :  { %4490 = vmatpush1.bf16.msra.mxu0 %v4363_v24  ;;  %4576 = vmatpush1.bf16.msra.mxu1 %v4365_v13  ;;  %v4396_v12 = vld [vmem:[#allocation4 + $0x168] sm:$0xff]  ;;  %v4398_v35 = vld [vmem:[#allocation4 + $0x178] sm:$0xff]  ;;  %v4395_v43 = vld [vmem:[#allocation4 + $0x160] sm:$0xff] }
 0xc25   :  { %4491 = vmatprep.subr.bf16.mxu0 %v4368_v29  ;;  %4577 = vmatprep.subr.bf16.mxu1 %v4370_v63  ;;  %v4397_v14 = vld [vmem:[#allocation4 + $0x170] sm:$0xff]  ;;  %v4400_v24 = vld [vmem:[#allocation4 + $0x188] sm:$0xff]  ;;  %v4402_v13 = vld [vmem:[#allocation4 + $0x198] sm:$0xff] }
 0xc26   :  { %v4399_v29 = vld [vmem:[#allocation4 + $0x180] sm:$0xff]  ;;  %v4401_v63 = vld [vmem:[#allocation4 + $0x190] sm:$0xff] }
 0xc28   :  { %4492 = vmatpush1.bf16.msra.mxu0 %v4367_v19  ;;  %4578 = vmatpush1.bf16.msra.mxu1 %v4369_v45  ;;  %v4404_v19 = vld [vmem:[#allocation4 + $0x1a8] sm:$0xff]  ;;  %v4406_v45 = vld [vmem:[#allocation4 + $0x1b8] sm:$0xff] }
 0xc29   :  { %4493 = vmatprep.subr.bf16.mxu0 %v4372_v20  ;;  %4579 = vmatprep.subr.bf16.mxu1 %v4374_v21  ;;  %v4403_v20 = vld [vmem:[#allocation4 + $0x1a0] sm:$0xff]  ;;  %v4405_v21 = vld [vmem:[#allocation4 + $0x1b0] sm:$0xff] }
 0xc2c   :  { %4494 = vmatpush1.bf16.msra.mxu0 %v4371_v27  ;;  %4580 = vmatpush1.bf16.msra.mxu1 %v4373_v16  ;;  %v4408_v27 = vld [vmem:[#allocation4 + $0x1c8] sm:$0xff]  ;;  %v4410_v16 = vld [vmem:[#allocation4 + $0x1d8] sm:$0xff] }
 0xc2d   :  { %4495 = vmatprep.subr.bf16.mxu0 %v4376_v15  ;;  %4581 = vmatprep.subr.bf16.mxu1 %v4378_v3  ;;  %v4407_v15 = vld [vmem:[#allocation4 + $0x1c0] sm:$0xff]  ;;  %v4409_v3 = vld [vmem:[#allocation4 + $0x1d0] sm:$0xff] }
 0xc30   :  { %4496 = vmatpush1.bf16.msra.mxu0 %v4375_v7  ;;  %4582 = vmatpush1.bf16.msra.mxu1 %v4377_v5  ;;  %v4412_v7 = vld [vmem:[#allocation4 + $0x1e8] sm:$0xff]  ;;  %v4414_v5 = vld [vmem:[#allocation4 + $0x1f8] sm:$0xff] }
 0xc31   :  { %4497 = vmatprep.subr.bf16.mxu0 %v4380_v34  ;;  %4583 = vmatprep.subr.bf16.mxu1 %v4382_v18  ;;  %v4411_v34 = vld [vmem:[#allocation4 + $0x1e0] sm:$0xff]  ;;  %v4413_v18 = vld [vmem:[#allocation4 + $0x1f0] sm:$0xff] }
 0xc34   :  { %4498 = vmatpush1.bf16.msra.mxu0 %v4379_v22  ;;  %4584 = vmatpush1.bf16.msra.mxu1 %v4381_v1  ;;  %v4416_v22 = vld [vmem:[#allocation4 + $0x208] sm:$0xff]  ;;  %v4418_v1 = vld [vmem:[#allocation4 + $0x218] sm:$0xff] }
 0xc35   :  { %4499 = vmatprep.subr.bf16.mxu0 %v4384_v47  ;;  %4585 = vmatprep.subr.bf16.mxu1 %v4386_v23  ;;  %v4479_v47 = vpack.c.bf16 %v10871_v4, %v10846_v9  ;;  %v4415_v23 = vld [vmem:[#allocation4 + $0x200] sm:$0xff]  ;;  %v4424_v9 = vld [vmem:[#allocation4 + $0x248] sm:$0xff]  ;;  %v4426_v4 = vld [vmem:[#allocation4 + $0x258] sm:$0xff] }
 0xc38   :  { %4500 = vmatpush1.bf16.msra.mxu0 %v4383_v40  ;;  %4586 = vmatpush1.bf16.msra.mxu1 %v4385_v46  ;;  %v4417_v40 = vld [vmem:[#allocation4 + $0x210] sm:$0xff]  ;;  %v4420_v46 = vld [vmem:[#allocation4 + $0x228] sm:$0xff] }
 0xc39   :  { %4501 = vmatprep.subr.bf16.mxu0 %v4388_v42  ;;  %4587 = vmatprep.subr.bf16.mxu1 %v4390_v33  ;;  %v4422_v42 = vld [vmem:[#allocation4 + $0x238] sm:$0xff]  ;;  %v4482_v33 = vpack.c.bf16 %v10882_v62, %v10865_v2  ;;  %v4427_v62 = vld [vmem:[#allocation4 + $0x260] sm:$0xff] }
 0xc3a   :  { %v4430_v2 = vld [vmem:[#allocation4 + $0x278] sm:$0xff] }
 0xc3c   :  { %4502 = vmatpush1.bf16.msra.mxu0 %v4387_v61  ;;  %4588 = vmatpush1.bf16.msra.mxu1 %v4389_v32  ;;  %v4419_v61 = vld [vmem:[#allocation4 + $0x220] sm:$0xff]  ;;  %v4421_v32 = vld [vmem:[#allocation4 + $0x230] sm:$0xff] }
 0xc3d   :  { %4503 = vmatprep.subr.bf16.mxu0 %v4392_v25  ;;  %4589 = vmatprep.subr.bf16.mxu1 %v4394_v36  ;;  %v4423_v25 = vld [vmem:[#allocation4 + $0x240] sm:$0xff]  ;;  %v4425_v36 = vld [vmem:[#allocation4 + $0x250] sm:$0xff] }
 0xc40   :  { %4504 = vmatpush1.bf16.msra.mxu0 %v4391_v37  ;;  %4590 = vmatpush1.bf16.msra.mxu1 %v4393_v38  ;;  %v4428_v37 = vld [vmem:[#allocation4 + $0x268] sm:$0xff]  ;;  %v4429_v38 = vld [vmem:[#allocation4 + $0x270] sm:$0xff] }
 0xc41   :  { %4505 = vmatprep.subr.bf16.mxu0 %v4396_v12  ;;  %4591 = vmatprep.subr.bf16.mxu1 %v4398_v35  ;;  %v4432_v12 = vld [vmem:[#allocation4 + $0x288] sm:$0xff]  ;;  %v4434_v35 = vld [vmem:[#allocation4 + $0x298] sm:$0xff] }
 0xc44   :  { %4506 = vmatpush1.bf16.msra.mxu0 %v4395_v43  ;;  %4592 = vmatpush1.bf16.msra.mxu1 %v4397_v14  ;;  %v4431_v43 = vld [vmem:[#allocation4 + $0x280] sm:$0xff]  ;;  %v4433_v14 = vld [vmem:[#allocation4 + $0x290] sm:$0xff] }
 0xc45   :  { %4507 = vmatprep.subr.bf16.mxu0 %v4400_v24  ;;  %4593 = vmatprep.subr.bf16.mxu1 %v4402_v13  ;;  %v4436_v24 = vld [vmem:[#allocation4 + $0x2a8] sm:$0xff]  ;;  %v4438_v13 = vld [vmem:[#allocation4 + $0x2b8] sm:$0xff] }
 0xc48   :  { %4508 = vmatpush1.bf16.msra.mxu0 %v4399_v29  ;;  %4594 = vmatpush1.bf16.msra.mxu1 %v4401_v63  ;;  %v4435_v29 = vld [vmem:[#allocation4 + $0x2a0] sm:$0xff]  ;;  %v4437_v63 = vld [vmem:[#allocation4 + $0x2b0] sm:$0xff] }
 0xc49   :  { %4509 = vmatprep.subr.bf16.mxu0 %v4404_v19  ;;  %4595 = vmatprep.subr.bf16.mxu1 %v4406_v45  ;;  %v4440_v19 = vld [vmem:[#allocation4 + $0x2c8] sm:$0xff]  ;;  %v4442_v45 = vld [vmem:[#allocation4 + $0x2d8] sm:$0xff] }
 0xc4c   :  { %4510 = vmatpush1.bf16.msra.mxu0 %v4403_v20  ;;  %4596 = vmatpush1.bf16.msra.mxu1 %v4405_v21  ;;  %v4439_v20 = vld [vmem:[#allocation4 + $0x2c0] sm:$0xff]  ;;  %v4441_v21 = vld [vmem:[#allocation4 + $0x2d0] sm:$0xff] }
 0xc4d   :  { %4511 = vmatprep.subr.bf16.mxu0 %v4408_v27  ;;  %4597 = vmatprep.subr.bf16.mxu1 %v4410_v16  ;;  %v4444_v27 = vld [vmem:[#allocation4 + $0x2e8] sm:$0xff]  ;;  %v4446_v16 = vld [vmem:[#allocation4 + $0x2f8] sm:$0xff] }
 0xc50   :  { %4512 = vmatpush1.bf16.msra.mxu0 %v4407_v15  ;;  %4598 = vmatpush1.bf16.msra.mxu1 %v4409_v3  ;;  %v4443_v15 = vld [vmem:[#allocation4 + $0x2e0] sm:$0xff]  ;;  %v4445_v3 = vld [vmem:[#allocation4 + $0x2f0] sm:$0xff] }
 0xc51   :  { %4513 = vmatprep.subr.bf16.mxu0 %v4412_v7  ;;  %4599 = vmatprep.subr.bf16.mxu1 %v4414_v5  ;;  %v4448_v7 = vld [vmem:[#allocation4 + $0x308] sm:$0xff]  ;;  %v4450_v5 = vld [vmem:[#allocation4 + $0x318] sm:$0xff] }
 0xc54   :  { %4514 = vmatpush1.bf16.msra.mxu0 %v4411_v34  ;;  %4600 = vmatpush1.bf16.msra.mxu1 %v4413_v18  ;;  %v4447_v34 = vld [vmem:[#allocation4 + $0x300] sm:$0xff]  ;;  %v4449_v18 = vld [vmem:[#allocation4 + $0x310] sm:$0xff] }
 0xc55   :  { %4526 = vmatprep.subr.bf16.mxu0 %v4416_v22  ;;  %4612 = vmatprep.subr.bf16.mxu1 %v4418_v1  ;;  %v4452_v22 = vld [vmem:[#allocation4 + $0x328] sm:$0xff]  ;;  %v4454_v1 = vld [vmem:[#allocation4 + $0x338] sm:$0xff] }
 0xc57   :  { %4516 = vmatmul.mubr.bf16.vlgmr.msra.gmra.mrb[24].mxu0 %v4479_v47  ;;  %4602 = vmatmul.mubr.bf16.vlgmr.msra.gmra.mrb[24].mxu1 %v4479_v47  ;;  %v4451_v47 = vld [vmem:[#allocation4 + $0x320] sm:$0xff] }
 0xc58   :  { %4527 = vmatpush1.bf16.msra.mxu0 %v4415_v23  ;;  %4613 = vmatpush1.bf16.msra.mxu1 %v4417_v40  ;;  %v4453_v23 = vld [vmem:[#allocation4 + $0x330] sm:$0xff]  ;;  %v4456_v40 = vld [vmem:[#allocation4 + $0x348] sm:$0xff] }
 0xc59   :  { %4528 = vmatprep.subr.bf16.mxu0 %v4420_v46  ;;  %4614 = vmatprep.subr.bf16.mxu1 %v4422_v42  ;;  %v4458_v46 = vld [vmem:[#allocation4 + $0x358] sm:$0xff]  ;;  %v4455_v42 = vld [vmem:[#allocation4 + $0x340] sm:$0xff] }
 0xc5a   :  { %4558 = vmatprep.mubr.bf16.mxu0 %v4482_v33  ;;  %4644 = vmatprep.mubr.bf16.mxu1 %v4482_v33  ;;  %v4457_v33 = vld [vmem:[#allocation4 + $0x350] sm:$0xff] }
 0xc5c   :  { %4529 = vmatpush1.bf16.msra.mxu0 %v4419_v61  ;;  %4615 = vmatpush1.bf16.msra.mxu1 %v4421_v32  ;;  %v4460_v61 = vld [vmem:[#allocation4 + $0x368] sm:$0xff]  ;;  %v4462_v32 = vld [vmem:[#allocation4 + $0x378] sm:$0xff] }
 0xc5d   :  { %4530 = vmatprep.subr.bf16.mxu0 %v4424_v9  ;;  %4616 = vmatprep.subr.bf16.mxu1 %v4426_v4  ;;  %v4459_v9 = vld [vmem:[#allocation4 + $0x360] sm:$0xff]  ;;  %v4461_v4 = vld [vmem:[#allocation4 + $0x370] sm:$0xff] }
 0xc60   :  { %4531 = vmatpush1.bf16.msra.mxu0 %v4423_v25  ;;  %4617 = vmatpush1.bf16.msra.mxu1 %v4425_v36  ;;  %v4464_v25 = vld [vmem:[#allocation4 + $0x388] sm:$0xff]  ;;  %v4466_v36 = vld [vmem:[#allocation4 + $0x398] sm:$0xff] }
 0xc61   :  { %4532 = vmatprep.subr.bf16.mxu0 %v4428_v37  ;;  %4618 = vmatprep.subr.bf16.mxu1 %v4430_v2  ;;  %v4463_v37 = vld [vmem:[#allocation4 + $0x380] sm:$0xff]  ;;  %v4465_v2 = vld [vmem:[#allocation4 + $0x390] sm:$0xff] }
 0xc64   :  { %4533 = vmatpush1.bf16.msra.mxu0 %v4427_v62  ;;  %4619 = vmatpush1.bf16.msra.mxu1 %v4429_v38  ;;  %v4468_v62 = vld [vmem:[#allocation4 + $0x3a8] sm:$0xff]  ;;  %v4470_v38 = vld [vmem:[#allocation4 + $0x3b8] sm:$0xff] }
 0xc65   :  { %4534 = vmatprep.subr.bf16.mxu0 %v4432_v12  ;;  %4620 = vmatprep.subr.bf16.mxu1 %v4434_v35  ;;  %v4467_v12 = vld [vmem:[#allocation4 + $0x3a0] sm:$0xff]  ;;  %v4469_v35 = vld [vmem:[#allocation4 + $0x3b0] sm:$0xff] }
 0xc68   :  { %4535 = vmatpush1.bf16.msra.mxu0 %v4431_v43  ;;  %4621 = vmatpush1.bf16.msra.mxu1 %v4433_v14  ;;  %v4472_v43 = vld [vmem:[#allocation4 + $0x3c8] sm:$0xff]  ;;  %v4474_v14 = vld [vmem:[#allocation4 + $0x3d8] sm:$0xff] }
 0xc69   :  { %4536 = vmatprep.subr.bf16.mxu0 %v4436_v24  ;;  %4622 = vmatprep.subr.bf16.mxu1 %v4438_v13  ;;  %v4471_v24 = vld [vmem:[#allocation4 + $0x3c0] sm:$0xff]  ;;  %v4473_v13 = vld [vmem:[#allocation4 + $0x3d0] sm:$0xff] }
 0xc6c   :  { %4537 = vmatpush1.bf16.msra.mxu0 %v4435_v29  ;;  %4623 = vmatpush1.bf16.msra.mxu1 %v4437_v63  ;;  %v4476_v29 = vld [vmem:[#allocation4 + $0x3e8] sm:$0xff]  ;;  %v4478_v63 = vld [vmem:[#allocation4 + $0x3f8] sm:$0xff] }
 0xc6d   :  { %4538 = vmatprep.subr.bf16.mxu0 %v4440_v19  ;;  %4624 = vmatprep.subr.bf16.mxu1 %v4442_v45  ;;  %v4475_v19 = vld [vmem:[#allocation4 + $0x3e0] sm:$0xff]  ;;  %v4477_v45 = vld [vmem:[#allocation4 + $0x3f0] sm:$0xff] }
 0xc70   :  { %4539 = vmatpush1.bf16.msra.mxu0 %v4439_v20  ;;  %4625 = vmatpush1.bf16.msra.mxu1 %v4441_v21  ;;  %v4481_v20 = vpack.c.bf16 %v10878_v41, %v10857_v48 }
 0xc71   :  { %4540 = vmatprep.subr.bf16.mxu0 %v4444_v27  ;;  %4626 = vmatprep.subr.bf16.mxu1 %v4446_v16 }
 0xc74   :  { %4541 = vmatpush1.bf16.msra.mxu0 %v4443_v15  ;;  %4627 = vmatpush1.bf16.msra.mxu1 %v4445_v3 }
 0xc75   :  { %4542 = vmatprep.subr.bf16.mxu0 %v4448_v7  ;;  %4628 = vmatprep.subr.bf16.mxu1 %v4450_v5 }
 0xc78   :  { %4543 = vmatpush1.bf16.msra.mxu0 %v4447_v34  ;;  %4629 = vmatpush1.bf16.msra.mxu1 %v4449_v18 }
 0xc79   :  { %4544 = vmatprep.subr.bf16.mxu0 %v4452_v22  ;;  %4630 = vmatprep.subr.bf16.mxu1 %v4454_v1 }
 0xc7c   :  { %4545 = vmatpush1.bf16.msra.mxu0 %v4451_v47  ;;  %4631 = vmatpush1.bf16.msra.mxu1 %v4453_v23 }
 0xc7d   :  { %4546 = vmatprep.subr.bf16.mxu0 %v4456_v40  ;;  %4632 = vmatprep.subr.bf16.mxu1 %v4458_v46 }
 0xc80   :  { %4547 = vmatpush1.bf16.msra.mxu0 %v4455_v42  ;;  %4633 = vmatpush1.bf16.msra.mxu1 %v4457_v33 }
 0xc81   :  { %4548 = vmatprep.subr.bf16.mxu0 %v4460_v61  ;;  %4634 = vmatprep.subr.bf16.mxu1 %v4462_v32 }
 0xc84   :  { %4549 = vmatpush1.bf16.msra.mxu0 %v4459_v9  ;;  %4635 = vmatpush1.bf16.msra.mxu1 %v4461_v4 }
 0xc85   :  { %4550 = vmatprep.subr.bf16.mxu0 %v4464_v25  ;;  %4636 = vmatprep.subr.bf16.mxu1 %v4466_v36 }
 0xc88   :  { %4551 = vmatpush1.bf16.msra.mxu0 %v4463_v37  ;;  %4637 = vmatpush1.bf16.msra.mxu1 %v4465_v2 }
 0xc89   :  { %4552 = vmatprep.subr.bf16.mxu0 %v4468_v62  ;;  %4638 = vmatprep.subr.bf16.mxu1 %v4470_v38 }
 0xc8c   :  { %4553 = vmatpush1.bf16.msra.mxu0 %v4467_v12  ;;  %4639 = vmatpush1.bf16.msra.mxu1 %v4469_v35 }
 0xc8d   :  { %4554 = vmatprep.subr.bf16.mxu0 %v4472_v43  ;;  %4640 = vmatprep.subr.bf16.mxu1 %v4474_v14 }
 0xc90   :  { %4555 = vmatpush1.bf16.msra.mxu0 %v4471_v24  ;;  %4641 = vmatpush1.bf16.msra.mxu1 %v4473_v13 }
 0xc91   :  { %4556 = vmatprep.subr.bf16.mxu0 %v4476_v29  ;;  %4642 = vmatprep.subr.bf16.mxu1 %v4478_v63 }
 0xc94   :  { %4557 = vmatpush1.bf16.msra.mxu0 %v4475_v19  ;;  %4643 = vmatpush1.bf16.msra.mxu1 %v4477_v45 }
 0xc97   :  { %4559 = vmatmul.mubr.bf16.vlgmr.msra.gmra.mrb[24].mxu0 %v4481_v20  ;;  %4645 = vmatmul.mubr.bf16.vlgmr.msra.gmra.mrb[24].mxu1 %v4481_v20 }
 0xc98   :  { %4719 = vmatprep.mubr.f32.mxu0 %v9849_v17  ;;  %4796 = vmatprep.mubr.f32.mxu1 %v9849_v17 }
 0xd6a   :  { %v4560_v21 = vpop.f32.mrb[24].mxu0  ;;  %v4646_v27 = vpop.f32.mrb[24].mxu1 }
 0xd6b   :  { %v4562_v16 = vpop.f32.mrb[25].mxu0  ;;  %v4648_v15 = vpop.f32.mrb[25].mxu1 }
 0xd6c   :  { %v4564_v3 = vpop.f32.mrb[26].mxu0  ;;  %v4650_v7 = vpop.f32.mrb[26].mxu1 }
 0xd6d   :  { %v8721_v5 = vpack.c.bf16 %v4564_v3, %v4560_v21  ;;  %v8725_v34 = vpack.c.bf16 %v4650_v7, %v4646_v27  ;;  %v4566_v18 = vpop.f32.mrb[27].mxu0  ;;  %v4652_v22 = vpop.f32.mrb[27].mxu1 }
 0xd6e   :  { %v8719_v1 = vpack.c.bf16 %v4566_v18, %v4562_v16  ;;  %v8723_v48 = vpack.c.bf16 %v4652_v22, %v4648_v15 }
 0xd70   :  { %8720 = vmatprep.subr.bf16.mxu0 %v8719_v1  ;;  %8724 = vmatprep.subr.bf16.mxu1 %v8723_v48 }
 0xd71   :  { %8722 = vmatpush1.bf16.msra.mxu0 %v8721_v5  ;;  %8726 = vmatpush1.bf16.msra.mxu1 %v8725_v34 }
 0xd74   :  { %8338 = vmatmul.mubr.msk.f32.vlgmr.msra.gmra.mrb[28].mxu0 %vm2706_vm0, %v10392_v30  ;;  %8340 = vmatmul.mubr.msk.f32.vlgmr.msra.gmra.mrb[28].mxu1 %vm2706_vm0, %v10392_v30 }
 0xd75   :  { %4725 = vmatprep.mubr.f32.mxu0 %v9849_v17  ;;  %4802 = vmatprep.mubr.f32.mxu1 %v9849_v17 }
 0xd78   :  { %8339 = vmatmul.mubr.msk.f32.gmra.mrb[30].mxu0 %vm2706_vm0, %v10399_v31  ;;  %8341 = vmatmul.mubr.msk.f32.gmra.mrb[30].mxu1 %vm2706_vm0, %v10399_v31 }
 0xe47   :  { %v4721_v41 = vpop.f32.mrb[28].mxu0  ;;  %v4798_v47 = vpop.f32.mrb[28].mxu1 }
 0xe48   :  { %v4819_v23 = vmul.f32 %v4721_v41, %v4721_v41  ;;  %v4723_v40 = vpop.f32.mrb[29].mxu0  ;;  %v4800_v46 = vpop.f32.mrb[29].mxu1  ;;  %v4821_v61 = vmul.f32 %v4798_v47, %v4798_v47 }
 0xe49   :  { %v4809_v42 = vadd.f32 %v4723_v40, %v4721_v41  ;;  %v4820_v33 = vmul.f32 %v4723_v40, %v4723_v40  ;;  %v4822_v43 = vmul.f32 %v4800_v46, %v4800_v46 }
 0xe4b   :  { %v4727_v32 = vpop.f32.mrb[30].mxu0  ;;  %v4804_v9 = vpop.f32.mrb[30].mxu1  ;;  %v4810_v4 = vadd.f32 %v4809_v42, %v4798_v47  ;;  %v4827_v25 = vadd.f32 %v4820_v33, %v4819_v23  ;;  %v8342_v23 = vld [vmem:[%s11441_s12 + $0x18] sm:$0xff] }
 0xe4c   :  { %v4823_v36 = vmul.f32 %v4727_v32, %v4727_v32  ;;  %v4729_v37 = vpop.f32.mrb[31].mxu0  ;;  %v4806_v2 = vpop.f32.mrb[31].mxu1  ;;  %v4825_v12 = vmul.f32 %v4804_v9, %v4804_v9 }
 0xe4d   :  { %v4814_v62 = vadd.f32 %v4729_v37, %v4727_v32  ;;  %v4824_v38 = vmul.f32 %v4729_v37, %v4729_v37  ;;  %v4811_v35 = vadd.f32 %v4810_v4, %v4800_v46  ;;  %v4828_v14 = vadd.f32 %v4827_v25, %v4821_v61  ;;  %v8343_v61 = vld [vmem:[%s11442_s29 + $0x18] sm:$0xff] }
 0xe4e   :  { %v4826_v63 = vmul.f32 %v4806_v2, %v4806_v2 }
 0xe4f   :  { %v4832_v24 = vadd.f32 %v4824_v38, %v4823_v36  ;;  %4812 = vadd.xlane.f32.xlu0 %v4811_v35  ;;  %v4815_v13 = vadd.f32 %v4814_v62, %v4804_v9  ;;  %v4829_v29 = vadd.f32 %v4828_v14, %v4822_v43 }
 0xe51   :  { %v4816_v19 = vadd.f32 %v4815_v13, %v4806_v2  ;;  %v4833_v45 = vadd.f32 %v4832_v24, %v4825_v12  ;;  %4830 = vadd.xlane.f32.xlu1 %v4829_v29 }
 0xe53   :  { %4817 = vadd.xlane.f32.xlu0 %v4816_v19  ;;  %v4834_v20 = vadd.f32 %v4833_v45, %v4826_v63 }
 0xe55   :  { %4835 = vadd.xlane.f32.xlu1 %v4834_v20 }
 0xedc   :  { %v4813_v21 = vpop.xlane.xlu0 %4812 }
 0xede   :  { %v4831_v27 = vpop.xlane.xlu1 %4830 }
 0xee0   :  { %v4818_v16 = vpop.xlane.xlu0 %4817 }
 0xee1   :  { %v4837_v15 = vadd.f32 %v4818_v16, %v4813_v21 }
 0xee2   :  { %v4836_v7 = vpop.xlane.xlu1 %4835 }
 0xee3   :  { %v4839_v3 = vmul.f32 0.0009765625, %v4837_v15  ;;  %v4838_v5 = vadd.f32 %v4836_v7, %v4831_v27 }
 0xee5   :  { %v4841_v34 = vmul.f32 %v4839_v3, %v4839_v3  ;;  %v4840_v18 = vmul.f32 0.0009765625, %v4838_v5 }
 0xee7   :  { %v4842_v22 = vsub.f32 %v4840_v18, %v4841_v34 }
 0xee9   :  { %v4843_v1 = vmax.f32 %v4842_v22, 0.0 }
 0xeeb   :  { %v4846_v48 = vadd.f32 1e-05, %v4843_v1 }
 0xeed   :  { %9363 = vrsqrt.f32 %v4846_v48 }
 0xef7   :  { %v9364_v42 = vpop.eup %9363 }
 0xef8   :  { %v4848_v33 = vmul.f32 %v9364_v42, %v8342_v23 }
 0xefa   :  { %4855 = vperm.xlu0 %9361, %v4848_v33   ;;  %v4851_v4 = vmul.f32 %v4848_v33, %v4839_v3 }
 0xefc   :  { %v4852_v25 = vsub.f32 %v8343_v61, %v4851_v4 }
 0xefe   :  { %4868 = vperm.xlu1 %9362, %v4852_v25  }
 0xf79   :  { %v4856_v36 = vpop.permute.xlu0 %4855 }
 0xf7a   :  { %v4858_v62 = vmul.f32 %v4856_v36, %v4721_v41  ;;  %v4859_v38 = vmul.f32 %v4856_v36, %v4723_v40  ;;  %v4860_v12 = vmul.f32 %v4856_v36, %v4798_v47  ;;  %v4861_v35 = vmul.f32 %v4856_v36, %v4800_v46 }
 0xf7b   :  { %v4862_v43 = vmul.f32 %v4856_v36, %v4727_v32  ;;  %v4863_v14 = vmul.f32 %v4856_v36, %v4729_v37  ;;  %v4864_v24 = vmul.f32 %v4856_v36, %v4804_v9  ;;  %v4865_v20 = vmul.f32 %v4856_v36, %v4806_v2 }
 0xf7d   :  { %v4869_v13 = vpop.permute.xlu1 %4868 }
 0xf7e   :  { %v4871_v29 = vadd.f32 %v4869_v13, %v4858_v62  ;;  %v4872_v63 = vadd.f32 %v4869_v13, %v4859_v38  ;;  %v4873_v19 = vadd.f32 %v4869_v13, %v4860_v12  ;;  %v4874_v45 = vadd.f32 %v4869_v13, %v4861_v35 }
 0xf7f   :  { %v4875_v21 = vadd.f32 %v4869_v13, %v4862_v43  ;;  %v4876_v27 = vadd.f32 %v4869_v13, %v4863_v14  ;;  %v4877_v16 = vadd.f32 %v4869_v13, %v4864_v24  ;;  %v4878_v46 = vadd.f32 %v4869_v13, %v4865_v20 }
 0xf80   :  { %v10911_v15 = vadd.f32 %v4871_v29, %v10556_v28  ;;  %v10914_v41 = vadd.f32 %v4872_v63, %v10563_v39  ;;  %v10917_v47 = vadd.f32 %v4873_v19, %v10569_v44  ;;  %v10920_v40 = vadd.f32 %v4874_v45, %v10577_v0 }
 0xf81   :  { %v10923_v32 = vadd.f32 %v4875_v21, %v10583_v6  ;;  %v10926_v9 = vadd.f32 %v4876_v27, %v10589_v10  ;;  %v10932_v2 = vadd.f32 %v4877_v16, %v10592_v26  ;;  %v10937_v3 = vadd.f32 %v4878_v46, %v10596_v11 }
 0xf82   :  { %v4887_v37 = vmin.f32 %v10911_v15, 20.0  ;;  %v4888_v28 = vmin.f32 %v10914_v41, 20.0  ;;  %v4889_v39 = vmin.f32 %v10917_v47, 20.0  ;;  %v4890_v44 = vmin.f32 %v10920_v40, 20.0 }
 0xf83   :  { %v4891_v0 = vmin.f32 %v10923_v32, 20.0  ;;  %v4892_v6 = vmin.f32 %v10926_v9, 20.0  ;;  %v4893_v34 = vmin.f32 %v10932_v2, 20.0  ;;  %v4894_v26 = vmin.f32 %v10937_v3, 20.0 }
 0xf84   :  { %v4903_v10 = vmul.f32 1.442695, %v4887_v37  ;;  %v4905_v7 = vmul.f32 1.442695, %v4888_v28  ;;  %v4907_v5 = vmul.f32 1.442695, %v4889_v39 }
 0xf85   :  { %v4909_v18 = vmul.f32 1.442695, %v4890_v44  ;;  %v4911_v22 = vmul.f32 1.442695, %v4891_v0  ;;  %v4913_v1 = vmul.f32 1.442695, %v4892_v6 }
 0xf86   :  { %9365 = vpow2.f32 %v4903_v10  ;;  %v4915_v48 = vmul.f32 1.442695, %v4893_v34  ;;  %v4917_v11 = vmul.f32 1.442695, %v4894_v26  ;;  %vm4895_vm4 = vcmp.gt.f32.partialorder %v10911_v15, 20.0 }
 0xf87   :  { %9367 = vpow2.f32 %v4905_v7  ;;  %vm4896_vm5 = vcmp.gt.f32.partialorder %v10914_v41, 20.0  ;;  %vm4897_vm6 = vcmp.gt.f32.partialorder %v10917_v47, 20.0  ;;  %vm4898_vm7 = vcmp.gt.f32.partialorder %v10920_v40, 20.0 }
 0xf88   :  { %9369 = vpow2.f32 %v4907_v5  ;;  %vm4899_vm12 = vcmp.gt.f32.partialorder %v10923_v32, 20.0  ;;  %vm4900_vm15 = vcmp.gt.f32.partialorder %v10926_v9, 20.0  ;;  %vm4901_vm1 = vcmp.gt.f32.partialorder %v10932_v2, 20.0 }
 0xf89   :  { %9371 = vpow2.f32 %v4909_v18 }
 0xf8a   :  { %9373 = vpow2.f32 %v4911_v22 }
 0xf8b   :  { %9375 = vpow2.f32 %v4913_v1 }
 0xf8c   :  { %9377 = vpow2.f32 %v4915_v48 }
 0xf8d   :  { %9379 = vpow2.f32 %v4917_v11 }
 0xf90   :  { %v9366_v23 = vpop.eup %9365 }
 0xf91   :  { %v9368_v42 = vpop.eup %9367  ;;  %v4919_v33 = vadd.f32 1.0, %v9366_v23  ;;  %v4922_v38 = vmul.f32 -0.5, %v9366_v23  ;;  %v4925_v63 = vand.u32 2147483647, %v9366_v23 }
 0xf92   :  { %v9370_v61 = vpop.eup %9369  ;;  %v4928_v4 = vadd.f32 1.0, %v9368_v42  ;;  %v4931_v12 = vmul.f32 -0.5, %v9368_v42  ;;  %v4934_v19 = vand.u32 2147483647, %v9368_v42 }
 0xf93   :  { %v10942_v25 = vpop.eup %9371  ;;  %9381 = vlog2.f32 %v4919_v33  ;;  %v4937_v36 = vadd.f32 1.0, %v9370_v61  ;;  %v4940_v24 = vmul.f32 -0.5, %v9370_v61  ;;  %v4923_v29 = vadd.f32 1.0, %v4922_v38 }
 0xf94   :  { %v10944_v62 = vpop.eup %9373  ;;  %9383 = vlog2.f32 %v4928_v4  ;;  %v4946_v35 = vadd.f32 1.0, %v10942_v25  ;;  %v4932_v20 = vadd.f32 1.0, %v4931_v12  ;;  %v4949_v21 = vmul.f32 -0.5, %v10942_v25 }
 0xf95   :  { %9385 = vlog2.f32 %v4937_v36  ;;  %v10947_v43 = vpop.eup %9375  ;;  %v4955_v13 = vadd.f32 1.0, %v10944_v62  ;;  %v4941_v46 = vadd.f32 1.0, %v4940_v24  ;;  %v4943_v37 = vand.u32 2147483647, %v9370_v61 }
 0xf96   :  { %v10949_v14 = vpop.eup %9377  ;;  %9387 = vlog2.f32 %v4946_v35  ;;  %v4964_v27 = vadd.f32 1.0, %v10947_v43  ;;  %vm10961_vm8 = vcmp.lt.f32.partialorder %v4925_v63, 0.0004427343  ;;  %v4958_v39 = vmul.f32 -0.5, %v10944_v62 }
 0xf97   :  { %v10952_v45 = vpop.eup %9379  ;;  %9389 = vlog2.f32 %v4955_v13  ;;  %v4973_v16 = vadd.f32 1.0, %v10949_v14  ;;  %v4924_v6 = vmul.f32 %v9366_v23, %v4923_v29  ;;  %v4933_v10 = vmul.f32 %v9368_v42, %v4932_v20 }
 0xf98   :  { %9391 = vlog2.f32 %v4964_v27  ;;  %v4982_v44 = vadd.f32 1.0, %v10952_v45  ;;  %vm10967_vm9 = vcmp.lt.f32.partialorder %v4934_v19, 0.0004427343  ;;  %v4950_v5 = vadd.f32 1.0, %v4949_v21 }
 0xf99   :  { %9393 = vlog2.f32 %v4973_v16  ;;  %v4952_v22 = vand.u32 2147483647, %v10942_v25  ;;  %v4967_v26 = vmul.f32 -0.5, %v10947_v43  ;;  %v4942_v11 = vmul.f32 %v9370_v61, %v4941_v46 }
 0xf9a   :  { %9395 = vlog2.f32 %v4982_v44  ;;  %vm10973_vm10 = vcmp.lt.f32.partialorder %v4943_v37, 0.0004427343  ;;  %v4976_v23 = vmul.f32 -0.5, %v10949_v14  ;;  %v4959_v36 = vadd.f32 1.0, %v4958_v39 }
 0xf9b   :  { %v4961_v38 = vand.u32 2147483647, %v10944_v62  ;;  %v4951_v24 = vmul.f32 %v10942_v25, %v4950_v5  ;;  %v4985_v61 = vmul.f32 -0.5, %v10952_v45  ;;  %v4968_v19 = vadd.f32 1.0, %v4967_v26 }
 0xf9c   :  { %vm4953_vm11 = vcmp.lt.f32.partialorder %v4952_v22, 0.0004427343  ;;  %v4970_v25 = vand.u32 2147483647, %v10947_v43  ;;  %v4977_v27 = vadd.f32 1.0, %v4976_v23  ;;  %v4960_v37 = vmul.f32 %v10944_v62, %v4959_v36 }
 0xf9d   :  { %v9382_v0 = vpop.eup %9381  ;;  %v4979_v28 = vand.u32 2147483647, %v10949_v14  ;;  %vm4962_vm13 = vcmp.lt.f32.partialorder %v4961_v38, 0.0004427343  ;;  %v4988_v7 = vand.u32 2147483647, %v10952_v45 }
 0xf9e   :  { %v9384_v34 = vpop.eup %9383  ;;  %v4921_v18 = vmul.f32 0.6931472, %v9382_v0  ;;  %vm4971_vm14 = vcmp.lt.f32.partialorder %v4970_v25, 0.0004427343  ;;  %v4978_v5 = vmul.f32 %v10949_v14, %v4977_v27 }
 0xf9f   :  { %v9386_v1 = vpop.eup %9385  ;;  %v4930_v48 = vmul.f32 0.6931472, %v9384_v34  ;;  %vm4980_vm2 = vcmp.lt.f32.partialorder %v4979_v28, 0.0004427343  ;;  %vm4989_vm3 = vcmp.lt.f32.partialorder %v4988_v7, 0.0004427343 }
 0xfa0   :  { %v4927_v42 = vsel %vm10961_vm8, %v4924_v6, %v4921_v18  ;;  %v4939_v4 = vmul.f32 0.6931472, %v9386_v1  ;;  %v9388_v12 = vpop.eup %9387 }
 0xfa1   :  { %v4936_v35 = vsel %vm10967_vm9, %v4933_v10, %v4930_v48  ;;  %v10988_v13 = vsel %vm4895_vm4, %v10911_v15, %v4927_v42  ;;  %v4948_v63 = vmul.f32 0.6931472, %v9388_v12  ;;  %v9390_v21 = vpop.eup %9389  ;;  %v4969_v10 = vmul.f32 %v10947_v43, %v4968_v19 }
 0xfa2   :  { %v4945_v29 = vsel %vm10973_vm10, %v4942_v11, %v4939_v4  ;;  %v4992_v20 = vsel %vm4896_vm5, %v10914_v41, %v4936_v35  ;;  %v4957_v46 = vmul.f32 0.6931472, %v9390_v21  ;;  %v9392_v39 = vpop.eup %9391  ;;  %v4986_v41 = vadd.f32 1.0, %v4985_v61 }
 0xfa3   :  { %v10999_v16 = vsel %vm4897_vm6, %v10917_v47, %v4945_v29  ;;  %v4954_v15 = vsel %vm4953_vm11, %v4951_v24, %v4948_v63  ;;  %v9394_v0 = vpop.eup %9393  ;;  %v4966_v47 = vmul.f32 0.6931472, %v9392_v39  ;;  %vm4902_vm4 = vcmp.gt.f32.partialorder %v10937_v3, 20.0 }
 0xfa4   :  { %v11007_v44 = vsel %vm4898_vm7, %v10920_v40, %v4954_v15  ;;  %v4963_v6 = vsel %vm4962_vm13, %v4960_v37, %v4957_v46  ;;  %v4975_v62 = vmul.f32 0.6931472, %v9394_v0  ;;  %v9396_v18 = vpop.eup %9395  ;;  %v4987_v43 = vmul.f32 %v10952_v45, %v4986_v41 }
 0xfa5   :  { %v11013_v34 = vsel %vm4899_vm12, %v10923_v32, %v4963_v6  ;;  %v4972_v40 = vsel %vm4971_vm14, %v4969_v10, %v4966_v47  ;;  %v4984_v26 = vmul.f32 0.6931472, %v9396_v18 }
 0xfa6   :  { %v4981_v22 = vsel %vm4980_vm2, %v4978_v5, %v4975_v62  ;;  %v4996_v1 = vsel %vm4900_vm15, %v10926_v9, %v4972_v40 }
 0xfa7   :  { %v11020_v48 = vsel %vm4901_vm1, %v10932_v2, %v4981_v22  ;;  %v4990_v32 = vsel %vm4989_vm3, %v4987_v43, %v4984_v26 }
 0xfa8   :  { %v11024_v14 = vsel %vm4902_vm4, %v10937_v3, %v4990_v32 }
 0xfa9   :  { %9789 = dma.done.wait [#allocation18 + $0x3], 8192 }
 0xfaa   :  { %9790 = vsyncadd [#allocation18 + $0x3], 4294959104  ;;  %v5067_v11 = vpack.c.bf16 %v4996_v1, %v4992_v20  ;;  %5220 = vmatprep.mubr.f32.mxu1 %v9849_v17  ;;  %9397 = vset.pattern.permute.xlu0 %v9850_v8  ;;  %v5003_v9 = vld [vmem:[#allocation5 + $0x8] sm:$0xff]  ;;  %v5002_v45 = vld [vmem:[#allocation5] sm:$0xff]  ;;  %v5066_v5 = vpack.c.bf16 %v11013_v34, %v10988_v13  ;;  %v5069_v18 = vpack.c.bf16 %v11024_v14, %v11007_v44 }
 0xfab   :  { %9398 = vset.pattern.permute.xlu1 %v9850_v8  ;;  %v5005_v2 = vld [vmem:[#allocation5 + $0x18] sm:$0xff]  ;;  %5070 = vmatprep.subr.bf16.mxu0 %v5003_v9  ;;  %v5004_v33 = vld [vmem:[#allocation5 + $0x10] sm:$0xff]  ;;  %v5007_v23 = vld [vmem:[#allocation5 + $0x28] sm:$0xff] }
 0xfac   :  { %5102 = vmatprep.mubr.bf16.mxu0 %v5067_v11  ;;  %5071 = vmatpush1.bf16.msra.mxu0 %v5002_v45  ;;  %v5006_v3 = vld [vmem:[#allocation5 + $0x20] sm:$0xff]  ;;  %v5009_v42 = vld [vmem:[#allocation5 + $0x38] sm:$0xff]  ;;  %v5008_v4 = vld [vmem:[#allocation5 + $0x30] sm:$0xff] }
 0xfad   :  { %5072 = vmatprep.subr.bf16.mxu0 %v5005_v2  ;;  %v5011_v36 = vld [vmem:[#allocation5 + $0x48] sm:$0xff]  ;;  %v5010_v38 = vld [vmem:[#allocation5 + $0x40] sm:$0xff]  ;;  %v5013_v12 = vld [vmem:[#allocation5 + $0x58] sm:$0xff] }
 0xfae   :  { %v5012_v35 = vld [vmem:[#allocation5 + $0x50] sm:$0xff]  ;;  %v5015_v24 = vld [vmem:[#allocation5 + $0x68] sm:$0xff]  ;;  %v5014_v61 = vld [vmem:[#allocation5 + $0x60] sm:$0xff] }
 0xfaf   :  { %v5017_v29 = vld [vmem:[#allocation5 + $0x78] sm:$0xff]  ;;  %v5016_v63 = vld [vmem:[#allocation5 + $0x70] sm:$0xff]  ;;  %v5019_v19 = vld [vmem:[#allocation5 + $0x88] sm:$0xff] }
 0xfb0   :  { %5073 = vmatpush1.bf16.msra.mxu0 %v5004_v33  ;;  %v5018_v20 = vld [vmem:[#allocation5 + $0x80] sm:$0xff]  ;;  %v5021_v21 = vld [vmem:[#allocation5 + $0x98] sm:$0xff]  ;;  %v5020_v25 = vld [vmem:[#allocation5 + $0x90] sm:$0xff] }
 0xfb1   :  { %5074 = vmatprep.subr.bf16.mxu0 %v5007_v23  ;;  %v5023_v27 = vld [vmem:[#allocation5 + $0xa8] sm:$0xff]  ;;  %v5022_v15 = vld [vmem:[#allocation5 + $0xa0] sm:$0xff]  ;;  %v5025_v46 = vld [vmem:[#allocation5 + $0xb8] sm:$0xff] }
 0xfb2   :  { %v5024_v37 = vld [vmem:[#allocation5 + $0xb0] sm:$0xff]  ;;  %v5027_v28 = vld [vmem:[#allocation5 + $0xc8] sm:$0xff]  ;;  %v5026_v39 = vld [vmem:[#allocation5 + $0xc0] sm:$0xff] }
 0xfb3   :  { %v5029_v41 = vld [vmem:[#allocation5 + $0xd8] sm:$0xff]  ;;  %v5028_v0 = vld [vmem:[#allocation5 + $0xd0] sm:$0xff]  ;;  %v5031_v6 = vld [vmem:[#allocation5 + $0xe8] sm:$0xff] }
 0xfb4   :  { %5075 = vmatpush1.bf16.msra.mxu0 %v5006_v3  ;;  %v5030_v47 = vld [vmem:[#allocation5 + $0xe0] sm:$0xff]  ;;  %v5033_v10 = vld [vmem:[#allocation5 + $0xf8] sm:$0xff]  ;;  %v5032_v7 = vld [vmem:[#allocation5 + $0xf0] sm:$0xff] }
 0xfb5   :  { %5076 = vmatprep.subr.bf16.mxu0 %v5009_v42  ;;  %v5035_v62 = vld [vmem:[#allocation5 + $0x108] sm:$0xff]  ;;  %v5034_v40 = vld [vmem:[#allocation5 + $0x100] sm:$0xff]  ;;  %v5037_v22 = vld [vmem:[#allocation5 + $0x118] sm:$0xff] }
 0xfb6   :  { %v5036_v26 = vld [vmem:[#allocation5 + $0x110] sm:$0xff]  ;;  %v5039_v43 = vld [vmem:[#allocation5 + $0x128] sm:$0xff]  ;;  %v5038_v1 = vld [vmem:[#allocation5 + $0x120] sm:$0xff] }
 0xfb7   :  { %v5041_v32 = vld [vmem:[#allocation5 + $0x138] sm:$0xff]  ;;  %v5040_v13 = vld [vmem:[#allocation5 + $0x130] sm:$0xff]  ;;  %v5043_v34 = vld [vmem:[#allocation5 + $0x148] sm:$0xff] }
 0xfb8   :  { %5077 = vmatpush1.bf16.msra.mxu0 %v5008_v4  ;;  %v5042_v44 = vld [vmem:[#allocation5 + $0x140] sm:$0xff]  ;;  %v5045_v14 = vld [vmem:[#allocation5 + $0x158] sm:$0xff]  ;;  %v5044_v11 = vld [vmem:[#allocation5 + $0x150] sm:$0xff] }
 0xfb9   :  { %5078 = vmatprep.subr.bf16.mxu0 %v5011_v36  ;;  %v5047_v9 = vld [vmem:[#allocation5 + $0x168] sm:$0xff]  ;;  %v5046_v45 = vld [vmem:[#allocation5 + $0x160] sm:$0xff]  ;;  %v5049_v2 = vld [vmem:[#allocation5 + $0x178] sm:$0xff] }
 0xfba   :  { %v5048_v33 = vld [vmem:[#allocation5 + $0x170] sm:$0xff]  ;;  %v5051_v23 = vld [vmem:[#allocation5 + $0x188] sm:$0xff]  ;;  %v5050_v3 = vld [vmem:[#allocation5 + $0x180] sm:$0xff] }
 0xfbb   :  { %v5053_v42 = vld [vmem:[#allocation5 + $0x198] sm:$0xff]  ;;  %v5052_v4 = vld [vmem:[#allocation5 + $0x190] sm:$0xff]  ;;  %v5055_v36 = vld [vmem:[#allocation5 + $0x1a8] sm:$0xff] }
 0xfbc   :  { %5079 = vmatpush1.bf16.msra.mxu0 %v5010_v38  ;;  %v5054_v38 = vld [vmem:[#allocation5 + $0x1a0] sm:$0xff] }
 0xfbd   :  { %5080 = vmatprep.subr.bf16.mxu0 %v5013_v12  ;;  %v5057_v12 = vld [vmem:[#allocation5 + $0x1b8] sm:$0xff] }
 0xfc0   :  { %5081 = vmatpush1.bf16.msra.mxu0 %v5012_v35  ;;  %v5056_v35 = vld [vmem:[#allocation5 + $0x1b0] sm:$0xff] }
 0xfc1   :  { %5082 = vmatprep.subr.bf16.mxu0 %v5015_v24  ;;  %v5059_v24 = vld [vmem:[#allocation5 + $0x1c8] sm:$0xff] }
 0xfc4   :  { %5083 = vmatpush1.bf16.msra.mxu0 %v5014_v61  ;;  %v5058_v61 = vld [vmem:[#allocation5 + $0x1c0] sm:$0xff] }
 0xfc5   :  { %5084 = vmatprep.subr.bf16.mxu0 %v5017_v29  ;;  %v5061_v29 = vld [vmem:[#allocation5 + $0x1d8] sm:$0xff] }
 0xfc8   :  { %5085 = vmatpush1.bf16.msra.mxu0 %v5016_v63  ;;  %v5060_v63 = vld [vmem:[#allocation5 + $0x1d0] sm:$0xff] }
 0xfc9   :  { %5086 = vmatprep.subr.bf16.mxu0 %v5019_v19  ;;  %v5063_v19 = vld [vmem:[#allocation5 + $0x1e8] sm:$0xff] }
 0xfcc   :  { %5087 = vmatpush1.bf16.msra.mxu0 %v5018_v20  ;;  %v5062_v20 = vld [vmem:[#allocation5 + $0x1e0] sm:$0xff] }
 0xfcd   :  { %5088 = vmatprep.subr.bf16.mxu0 %v5021_v21  ;;  %v5065_v21 = vld [vmem:[#allocation5 + $0x1f8] sm:$0xff] }
 0xfd0   :  { %5089 = vmatpush1.bf16.msra.mxu0 %v5020_v25  ;;  %v5064_v25 = vld [vmem:[#allocation5 + $0x1f0] sm:$0xff] }
 0xfd1   :  { %5090 = vmatprep.subr.bf16.mxu0 %v5023_v27  ;;  %v5068_v27 = vpack.c.bf16 %v11020_v48, %v10999_v16 }
 0xfd4   :  { %5091 = vmatpush1.bf16.msra.mxu0 %v5022_v15 }
 0xfd5   :  { %5092 = vmatprep.subr.bf16.mxu0 %v5025_v46 }
 0xfd8   :  { %5093 = vmatpush1.bf16.msra.mxu0 %v5024_v37 }
 0xfd9   :  { %5094 = vmatprep.subr.bf16.mxu0 %v5027_v28 }
 0xfdc   :  { %5095 = vmatpush1.bf16.msra.mxu0 %v5026_v39 }
 0xfdd   :  { %5096 = vmatprep.subr.bf16.mxu0 %v5029_v41 }
 0xfe0   :  { %5097 = vmatpush1.bf16.msra.mxu0 %v5028_v0 }
 0xfe1   :  { %5098 = vmatprep.subr.bf16.mxu0 %v5031_v6 }
 0xfe4   :  { %5099 = vmatpush1.bf16.msra.mxu0 %v5030_v47 }
 0xfe5   :  { %5100 = vmatprep.subr.bf16.mxu0 %v5033_v10 }
 0xfe8   :  { %5101 = vmatpush1.bf16.msra.mxu0 %v5032_v7 }
 0xfe9   :  { %5113 = vmatprep.subr.bf16.mxu0 %v5035_v62 }
 0xfeb   :  { %5103 = vmatmul.mubr.bf16.vlgmr.msra.gmra.mrb[32].mxu0 %v5066_v5 }
 0xfec   :  { %5114 = vmatpush1.bf16.msra.mxu0 %v5034_v40  ;;  %5145 = vmatprep.mubr.bf16.mxu0 %v5069_v18 }
 0xfed   :  { %5115 = vmatprep.subr.bf16.mxu0 %v5037_v22 }
 0xff0   :  { %5116 = vmatpush1.bf16.msra.mxu0 %v5036_v26 }
 0xff1   :  { %5117 = vmatprep.subr.bf16.mxu0 %v5039_v43 }
 0xff4   :  { %5118 = vmatpush1.bf16.msra.mxu0 %v5038_v1 }
 0xff5   :  { %5119 = vmatprep.subr.bf16.mxu0 %v5041_v32 }
 0xff8   :  { %5120 = vmatpush1.bf16.msra.mxu0 %v5040_v13 }
 0xff9   :  { %5121 = vmatprep.subr.bf16.mxu0 %v5043_v34 }
 0xffc   :  { %5122 = vmatpush1.bf16.msra.mxu0 %v5042_v44 }
 0xffd   :  { %5123 = vmatprep.subr.bf16.mxu0 %v5045_v14 }
0x1000   :  { %5124 = vmatpush1.bf16.msra.mxu0 %v5044_v11 }
0x1001   :  { %5125 = vmatprep.subr.bf16.mxu0 %v5047_v9 }
0x1004   :  { %5126 = vmatpush1.bf16.msra.mxu0 %v5046_v45 }
0x1005   :  { %5127 = vmatprep.subr.bf16.mxu0 %v5049_v2 }
0x1008   :  { %5128 = vmatpush1.bf16.msra.mxu0 %v5048_v33  ;;  %v8346_v33 = vld [vmem:[%s11441_s12 + $0x20] sm:$0xff] }
0x1009   :  { %5129 = vmatprep.subr.bf16.mxu0 %v5051_v23 }
0x100c   :  { %5130 = vmatpush1.bf16.msra.mxu0 %v5050_v3 }
0x100d   :  { %5131 = vmatprep.subr.bf16.mxu0 %v5053_v42  ;;  %v8347_v42 = vld [vmem:[%s11442_s29 + $0x20] sm:$0xff] }
0x1010   :  { %5132 = vmatpush1.bf16.msra.mxu0 %v5052_v4 }
0x1011   :  { %5133 = vmatprep.subr.bf16.mxu0 %v5055_v36 }
0x1014   :  { %5134 = vmatpush1.bf16.msra.mxu0 %v5054_v38 }
0x1015   :  { %5135 = vmatprep.subr.bf16.mxu0 %v5057_v12 }
0x1018   :  { %5136 = vmatpush1.bf16.msra.mxu0 %v5056_v35 }
0x1019   :  { %5137 = vmatprep.subr.bf16.mxu0 %v5059_v24 }
0x101c   :  { %5138 = vmatpush1.bf16.msra.mxu0 %v5058_v61 }
0x101d   :  { %5139 = vmatprep.subr.bf16.mxu0 %v5061_v29 }
0x1020   :  { %5140 = vmatpush1.bf16.msra.mxu0 %v5060_v63 }
0x1021   :  { %5141 = vmatprep.subr.bf16.mxu0 %v5063_v19 }
0x1024   :  { %5142 = vmatpush1.bf16.msra.mxu0 %v5062_v20 }
0x1025   :  { %5143 = vmatprep.subr.bf16.mxu0 %v5065_v21 }
0x1028   :  { %5144 = vmatpush1.bf16.msra.mxu0 %v5064_v25 }
0x102b   :  { %5146 = vmatmul.mubr.bf16.vlgmr.msra.gmra.mrb[32].mxu0 %v5068_v27 }
0x10fe   :  { %v5147_v15 = vpop.f32.mrb[32].mxu0 }
0x10ff   :  { %v5149_v46 = vpop.f32.mrb[33].mxu0 }
0x1100   :  { %v5151_v37 = vpop.f32.mrb[34].mxu0 }
0x1101   :  { %v8729_v28 = vpack.c.bf16 %v5151_v37, %v5147_v15  ;;  %v5153_v39 = vpop.f32.mrb[35].mxu0 }
0x1102   :  { %v8727_v41 = vpack.c.bf16 %v5153_v39, %v5149_v46 }
0x1104   :  { %8728 = vmatprep.subr.bf16.mxu1 %v8727_v41 }
0x1105   :  { %8730 = vmatpush1.bf16.msra.mxu1 %v8729_v28 }
0x1108   :  { %8344 = vmatmul.mubr.msk.f32.vlgmr.msra.gmra.mrb[32].mxu1 %vm2706_vm0, %v10392_v30 }
0x1109   :  { %5226 = vmatprep.mubr.f32.mxu1 %v9849_v17 }
0x110c   :  { %8345 = vmatmul.mubr.msk.f32.gmra.mrb[34].mxu1 %vm2706_vm0, %v10399_v31 }
0x11db   :  { %v5222_v0 = vpop.f32.mrb[32].mxu1 }
0x11dc   :  { %v5224_v16 = vpop.f32.mrb[33].mxu1  ;;  %v5239_v48 = vmul.f32 %v5222_v0, %v5222_v0 }
0x11dd   :  { %v5233_v6 = vadd.f32 %v5224_v16, %v5222_v0  ;;  %v5240_v47 = vmul.f32 %v5224_v16, %v5224_v16 }
0x11df   :  { %5234 = vadd.xlane.f32.xlu0 %v5233_v6  ;;  %v5228_v10 = vpop.f32.mrb[34].mxu1  ;;  %v5243_v7 = vadd.f32 %v5240_v47, %v5239_v48 }
0x11e0   :  { %v5230_v62 = vpop.f32.mrb[35].mxu1  ;;  %v5241_v5 = vmul.f32 %v5228_v10, %v5228_v10 }
0x11e1   :  { %v5242_v18 = vmul.f32 %v5230_v62, %v5230_v62  ;;  %5244 = vadd.xlane.f32.xlu1 %v5243_v7  ;;  %v5236_v40 = vadd.f32 %v5230_v62, %v5228_v10 }
0x11e3   :  { %5237 = vadd.xlane.f32.xlu0 %v5236_v40  ;;  %v5246_v22 = vadd.f32 %v5242_v18, %v5241_v5 }
0x11e5   :  { %5247 = vadd.xlane.f32.xlu1 %v5246_v22 }
0x126c   :  { %v5235_v26 = vpop.xlane.xlu0 %5234 }
0x126e   :  { %v5245_v43 = vpop.xlane.xlu1 %5244 }
0x1270   :  { %v5238_v1 = vpop.xlane.xlu0 %5237 }
0x1271   :  { %v5249_v32 = vadd.f32 %v5238_v1, %v5235_v26 }
0x1272   :  { %v5248_v13 = vpop.xlane.xlu1 %5247 }
0x1273   :  { %v5251_v34 = vmul.f32 0.001953125, %v5249_v32  ;;  %v5250_v44 = vadd.f32 %v5248_v13, %v5245_v43 }
0x1275   :  { %v5253_v14 = vmul.f32 %v5251_v34, %v5251_v34  ;;  %v5252_v11 = vmul.f32 0.001953125, %v5250_v44 }
0x1277   :  { %v5254_v9 = vsub.f32 %v5252_v11, %v5253_v14 }
0x1279   :  { %v5255_v45 = vmax.f32 %v5254_v9, 0.0 }
0x127b   :  { %v5258_v2 = vadd.f32 1e-05, %v5255_v45 }
0x127d   :  { %9399 = vrsqrt.f32 %v5258_v2 }
0x1287   :  { %v9400_v23 = vpop.eup %9399 }
0x1288   :  { %v5260_v3 = vmul.f32 %v9400_v23, %v8346_v33 }
0x128a   :  { %5267 = vperm.xlu0 %9397, %v5260_v3   ;;  %v5263_v4 = vmul.f32 %v5260_v3, %v5251_v34 }
0x128c   :  { %v5264_v36 = vsub.f32 %v8347_v42, %v5263_v4 }
0x128e   :  { %5276 = vperm.xlu1 %9398, %v5264_v36  }
0x1309   :  { %v5268_v38 = vpop.permute.xlu0 %5267 }
0x130a   :  { %v5270_v12 = vmul.f32 %v5268_v38, %v5222_v0  ;;  %v5271_v35 = vmul.f32 %v5268_v38, %v5224_v16  ;;  %v5272_v24 = vmul.f32 %v5268_v38, %v5228_v10  ;;  %v5273_v61 = vmul.f32 %v5268_v38, %v5230_v62 }
0x130d   :  { %v5277_v29 = vpop.permute.xlu1 %5276 }
0x130e   :  { %v5279_v63 = vadd.f32 %v5277_v29, %v5270_v12  ;;  %v5280_v19 = vadd.f32 %v5277_v29, %v5271_v35  ;;  %v11046_v20 = vadd.f32 %v5277_v29, %v5272_v24  ;;  %v11048_v21 = vadd.f32 %v5277_v29, %v5273_v61 }
0x1310   :  { %v5283_v25 = vmin.f32 %v5279_v63, 20.0  ;;  %v5284_v27 = vmin.f32 %v5280_v19, 20.0  ;;  %v5285_v15 = vmin.f32 %v11046_v20, 20.0  ;;  %v5286_v46 = vmin.f32 %v11048_v21, 20.0 }
0x1311   :  { %vm5287_vm5 = vcmp.gt.f32.partialorder %v5279_v63, 20.0  ;;  %vm5288_vm6 = vcmp.gt.f32.partialorder %v5280_v19, 20.0  ;;  %vm5289_vm9 = vcmp.gt.f32.partialorder %v11046_v20, 20.0  ;;  %vm5290_vm12 = vcmp.gt.f32.partialorder %v11048_v21, 20.0 }
0x1312   :  { %v5291_v37 = vmul.f32 1.442695, %v5283_v25  ;;  %v5293_v28 = vmul.f32 1.442695, %v5284_v27  ;;  %v5295_v39 = vmul.f32 1.442695, %v5285_v15 }
0x1313   :  { %v5297_v41 = vmul.f32 1.442695, %v5286_v46 }
0x1314   :  { %9401 = vpow2.f32 %v5291_v37 }
0x1315   :  { %9403 = vpow2.f32 %v5293_v28 }
0x1316   :  { %9405 = vpow2.f32 %v5295_v39 }
0x1317   :  { %9407 = vpow2.f32 %v5297_v41 }
0x131e   :  { %v9402_v0 = vpop.eup %9401 }
0x131f   :  { %v9404_v16 = vpop.eup %9403  ;;  %v5299_v48 = vadd.f32 1.0, %v9402_v0  ;;  %v5302_v5 = vmul.f32 -0.5, %v9402_v0  ;;  %v5305_v43 = vand.u32 2147483647, %v9402_v0 }
0x1320   :  { %v9406_v6 = vpop.eup %9405  ;;  %v5308_v47 = vadd.f32 1.0, %v9404_v16  ;;  %v5311_v18 = vmul.f32 -0.5, %v9404_v16  ;;  %v5314_v32 = vand.u32 2147483647, %v9404_v16 }
0x1321   :  { %v9408_v10 = vpop.eup %9407  ;;  %9409 = vlog2.f32 %v5299_v48  ;;  %v5317_v7 = vadd.f32 1.0, %v9406_v6  ;;  %v5320_v40 = vmul.f32 -0.5, %v9406_v6  ;;  %v5303_v22 = vadd.f32 1.0, %v5302_v5 }
0x1322   :  { %9411 = vlog2.f32 %v5308_v47  ;;  %v5326_v62 = vadd.f32 1.0, %v9408_v10  ;;  %v5329_v26 = vmul.f32 -0.5, %v9408_v10  ;;  %v5312_v1 = vadd.f32 1.0, %v5311_v18 }
0x1323   :  { %9413 = vlog2.f32 %v5317_v7  ;;  %v5321_v13 = vadd.f32 1.0, %v5320_v40  ;;  %v5323_v44 = vand.u32 2147483647, %v9406_v6  ;;  %v5304_v9 = vmul.f32 %v9402_v0, %v5303_v22 }
0x1324   :  { %9415 = vlog2.f32 %v5326_v62  ;;  %v5330_v45 = vadd.f32 1.0, %v5329_v26  ;;  %vm5306_vm7 = vcmp.lt.f32.partialorder %v5305_v43, 0.0004427343  ;;  %v5313_v23 = vmul.f32 %v9404_v16, %v5312_v1 }
0x1325   :  { %v5332_v3 = vand.u32 2147483647, %v9408_v10  ;;  %vm5315_vm8 = vcmp.lt.f32.partialorder %v5314_v32, 0.0004427343  ;;  %v5322_v36 = vmul.f32 %v9406_v6, %v5321_v13  ;;  %vm5324_vm10 = vcmp.lt.f32.partialorder %v5323_v44, 0.0004427343 }
0x1326   :  { %v5331_v29 = vmul.f32 %v9408_v10, %v5330_v45 }
0x1327   :  { %vm5333_vm11 = vcmp.lt.f32.partialorder %v5332_v3, 0.0004427343 }
0x132b   :  { %v9410_v34 = vpop.eup %9409 }
0x132c   :  { %v9412_v14 = vpop.eup %9411  ;;  %v5301_v11 = vmul.f32 0.6931472, %v9410_v34 }
0x132d   :  { %v9414_v2 = vpop.eup %9413  ;;  %v5310_v33 = vmul.f32 0.6931472, %v9412_v14 }
0x132e   :  { %v5307_v42 = vsel %vm5306_vm7, %v5304_v9, %v5301_v11  ;;  %v5319_v4 = vmul.f32 0.6931472, %v9414_v2  ;;  %v9416_v38 = vpop.eup %9415 }
0x132f   :  { %v5316_v12 = vsel %vm5315_vm8, %v5313_v23, %v5310_v33  ;;  %v11054_v35 = vsel %vm5287_vm5, %v5279_v63, %v5307_v42  ;;  %v5328_v61 = vmul.f32 0.6931472, %v9416_v38 }
0x1330   :  { %v5325_v24 = vsel %vm5324_vm10, %v5322_v36, %v5319_v4  ;;  %v11057_v25 = vsel %vm5288_vm6, %v5280_v19, %v5316_v12 }
0x1331   :  { %v11060_v27 = vsel %vm5289_vm9, %v11046_v20, %v5325_v24  ;;  %v5334_v15 = vsel %vm5333_vm11, %v5331_v29, %v5328_v61 }
0x1332   :  { %v11064_v46 = vsel %vm5290_vm12, %v11048_v21, %v5334_v15 }
0x1333   :  { %9791 = dma.done.wait [#allocation18 + $0x4], 4096 }
0x1334   :  { %9792 = vsyncadd [#allocation18 + $0x4], 4294963200  ;;  %v5376_v63 = vpack.c.bf16 %v11064_v46, %v11057_v25  ;;  %9417 = vset.pattern.permute.xlu0 %v9850_v8  ;;  %9418 = vset.pattern.permute.xlu1 %v9850_v8  ;;  %v5344_v19 = vld [vmem:[#allocation6 + $0x8] sm:$0xff]  ;;  %v5343_v37 = vld [vmem:[#allocation6] sm:$0xff]  ;;  %v5375_v23 = vpack.c.bf16 %v11060_v27, %v11054_v35 }
0x1335   :  { %v5346_v20 = vld [vmem:[#allocation6 + $0x18] sm:$0xff]  ;;  %5377 = vmatprep.subr.bf16.mxu1 %v5344_v19  ;;  %v5345_v28 = vld [vmem:[#allocation6 + $0x10] sm:$0xff]  ;;  %v5348_v39 = vld [vmem:[#allocation6 + $0x28] sm:$0xff] }
0x1336   :  { %5409 = vmatprep.mubr.bf16.mxu1 %v5376_v63  ;;  %5378 = vmatpush1.bf16.msra.mxu1 %v5343_v37  ;;  %v5347_v21 = vld [vmem:[#allocation6 + $0x20] sm:$0xff]  ;;  %v5350_v41 = vld [vmem:[#allocation6 + $0x38] sm:$0xff]  ;;  %v5349_v0 = vld [vmem:[#allocation6 + $0x30] sm:$0xff] }
0x1337   :  { %5379 = vmatprep.subr.bf16.mxu1 %v5346_v20  ;;  %v5352_v16 = vld [vmem:[#allocation6 + $0x48] sm:$0xff]  ;;  %v5351_v48 = vld [vmem:[#allocation6 + $0x40] sm:$0xff]  ;;  %v5354_v6 = vld [vmem:[#allocation6 + $0x58] sm:$0xff] }
0x1338   :  { %v5353_v47 = vld [vmem:[#allocation6 + $0x50] sm:$0xff]  ;;  %v5356_v10 = vld [vmem:[#allocation6 + $0x68] sm:$0xff]  ;;  %v5355_v7 = vld [vmem:[#allocation6 + $0x60] sm:$0xff] }
0x1339   :  { %v5358_v62 = vld [vmem:[#allocation6 + $0x78] sm:$0xff]  ;;  %v5357_v5 = vld [vmem:[#allocation6 + $0x70] sm:$0xff]  ;;  %v5360_v18 = vld [vmem:[#allocation6 + $0x88] sm:$0xff] }
0x133a   :  { %5380 = vmatpush1.bf16.msra.mxu1 %v5345_v28  ;;  %v5359_v40 = vld [vmem:[#allocation6 + $0x80] sm:$0xff]  ;;  %v5362_v22 = vld [vmem:[#allocation6 + $0x98] sm:$0xff]  ;;  %v5361_v26 = vld [vmem:[#allocation6 + $0x90] sm:$0xff] }
0x133b   :  { %5381 = vmatprep.subr.bf16.mxu1 %v5348_v39  ;;  %v5364_v43 = vld [vmem:[#allocation6 + $0xa8] sm:$0xff]  ;;  %v5363_v1 = vld [vmem:[#allocation6 + $0xa0] sm:$0xff]  ;;  %v5366_v32 = vld [vmem:[#allocation6 + $0xb8] sm:$0xff] }
0x133c   :  { %v5365_v13 = vld [vmem:[#allocation6 + $0xb0] sm:$0xff]  ;;  %v5368_v34 = vld [vmem:[#allocation6 + $0xc8] sm:$0xff]  ;;  %v5367_v44 = vld [vmem:[#allocation6 + $0xc0] sm:$0xff] }
0x133d   :  { %v5370_v14 = vld [vmem:[#allocation6 + $0xd8] sm:$0xff]  ;;  %v5369_v11 = vld [vmem:[#allocation6 + $0xd0] sm:$0xff]  ;;  %v5372_v9 = vld [vmem:[#allocation6 + $0xe8] sm:$0xff] }
0x133e   :  { %5382 = vmatpush1.bf16.msra.mxu1 %v5347_v21  ;;  %v5371_v45 = vld [vmem:[#allocation6 + $0xe0] sm:$0xff]  ;;  %v5374_v2 = vld [vmem:[#allocation6 + $0xf8] sm:$0xff]  ;;  %v5373_v33 = vld [vmem:[#allocation6 + $0xf0] sm:$0xff] }
0x133f   :  { %5383 = vmatprep.subr.bf16.mxu1 %v5350_v41 }
0x1342   :  { %5384 = vmatpush1.bf16.msra.mxu1 %v5349_v0 }
0x1343   :  { %5385 = vmatprep.subr.bf16.mxu1 %v5352_v16 }
0x1346   :  { %5386 = vmatpush1.bf16.msra.mxu1 %v5351_v48 }
0x1347   :  { %5387 = vmatprep.subr.bf16.mxu1 %v5354_v6 }
0x134a   :  { %5388 = vmatpush1.bf16.msra.mxu1 %v5353_v47 }
0x134b   :  { %5389 = vmatprep.subr.bf16.mxu1 %v5356_v10 }
0x134e   :  { %5390 = vmatpush1.bf16.msra.mxu1 %v5355_v7 }
0x134f   :  { %5391 = vmatprep.subr.bf16.mxu1 %v5358_v62 }
0x1352   :  { %5392 = vmatpush1.bf16.msra.mxu1 %v5357_v5 }
0x1353   :  { %5393 = vmatprep.subr.bf16.mxu1 %v5360_v18 }
0x1356   :  { %5394 = vmatpush1.bf16.msra.mxu1 %v5359_v40 }
0x1357   :  { %5395 = vmatprep.subr.bf16.mxu1 %v5362_v22 }
0x135a   :  { %5396 = vmatpush1.bf16.msra.mxu1 %v5361_v26  ;;  %v8350_v26 = vld [vmem:[%s11441_s12 + $0x28] sm:$0xff] }
0x135b   :  { %5397 = vmatprep.subr.bf16.mxu1 %v5364_v43 }
0x135e   :  { %5398 = vmatpush1.bf16.msra.mxu1 %v5363_v1 }
0x135f   :  { %5399 = vmatprep.subr.bf16.mxu1 %v5366_v32  ;;  %v8351_v32 = vld [vmem:[%s11442_s29 + $0x28] sm:$0xff] }
0x1362   :  { %5400 = vmatpush1.bf16.msra.mxu1 %v5365_v13 }
0x1363   :  { %5401 = vmatprep.subr.bf16.mxu1 %v5368_v34 }
0x1366   :  { %5402 = vmatpush1.bf16.msra.mxu1 %v5367_v44 }
0x1367   :  { %5403 = vmatprep.subr.bf16.mxu1 %v5370_v14 }
0x136a   :  { %5404 = vmatpush1.bf16.msra.mxu1 %v5369_v11 }
0x136b   :  { %5405 = vmatprep.subr.bf16.mxu1 %v5372_v9 }
0x136e   :  { %5406 = vmatpush1.bf16.msra.mxu1 %v5371_v45 }
0x136f   :  { %5407 = vmatprep.subr.bf16.mxu1 %v5374_v2 }
0x1372   :  { %5408 = vmatpush1.bf16.msra.mxu1 %v5373_v33 }
0x1375   :  { %5410 = vmatmul.mubr.bf16.vlgmr.msra.gmra.mrb[36].mxu1 %v5375_v23 }
0x1376   :  { %5484 = vmatprep.mubr.f32.mxu1 %v9849_v17 }
0x1448   :  { %v5411_v3 = vpop.f32.mrb[36].mxu1 }
0x1449   :  { %v5413_v42 = vpop.f32.mrb[37].mxu1 }
0x144a   :  { %v5415_v4 = vpop.f32.mrb[38].mxu1 }
0x144b   :  { %v8733_v36 = vpack.c.bf16 %v5415_v4, %v5411_v3  ;;  %v5417_v38 = vpop.f32.mrb[39].mxu1 }
0x144c   :  { %v8731_v12 = vpack.c.bf16 %v5417_v38, %v5413_v42 }
0x144e   :  { %8732 = vmatprep.subr.bf16.mxu1 %v8731_v12 }
0x144f   :  { %8734 = vmatpush1.bf16.msra.mxu1 %v8733_v36 }
0x1452   :  { %8348 = vmatmul.mubr.msk.f32.vlgmr.msra.gmra.mrb[40].mxu1 %vm2706_vm0, %v10392_v30 }
0x1453   :  { %5490 = vmatprep.mubr.f32.mxu1 %v9849_v17 }
0x1456   :  { %8349 = vmatmul.mubr.msk.f32.gmra.mrb[42].mxu1 %vm2706_vm0, %v10399_v31 }
0x1525   :  { %v5486_v24 = vpop.f32.mrb[40].mxu1 }
0x1526   :  { %v5488_v61 = vpop.f32.mrb[41].mxu1  ;;  %v5503_v29 = vmul.f32 %v5486_v24, %v5486_v24 }
0x1527   :  { %v5497_v15 = vadd.f32 %v5488_v61, %v5486_v24  ;;  %v5504_v63 = vmul.f32 %v5488_v61, %v5488_v61 }
0x1529   :  { %5498 = vadd.xlane.f32.xlu0 %v5497_v15  ;;  %v5492_v19 = vpop.f32.mrb[42].mxu1  ;;  %v5507_v37 = vadd.f32 %v5504_v63, %v5503_v29 }
0x152a   :  { %v5494_v20 = vpop.f32.mrb[43].mxu1  ;;  %v5505_v28 = vmul.f32 %v5492_v19, %v5492_v19 }
0x152b   :  { %v5506_v39 = vmul.f32 %v5494_v20, %v5494_v20  ;;  %5508 = vadd.xlane.f32.xlu1 %v5507_v37  ;;  %v5500_v21 = vadd.f32 %v5494_v20, %v5492_v19 }
0x152d   :  { %5501 = vadd.xlane.f32.xlu0 %v5500_v21  ;;  %v5510_v41 = vadd.f32 %v5506_v39, %v5505_v28 }
0x152f   :  { %5511 = vadd.xlane.f32.xlu1 %v5510_v41 }
0x15b6   :  { %v5499_v0 = vpop.xlane.xlu0 %5498 }
0x15b8   :  { %v5509_v16 = vpop.xlane.xlu1 %5508 }
0x15ba   :  { %v5502_v48 = vpop.xlane.xlu0 %5501 }
0x15bb   :  { %v5513_v6 = vadd.f32 %v5502_v48, %v5499_v0 }
0x15bc   :  { %v5512_v47 = vpop.xlane.xlu1 %5511 }
0x15bd   :  { %v5515_v10 = vmul.f32 0.001953125, %v5513_v6  ;;  %v5514_v7 = vadd.f32 %v5512_v47, %v5509_v16 }
0x15bf   :  { %v5517_v62 = vmul.f32 %v5515_v10, %v5515_v10  ;;  %v5516_v5 = vmul.f32 0.001953125, %v5514_v7 }
0x15c1   :  { %v5518_v18 = vsub.f32 %v5516_v5, %v5517_v62 }
0x15c3   :  { %v5519_v40 = vmax.f32 %v5518_v18, 0.0 }
0x15c5   :  { %v5522_v22 = vadd.f32 1e-05, %v5519_v40 }
0x15c7   :  { %9419 = vrsqrt.f32 %v5522_v22 }
0x15d1   :  { %v9420_v43 = vpop.eup %9419 }
0x15d2   :  { %v5524_v1 = vmul.f32 %v9420_v43, %v8350_v26 }
0x15d4   :  { %5531 = vperm.xlu0 %9417, %v5524_v1   ;;  %v5527_v13 = vmul.f32 %v5524_v1, %v5515_v10 }
0x15d6   :  { %v5528_v34 = vsub.f32 %v8351_v32, %v5527_v13 }
0x15d8   :  { %5540 = vperm.xlu1 %9418, %v5528_v34  }
0x1653   :  { %v5532_v44 = vpop.permute.xlu0 %5531 }
0x1654   :  { %v5534_v14 = vmul.f32 %v5532_v44, %v5486_v24  ;;  %v5535_v11 = vmul.f32 %v5532_v44, %v5488_v61  ;;  %v5536_v9 = vmul.f32 %v5532_v44, %v5492_v19  ;;  %v5537_v45 = vmul.f32 %v5532_v44, %v5494_v20 }
0x1657   :  { %v5541_v2 = vpop.permute.xlu1 %5540 }
0x1658   :  { %v5543_v33 = vadd.f32 %v5541_v2, %v5534_v14  ;;  %v5544_v23 = vadd.f32 %v5541_v2, %v5535_v11  ;;  %v5545_v3 = vadd.f32 %v5541_v2, %v5536_v9  ;;  %v5546_v42 = vadd.f32 %v5541_v2, %v5537_v45 }
0x165a   :  { %v5547_v4 = vadd.f32 %v5543_v33, %v11054_v35  ;;  %v5548_v36 = vadd.f32 %v5544_v23, %v11057_v25  ;;  %v11087_v38 = vadd.f32 %v5545_v3, %v11060_v27  ;;  %v11090_v12 = vadd.f32 %v5546_v42, %v11064_v46 }
0x165c   :  { %v5551_v29 = vmin.f32 %v5547_v4, 20.0  ;;  %v5552_v24 = vmin.f32 %v5548_v36, 20.0  ;;  %v5553_v61 = vmin.f32 %v11087_v38, 20.0  ;;  %v5554_v15 = vmin.f32 %v11090_v12, 20.0 }
0x165d   :  { %vm5555_vm13 = vcmp.gt.f32.partialorder %v5547_v4, 20.0  ;;  %vm5556_vm14 = vcmp.gt.f32.partialorder %v5548_v36, 20.0  ;;  %vm5557_vm2 = vcmp.gt.f32.partialorder %v11087_v38, 20.0  ;;  %vm5558_vm5 = vcmp.gt.f32.partialorder %v11090_v12, 20.0 }
0x165e   :  { %v5559_v63 = vmul.f32 1.442695, %v5551_v29  ;;  %v5561_v19 = vmul.f32 1.442695, %v5552_v24  ;;  %v5563_v37 = vmul.f32 1.442695, %v5553_v61 }
0x165f   :  { %v5565_v20 = vmul.f32 1.442695, %v5554_v15 }
0x1660   :  { %9421 = vpow2.f32 %v5559_v63 }
0x1661   :  { %9423 = vpow2.f32 %v5561_v19 }
0x1662   :  { %9425 = vpow2.f32 %v5563_v37 }
0x1663   :  { %9427 = vpow2.f32 %v5565_v20 }
0x166a   :  { %v9422_v28 = vpop.eup %9421 }
0x166b   :  { %v9424_v39 = vpop.eup %9423  ;;  %v5567_v21 = vadd.f32 1.0, %v9422_v28  ;;  %v5570_v47 = vmul.f32 -0.5, %v9422_v28  ;;  %v5573_v18 = vand.u32 2147483647, %v9422_v28 }
0x166c   :  { %v9426_v41 = vpop.eup %9425  ;;  %v5576_v0 = vadd.f32 1.0, %v9424_v39  ;;  %v5579_v10 = vmul.f32 -0.5, %v9424_v39  ;;  %v5582_v22 = vand.u32 2147483647, %v9424_v39 }
0x166d   :  { %v9428_v16 = vpop.eup %9427  ;;  %9429 = vlog2.f32 %v5567_v21  ;;  %v5585_v48 = vadd.f32 1.0, %v9426_v41  ;;  %v5588_v7 = vmul.f32 -0.5, %v9426_v41  ;;  %v5571_v62 = vadd.f32 1.0, %v5570_v47 }
0x166e   :  { %9431 = vlog2.f32 %v5576_v0  ;;  %v5594_v6 = vadd.f32 1.0, %v9428_v16  ;;  %v5597_v5 = vmul.f32 -0.5, %v9428_v16  ;;  %v5580_v40 = vadd.f32 1.0, %v5579_v10 }
0x166f   :  { %9433 = vlog2.f32 %v5585_v48  ;;  %v5589_v26 = vadd.f32 1.0, %v5588_v7  ;;  %v5591_v1 = vand.u32 2147483647, %v9426_v41  ;;  %v5572_v34 = vmul.f32 %v9422_v28, %v5571_v62 }
0x1670   :  { %9435 = vlog2.f32 %v5594_v6  ;;  %v5598_v44 = vadd.f32 1.0, %v5597_v5  ;;  %vm5574_vm15 = vcmp.lt.f32.partialorder %v5573_v18, 0.0004427343  ;;  %v5581_v9 = vmul.f32 %v9424_v39, %v5580_v40 }
0x1671   :  { %v5600_v45 = vand.u32 2147483647, %v9428_v16  ;;  %vm5583_vm1 = vcmp.lt.f32.partialorder %v5582_v22, 0.0004427343  ;;  %v5590_v23 = vmul.f32 %v9426_v41, %v5589_v26  ;;  %vm5592_vm3 = vcmp.lt.f32.partialorder %v5591_v1, 0.0004427343 }
0x1672   :  { %v5599_v15 = vmul.f32 %v9428_v16, %v5598_v44 }
0x1673   :  { %vm5601_vm4 = vcmp.lt.f32.partialorder %v5600_v45, 0.0004427343 }
0x1677   :  { %v9430_v43 = vpop.eup %9429 }
0x1678   :  { %v9432_v32 = vpop.eup %9431  ;;  %v5569_v13 = vmul.f32 0.6931472, %v9430_v43 }
0x1679   :  { %v9434_v14 = vpop.eup %9433  ;;  %v5578_v11 = vmul.f32 0.6931472, %v9432_v32 }
0x167a   :  { %v5575_v2 = vsel %vm5574_vm15, %v5572_v34, %v5569_v13  ;;  %v5587_v33 = vmul.f32 0.6931472, %v9434_v14  ;;  %v9436_v3 = vpop.eup %9435 }
0x167b   :  { %v5584_v42 = vsel %vm5583_vm1, %v5581_v9, %v5578_v11  ;;  %v11096_v29 = vsel %vm5555_vm13, %v5547_v4, %v5575_v2  ;;  %v5596_v61 = vmul.f32 0.6931472, %v9436_v3 }
0x167c   :  { %v5593_v24 = vsel %vm5592_vm3, %v5590_v23, %v5587_v33  ;;  %v5604_v63 = vsel %vm5556_vm14, %v5548_v36, %v5584_v42 }
0x167d   :  { %v11100_v19 = vsel %vm5557_vm2, %v11087_v38, %v5593_v24  ;;  %v5602_v37 = vsel %vm5601_vm4, %v5599_v15, %v5596_v61 }
0x167e   :  { %v5606_v20 = vsel %vm5558_vm5, %v11090_v12, %v5602_v37 }
0x167f   :  { %9793 = dma.done.wait [#allocation18 + $0x5], 4096 }
0x1680   :  { %9794 = vsyncadd [#allocation18 + $0x5], 4294963200  ;;  %v5642_v28 = vpack.c.bf16 %v5606_v20, %v5604_v63  ;;  %5750 = vmatprep.mubr.f32.mxu0 %v9849_v17  ;;  %9437 = vset.pattern.permute.xlu0 %v9850_v8  ;;  %v5610_v4 = vld [vmem:[#allocation7 + $0x8] sm:$0xff]  ;;  %v5609_v36 = vld [vmem:[#allocation7] sm:$0xff]  ;;  %v5641_v23 = vpack.c.bf16 %v11100_v19, %v11096_v29 }
0x1681   :  { %9438 = vset.pattern.permute.xlu1 %v9850_v8  ;;  %v5612_v39 = vld [vmem:[#allocation7 + $0x18] sm:$0xff]  ;;  %5643 = vmatprep.subr.bf16.mxu1 %v5610_v4  ;;  %v5611_v38 = vld [vmem:[#allocation7 + $0x10] sm:$0xff]  ;;  %v5614_v21 = vld [vmem:[#allocation7 + $0x28] sm:$0xff] }
0x1682   :  { %5675 = vmatprep.mubr.bf16.mxu1 %v5642_v28  ;;  %5644 = vmatpush1.bf16.msra.mxu1 %v5609_v36  ;;  %v5613_v12 = vld [vmem:[#allocation7 + $0x20] sm:$0xff]  ;;  %v5616_v41 = vld [vmem:[#allocation7 + $0x38] sm:$0xff]  ;;  %v5615_v0 = vld [vmem:[#allocation7 + $0x30] sm:$0xff] }
0x1683   :  { %5645 = vmatprep.subr.bf16.mxu1 %v5612_v39  ;;  %v5618_v16 = vld [vmem:[#allocation7 + $0x48] sm:$0xff]  ;;  %v5617_v48 = vld [vmem:[#allocation7 + $0x40] sm:$0xff]  ;;  %v5620_v6 = vld [vmem:[#allocation7 + $0x58] sm:$0xff] }
0x1684   :  { %v5619_v47 = vld [vmem:[#allocation7 + $0x50] sm:$0xff]  ;;  %v5622_v10 = vld [vmem:[#allocation7 + $0x68] sm:$0xff]  ;;  %v5621_v7 = vld [vmem:[#allocation7 + $0x60] sm:$0xff] }
0x1685   :  { %v5624_v62 = vld [vmem:[#allocation7 + $0x78] sm:$0xff]  ;;  %v5623_v5 = vld [vmem:[#allocation7 + $0x70] sm:$0xff]  ;;  %v5626_v18 = vld [vmem:[#allocation7 + $0x88] sm:$0xff] }
0x1686   :  { %5646 = vmatpush1.bf16.msra.mxu1 %v5611_v38  ;;  %v5625_v40 = vld [vmem:[#allocation7 + $0x80] sm:$0xff]  ;;  %v5628_v22 = vld [vmem:[#allocation7 + $0x98] sm:$0xff]  ;;  %v5627_v26 = vld [vmem:[#allocation7 + $0x90] sm:$0xff] }
0x1687   :  { %5647 = vmatprep.subr.bf16.mxu1 %v5614_v21  ;;  %v5630_v43 = vld [vmem:[#allocation7 + $0xa8] sm:$0xff]  ;;  %v5629_v1 = vld [vmem:[#allocation7 + $0xa0] sm:$0xff]  ;;  %v5632_v32 = vld [vmem:[#allocation7 + $0xb8] sm:$0xff] }
0x1688   :  { %v5631_v13 = vld [vmem:[#allocation7 + $0xb0] sm:$0xff]  ;;  %v5634_v34 = vld [vmem:[#allocation7 + $0xc8] sm:$0xff]  ;;  %v5633_v44 = vld [vmem:[#allocation7 + $0xc0] sm:$0xff] }
0x1689   :  { %v5636_v14 = vld [vmem:[#allocation7 + $0xd8] sm:$0xff]  ;;  %v5635_v11 = vld [vmem:[#allocation7 + $0xd0] sm:$0xff]  ;;  %v5638_v9 = vld [vmem:[#allocation7 + $0xe8] sm:$0xff] }
0x168a   :  { %5648 = vmatpush1.bf16.msra.mxu1 %v5613_v12  ;;  %v5637_v45 = vld [vmem:[#allocation7 + $0xe0] sm:$0xff]  ;;  %v5640_v2 = vld [vmem:[#allocation7 + $0xf8] sm:$0xff]  ;;  %v5639_v33 = vld [vmem:[#allocation7 + $0xf0] sm:$0xff] }
0x168b   :  { %5649 = vmatprep.subr.bf16.mxu1 %v5616_v41 }
0x168e   :  { %5650 = vmatpush1.bf16.msra.mxu1 %v5615_v0 }
0x168f   :  { %5651 = vmatprep.subr.bf16.mxu1 %v5618_v16 }
0x1692   :  { %5652 = vmatpush1.bf16.msra.mxu1 %v5617_v48 }
0x1693   :  { %5653 = vmatprep.subr.bf16.mxu1 %v5620_v6 }
0x1696   :  { %5654 = vmatpush1.bf16.msra.mxu1 %v5619_v47 }
0x1697   :  { %5655 = vmatprep.subr.bf16.mxu1 %v5622_v10 }
0x169a   :  { %5656 = vmatpush1.bf16.msra.mxu1 %v5621_v7 }
0x169b   :  { %5657 = vmatprep.subr.bf16.mxu1 %v5624_v62 }
0x169e   :  { %5658 = vmatpush1.bf16.msra.mxu1 %v5623_v5 }
0x169f   :  { %5659 = vmatprep.subr.bf16.mxu1 %v5626_v18 }
0x16a2   :  { %5660 = vmatpush1.bf16.msra.mxu1 %v5625_v40 }
0x16a3   :  { %5661 = vmatprep.subr.bf16.mxu1 %v5628_v22 }
0x16a6   :  { %5662 = vmatpush1.bf16.msra.mxu1 %v5627_v26  ;;  %v8354_v26 = vld [vmem:[%s11441_s12 + $0x30] sm:$0xff] }
0x16a7   :  { %5663 = vmatprep.subr.bf16.mxu1 %v5630_v43 }
0x16aa   :  { %5664 = vmatpush1.bf16.msra.mxu1 %v5629_v1 }
0x16ab   :  { %5665 = vmatprep.subr.bf16.mxu1 %v5632_v32  ;;  %v8355_v32 = vld [vmem:[%s11442_s29 + $0x30] sm:$0xff] }
0x16ae   :  { %5666 = vmatpush1.bf16.msra.mxu1 %v5631_v13 }
0x16af   :  { %5667 = vmatprep.subr.bf16.mxu1 %v5634_v34 }
0x16b2   :  { %5668 = vmatpush1.bf16.msra.mxu1 %v5633_v44 }
0x16b3   :  { %5669 = vmatprep.subr.bf16.mxu1 %v5636_v14 }
0x16b6   :  { %5670 = vmatpush1.bf16.msra.mxu1 %v5635_v11 }
0x16b7   :  { %5671 = vmatprep.subr.bf16.mxu1 %v5638_v9 }
0x16ba   :  { %5672 = vmatpush1.bf16.msra.mxu1 %v5637_v45 }
0x16bb   :  { %5673 = vmatprep.subr.bf16.mxu1 %v5640_v2 }
0x16be   :  { %5674 = vmatpush1.bf16.msra.mxu1 %v5639_v33 }
0x16c1   :  { %5676 = vmatmul.mubr.bf16.vlgmr.msra.gmra.mrb[44].mxu1 %v5641_v23 }
0x1794   :  { %v5677_v3 = vpop.f32.mrb[44].mxu1 }
0x1795   :  { %v5679_v42 = vpop.f32.mrb[45].mxu1 }
0x1796   :  { %v5681_v24 = vpop.f32.mrb[46].mxu1 }
0x1797   :  { %v8737_v61 = vpack.c.bf16 %v5681_v24, %v5677_v3  ;;  %v5683_v15 = vpop.f32.mrb[47].mxu1 }
0x1798   :  { %v8735_v63 = vpack.c.bf16 %v5683_v15, %v5679_v42 }
0x179a   :  { %8736 = vmatprep.subr.bf16.mxu0 %v8735_v63 }
0x179b   :  { %8738 = vmatpush1.bf16.msra.mxu0 %v8737_v61 }
0x179e   :  { %8352 = vmatmul.mubr.msk.f32.vlgmr.msra.gmra.mrb[36].mxu0 %vm2706_vm0, %v10392_v30 }
0x179f   :  { %5756 = vmatprep.mubr.f32.mxu0 %v9849_v17 }
0x17a2   :  { %8353 = vmatmul.mubr.msk.f32.gmra.mrb[38].mxu0 %vm2706_vm0, %v10399_v31 }
0x1871   :  { %v5752_v37 = vpop.f32.mrb[36].mxu0 }
0x1872   :  { %v5754_v29 = vpop.f32.mrb[37].mxu0  ;;  %v5769_v19 = vmul.f32 %v5752_v37, %v5752_v37 }
0x1873   :  { %v5763_v20 = vadd.f32 %v5754_v29, %v5752_v37  ;;  %v5770_v28 = vmul.f32 %v5754_v29, %v5754_v29 }
0x1875   :  { %5764 = vadd.xlane.f32.xlu0 %v5763_v20  ;;  %v5758_v4 = vpop.f32.mrb[38].mxu0  ;;  %v5773_v36 = vadd.f32 %v5770_v28, %v5769_v19 }
0x1876   :  { %v5760_v39 = vpop.f32.mrb[39].mxu0  ;;  %v5771_v38 = vmul.f32 %v5758_v4, %v5758_v4 }
0x1877   :  { %v5772_v21 = vmul.f32 %v5760_v39, %v5760_v39  ;;  %5774 = vadd.xlane.f32.xlu1 %v5773_v36  ;;  %v5766_v12 = vadd.f32 %v5760_v39, %v5758_v4 }
0x1879   :  { %5767 = vadd.xlane.f32.xlu0 %v5766_v12  ;;  %v5776_v41 = vadd.f32 %v5772_v21, %v5771_v38 }
0x187b   :  { %5777 = vadd.xlane.f32.xlu1 %v5776_v41 }
0x1902   :  { %v5765_v0 = vpop.xlane.xlu0 %5764 }
0x1904   :  { %v5775_v16 = vpop.xlane.xlu1 %5774 }
0x1906   :  { %v5768_v48 = vpop.xlane.xlu0 %5767 }
0x1907   :  { %v5779_v6 = vadd.f32 %v5768_v48, %v5765_v0 }
0x1908   :  { %v5778_v47 = vpop.xlane.xlu1 %5777 }
0x1909   :  { %v5781_v10 = vmul.f32 0.001953125, %v5779_v6  ;;  %v5780_v7 = vadd.f32 %v5778_v47, %v5775_v16 }
0x190b   :  { %v5783_v62 = vmul.f32 %v5781_v10, %v5781_v10  ;;  %v5782_v5 = vmul.f32 0.001953125, %v5780_v7 }
0x190d   :  { %v5784_v18 = vsub.f32 %v5782_v5, %v5783_v62 }
0x190f   :  { %v5785_v40 = vmax.f32 %v5784_v18, 0.0 }
0x1911   :  { %v5788_v22 = vadd.f32 1e-05, %v5785_v40 }
0x1913   :  { %9439 = vrsqrt.f32 %v5788_v22 }
0x191d   :  { %v9440_v43 = vpop.eup %9439 }
0x191e   :  { %v5790_v1 = vmul.f32 %v9440_v43, %v8354_v26 }
0x1920   :  { %5797 = vperm.xlu0 %9437, %v5790_v1   ;;  %v5793_v13 = vmul.f32 %v5790_v1, %v5781_v10 }
0x1922   :  { %v5794_v34 = vsub.f32 %v8355_v32, %v5793_v13 }
0x1924   :  { %5806 = vperm.xlu1 %9438, %v5794_v34  }
0x199f   :  { %v5798_v44 = vpop.permute.xlu0 %5797 }
0x19a0   :  { %v5800_v14 = vmul.f32 %v5798_v44, %v5752_v37  ;;  %v5801_v11 = vmul.f32 %v5798_v44, %v5754_v29  ;;  %v5802_v9 = vmul.f32 %v5798_v44, %v5758_v4  ;;  %v5803_v45 = vmul.f32 %v5798_v44, %v5760_v39 }
0x19a3   :  { %v5807_v2 = vpop.permute.xlu1 %5806 }
0x19a4   :  { %v5809_v33 = vadd.f32 %v5807_v2, %v5800_v14  ;;  %v5810_v23 = vadd.f32 %v5807_v2, %v5801_v11  ;;  %v5811_v3 = vadd.f32 %v5807_v2, %v5802_v9  ;;  %v5812_v42 = vadd.f32 %v5807_v2, %v5803_v45 }
0x19a6   :  { %v5813_v24 = vadd.f32 %v5809_v33, %v11054_v35  ;;  %v5814_v61 = vadd.f32 %v5810_v23, %v11057_v25  ;;  %v11123_v15 = vadd.f32 %v5811_v3, %v11060_v27  ;;  %v11126_v63 = vadd.f32 %v5812_v42, %v11064_v46 }
0x19a8   :  { %v5817_v19 = vmin.f32 %v5813_v24, 20.0  ;;  %v5818_v37 = vmin.f32 %v5814_v61, 20.0  ;;  %v5819_v29 = vmin.f32 %v11123_v15, 20.0  ;;  %v5820_v20 = vmin.f32 %v11126_v63, 20.0 }
0x19a9   :  { %vm5821_vm6 = vcmp.gt.f32.partialorder %v5813_v24, 20.0  ;;  %vm5822_vm7 = vcmp.gt.f32.partialorder %v5814_v61, 20.0  ;;  %vm5823_vm10 = vcmp.gt.f32.partialorder %v11123_v15, 20.0  ;;  %vm5824_vm13 = vcmp.gt.f32.partialorder %v11126_v63, 20.0 }
0x19aa   :  { %v5825_v28 = vmul.f32 1.442695, %v5817_v19  ;;  %v5827_v4 = vmul.f32 1.442695, %v5818_v37  ;;  %v5829_v36 = vmul.f32 1.442695, %v5819_v29 }
0x19ab   :  { %v5831_v39 = vmul.f32 1.442695, %v5820_v20 }
0x19ac   :  { %9441 = vpow2.f32 %v5825_v28 }
0x19ad   :  { %9443 = vpow2.f32 %v5827_v4 }
0x19ae   :  { %9445 = vpow2.f32 %v5829_v36 }
0x19af   :  { %9447 = vpow2.f32 %v5831_v39 }
0x19b6   :  { %v9442_v38 = vpop.eup %9441 }
0x19b7   :  { %v9444_v21 = vpop.eup %9443  ;;  %v5833_v12 = vadd.f32 1.0, %v9442_v38  ;;  %v5836_v47 = vmul.f32 -0.5, %v9442_v38  ;;  %v5839_v18 = vand.u32 2147483647, %v9442_v38 }
0x19b8   :  { %v9446_v41 = vpop.eup %9445  ;;  %v5842_v0 = vadd.f32 1.0, %v9444_v21  ;;  %v5845_v10 = vmul.f32 -0.5, %v9444_v21  ;;  %v5848_v22 = vand.u32 2147483647, %v9444_v21 }
0x19b9   :  { %v9448_v16 = vpop.eup %9447  ;;  %9449 = vlog2.f32 %v5833_v12  ;;  %v5851_v48 = vadd.f32 1.0, %v9446_v41  ;;  %v5854_v7 = vmul.f32 -0.5, %v9446_v41  ;;  %v5837_v62 = vadd.f32 1.0, %v5836_v47 }
0x19ba   :  { %9451 = vlog2.f32 %v5842_v0  ;;  %v5860_v6 = vadd.f32 1.0, %v9448_v16  ;;  %v5863_v5 = vmul.f32 -0.5, %v9448_v16  ;;  %v5846_v40 = vadd.f32 1.0, %v5845_v10 }
0x19bb   :  { %9453 = vlog2.f32 %v5851_v48  ;;  %v5855_v26 = vadd.f32 1.0, %v5854_v7  ;;  %v5857_v1 = vand.u32 2147483647, %v9446_v41  ;;  %v5838_v34 = vmul.f32 %v9442_v38, %v5837_v62 }
0x19bc   :  { %9455 = vlog2.f32 %v5860_v6  ;;  %v5864_v44 = vadd.f32 1.0, %v5863_v5  ;;  %vm5840_vm8 = vcmp.lt.f32.partialorder %v5839_v18, 0.0004427343  ;;  %v5847_v9 = vmul.f32 %v9444_v21, %v5846_v40 }
0x19bd   :  { %v5866_v45 = vand.u32 2147483647, %v9448_v16  ;;  %vm5849_vm9 = vcmp.lt.f32.partialorder %v5848_v22, 0.0004427343  ;;  %v5856_v23 = vmul.f32 %v9446_v41, %v5855_v26  ;;  %vm5858_vm11 = vcmp.lt.f32.partialorder %v5857_v1, 0.0004427343 }
0x19be   :  { %v5865_v20 = vmul.f32 %v9448_v16, %v5864_v44 }
0x19bf   :  { %vm5867_vm12 = vcmp.lt.f32.partialorder %v5866_v45, 0.0004427343 }
0x19c3   :  { %v9450_v43 = vpop.eup %9449 }
0x19c4   :  { %v9452_v32 = vpop.eup %9451  ;;  %v5835_v13 = vmul.f32 0.6931472, %v9450_v43 }
0x19c5   :  { %v9454_v14 = vpop.eup %9453  ;;  %v5844_v11 = vmul.f32 0.6931472, %v9452_v32 }
0x19c6   :  { %v5841_v2 = vsel %vm5840_vm8, %v5838_v34, %v5835_v13  ;;  %v5853_v33 = vmul.f32 0.6931472, %v9454_v14  ;;  %v9456_v3 = vpop.eup %9455 }
0x19c7   :  { %v5850_v42 = vsel %vm5849_vm9, %v5847_v9, %v5844_v11  ;;  %v11132_v19 = vsel %vm5821_vm6, %v5813_v24, %v5841_v2  ;;  %v5862_v29 = vmul.f32 0.6931472, %v9456_v3 }
0x19c8   :  { %v5859_v37 = vsel %vm5858_vm11, %v5856_v23, %v5853_v33  ;;  %v5870_v28 = vsel %vm5822_vm7, %v5814_v61, %v5850_v42 }
0x19c9   :  { %v11136_v4 = vsel %vm5823_vm10, %v11123_v15, %v5859_v37  ;;  %v5868_v36 = vsel %vm5867_vm12, %v5865_v20, %v5862_v29 }
0x19ca   :  { %v5872_v39 = vsel %vm5824_vm13, %v11126_v63, %v5868_v36 }
0x19cb   :  { %9795 = dma.done.wait [#allocation18 + $0x6], 4096 }
0x19cc   :  { %9796 = vsyncadd [#allocation18 + $0x6], 4294963200  ;;  %v5908_v38 = vpack.c.bf16 %v5872_v39, %v5870_v28  ;;  %6016 = vmatprep.mubr.f32.mxu1 %v9849_v17  ;;  %9457 = vset.pattern.permute.xlu0 %v9850_v8  ;;  %v5876_v24 = vld [vmem:[#allocation8 + $0x8] sm:$0xff]  ;;  %v5875_v61 = vld [vmem:[#allocation8] sm:$0xff]  ;;  %v5907_v23 = vpack.c.bf16 %v11136_v4, %v11132_v19 }
0x19cd   :  { %9458 = vset.pattern.permute.xlu1 %v9850_v8  ;;  %v5878_v21 = vld [vmem:[#allocation8 + $0x18] sm:$0xff]  ;;  %5909 = vmatprep.subr.bf16.mxu0 %v5876_v24  ;;  %v5877_v15 = vld [vmem:[#allocation8 + $0x10] sm:$0xff]  ;;  %v5880_v12 = vld [vmem:[#allocation8 + $0x28] sm:$0xff] }
0x19ce   :  { %5941 = vmatprep.mubr.bf16.mxu0 %v5908_v38  ;;  %5910 = vmatpush1.bf16.msra.mxu0 %v5875_v61  ;;  %v5879_v63 = vld [vmem:[#allocation8 + $0x20] sm:$0xff]  ;;  %v5882_v41 = vld [vmem:[#allocation8 + $0x38] sm:$0xff]  ;;  %v5881_v0 = vld [vmem:[#allocation8 + $0x30] sm:$0xff] }
0x19cf   :  { %5911 = vmatprep.subr.bf16.mxu0 %v5878_v21  ;;  %v5884_v16 = vld [vmem:[#allocation8 + $0x48] sm:$0xff]  ;;  %v5883_v48 = vld [vmem:[#allocation8 + $0x40] sm:$0xff]  ;;  %v5886_v6 = vld [vmem:[#allocation8 + $0x58] sm:$0xff] }
0x19d0   :  { %v5885_v47 = vld [vmem:[#allocation8 + $0x50] sm:$0xff]  ;;  %v5888_v10 = vld [vmem:[#allocation8 + $0x68] sm:$0xff]  ;;  %v5887_v7 = vld [vmem:[#allocation8 + $0x60] sm:$0xff] }
0x19d1   :  { %v5890_v62 = vld [vmem:[#allocation8 + $0x78] sm:$0xff]  ;;  %v5889_v5 = vld [vmem:[#allocation8 + $0x70] sm:$0xff]  ;;  %v5892_v18 = vld [vmem:[#allocation8 + $0x88] sm:$0xff] }
0x19d2   :  { %5912 = vmatpush1.bf16.msra.mxu0 %v5877_v15  ;;  %v5891_v40 = vld [vmem:[#allocation8 + $0x80] sm:$0xff]  ;;  %v5894_v22 = vld [vmem:[#allocation8 + $0x98] sm:$0xff]  ;;  %v5893_v26 = vld [vmem:[#allocation8 + $0x90] sm:$0xff] }
0x19d3   :  { %5913 = vmatprep.subr.bf16.mxu0 %v5880_v12  ;;  %v5896_v43 = vld [vmem:[#allocation8 + $0xa8] sm:$0xff]  ;;  %v5895_v1 = vld [vmem:[#allocation8 + $0xa0] sm:$0xff]  ;;  %v5898_v32 = vld [vmem:[#allocation8 + $0xb8] sm:$0xff] }
0x19d4   :  { %v5897_v13 = vld [vmem:[#allocation8 + $0xb0] sm:$0xff]  ;;  %v5900_v34 = vld [vmem:[#allocation8 + $0xc8] sm:$0xff]  ;;  %v5899_v44 = vld [vmem:[#allocation8 + $0xc0] sm:$0xff] }
0x19d5   :  { %v5902_v14 = vld [vmem:[#allocation8 + $0xd8] sm:$0xff]  ;;  %v5901_v11 = vld [vmem:[#allocation8 + $0xd0] sm:$0xff]  ;;  %v5904_v9 = vld [vmem:[#allocation8 + $0xe8] sm:$0xff] }
0x19d6   :  { %5914 = vmatpush1.bf16.msra.mxu0 %v5879_v63  ;;  %v5903_v45 = vld [vmem:[#allocation8 + $0xe0] sm:$0xff]  ;;  %v5906_v2 = vld [vmem:[#allocation8 + $0xf8] sm:$0xff]  ;;  %v5905_v33 = vld [vmem:[#allocation8 + $0xf0] sm:$0xff] }
0x19d7   :  { %5915 = vmatprep.subr.bf16.mxu0 %v5882_v41 }
0x19da   :  { %5916 = vmatpush1.bf16.msra.mxu0 %v5881_v0 }
0x19db   :  { %5917 = vmatprep.subr.bf16.mxu0 %v5884_v16 }
0x19de   :  { %5918 = vmatpush1.bf16.msra.mxu0 %v5883_v48 }
0x19df   :  { %5919 = vmatprep.subr.bf16.mxu0 %v5886_v6 }
0x19e2   :  { %5920 = vmatpush1.bf16.msra.mxu0 %v5885_v47 }
0x19e3   :  { %5921 = vmatprep.subr.bf16.mxu0 %v5888_v10 }
0x19e6   :  { %5922 = vmatpush1.bf16.msra.mxu0 %v5887_v7 }
0x19e7   :  { %5923 = vmatprep.subr.bf16.mxu0 %v5890_v62 }
0x19ea   :  { %5924 = vmatpush1.bf16.msra.mxu0 %v5889_v5 }
0x19eb   :  { %5925 = vmatprep.subr.bf16.mxu0 %v5892_v18 }
0x19ee   :  { %5926 = vmatpush1.bf16.msra.mxu0 %v5891_v40 }
0x19ef   :  { %5927 = vmatprep.subr.bf16.mxu0 %v5894_v22 }
0x19f2   :  { %5928 = vmatpush1.bf16.msra.mxu0 %v5893_v26  ;;  %v8358_v26 = vld [vmem:[%s11441_s12 + $0x38] sm:$0xff] }
0x19f3   :  { %5929 = vmatprep.subr.bf16.mxu0 %v5896_v43 }
0x19f6   :  { %5930 = vmatpush1.bf16.msra.mxu0 %v5895_v1 }
0x19f7   :  { %5931 = vmatprep.subr.bf16.mxu0 %v5898_v32  ;;  %v8359_v32 = vld [vmem:[%s11442_s29 + $0x38] sm:$0xff] }
0x19fa   :  { %5932 = vmatpush1.bf16.msra.mxu0 %v5897_v13 }
0x19fb   :  { %5933 = vmatprep.subr.bf16.mxu0 %v5900_v34 }
0x19fe   :  { %5934 = vmatpush1.bf16.msra.mxu0 %v5899_v44 }
0x19ff   :  { %5935 = vmatprep.subr.bf16.mxu0 %v5902_v14 }
0x1a02   :  { %5936 = vmatpush1.bf16.msra.mxu0 %v5901_v11 }
0x1a03   :  { %5937 = vmatprep.subr.bf16.mxu0 %v5904_v9 }
0x1a06   :  { %5938 = vmatpush1.bf16.msra.mxu0 %v5903_v45 }
0x1a07   :  { %5939 = vmatprep.subr.bf16.mxu0 %v5906_v2 }
0x1a0a   :  { %5940 = vmatpush1.bf16.msra.mxu0 %v5905_v33 }
0x1a0d   :  { %5942 = vmatmul.mubr.bf16.vlgmr.msra.gmra.mrb[40].mxu0 %v5907_v23 }
0x1ae0   :  { %v5943_v3 = vpop.f32.mrb[40].mxu0 }
0x1ae1   :  { %v5945_v42 = vpop.f32.mrb[41].mxu0 }
0x1ae2   :  { %v5947_v37 = vpop.f32.mrb[42].mxu0 }
0x1ae3   :  { %v8741_v29 = vpack.c.bf16 %v5947_v37, %v5943_v3  ;;  %v5949_v20 = vpop.f32.mrb[43].mxu0 }
0x1ae4   :  { %v8739_v28 = vpack.c.bf16 %v5949_v20, %v5945_v42 }
0x1ae6   :  { %8740 = vmatprep.subr.bf16.mxu1 %v8739_v28 }
0x1ae7   :  { %8742 = vmatpush1.bf16.msra.mxu1 %v8741_v29 }
0x1aea   :  { %8356 = vmatmul.mubr.msk.f32.vlgmr.msra.gmra.mrb[48].mxu1 %vm2706_vm0, %v10392_v30 }
0x1aeb   :  { %6022 = vmatprep.mubr.f32.mxu1 %v9849_v17 }
0x1aee   :  { %8357 = vmatmul.mubr.msk.f32.gmra.mrb[50].mxu1 %vm2706_vm0, %v10399_v31 }
0x1bbd   :  { %v6018_v36 = vpop.f32.mrb[48].mxu1 }
0x1bbe   :  { %v6020_v19 = vpop.f32.mrb[49].mxu1  ;;  %v6035_v4 = vmul.f32 %v6018_v36, %v6018_v36 }
0x1bbf   :  { %v6029_v39 = vadd.f32 %v6020_v19, %v6018_v36  ;;  %v6036_v38 = vmul.f32 %v6020_v19, %v6020_v19 }
0x1bc1   :  { %6030 = vadd.xlane.f32.xlu0 %v6029_v39  ;;  %v6024_v24 = vpop.f32.mrb[50].mxu1  ;;  %v6039_v61 = vadd.f32 %v6036_v38, %v6035_v4 }
0x1bc2   :  { %v6026_v21 = vpop.f32.mrb[51].mxu1  ;;  %v6037_v15 = vmul.f32 %v6024_v24, %v6024_v24 }
0x1bc3   :  { %v6038_v12 = vmul.f32 %v6026_v21, %v6026_v21  ;;  %6040 = vadd.xlane.f32.xlu1 %v6039_v61  ;;  %v6032_v63 = vadd.f32 %v6026_v21, %v6024_v24 }
0x1bc5   :  { %6033 = vadd.xlane.f32.xlu0 %v6032_v63  ;;  %v6042_v41 = vadd.f32 %v6038_v12, %v6037_v15 }
0x1bc7   :  { %6043 = vadd.xlane.f32.xlu1 %v6042_v41 }
0x1c4e   :  { %v6031_v0 = vpop.xlane.xlu0 %6030 }
0x1c50   :  { %v6041_v16 = vpop.xlane.xlu1 %6040 }
0x1c52   :  { %v6034_v48 = vpop.xlane.xlu0 %6033 }
0x1c53   :  { %v6045_v6 = vadd.f32 %v6034_v48, %v6031_v0 }
0x1c54   :  { %v6044_v47 = vpop.xlane.xlu1 %6043 }
0x1c55   :  { %v6047_v10 = vmul.f32 0.001953125, %v6045_v6  ;;  %v6046_v7 = vadd.f32 %v6044_v47, %v6041_v16 }
0x1c57   :  { %v6049_v62 = vmul.f32 %v6047_v10, %v6047_v10  ;;  %v6048_v5 = vmul.f32 0.001953125, %v6046_v7 }
0x1c59   :  { %v6050_v18 = vsub.f32 %v6048_v5, %v6049_v62 }
0x1c5b   :  { %v6051_v40 = vmax.f32 %v6050_v18, 0.0 }
0x1c5d   :  { %v6054_v22 = vadd.f32 1e-05, %v6051_v40 }
0x1c5f   :  { %9459 = vrsqrt.f32 %v6054_v22 }
0x1c69   :  { %v9460_v43 = vpop.eup %9459 }
0x1c6a   :  { %v6056_v1 = vmul.f32 %v9460_v43, %v8358_v26 }
0x1c6c   :  { %6063 = vperm.xlu0 %9457, %v6056_v1   ;;  %v6059_v13 = vmul.f32 %v6056_v1, %v6047_v10 }
0x1c6e   :  { %v6060_v34 = vsub.f32 %v8359_v32, %v6059_v13 }
0x1c70   :  { %6072 = vperm.xlu1 %9458, %v6060_v34  }
0x1ceb   :  { %v6064_v44 = vpop.permute.xlu0 %6063 }
0x1cec   :  { %v6066_v14 = vmul.f32 %v6064_v44, %v6018_v36  ;;  %v6067_v11 = vmul.f32 %v6064_v44, %v6020_v19  ;;  %v6068_v9 = vmul.f32 %v6064_v44, %v6024_v24  ;;  %v6069_v45 = vmul.f32 %v6064_v44, %v6026_v21 }
0x1cef   :  { %v6073_v2 = vpop.permute.xlu1 %6072 }
0x1cf0   :  { %v6075_v33 = vadd.f32 %v6073_v2, %v6066_v14  ;;  %v6076_v23 = vadd.f32 %v6073_v2, %v6067_v11  ;;  %v6077_v3 = vadd.f32 %v6073_v2, %v6068_v9  ;;  %v6078_v42 = vadd.f32 %v6073_v2, %v6069_v45 }
0x1cf2   :  { %v6079_v37 = vadd.f32 %v6075_v33, %v11054_v35  ;;  %v6080_v29 = vadd.f32 %v6076_v23, %v11057_v25  ;;  %v11159_v20 = vadd.f32 %v6077_v3, %v11060_v27  ;;  %v11162_v28 = vadd.f32 %v6078_v42, %v11064_v46 }
0x1cf4   :  { %v6083_v4 = vmin.f32 %v6079_v37, 20.0  ;;  %v6084_v36 = vmin.f32 %v6080_v29, 20.0  ;;  %v6085_v19 = vmin.f32 %v11159_v20, 20.0  ;;  %v6086_v39 = vmin.f32 %v11162_v28, 20.0 }
0x1cf5   :  { %vm6087_vm14 = vcmp.gt.f32.partialorder %v6079_v37, 20.0  ;;  %vm6088_vm15 = vcmp.gt.f32.partialorder %v6080_v29, 20.0  ;;  %vm6089_vm3 = vcmp.gt.f32.partialorder %v11159_v20, 20.0  ;;  %vm6090_vm6 = vcmp.gt.f32.partialorder %v11162_v28, 20.0 }
0x1cf6   :  { %v6091_v38 = vmul.f32 1.442695, %v6083_v4  ;;  %v6093_v24 = vmul.f32 1.442695, %v6084_v36  ;;  %v6095_v61 = vmul.f32 1.442695, %v6085_v19 }
0x1cf7   :  { %v6097_v21 = vmul.f32 1.442695, %v6086_v39 }
0x1cf8   :  { %9461 = vpow2.f32 %v6091_v38 }
0x1cf9   :  { %9463 = vpow2.f32 %v6093_v24 }
0x1cfa   :  { %9465 = vpow2.f32 %v6095_v61 }
0x1cfb   :  { %9467 = vpow2.f32 %v6097_v21 }
0x1d02   :  { %v9462_v35 = vpop.eup %9461 }
0x1d03   :  { %v9464_v25 = vpop.eup %9463  ;;  %v6099_v27 = vadd.f32 1.0, %v9462_v35  ;;  %v6102_v0 = vmul.f32 -0.5, %v9462_v35  ;;  %v6105_v10 = vand.u32 2147483647, %v9462_v35 }
0x1d04   :  { %v9466_v15 = vpop.eup %9465  ;;  %v6108_v46 = vadd.f32 1.0, %v9464_v25  ;;  %v6111_v16 = vmul.f32 -0.5, %v9464_v25  ;;  %v6114_v62 = vand.u32 2147483647, %v9464_v25 }
0x1d05   :  { %v9468_v12 = vpop.eup %9467  ;;  %9469 = vlog2.f32 %v6099_v27  ;;  %v6117_v63 = vadd.f32 1.0, %v9466_v15  ;;  %v6120_v48 = vmul.f32 -0.5, %v9466_v15  ;;  %v6103_v6 = vadd.f32 1.0, %v6102_v0 }
0x1d06   :  { %9471 = vlog2.f32 %v6108_v46  ;;  %v6126_v41 = vadd.f32 1.0, %v9468_v12  ;;  %v6129_v47 = vmul.f32 -0.5, %v9468_v12  ;;  %v6112_v7 = vadd.f32 1.0, %v6111_v16 }
0x1d07   :  { %9473 = vlog2.f32 %v6117_v63  ;;  %v6121_v5 = vadd.f32 1.0, %v6120_v48  ;;  %v6123_v40 = vand.u32 2147483647, %v9466_v15  ;;  %v6104_v43 = vmul.f32 %v9462_v35, %v6103_v6 }
0x1d08   :  { %9475 = vlog2.f32 %v6126_v41  ;;  %v6130_v1 = vadd.f32 1.0, %v6129_v47  ;;  %vm6106_vm1 = vcmp.lt.f32.partialorder %v6105_v10, 0.0004427343  ;;  %v6113_v34 = vmul.f32 %v9464_v25, %v6112_v7 }
0x1d09   :  { %v6132_v44 = vand.u32 2147483647, %v9468_v12  ;;  %vm6115_vm2 = vcmp.lt.f32.partialorder %v6114_v62, 0.0004427343  ;;  %v6122_v9 = vmul.f32 %v9466_v15, %v6121_v5  ;;  %vm6124_vm4 = vcmp.lt.f32.partialorder %v6123_v40, 0.0004427343 }
0x1d0a   :  { %v6131_v42 = vmul.f32 %v9468_v12, %v6130_v1 }
0x1d0b   :  { %vm6133_vm5 = vcmp.lt.f32.partialorder %v6132_v44, 0.0004427343 }
0x1d0f   :  { %v9470_v18 = vpop.eup %9469 }
0x1d10   :  { %v9472_v22 = vpop.eup %9471  ;;  %v6101_v26 = vmul.f32 0.6931472, %v9470_v18 }
0x1d11   :  { %v9474_v32 = vpop.eup %9473  ;;  %v6110_v13 = vmul.f32 0.6931472, %v9472_v22 }
0x1d12   :  { %v6107_v14 = vsel %vm6106_vm1, %v6104_v43, %v6101_v26  ;;  %v6119_v11 = vmul.f32 0.6931472, %v9474_v32  ;;  %v9476_v45 = vpop.eup %9475 }
0x1d13   :  { %v6116_v2 = vsel %vm6115_vm2, %v6113_v34, %v6110_v13  ;;  %v6135_v33 = vsel %vm6087_vm14, %v6079_v37, %v6107_v14  ;;  %v6128_v3 = vmul.f32 0.6931472, %v9476_v45 }
0x1d14   :  { %v6125_v23 = vsel %vm6124_vm4, %v6122_v9, %v6119_v11  ;;  %v6136_v4 = vsel %vm6088_vm15, %v6080_v29, %v6116_v2 }
0x1d15   :  { %v6137_v36 = vsel %vm6089_vm3, %v11159_v20, %v6125_v23  ;;  %v6134_v19 = vsel %vm6133_vm5, %v6131_v42, %v6128_v3 }
0x1d16   :  { %v6138_v39 = vsel %vm6090_vm6, %v11162_v28, %v6134_v19 }
0x1d17   :  { %9797 = dma.done.wait [#allocation18 + $0x7], 2048 }
0x1d18   :  { %9798 = vsyncadd [#allocation18 + $0x7], 4294965248  ;;  %v6159_v38 = vpack.c.bf16 %v6138_v39, %v6136_v4  ;;  %9477 = vset.pattern.permute.xlu0 %v9850_v8  ;;  %9478 = vset.pattern.permute.xlu1 %v9850_v8  ;;  %v6150_v37 = vld [vmem:[#allocation9 + $0x40] sm:$0xff]  ;;  %v6151_v61 = vld [vmem:[#allocation9 + $0x48] sm:$0xff]  ;;  %v6158_v16 = vpack.c.bf16 %v6137_v36, %v6135_v33 }
0x1d19   :  { %v6142_v24 = vld [vmem:[#allocation9] sm:$0xff]  ;;  %8414 = vmatprep.subr.bf16.mxu1 %v6150_v37  ;;  %v6143_v29 = vld [vmem:[#allocation9 + $0x8] sm:$0xff]  ;;  %v6152_v20 = vld [vmem:[#allocation9 + $0x50] sm:$0xff] }
0x1d1a   :  { %6192 = vmatprep.mubr.bf16.mxu1 %v6159_v38  ;;  %8415 = vmatpush3.bf16.msra.mxu1 %v6142_v24  ;;  %v6144_v21 = vld [vmem:[#allocation9 + $0x10] sm:$0xff]  ;;  %v6153_v28 = vld [vmem:[#allocation9 + $0x58] sm:$0xff]  ;;  %v6154_v25 = vld [vmem:[#allocation9 + $0x60] sm:$0xff] }
0x1d1b   :  { %8416 = vmatprep.subr.bf16.mxu1 %v6151_v61  ;;  %v6145_v35 = vld [vmem:[#allocation9 + $0x18] sm:$0xff]  ;;  %v6146_v27 = vld [vmem:[#allocation9 + $0x20] sm:$0xff]  ;;  %v6155_v15 = vld [vmem:[#allocation9 + $0x68] sm:$0xff] }
0x1d1c   :  { %v6147_v46 = vld [vmem:[#allocation9 + $0x28] sm:$0xff]  ;;  %v6156_v12 = vld [vmem:[#allocation9 + $0x70] sm:$0xff]  ;;  %v6157_v41 = vld [vmem:[#allocation9 + $0x78] sm:$0xff] }
0x1d1d   :  { %v6148_v63 = vld [vmem:[#allocation9 + $0x30] sm:$0xff]  ;;  %v6149_v0 = vld [vmem:[#allocation9 + $0x38] sm:$0xff]  ;;  %v8362_v23 = vld [vmem:[%s11441_s12 + $0x40] sm:$0xff] }
0x1d1e   :  { %8417 = vmatpush3.bf16.msra.mxu1 %v6143_v29  ;;  %v8363_v4 = vld [vmem:[%s11442_s29 + $0x40] sm:$0xff] }
0x1d1f   :  { %8418 = vmatprep.subr.bf16.mxu1 %v6152_v20 }
0x1d22   :  { %8419 = vmatpush3.bf16.msra.mxu1 %v6144_v21 }
0x1d23   :  { %8420 = vmatprep.subr.bf16.mxu1 %v6153_v28 }
0x1d26   :  { %8421 = vmatpush3.bf16.msra.mxu1 %v6145_v35 }
0x1d27   :  { %8422 = vmatprep.subr.bf16.mxu1 %v6154_v25 }
0x1d2a   :  { %8423 = vmatpush3.bf16.msra.mxu1 %v6146_v27 }
0x1d2b   :  { %8424 = vmatprep.subr.bf16.mxu1 %v6155_v15 }
0x1d2e   :  { %8425 = vmatpush3.bf16.msra.mxu1 %v6147_v46 }
0x1d2f   :  { %8426 = vmatprep.subr.bf16.mxu1 %v6156_v12 }
0x1d32   :  { %8427 = vmatpush3.bf16.msra.mxu1 %v6148_v63 }
0x1d33   :  { %8428 = vmatprep.subr.bf16.mxu1 %v6157_v41 }
0x1d36   :  { %8429 = vmatpush3.bf16.msra.mxu1 %v6149_v0 }
0x1d39   :  { %6193 = vmatmul.mubr.bf16.vlgmr.msra.gmra.mrb[52].mxu1 %v6158_v16 }
0x1d3a   :  { %8524 = vmatprep.mubr.msk.f32.mxu1 %vm2706_vm0, %v10392_v30 }
0x1e0c   :  { %v8430_v48 = vpop.f32.mrb[52].mxu1 }
0x1e0d   :  { %v8431_v6 = vpop.f32.mrb[53].mxu1 }
0x1e0e   :  { %v8432_v47 = vadd.f32 %v8431_v6, %v8430_v48  ;;  %v8433_v10 = vpop.f32.mrb[54].mxu1 }
0x1e0f   :  { %v8434_v7 = vpop.f32.mrb[55].mxu1 }
0x1e10   :  { %v8435_v62 = vadd.f32 %v8434_v7, %v8433_v10 }
0x1e12   :  { %v8743_v5 = vpack.c.bf16 %v8435_v62, %v8432_v47 }
0x1e14   :  { %8744 = vmatprep.subr.bf16.mxu1 %v8743_v5 }
0x1e15   :  { %8746 = vmatpush3.bf16.msra.mxu1 %v8743_v5 }
0x1e18   :  { %8525 = vmatmul.mubr.msk.f32.vlgmr.msra.gmra.mrb[56].mxu1 %vm2706_vm0, %v10399_v31 }
0x1eeb   :  { %v8526_v18 = vpop.f32.mrb[56].mxu1 }
0x1eec   :  { %v6267_v40 = vpop.f32.mrb[57].mxu1  ;;  %v6281_v26 = vmul.f32 %v8526_v18, %v8526_v18 }
0x1eed   :  { %6276 = vadd.xlane.f32.xlu0 %v6267_v40  ;;  %v6280_v22 = vmul.f32 %v6267_v40, %v6267_v40 }
0x1eef   :  { %6282 = vadd.xlane.f32.xlu1 %v6280_v22 }
0x1ef1   :  { %6278 = vadd.xlane.f32.xlu0 %v8526_v18 }
0x1ef3   :  { %6284 = vadd.xlane.f32.xlu1 %v6281_v26 }
0x1f7a   :  { %v6277_v43 = vpop.xlane.xlu0 %6276 }
0x1f7c   :  { %v6283_v1 = vpop.xlane.xlu1 %6282 }
0x1f7e   :  { %v6279_v32 = vpop.xlane.xlu0 %6278 }
0x1f7f   :  { %v6286_v13 = vadd.f32 %v6279_v32, %v6277_v43 }
0x1f80   :  { %v6285_v34 = vpop.xlane.xlu1 %6284 }
0x1f81   :  { %v6288_v44 = vmul.f32 0.00390625, %v6286_v13  ;;  %v6287_v14 = vadd.f32 %v6285_v34, %v6283_v1 }
0x1f83   :  { %v6290_v11 = vmul.f32 %v6288_v44, %v6288_v44  ;;  %v6289_v9 = vmul.f32 0.00390625, %v6287_v14 }
0x1f85   :  { %v6291_v45 = vsub.f32 %v6289_v9, %v6290_v11 }
0x1f87   :  { %v6292_v2 = vmax.f32 %v6291_v45, 0.0 }
0x1f89   :  { %v6295_v33 = vadd.f32 1e-05, %v6292_v2 }
0x1f8b   :  { %9479 = vrsqrt.f32 %v6295_v33 }
0x1f95   :  { %v9480_v3 = vpop.eup %9479 }
0x1f96   :  { %v6297_v42 = vmul.f32 %v9480_v3, %v8362_v23 }
0x1f98   :  { %6304 = vperm.xlu0 %9477, %v6297_v42   ;;  %v6300_v36 = vmul.f32 %v6297_v42, %v6288_v44 }
0x1f9a   :  { %v6301_v19 = vsub.f32 %v8363_v4, %v6300_v36 }
0x1f9c   :  { %6311 = vperm.xlu1 %9478, %v6301_v19  }
0x2017   :  { %v6305_v39 = vpop.permute.xlu0 %6304 }
0x2018   :  { %v6307_v38 = vmul.f32 %v6305_v39, %v6267_v40  ;;  %v6308_v37 = vmul.f32 %v8526_v18, %v6305_v39 }
0x201b   :  { %v6312_v24 = vpop.permute.xlu1 %6311 }
0x201c   :  { %v6314_v61 = vadd.f32 %v6312_v24, %v6307_v38  ;;  %v6315_v29 = vadd.f32 %v6312_v24, %v6308_v37 }
0x201e   :  { %v6316_v20 = vmin.f32 %v6314_v61, 20.0  ;;  %v6317_v21 = vmin.f32 %v6315_v29, 20.0  ;;  %vm6318_vm8 = vcmp.gt.f32.partialorder %v6314_v61, 20.0  ;;  %vm6319_vm10 = vcmp.gt.f32.partialorder %v6315_v29, 20.0 }
0x2020   :  { %v6320_v28 = vmul.f32 1.442695, %v6316_v20  ;;  %v6322_v35 = vmul.f32 1.442695, %v6317_v21 }
0x2022   :  { %9481 = vpow2.f32 %v6320_v28 }
0x2023   :  { %9483 = vpow2.f32 %v6322_v35 }
0x202c   :  { %v9482_v25 = vpop.eup %9481 }
0x202d   :  { %v9484_v27 = vpop.eup %9483  ;;  %v6324_v15 = vadd.f32 1.0, %v9482_v25  ;;  %v6327_v12 = vmul.f32 -0.5, %v9482_v25  ;;  %v6330_v0 = vand.u32 2147483647, %v9482_v25 }
0x202e   :  { %v6333_v46 = vadd.f32 1.0, %v9484_v27  ;;  %v6336_v63 = vmul.f32 -0.5, %v9484_v27  ;;  %v6339_v48 = vand.u32 2147483647, %v9484_v27 }
0x202f   :  { %9485 = vlog2.f32 %v6324_v15  ;;  %v6328_v41 = vadd.f32 1.0, %v6327_v12  ;;  %vm6331_vm7 = vcmp.lt.f32.partialorder %v6330_v0, 0.0004427343 }
0x2030   :  { %9487 = vlog2.f32 %v6333_v46  ;;  %v6337_v16 = vadd.f32 1.0, %v6336_v63  ;;  %vm6340_vm9 = vcmp.lt.f32.partialorder %v6339_v48, 0.0004427343 }
0x2031   :  { %v6329_v7 = vmul.f32 %v9482_v25, %v6328_v41 }
0x2032   :  { %v6338_v5 = vmul.f32 %v9484_v27, %v6337_v16 }
0x2039   :  { %v9486_v6 = vpop.eup %9485 }
0x203a   :  { %v9488_v47 = vpop.eup %9487  ;;  %v6326_v10 = vmul.f32 0.6931472, %v9486_v6 }
0x203b   :  { %v6335_v62 = vmul.f32 0.6931472, %v9488_v47 }
0x203c   :  { %v6332_v18 = vsel %vm6331_vm7, %v6329_v7, %v6326_v10 }
0x203d   :  { %v6341_v40 = vsel %vm6340_vm9, %v6338_v5, %v6335_v62  ;;  %v11184_v22 = vsel %vm6318_vm8, %v6314_v61, %v6332_v18 }
0x203e   :  { %v11186_v26 = vsel %vm6319_vm10, %v6315_v29, %v6341_v40 }
0x203f   :  { %9799 = dma.done.wait [#allocation18 + $0x8], 1024 }
0x2040   :  { %9800 = vsyncadd [#allocation18 + $0x8], 4294966272  ;;  %8527 = vmatprep.subr.bf16.mxu1 %v9849_v17  ;;  %8551 = vmatprep.mubr.msk.f32.mxu0 %vm2706_vm0, %v10392_v30  ;;  %vm9853_vm11 = vmmov 0   ;;  %v6348_v43 = vld [vmem:[#allocation10] sm:$0xff]  ;;  %v6349_v1 = vld [vmem:[#allocation10 + $0x8] sm:$0xff]  ;;  %v6356_v9 = vpack.c.bf16 %v11186_v26, %v11184_v22 }
0x2041   :  { %8543 = vmatprep.mubr.msk.bf16.mxu1 %vm9853_vm11, %v9849_v17  ;;  %9489 = vset.pattern.permute.xlu0 %v9850_v8  ;;  %v6350_v32 = vld [vmem:[#allocation10 + $0x10] sm:$0xff]  ;;  %v6351_v13 = vld [vmem:[#allocation10 + $0x18] sm:$0xff]  ;;  %v6352_v34 = vld [vmem:[#allocation10 + $0x20] sm:$0xff] }
0x2042   :  { %9490 = vset.pattern.permute.xlu1 %v9850_v8  ;;  %8528 = vmatpush3.bf16.msra.mxu1 %v6348_v43  ;;  %v6353_v44 = vld [vmem:[#allocation10 + $0x28] sm:$0xff]  ;;  %v6354_v14 = vld [vmem:[#allocation10 + $0x30] sm:$0xff]  ;;  %v6355_v11 = vld [vmem:[#allocation10 + $0x38] sm:$0xff] }
0x2043   :  { %8529 = vmatprep.subr.bf16.mxu1 %v9849_v17  ;;  %v8366_v15 = vld [vmem:[%s11441_s12 + $0x48] sm:$0xff] }
0x2044   :  { %v8367_v63 = vld [vmem:[%s11442_s29 + $0x48] sm:$0xff] }
0x2046   :  { %8530 = vmatpush3.bf16.msra.mxu1 %v6349_v1 }
0x2047   :  { %8531 = vmatprep.subr.bf16.mxu1 %v9849_v17 }
0x204a   :  { %8532 = vmatpush3.bf16.msra.mxu1 %v6350_v32 }
0x204b   :  { %8533 = vmatprep.subr.bf16.mxu1 %v9849_v17 }
0x204e   :  { %8534 = vmatpush3.bf16.msra.mxu1 %v6351_v13 }
0x204f   :  { %8535 = vmatprep.subr.bf16.mxu1 %v9849_v17 }
0x2052   :  { %8536 = vmatpush3.bf16.msra.mxu1 %v6352_v34 }
0x2053   :  { %8537 = vmatprep.subr.bf16.mxu1 %v9849_v17 }
0x2056   :  { %8538 = vmatpush3.bf16.msra.mxu1 %v6353_v44 }
0x2057   :  { %8539 = vmatprep.subr.bf16.mxu1 %v9849_v17 }
0x205a   :  { %8540 = vmatpush3.bf16.msra.mxu1 %v6354_v14 }
0x205b   :  { %8541 = vmatprep.subr.bf16.mxu1 %v9849_v17 }
0x205e   :  { %8542 = vmatpush3.bf16.msra.mxu1 %v6355_v11 }
0x2061   :  { %8544 = vmatmul.mubr.bf16.vlgmr.msra.gmra.mrb[60].mxu1 %v6356_v9 }
0x2134   :  { %v6391_v45 = vpop.f32.mrb[60].mxu1 }
0x2135   :  { %v8545_v2 = vpop.f32.mrb[61].mxu1 }
0x2136   :  { %v6394_v33 = vpop.f32.mrb[62].mxu1 }
0x2137   :  { %v8747_v23 = vpack.c.bf16 %v6394_v33, %v6391_v45  ;;  %v8546_v3 = vpop.f32.mrb[63].mxu1 }
0x2139   :  { %8748 = vmatprep.subr.bf16.mxu0 %v8747_v23 }
0x213a   :  { %8750 = vmatpush3.bf16.msra.mxu0 %v8747_v23 }
0x213d   :  { %8552 = vmatmul.mubr.msk.f32.vlgmr.msra.gmra.mrb[44].mxu0 %vm2706_vm0, %v10399_v31 }
0x2210   :  { %v8553_v42 = vpop.f32.mrb[44].mxu0 }
0x2211   :  { %v6464_v4 = vpop.f32.mrb[45].mxu0  ;;  %v6478_v19 = vmul.f32 %v8553_v42, %v8553_v42 }
0x2212   :  { %6473 = vadd.xlane.f32.xlu0 %v6464_v4  ;;  %v6477_v36 = vmul.f32 %v6464_v4, %v6464_v4 }
0x2214   :  { %6479 = vadd.xlane.f32.xlu1 %v6477_v36 }
0x2216   :  { %6475 = vadd.xlane.f32.xlu0 %v8553_v42 }
0x2218   :  { %6481 = vadd.xlane.f32.xlu1 %v6478_v19 }
0x229f   :  { %v6474_v39 = vpop.xlane.xlu0 %6473 }
0x22a1   :  { %v6480_v38 = vpop.xlane.xlu1 %6479 }
0x22a3   :  { %v6476_v37 = vpop.xlane.xlu0 %6475 }
0x22a4   :  { %v6483_v24 = vadd.f32 %v6476_v37, %v6474_v39 }
0x22a5   :  { %v6482_v61 = vpop.xlane.xlu1 %6481 }
0x22a6   :  { %v6485_v29 = vmul.f32 0.00390625, %v6483_v24  ;;  %v6484_v20 = vadd.f32 %v6482_v61, %v6480_v38 }
0x22a8   :  { %v6487_v21 = vmul.f32 %v6485_v29, %v6485_v29  ;;  %v6486_v28 = vmul.f32 0.00390625, %v6484_v20 }
0x22aa   :  { %v6488_v35 = vsub.f32 %v6486_v28, %v6487_v21 }
0x22ac   :  { %v6489_v25 = vmax.f32 %v6488_v35, 0.0 }
0x22ae   :  { %v6492_v27 = vadd.f32 1e-05, %v6489_v25 }
0x22b0   :  { %9491 = vrsqrt.f32 %v6492_v27 }
0x22ba   :  { %v9492_v46 = vpop.eup %9491 }
0x22bb   :  { %v6494_v12 = vmul.f32 %v9492_v46, %v8366_v15 }
0x22bd   :  { %6501 = vperm.xlu0 %9489, %v6494_v12   ;;  %v6497_v41 = vmul.f32 %v6494_v12, %v6485_v29 }
0x22bf   :  { %v6498_v0 = vsub.f32 %v8367_v63, %v6497_v41 }
0x22c1   :  { %6508 = vperm.xlu1 %9490, %v6498_v0  }
0x233c   :  { %v6502_v16 = vpop.permute.xlu0 %6501 }
0x233d   :  { %v6504_v48 = vmul.f32 %v6502_v16, %v6464_v4  ;;  %v6505_v6 = vmul.f32 %v8553_v42, %v6502_v16 }
0x2340   :  { %v6509_v47 = vpop.permute.xlu1 %6508 }
0x2341   :  { %v6511_v10 = vadd.f32 %v6509_v47, %v6504_v48  ;;  %v6512_v7 = vadd.f32 %v6509_v47, %v6505_v6 }
0x2343   :  { %v6513_v62 = vadd.f32 %v6511_v10, %v11184_v22  ;;  %v6514_v5 = vadd.f32 %v6512_v7, %v11186_v26 }
0x2345   :  { %v6515_v18 = vmin.f32 %v6513_v62, 20.0  ;;  %v6516_v40 = vmin.f32 %v6514_v5, 20.0  ;;  %vm6517_vm13 = vcmp.gt.f32.partialorder %v6513_v62, 20.0  ;;  %vm6518_vm15 = vcmp.gt.f32.partialorder %v6514_v5, 20.0 }
0x2347   :  { %v6519_v43 = vmul.f32 1.442695, %v6515_v18  ;;  %v6521_v1 = vmul.f32 1.442695, %v6516_v40 }
0x2349   :  { %9493 = vpow2.f32 %v6519_v43 }
0x234a   :  { %9495 = vpow2.f32 %v6521_v1 }
0x2353   :  { %v9494_v32 = vpop.eup %9493 }
0x2354   :  { %v9496_v13 = vpop.eup %9495  ;;  %v6523_v34 = vadd.f32 1.0, %v9494_v32  ;;  %v6526_v14 = vmul.f32 -0.5, %v9494_v32  ;;  %v6529_v45 = vand.u32 2147483647, %v9494_v32 }
0x2355   :  { %v6532_v44 = vadd.f32 1.0, %v9496_v13  ;;  %v6535_v11 = vmul.f32 -0.5, %v9496_v13  ;;  %v6538_v33 = vand.u32 2147483647, %v9496_v13 }
0x2356   :  { %9497 = vlog2.f32 %v6523_v34  ;;  %v6527_v9 = vadd.f32 1.0, %v6526_v14  ;;  %vm6530_vm12 = vcmp.lt.f32.partialorder %v6529_v45, 0.0004427343 }
0x2357   :  { %9499 = vlog2.f32 %v6532_v44  ;;  %v6536_v2 = vadd.f32 1.0, %v6535_v11  ;;  %vm6539_vm14 = vcmp.lt.f32.partialorder %v6538_v33, 0.0004427343 }
0x2358   :  { %v6528_v4 = vmul.f32 %v9494_v32, %v6527_v9 }
0x2359   :  { %v6537_v19 = vmul.f32 %v9496_v13, %v6536_v2 }
0x2360   :  { %v9498_v23 = vpop.eup %9497 }
0x2361   :  { %v9500_v3 = vpop.eup %9499  ;;  %v6525_v42 = vmul.f32 0.6931472, %v9498_v23 }
0x2362   :  { %v6534_v36 = vmul.f32 0.6931472, %v9500_v3 }
0x2363   :  { %v6531_v39 = vsel %vm6530_vm12, %v6528_v4, %v6525_v42 }
0x2364   :  { %v6540_v38 = vsel %vm6539_vm14, %v6537_v19, %v6534_v36  ;;  %v6541_v37 = vsel %vm6517_vm13, %v6513_v62, %v6531_v39 }
0x2365   :  { %v6542_v24 = vsel %vm6518_vm15, %v6514_v5, %v6540_v38 }
0x2366   :  { %9801 = dma.done.wait [#allocation18 + $0x9], 1024 }
0x2367   :  { %9802 = vsyncadd [#allocation18 + $0x9], 4294966272  ;;  %8554 = vmatprep.subr.bf16.mxu0 %v9849_v17  ;;  %8570 = vmatprep.mubr.msk.bf16.mxu0 %vm9853_vm11, %v9849_v17  ;;  %v6545_v61 = vld [vmem:[#allocation11] sm:$0xff]  ;;  %v6546_v29 = vld [vmem:[#allocation11 + $0x8] sm:$0xff]  ;;  %v6553_v15 = vpack.c.bf16 %v6542_v24, %v6541_v37 }
0x2368   :  { %8578 = vmatprep.mubr.msk.f32.mxu1 %vm2706_vm0, %v10392_v30  ;;  %9501 = vset.pattern.permute.xlu0 %v9850_v8  ;;  %v6547_v20 = vld [vmem:[#allocation11 + $0x10] sm:$0xff]  ;;  %v6548_v21 = vld [vmem:[#allocation11 + $0x18] sm:$0xff]  ;;  %v6549_v28 = vld [vmem:[#allocation11 + $0x20] sm:$0xff] }
0x2369   :  { %9502 = vset.pattern.permute.xlu1 %v9850_v8  ;;  %8555 = vmatpush3.bf16.msra.mxu0 %v6545_v61  ;;  %v6550_v35 = vld [vmem:[#allocation11 + $0x28] sm:$0xff]  ;;  %v6551_v25 = vld [vmem:[#allocation11 + $0x30] sm:$0xff]  ;;  %v6552_v27 = vld [vmem:[#allocation11 + $0x38] sm:$0xff] }
0x236a   :  { %8556 = vmatprep.subr.bf16.mxu0 %v9849_v17  ;;  %v8370_v14 = vld [vmem:[%s11441_s12 + $0x50] sm:$0xff] }
0x236b   :  { %v8371_v45 = vld [vmem:[%s11442_s29 + $0x50] sm:$0xff] }
0x236d   :  { %8557 = vmatpush3.bf16.msra.mxu0 %v6546_v29 }
0x236e   :  { %8558 = vmatprep.subr.bf16.mxu0 %v9849_v17 }
0x2371   :  { %8559 = vmatpush3.bf16.msra.mxu0 %v6547_v20 }
0x2372   :  { %8560 = vmatprep.subr.bf16.mxu0 %v9849_v17 }
0x2375   :  { %8561 = vmatpush3.bf16.msra.mxu0 %v6548_v21 }
0x2376   :  { %8562 = vmatprep.subr.bf16.mxu0 %v9849_v17 }
0x2379   :  { %8563 = vmatpush3.bf16.msra.mxu0 %v6549_v28 }
0x237a   :  { %8564 = vmatprep.subr.bf16.mxu0 %v9849_v17 }
0x237d   :  { %8565 = vmatpush3.bf16.msra.mxu0 %v6550_v35 }
0x237e   :  { %8566 = vmatprep.subr.bf16.mxu0 %v9849_v17 }
0x2381   :  { %8567 = vmatpush3.bf16.msra.mxu0 %v6551_v25 }
0x2382   :  { %8568 = vmatprep.subr.bf16.mxu0 %v9849_v17 }
0x2385   :  { %8569 = vmatpush3.bf16.msra.mxu0 %v6552_v27 }
0x2388   :  { %8571 = vmatmul.mubr.bf16.vlgmr.msra.gmra.mrb[48].mxu0 %v6553_v15 }
0x245b   :  { %v6588_v46 = vpop.f32.mrb[48].mxu0 }
0x245c   :  { %v8572_v12 = vpop.f32.mrb[49].mxu0 }
0x245d   :  { %v6591_v63 = vpop.f32.mrb[50].mxu0 }
0x245e   :  { %v8751_v41 = vpack.c.bf16 %v6591_v63, %v6588_v46  ;;  %v8573_v0 = vpop.f32.mrb[51].mxu0 }
0x2460   :  { %8752 = vmatprep.subr.bf16.mxu1 %v8751_v41 }
0x2461   :  { %8754 = vmatpush3.bf16.msra.mxu1 %v8751_v41 }
0x2464   :  { %8579 = vmatmul.mubr.msk.f32.vlgmr.msra.gmra.mrb[58].mxu1 %vm2706_vm0, %v10399_v31 }
0x2537   :  { %v8580_v16 = vpop.f32.mrb[58].mxu1 }
0x2538   :  { %v6661_v48 = vpop.f32.mrb[59].mxu1  ;;  %v6675_v47 = vmul.f32 %v8580_v16, %v8580_v16 }
0x2539   :  { %6670 = vadd.xlane.f32.xlu0 %v6661_v48  ;;  %v6674_v6 = vmul.f32 %v6661_v48, %v6661_v48 }
0x253b   :  { %6676 = vadd.xlane.f32.xlu1 %v6674_v6 }
0x253d   :  { %6672 = vadd.xlane.f32.xlu0 %v8580_v16 }
0x253f   :  { %6678 = vadd.xlane.f32.xlu1 %v6675_v47 }
0x25c6   :  { %v6671_v10 = vpop.xlane.xlu0 %6670 }
0x25c8   :  { %v6677_v7 = vpop.xlane.xlu1 %6676 }
0x25ca   :  { %v6673_v62 = vpop.xlane.xlu0 %6672 }
0x25cb   :  { %v6680_v5 = vadd.f32 %v6673_v62, %v6671_v10 }
0x25cc   :  { %v6679_v18 = vpop.xlane.xlu1 %6678 }
0x25cd   :  { %v6682_v40 = vmul.f32 0.00390625, %v6680_v5  ;;  %v6681_v43 = vadd.f32 %v6679_v18, %v6677_v7 }
0x25cf   :  { %v6684_v1 = vmul.f32 %v6682_v40, %v6682_v40  ;;  %v6683_v32 = vmul.f32 0.00390625, %v6681_v43 }
0x25d1   :  { %v6685_v13 = vsub.f32 %v6683_v32, %v6684_v1 }
0x25d3   :  { %v6686_v34 = vmax.f32 %v6685_v13, 0.0 }
0x25d5   :  { %v6689_v44 = vadd.f32 1e-05, %v6686_v34 }
0x25d7   :  { %9503 = vrsqrt.f32 %v6689_v44 }
0x25e1   :  { %v9504_v11 = vpop.eup %9503 }
0x25e2   :  { %v6691_v9 = vmul.f32 %v9504_v11, %v8370_v14 }
0x25e4   :  { %6698 = vperm.xlu0 %9501, %v6691_v9   ;;  %v6694_v2 = vmul.f32 %v6691_v9, %v6682_v40 }
0x25e6   :  { %v6695_v33 = vsub.f32 %v8371_v45, %v6694_v2 }
0x25e8   :  { %6705 = vperm.xlu1 %9502, %v6695_v33  }
0x2663   :  { %v6699_v23 = vpop.permute.xlu0 %6698 }
0x2664   :  { %v6701_v3 = vmul.f32 %v6699_v23, %v6661_v48  ;;  %v6702_v42 = vmul.f32 %v8580_v16, %v6699_v23 }
0x2667   :  { %v6706_v4 = vpop.permute.xlu1 %6705 }
0x2668   :  { %v6708_v36 = vadd.f32 %v6706_v4, %v6701_v3  ;;  %v6709_v19 = vadd.f32 %v6706_v4, %v6702_v42 }
0x266a   :  { %v6710_v39 = vadd.f32 %v6708_v36, %v11184_v22  ;;  %v6711_v38 = vadd.f32 %v6709_v19, %v11186_v26 }
0x266c   :  { %v6712_v37 = vmin.f32 %v6710_v39, 20.0  ;;  %v6713_v24 = vmin.f32 %v6711_v38, 20.0  ;;  %vm6714_vm2 = vcmp.gt.f32.partialorder %v6710_v39, 20.0  ;;  %vm6715_vm4 = vcmp.gt.f32.partialorder %v6711_v38, 20.0 }
0x266e   :  { %v6716_v61 = vmul.f32 1.442695, %v6712_v37  ;;  %v6718_v29 = vmul.f32 1.442695, %v6713_v24 }
0x2670   :  { %9505 = vpow2.f32 %v6716_v61 }
0x2671   :  { %9507 = vpow2.f32 %v6718_v29 }
0x267a   :  { %v9506_v20 = vpop.eup %9505 }
0x267b   :  { %v9508_v21 = vpop.eup %9507  ;;  %v6720_v28 = vadd.f32 1.0, %v9506_v20  ;;  %v6723_v25 = vmul.f32 -0.5, %v9506_v20  ;;  %v6726_v46 = vand.u32 2147483647, %v9506_v20 }
0x267c   :  { %v6729_v35 = vadd.f32 1.0, %v9508_v21  ;;  %v6732_v27 = vmul.f32 -0.5, %v9508_v21  ;;  %v6735_v63 = vand.u32 2147483647, %v9508_v21 }
0x267d   :  { %9509 = vlog2.f32 %v6720_v28  ;;  %v6724_v15 = vadd.f32 1.0, %v6723_v25  ;;  %vm6727_vm1 = vcmp.lt.f32.partialorder %v6726_v46, 0.0004427343 }
0x267e   :  { %9511 = vlog2.f32 %v6729_v35  ;;  %v6733_v12 = vadd.f32 1.0, %v6732_v27  ;;  %vm6736_vm3 = vcmp.lt.f32.partialorder %v6735_v63, 0.0004427343 }
0x267f   :  { %v6725_v48 = vmul.f32 %v9506_v20, %v6724_v15 }
0x2680   :  { %v6734_v47 = vmul.f32 %v9508_v21, %v6733_v12 }
0x2687   :  { %v9510_v41 = vpop.eup %9509 }
0x2688   :  { %v9512_v0 = vpop.eup %9511  ;;  %v6722_v16 = vmul.f32 0.6931472, %v9510_v41 }
0x2689   :  { %v6731_v6 = vmul.f32 0.6931472, %v9512_v0 }
0x268a   :  { %v6728_v10 = vsel %vm6727_vm1, %v6725_v48, %v6722_v16 }
0x268b   :  { %v6737_v7 = vsel %vm6736_vm3, %v6734_v47, %v6731_v6  ;;  %v6738_v62 = vsel %vm6714_vm2, %v6710_v39, %v6728_v10 }
0x268c   :  { %v6739_v5 = vsel %vm6715_vm4, %v6711_v38, %v6737_v7 }
0x268d   :  { %9803 = dma.done.wait [#allocation18 + $0xa], 1024 }
0x268e   :  { %9804 = vsyncadd [#allocation18 + $0xa], 4294966272  ;;  %8581 = vmatprep.subr.bf16.mxu1 %v9849_v17  ;;  %8597 = vmatprep.mubr.msk.bf16.mxu1 %vm9853_vm11, %v9849_v17  ;;  %v6742_v18 = vld [vmem:[#allocation12] sm:$0xff]  ;;  %v6743_v40 = vld [vmem:[#allocation12 + $0x8] sm:$0xff]  ;;  %v6750_v14 = vpack.c.bf16 %v6739_v5, %v6738_v62 }
0x268f   :  { %8605 = vmatprep.mubr.msk.f32.mxu0 %vm2706_vm0, %v10392_v30  ;;  %9513 = vset.pattern.permute.xlu0 %v9850_v8  ;;  %v6744_v43 = vld [vmem:[#allocation12 + $0x10] sm:$0xff]  ;;  %v6745_v1 = vld [vmem:[#allocation12 + $0x18] sm:$0xff]  ;;  %v6746_v32 = vld [vmem:[#allocation12 + $0x20] sm:$0xff] }
0x2690   :  { %9514 = vset.pattern.permute.xlu1 %v9850_v8  ;;  %8582 = vmatpush3.bf16.msra.mxu1 %v6742_v18  ;;  %v6747_v13 = vld [vmem:[#allocation12 + $0x28] sm:$0xff]  ;;  %v6748_v34 = vld [vmem:[#allocation12 + $0x30] sm:$0xff]  ;;  %v6749_v44 = vld [vmem:[#allocation12 + $0x38] sm:$0xff] }
0x2691   :  { %8583 = vmatprep.subr.bf16.mxu1 %v9849_v17  ;;  %v8374_v25 = vld [vmem:[%s11441_s12 + $0x58] sm:$0xff] }
0x2692   :  { %v8375_v46 = vld [vmem:[%s11442_s29 + $0x58] sm:$0xff] }
0x2694   :  { %8584 = vmatpush3.bf16.msra.mxu1 %v6743_v40 }
0x2695   :  { %8585 = vmatprep.subr.bf16.mxu1 %v9849_v17 }
0x2698   :  { %8586 = vmatpush3.bf16.msra.mxu1 %v6744_v43 }
0x2699   :  { %8587 = vmatprep.subr.bf16.mxu1 %v9849_v17 }
0x269c   :  { %8588 = vmatpush3.bf16.msra.mxu1 %v6745_v1 }
0x269d   :  { %8589 = vmatprep.subr.bf16.mxu1 %v9849_v17 }
0x26a0   :  { %8590 = vmatpush3.bf16.msra.mxu1 %v6746_v32 }
0x26a1   :  { %8591 = vmatprep.subr.bf16.mxu1 %v9849_v17 }
0x26a4   :  { %8592 = vmatpush3.bf16.msra.mxu1 %v6747_v13 }
0x26a5   :  { %8593 = vmatprep.subr.bf16.mxu1 %v9849_v17 }
0x26a8   :  { %8594 = vmatpush3.bf16.msra.mxu1 %v6748_v34 }
0x26a9   :  { %8595 = vmatprep.subr.bf16.mxu1 %v9849_v17 }
0x26ac   :  { %8596 = vmatpush3.bf16.msra.mxu1 %v6749_v44 }
0x26af   :  { %8598 = vmatmul.mubr.bf16.vlgmr.msra.gmra.mrb[64].mxu1 %v6750_v14 }
0x2782   :  { %v6785_v11 = vpop.f32.mrb[64].mxu1 }
0x2783   :  { %v8599_v9 = vpop.f32.mrb[65].mxu1 }
0x2784   :  { %v6788_v45 = vpop.f32.mrb[66].mxu1 }
0x2785   :  { %v8755_v2 = vpack.c.bf16 %v6788_v45, %v6785_v11  ;;  %v8600_v33 = vpop.f32.mrb[67].mxu1 }
0x2787   :  { %8756 = vmatprep.subr.bf16.mxu0 %v8755_v2 }
0x2788   :  { %8758 = vmatpush3.bf16.msra.mxu0 %v8755_v2 }
0x2789   :  { %8608 = vmatprep.subr.bf16.mxu0 %v9849_v17 }
0x278b   :  { %8606 = vmatmul.mubr.msk.f32.vlgmr.msra.gmra.mrb[46].mxu0 %vm2706_vm0, %v10399_v31 }
0x278c   :  { %8624 = vmatprep.mubr.msk.bf16.mxu0 %vm9853_vm11, %v9849_v17 }
0x285e   :  { %v8607_v23 = vpop.f32.mrb[46].mxu0 }
0x285f   :  { %v6858_v3 = vpop.f32.mrb[47].mxu0  ;;  %v6872_v4 = vmul.f32 %v8607_v23, %v8607_v23 }
0x2860   :  { %6867 = vadd.xlane.f32.xlu0 %v6858_v3  ;;  %v6871_v42 = vmul.f32 %v6858_v3, %v6858_v3 }
0x2862   :  { %6873 = vadd.xlane.f32.xlu1 %v6871_v42 }
0x2864   :  { %6869 = vadd.xlane.f32.xlu0 %v8607_v23 }
0x2866   :  { %6875 = vadd.xlane.f32.xlu1 %v6872_v4 }
0x28ed   :  { %v6868_v36 = vpop.xlane.xlu0 %6867 }
0x28ef   :  { %v6874_v19 = vpop.xlane.xlu1 %6873 }
0x28f1   :  { %v6870_v39 = vpop.xlane.xlu0 %6869 }
0x28f2   :  { %v6877_v38 = vadd.f32 %v6870_v39, %v6868_v36 }
0x28f3   :  { %v6876_v37 = vpop.xlane.xlu1 %6875 }
0x28f4   :  { %v6879_v24 = vmul.f32 0.00390625, %v6877_v38  ;;  %v6878_v61 = vadd.f32 %v6876_v37, %v6874_v19 }
0x28f6   :  { %v6881_v29 = vmul.f32 %v6879_v24, %v6879_v24  ;;  %v6880_v20 = vmul.f32 0.00390625, %v6878_v61 }
0x28f8   :  { %v6882_v21 = vsub.f32 %v6880_v20, %v6881_v29 }
0x28fa   :  { %v6883_v28 = vmax.f32 %v6882_v21, 0.0 }
0x28fc   :  { %v6886_v35 = vadd.f32 1e-05, %v6883_v28 }
0x28fe   :  { %9515 = vrsqrt.f32 %v6886_v35 }
0x2908   :  { %v9516_v27 = vpop.eup %9515 }
0x2909   :  { %v6888_v15 = vmul.f32 %v9516_v27, %v8374_v25 }
0x290b   :  { %6895 = vperm.xlu0 %9513, %v6888_v15   ;;  %v6891_v12 = vmul.f32 %v6888_v15, %v6879_v24 }
0x290d   :  { %v6892_v63 = vsub.f32 %v8375_v46, %v6891_v12 }
0x290f   :  { %6902 = vperm.xlu1 %9514, %v6892_v63  }
0x298a   :  { %v6896_v41 = vpop.permute.xlu0 %6895 }
0x298b   :  { %v6898_v0 = vmul.f32 %v6896_v41, %v6858_v3  ;;  %v6899_v16 = vmul.f32 %v8607_v23, %v6896_v41 }
0x298e   :  { %v6903_v48 = vpop.permute.xlu1 %6902 }
0x298f   :  { %v6905_v6 = vadd.f32 %v6903_v48, %v6898_v0  ;;  %v6906_v47 = vadd.f32 %v6903_v48, %v6899_v16 }
0x2991   :  { %v6907_v10 = vadd.f32 %v6905_v6, %v11184_v22  ;;  %v6908_v7 = vadd.f32 %v6906_v47, %v11186_v26 }
0x2993   :  { %v6909_v62 = vmin.f32 %v6907_v10, 20.0  ;;  %v6910_v5 = vmin.f32 %v6908_v7, 20.0  ;;  %vm6911_vm6 = vcmp.gt.f32.partialorder %v6907_v10, 20.0  ;;  %vm6912_vm8 = vcmp.gt.f32.partialorder %v6908_v7, 20.0 }
0x2995   :  { %v6913_v18 = vmul.f32 1.442695, %v6909_v62  ;;  %v6915_v40 = vmul.f32 1.442695, %v6910_v5 }
0x2997   :  { %9517 = vpow2.f32 %v6913_v18 }
0x2998   :  { %9519 = vpow2.f32 %v6915_v40 }
0x29a1   :  { %v9518_v43 = vpop.eup %9517 }
0x29a2   :  { %v9520_v1 = vpop.eup %9519  ;;  %v6917_v32 = vadd.f32 1.0, %v9518_v43  ;;  %v6920_v34 = vmul.f32 -0.5, %v9518_v43  ;;  %v6923_v11 = vand.u32 2147483647, %v9518_v43 }
0x29a3   :  { %v6926_v13 = vadd.f32 1.0, %v9520_v1  ;;  %v6929_v44 = vmul.f32 -0.5, %v9520_v1  ;;  %v6932_v22 = vand.u32 2147483647, %v9520_v1 }
0x29a4   :  { %9521 = vlog2.f32 %v6917_v32  ;;  %v6921_v14 = vadd.f32 1.0, %v6920_v34  ;;  %vm6924_vm5 = vcmp.lt.f32.partialorder %v6923_v11, 0.0004427343 }
0x29a5   :  { %9523 = vlog2.f32 %v6926_v13  ;;  %v6930_v9 = vadd.f32 1.0, %v6929_v44  ;;  %vm6933_vm7 = vcmp.lt.f32.partialorder %v6932_v22, 0.0004427343 }
0x29a6   :  { %v6922_v33 = vmul.f32 %v9518_v43, %v6921_v14 }
0x29a7   :  { %v6931_v3 = vmul.f32 %v9520_v1, %v6930_v9 }
0x29ae   :  { %v9522_v45 = vpop.eup %9521 }
0x29af   :  { %v9524_v26 = vpop.eup %9523  ;;  %v6919_v2 = vmul.f32 0.6931472, %v9522_v45 }
0x29b0   :  { %v6928_v23 = vmul.f32 0.6931472, %v9524_v26 }
0x29b1   :  { %v6925_v42 = vsel %vm6924_vm5, %v6922_v33, %v6919_v2 }
0x29b2   :  { %v6934_v4 = vsel %vm6933_vm7, %v6931_v3, %v6928_v23  ;;  %v6935_v36 = vsel %vm6911_vm6, %v6907_v10, %v6925_v42 }
0x29b3   :  { %v6936_v19 = vsel %vm6912_vm8, %v6908_v7, %v6934_v4 }
0x29b4   :  { %9805 = dma.done.wait [#allocation18 + $0xb], 1024 }
0x29b5   :  { %9806 = vsyncadd [#allocation18 + $0xb], 4294966272  ;;  %8609 = vmatpush3.bf16.msra.mxu0 %v10273_v49  ;;  %8632 = vmatprep.mubr.msk.f32.mxu1 %vm2706_vm0, %v10392_v30  ;;  %v6947_v49 = vpack.c.bf16 %v6936_v19, %v6935_v36  ;;  %vm7064_vm9 = vcmask 261120   ;;  %v8378_v16 = vld [vmem:[%s11441_s12 + $0x60] sm:$0xff] }
0x29b6   :  { %8610 = vmatprep.subr.bf16.mxu0 %v9849_v17  ;;  %9525 = vset.pattern.permute.xlu0 %v9850_v8  ;;  %v8379_v47 = vld [vmem:[%s11442_s29 + $0x60] sm:$0xff] }
0x29b7   :  { %9526 = vset.pattern.permute.xlu1 %v9850_v8 }
0x29b9   :  { %8611 = vmatpush3.bf16.msra.mxu0 %v10278_v50 }
0x29ba   :  { %8612 = vmatprep.subr.bf16.mxu0 %v9849_v17 }
0x29bd   :  { %8613 = vmatpush3.bf16.msra.mxu0 %v10283_v51 }
0x29be   :  { %8614 = vmatprep.subr.bf16.mxu0 %v9849_v17 }
0x29c1   :  { %8615 = vmatpush3.bf16.msra.mxu0 %v10300_v52 }
0x29c2   :  { %8616 = vmatprep.subr.bf16.mxu0 %v9849_v17 }
0x29c5   :  { %8617 = vmatpush3.bf16.msra.mxu0 %v10305_v53 }
0x29c6   :  { %8618 = vmatprep.subr.bf16.mxu0 %v9849_v17 }
0x29c9   :  { %8619 = vmatpush3.bf16.msra.mxu0 %v10310_v54 }
0x29ca   :  { %8620 = vmatprep.subr.bf16.mxu0 %v9849_v17 }
0x29cd   :  { %8621 = vmatpush3.bf16.msra.mxu0 %v10315_v55 }
0x29ce   :  { %8622 = vmatprep.subr.bf16.mxu0 %v9849_v17 }
0x29d1   :  { %8623 = vmatpush3.bf16.msra.mxu0 %v10320_v56 }
0x29d4   :  { %8625 = vmatmul.mubr.bf16.vlgmr.msra.gmra.mrb[52].mxu0 %v6947_v49 }
0x2aa7   :  { %v6982_v50 = vpop.f32.mrb[52].mxu0 }
0x2aa8   :  { %v8626_v51 = vpop.f32.mrb[53].mxu0 }
0x2aa9   :  { %v6985_v52 = vpop.f32.mrb[54].mxu0 }
0x2aaa   :  { %v8759_v39 = vpack.c.bf16 %v6985_v52, %v6982_v50  ;;  %v8627_v38 = vpop.f32.mrb[55].mxu0 }
0x2aac   :  { %8760 = vmatprep.subr.bf16.mxu1 %v8759_v39 }
0x2aad   :  { %8762 = vmatpush3.bf16.msra.mxu1 %v8759_v39 }
0x2aae   :  { %8635 = vmatprep.subr.bf16.mxu1 %v9849_v17 }
0x2ab0   :  { %8633 = vmatmul.mubr.msk.f32.vlgmr.msra.gmra.mrb[68].mxu1 %vm2706_vm0, %v10399_v31 }
0x2ab1   :  { %8639 = vmatprep.mubr.msk.bf16.mxu1 %vm9853_vm11, %v9849_v17 }
0x2b83   :  { %v8634_v53 = vpop.f32.mrb[68].mxu1 }
0x2b84   :  { %v7055_v54 = vpop.f32.mrb[69].mxu1  ;;  %v7072_v24 = vmul.f32 %v8634_v53, %v8634_v53  ;;  %v7068_v61 = vsel %vm7064_vm9, %v8634_v53, 0.0 }
0x2b85   :  { %v7065_v55 = vsel %vm7064_vm9, %v7055_v54, 0.0  ;;  %v7071_v37 = vmul.f32 %v7055_v54, %v7055_v54 }
0x2b86   :  { %7066 = vadd.xlane.f32.xlu0 %v7065_v55  ;;  %v7076_v29 = vsel %vm7064_vm9, %v7072_v24, 0.0 }
0x2b87   :  { %v7073_v56 = vsel %vm7064_vm9, %v7071_v37, 0.0 }
0x2b88   :  { %7074 = vadd.xlane.f32.xlu1 %v7073_v56 }
0x2b8a   :  { %7069 = vadd.xlane.f32.xlu0 %v7068_v61 }
0x2b8c   :  { %7077 = vadd.xlane.f32.xlu1 %v7076_v29 }
0x2c13   :  { %v7067_v20 = vpop.xlane.xlu0 %7066 }
0x2c15   :  { %v7075_v21 = vpop.xlane.xlu1 %7074 }
0x2c17   :  { %v7070_v28 = vpop.xlane.xlu0 %7069 }
0x2c18   :  { %v7079_v35 = vadd.f32 %v7070_v28, %v7067_v20 }
0x2c19   :  { %v7078_v25 = vpop.xlane.xlu1 %7077 }
0x2c1a   :  { %v7081_v27 = vmul.f32 0.015625, %v7079_v35  ;;  %v7080_v15 = vadd.f32 %v7078_v25, %v7075_v21 }
0x2c1c   :  { %v7083_v46 = vmul.f32 %v7081_v27, %v7081_v27  ;;  %v7082_v12 = vmul.f32 0.015625, %v7080_v15 }
0x2c1e   :  { %v7084_v63 = vsub.f32 %v7082_v12, %v7083_v46 }
0x2c20   :  { %v7085_v41 = vmax.f32 %v7084_v63, 0.0 }
0x2c22   :  { %v7088_v0 = vadd.f32 1e-05, %v7085_v41 }
0x2c24   :  { %9527 = vrsqrt.f32 %v7088_v0 }
0x2c2e   :  { %v9528_v48 = vpop.eup %9527 }
0x2c2f   :  { %v7090_v6 = vmul.f32 %v9528_v48, %v8378_v16 }
0x2c31   :  { %7097 = vperm.xlu0 %9525, %v7090_v6   ;;  %v7093_v10 = vmul.f32 %v7090_v6, %v7081_v27 }
0x2c33   :  { %v7094_v7 = vsub.f32 %v8379_v47, %v7093_v10 }
0x2c35   :  { %7104 = vperm.xlu1 %9526, %v7094_v7  }
0x2cb0   :  { %v7098_v62 = vpop.permute.xlu0 %7097 }
0x2cb1   :  { %v7100_v5 = vmul.f32 %v7098_v62, %v7055_v54  ;;  %v7101_v18 = vmul.f32 %v8634_v53, %v7098_v62 }
0x2cb4   :  { %v7105_v40 = vpop.permute.xlu1 %7104 }
0x2cb5   :  { %v7107_v43 = vadd.f32 %v7105_v40, %v7100_v5  ;;  %v7108_v1 = vadd.f32 %v7105_v40, %v7101_v18 }
0x2cb7   :  { %v7109_v32 = vmin.f32 %v7107_v43, 20.0  ;;  %v7110_v13 = vmin.f32 %v7108_v1, 20.0  ;;  %vm7111_vm12 = vcmp.gt.f32.partialorder %v7107_v43, 20.0  ;;  %vm7112_vm14 = vcmp.gt.f32.partialorder %v7108_v1, 20.0 }
0x2cb9   :  { %v7113_v34 = vmul.f32 1.442695, %v7109_v32  ;;  %v7115_v44 = vmul.f32 1.442695, %v7110_v13 }
0x2cbb   :  { %9529 = vpow2.f32 %v7113_v34 }
0x2cbc   :  { %9531 = vpow2.f32 %v7115_v44 }
0x2cc5   :  { %v9530_v14 = vpop.eup %9529 }
0x2cc6   :  { %v9532_v11 = vpop.eup %9531  ;;  %v7117_v9 = vadd.f32 1.0, %v9530_v14  ;;  %v7120_v45 = vmul.f32 -0.5, %v9530_v14  ;;  %v7123_v33 = vand.u32 2147483647, %v9530_v14 }
0x2cc7   :  { %v7126_v22 = vadd.f32 1.0, %v9532_v11  ;;  %v7129_v26 = vmul.f32 -0.5, %v9532_v11  ;;  %v7132_v3 = vand.u32 2147483647, %v9532_v11 }
0x2cc8   :  { %9533 = vlog2.f32 %v7117_v9  ;;  %v7121_v2 = vadd.f32 1.0, %v7120_v45  ;;  %vm7124_vm10 = vcmp.lt.f32.partialorder %v7123_v33, 0.0004427343 }
0x2cc9   :  { %9535 = vlog2.f32 %v7126_v22  ;;  %v7130_v23 = vadd.f32 1.0, %v7129_v26  ;;  %vm7133_vm13 = vcmp.lt.f32.partialorder %v7132_v3, 0.0004427343 }
0x2cca   :  { %v7122_v19 = vmul.f32 %v9530_v14, %v7121_v2 }
0x2ccb   :  { %v7131_v50 = vmul.f32 %v9532_v11, %v7130_v23 }
0x2cd2   :  { %v9534_v42 = vpop.eup %9533 }
0x2cd3   :  { %v9536_v4 = vpop.eup %9535  ;;  %v7119_v36 = vmul.f32 0.6931472, %v9534_v42 }
0x2cd4   :  { %v7128_v49 = vmul.f32 0.6931472, %v9536_v4 }
0x2cd5   :  { %v7125_v51 = vsel %vm7124_vm10, %v7122_v19, %v7119_v36 }
0x2cd6   :  { %v7134_v52 = vsel %vm7133_vm13, %v7131_v50, %v7128_v49  ;;  %v11296_v39 = vsel %vm7111_vm12, %v7107_v43, %v7125_v51 }
0x2cd7   :  { %v11298_v38 = vsel %vm7112_vm14, %v7108_v1, %v7134_v52 }
0x2cd8   :  { %9807 = dma.done.wait [#allocation18 + $0xc], 256 }
0x2cd9   :  { %9808 = vsyncadd [#allocation18 + $0xc], 4294967040  ;;  %8636 = vmatpush3.bf16.msra.mxu1 %v10325_v57  ;;  %8647 = vmatprep.mubr.msk.f32.mxu0 %vm2706_vm0, %v10392_v30  ;;  %v7143_v53 = vpack.c.bf16 %v11298_v38, %v11296_v39  ;;  %v8383_v10 = vld [vmem:[%s11441_s12 + $0x68] sm:$0xff] }
0x2cda   :  { %8637 = vmatprep.subr.bf16.mxu1 %v9849_v17  ;;  %9537 = vset.pattern.permute.xlu0 %v9850_v8  ;;  %v8384_v5 = vld [vmem:[%s11442_s29 + $0x68] sm:$0xff] }
0x2cdb   :  { %9538 = vset.pattern.permute.xlu1 %v9850_v8 }
0x2cdd   :  { %8638 = vmatpush3.bf16.msra.mxu1 %v10330_v58 }
0x2cde   :  { %8650 = vmatprep.subr.bf16.mxu1 %v9849_v17 }
0x2ce0   :  { %8640 = vmatmul.mubr.msk.bf16.vlgmr.msra.gmra.mrb[72].mxu1 %vm7064_vm9, %v7143_v53 }
0x2ce1   :  { %8654 = vmatprep.mubr.msk.bf16.mxu1 %vm9853_vm11, %v9849_v17 }
0x2db3   :  { %v7181_v54 = vpop.f32.mrb[72].mxu1 }
0x2db4   :  { %v8641_v55 = vpop.f32.mrb[73].mxu1 }
0x2db5   :  { %v7184_v37 = vpop.f32.mrb[74].mxu1 }
0x2db6   :  { %v8763_v57 = vpack.c.bf16 %v7184_v37, %v7181_v54  ;;  %v8642_v56 = vpop.f32.mrb[75].mxu1 }
0x2db8   :  { %8764 = vmatprep.subr.bf16.mxu0 %v8763_v57 }
0x2db9   :  { %8766 = vmatpush3.bf16.msra.mxu0 %v8763_v57 }
0x2dbc   :  { %8648 = vmatmul.mubr.msk.f32.vlgmr.msra.gmra.mrb[56].mxu0 %vm2706_vm0, %v10399_v31 }
0x2e8f   :  { %v8649_v24 = vpop.f32.mrb[56].mxu0 }
0x2e90   :  { %v7254_v61 = vpop.f32.mrb[57].mxu0  ;;  %v7270_v21 = vmul.f32 %v8649_v24, %v8649_v24  ;;  %v7266_v28 = vsel %vm7064_vm9, %v8649_v24, 0.0 }
0x2e91   :  { %v7263_v29 = vsel %vm7064_vm9, %v7254_v61, 0.0  ;;  %v7269_v20 = vmul.f32 %v7254_v61, %v7254_v61 }
0x2e92   :  { %7264 = vadd.xlane.f32.xlu0 %v7263_v29  ;;  %v7274_v35 = vsel %vm7064_vm9, %v7270_v21, 0.0 }
0x2e93   :  { %v7271_v58 = vsel %vm7064_vm9, %v7269_v20, 0.0 }
0x2e94   :  { %7272 = vadd.xlane.f32.xlu1 %v7271_v58 }
0x2e96   :  { %7267 = vadd.xlane.f32.xlu0 %v7266_v28 }
0x2e98   :  { %7275 = vadd.xlane.f32.xlu1 %v7274_v35 }
0x2f1f   :  { %v7265_v25 = vpop.xlane.xlu0 %7264 }
0x2f21   :  { %v7273_v27 = vpop.xlane.xlu1 %7272 }
0x2f23   :  { %v7268_v15 = vpop.xlane.xlu0 %7267 }
0x2f24   :  { %v7277_v46 = vadd.f32 %v7268_v15, %v7265_v25 }
0x2f25   :  { %v7276_v12 = vpop.xlane.xlu1 %7275 }
0x2f26   :  { %v7279_v63 = vmul.f32 0.015625, %v7277_v46  ;;  %v7278_v41 = vadd.f32 %v7276_v12, %v7273_v27 }
0x2f28   :  { %v7281_v0 = vmul.f32 %v7279_v63, %v7279_v63  ;;  %v7280_v16 = vmul.f32 0.015625, %v7278_v41 }
0x2f2a   :  { %v7282_v48 = vsub.f32 %v7280_v16, %v7281_v0 }
0x2f2c   :  { %v7283_v6 = vmax.f32 %v7282_v48, 0.0 }
0x2f2e   :  { %v7286_v47 = vadd.f32 1e-05, %v7283_v6 }
0x2f30   :  { %9539 = vrsqrt.f32 %v7286_v47 }
0x2f3a   :  { %v9540_v7 = vpop.eup %9539 }
0x2f3b   :  { %v7288_v62 = vmul.f32 %v9540_v7, %v8383_v10 }
0x2f3d   :  { %7295 = vperm.xlu0 %9537, %v7288_v62   ;;  %v7291_v18 = vmul.f32 %v7288_v62, %v7279_v63 }
0x2f3f   :  { %v7292_v40 = vsub.f32 %v8384_v5, %v7291_v18 }
0x2f41   :  { %7302 = vperm.xlu1 %9538, %v7292_v40  }
0x2fbc   :  { %v7296_v43 = vpop.permute.xlu0 %7295 }
0x2fbd   :  { %v7298_v1 = vmul.f32 %v7296_v43, %v7254_v61  ;;  %v7299_v32 = vmul.f32 %v8649_v24, %v7296_v43 }
0x2fc0   :  { %v7303_v13 = vpop.permute.xlu1 %7302 }
0x2fc1   :  { %v7305_v34 = vadd.f32 %v7303_v13, %v7298_v1  ;;  %v7306_v44 = vadd.f32 %v7303_v13, %v7299_v32 }
0x2fc3   :  { %v7307_v14 = vadd.f32 %v7305_v34, %v11296_v39  ;;  %v7308_v11 = vadd.f32 %v7306_v44, %v11298_v38 }
0x2fc5   :  { %v7309_v9 = vmin.f32 %v7307_v14, 20.0  ;;  %v7310_v22 = vmin.f32 %v7308_v11, 20.0  ;;  %vm7311_vm1 = vcmp.gt.f32.partialorder %v7307_v14, 20.0  ;;  %vm7312_vm3 = vcmp.gt.f32.partialorder %v7308_v11, 20.0 }
0x2fc7   :  { %v7313_v45 = vmul.f32 1.442695, %v7309_v9  ;;  %v7315_v26 = vmul.f32 1.442695, %v7310_v22 }
0x2fc9   :  { %9541 = vpow2.f32 %v7313_v45 }
0x2fca   :  { %9543 = vpow2.f32 %v7315_v26 }
0x2fd3   :  { %v9542_v2 = vpop.eup %9541 }
0x2fd4   :  { %v9544_v33 = vpop.eup %9543  ;;  %v7317_v23 = vadd.f32 1.0, %v9542_v2  ;;  %v7320_v42 = vmul.f32 -0.5, %v9542_v2  ;;  %v7323_v19 = vand.u32 2147483647, %v9542_v2 }
0x2fd5   :  { %v7326_v3 = vadd.f32 1.0, %v9544_v33  ;;  %v7329_v4 = vmul.f32 -0.5, %v9544_v33  ;;  %v7332_v50 = vand.u32 2147483647, %v9544_v33 }
0x2fd6   :  { %9545 = vlog2.f32 %v7317_v23  ;;  %v7321_v36 = vadd.f32 1.0, %v7320_v42  ;;  %vm7324_vm15 = vcmp.lt.f32.partialorder %v7323_v19, 0.0004427343 }
0x2fd7   :  { %9547 = vlog2.f32 %v7326_v3  ;;  %v7330_v49 = vadd.f32 1.0, %v7329_v4  ;;  %vm7333_vm2 = vcmp.lt.f32.partialorder %v7332_v50, 0.0004427343 }
0x2fd8   :  { %v7322_v54 = vmul.f32 %v9542_v2, %v7321_v36 }
0x2fd9   :  { %v7331_v37 = vmul.f32 %v9544_v33, %v7330_v49 }
0x2fe0   :  { %v9546_v51 = vpop.eup %9545 }
0x2fe1   :  { %v9548_v52 = vpop.eup %9547  ;;  %v7319_v53 = vmul.f32 0.6931472, %v9546_v51 }
0x2fe2   :  { %v7328_v55 = vmul.f32 0.6931472, %v9548_v52 }
0x2fe3   :  { %v7325_v57 = vsel %vm7324_vm15, %v7322_v54, %v7319_v53 }
0x2fe4   :  { %v7334_v56 = vsel %vm7333_vm2, %v7331_v37, %v7328_v55  ;;  %v7335_v24 = vsel %vm7311_vm1, %v7307_v14, %v7325_v57 }
0x2fe5   :  { %v7336_v61 = vsel %vm7312_vm3, %v7308_v11, %v7334_v56 }
0x2fe6   :  { %9809 = dma.done.wait [#allocation18 + $0xd], 256 }
0x2fe7   :  { %9810 = vsyncadd [#allocation18 + $0xd], 4294967040  ;;  %8651 = vmatpush3.bf16.msra.mxu1 %v10335_v59  ;;  %8662 = vmatprep.mubr.msk.f32.mxu0 %vm2706_vm0, %v10392_v30  ;;  %v7341_v29 = vpack.c.bf16 %v7336_v61, %v7335_v24  ;;  %v8388_v43 = vld [vmem:[%s11441_s12 + $0x70] sm:$0xff] }
0x2fe8   :  { %8652 = vmatprep.subr.bf16.mxu1 %v9849_v17  ;;  %9549 = vset.pattern.permute.xlu0 %v9850_v8  ;;  %v8389_v13 = vld [vmem:[%s11442_s29 + $0x70] sm:$0xff] }
0x2fe9   :  { %9550 = vset.pattern.permute.xlu1 %v9850_v8 }
0x2feb   :  { %8653 = vmatpush3.bf16.msra.mxu1 %v10340_v60 }
0x2fee   :  { %8655 = vmatmul.mubr.msk.bf16.vlgmr.msra.gmra.mrb[76].mxu1 %vm7064_vm9, %v7341_v29 }
0x30c1   :  { %v7379_v20 = vpop.f32.mrb[76].mxu1 }
0x30c2   :  { %v8656_v58 = vpop.f32.mrb[77].mxu1 }
0x30c3   :  { %v7382_v21 = vpop.f32.mrb[78].mxu1 }
0x30c4   :  { %v8767_v28 = vpack.c.bf16 %v7382_v21, %v7379_v20  ;;  %v8657_v35 = vpop.f32.mrb[79].mxu1 }
0x30c6   :  { %8768 = vmatprep.subr.bf16.mxu0 %v8767_v28 }
0x30c7   :  { %8770 = vmatpush3.bf16.msra.mxu0 %v8767_v28 }
0x30ca   :  { %8663 = vmatmul.mubr.msk.f32.vlgmr.msra.gmra.mrb[58].mxu0 %vm2706_vm0, %v10399_v31 }
0x319d   :  { %v8664_v59 = vpop.f32.mrb[58].mxu0 }
0x319e   :  { %v7452_v25 = vpop.f32.mrb[59].mxu0  ;;  %v7468_v46 = vmul.f32 %v8664_v59, %v8664_v59  ;;  %v7464_v12 = vsel %vm7064_vm9, %v8664_v59, 0.0 }
0x319f   :  { %v7461_v27 = vsel %vm7064_vm9, %v7452_v25, 0.0  ;;  %v7467_v15 = vmul.f32 %v7452_v25, %v7452_v25 }
0x31a0   :  { %7462 = vadd.xlane.f32.xlu0 %v7461_v27  ;;  %v7472_v63 = vsel %vm7064_vm9, %v7468_v46, 0.0 }
0x31a1   :  { %v7469_v60 = vsel %vm7064_vm9, %v7467_v15, 0.0 }
0x31a2   :  { %7470 = vadd.xlane.f32.xlu1 %v7469_v60 }
0x31a4   :  { %7465 = vadd.xlane.f32.xlu0 %v7464_v12 }
0x31a6   :  { %7473 = vadd.xlane.f32.xlu1 %v7472_v63 }
0x322d   :  { %v7463_v41 = vpop.xlane.xlu0 %7462 }
0x322f   :  { %v7471_v0 = vpop.xlane.xlu1 %7470 }
0x3231   :  { %v7466_v16 = vpop.xlane.xlu0 %7465 }
0x3232   :  { %v7475_v48 = vadd.f32 %v7466_v16, %v7463_v41 }
0x3233   :  { %v7474_v6 = vpop.xlane.xlu1 %7473 }
0x3234   :  { %v7477_v47 = vmul.f32 0.015625, %v7475_v48  ;;  %v7476_v10 = vadd.f32 %v7474_v6, %v7471_v0 }
0x3236   :  { %v7479_v7 = vmul.f32 %v7477_v47, %v7477_v47  ;;  %v7478_v62 = vmul.f32 0.015625, %v7476_v10 }
0x3238   :  { %v7480_v5 = vsub.f32 %v7478_v62, %v7479_v7 }
0x323a   :  { %v7481_v18 = vmax.f32 %v7480_v5, 0.0 }
0x323c   :  { %v7484_v40 = vadd.f32 1e-05, %v7481_v18 }
0x323e   :  { %9551 = vrsqrt.f32 %v7484_v40 }
0x3248   :  { %v9552_v1 = vpop.eup %9551 }
0x3249   :  { %v7486_v32 = vmul.f32 %v9552_v1, %v8388_v43 }
0x324b   :  { %7493 = vperm.xlu0 %9549, %v7486_v32   ;;  %v7489_v34 = vmul.f32 %v7486_v32, %v7477_v47 }
0x324d   :  { %v7490_v44 = vsub.f32 %v8389_v13, %v7489_v34 }
0x324f   :  { %7500 = vperm.xlu1 %9550, %v7490_v44  }
0x32ca   :  { %v7494_v14 = vpop.permute.xlu0 %7493 }
0x32cb   :  { %v7496_v11 = vmul.f32 %v7494_v14, %v7452_v25  ;;  %v7497_v9 = vmul.f32 %v8664_v59, %v7494_v14 }
0x32ce   :  { %v7501_v22 = vpop.permute.xlu1 %7500 }
0x32cf   :  { %v7503_v45 = vadd.f32 %v7501_v22, %v7496_v11  ;;  %v7504_v26 = vadd.f32 %v7501_v22, %v7497_v9 }
0x32d1   :  { %v7505_v2 = vadd.f32 %v7503_v45, %v11296_v39  ;;  %v7506_v33 = vadd.f32 %v7504_v26, %v11298_v38 }
0x32d3   :  { %v7507_v23 = vmin.f32 %v7505_v2, 20.0  ;;  %v7508_v3 = vmin.f32 %v7506_v33, 20.0  ;;  %vm7509_vm5 = vcmp.gt.f32.partialorder %v7505_v2, 20.0  ;;  %vm7510_vm7 = vcmp.gt.f32.partialorder %v7506_v33, 20.0 }
0x32d5   :  { %v7511_v42 = vmul.f32 1.442695, %v7507_v23  ;;  %v7513_v4 = vmul.f32 1.442695, %v7508_v3 }
0x32d7   :  { %9553 = vpow2.f32 %v7511_v42 }
0x32d8   :  { %9555 = vpow2.f32 %v7513_v4 }
0x32e1   :  { %v9554_v36 = vpop.eup %9553 }
0x32e2   :  { %v9556_v19 = vpop.eup %9555  ;;  %v7515_v49 = vadd.f32 1.0, %v9554_v36  ;;  %v7518_v51 = vmul.f32 -0.5, %v9554_v36  ;;  %v7521_v54 = vand.u32 2147483647, %v9554_v36 }
0x32e3   :  { %v7524_v50 = vadd.f32 1.0, %v9556_v19  ;;  %v7527_v52 = vmul.f32 -0.5, %v9556_v19  ;;  %v7530_v37 = vand.u32 2147483647, %v9556_v19 }
0x32e4   :  { %9557 = vlog2.f32 %v7515_v49  ;;  %v7519_v53 = vadd.f32 1.0, %v7518_v51  ;;  %vm7522_vm4 = vcmp.lt.f32.partialorder %v7521_v54, 0.0004427343 }
0x32e5   :  { %9559 = vlog2.f32 %v7524_v50  ;;  %v7528_v55 = vadd.f32 1.0, %v7527_v52  ;;  %vm7531_vm6 = vcmp.lt.f32.partialorder %v7530_v37, 0.0004427343 }
0x32e6   :  { %v7520_v61 = vmul.f32 %v9554_v36, %v7519_v53 }
0x32e7   :  { %v7529_v20 = vmul.f32 %v9556_v19, %v7528_v55 }
0x32ee   :  { %v9558_v57 = vpop.eup %9557 }
0x32ef   :  { %v9560_v56 = vpop.eup %9559  ;;  %v7517_v24 = vmul.f32 0.6931472, %v9558_v57 }
0x32f0   :  { %v7526_v29 = vmul.f32 0.6931472, %v9560_v56 }
0x32f1   :  { %v7523_v58 = vsel %vm7522_vm4, %v7520_v61, %v7517_v24 }
0x32f2   :  { %v7532_v21 = vsel %vm7531_vm6, %v7529_v20, %v7526_v29  ;;  %v7533_v28 = vsel %vm7509_vm5, %v7505_v2, %v7523_v58 }
0x32f3   :  { %v7534_v35 = vsel %vm7510_vm7, %v7506_v33, %v7532_v21 }
0x32f4   :  { %9811 = dma.done.wait [#allocation18 + $0xe], 256 }
0x32f5   :  { %9812 = vsyncadd [#allocation18 + $0xe], 4294967040  ;;  %8665 = vmatprep.subr.bf16.mxu1 %v9849_v17  ;;  %8669 = vmatprep.mubr.msk.bf16.mxu1 %vm9853_vm11, %v9849_v17  ;;  %v7537_v59 = vld [vmem:[#allocation16] sm:$0xff]  ;;  %v7538_v25 = vld [vmem:[#allocation16 + $0x8] sm:$0xff]  ;;  %v7539_v27 = vpack.c.bf16 %v7534_v35, %v7533_v28 }
0x32f6   :  { %8677 = vmatprep.mubr.msk.f32.mxu0 %vm2706_vm0, %v10392_v30  ;;  %9561 = vset.pattern.permute.xlu0 %v9850_v8  ;;  %v8393_v11 = vld [vmem:[%s11441_s12 + $0x78] sm:$0xff] }
0x32f7   :  { %9562 = vset.pattern.permute.xlu1 %v9850_v8  ;;  %8666 = vmatpush3.bf16.msra.mxu1 %v7537_v59  ;;  %v8394_v45 = vld [vmem:[%s11442_s29 + $0x78] sm:$0xff] }
0x32f8   :  { %8667 = vmatprep.subr.bf16.mxu1 %v9849_v17 }
0x32fb   :  { %8668 = vmatpush3.bf16.msra.mxu1 %v7538_v25 }
0x32fe   :  { %8670 = vmatmul.mubr.msk.bf16.vlgmr.msra.gmra.mrb[80].mxu1 %vm7064_vm9, %v7539_v27 }
0x33d1   :  { %v7577_v15 = vpop.f32.mrb[80].mxu1 }
0x33d2   :  { %v8671_v60 = vpop.f32.mrb[81].mxu1 }
0x33d3   :  { %v7580_v46 = vpop.f32.mrb[82].mxu1 }
0x33d4   :  { %v8771_v12 = vpack.c.bf16 %v7580_v46, %v7577_v15  ;;  %v8672_v63 = vpop.f32.mrb[83].mxu1 }
0x33d6   :  { %8772 = vmatprep.subr.bf16.mxu0 %v8771_v12 }
0x33d7   :  { %8774 = vmatpush3.bf16.msra.mxu0 %v8771_v12 }
0x33da   :  { %8678 = vmatmul.mubr.msk.f32.vlgmr.msra.gmra.mrb[60].mxu0 %vm2706_vm0, %v10399_v31 }
0x34ad   :  { %v8679_v8 = vpop.f32.mrb[60].mxu0 }
0x34ae   :  { %v7650_v41 = vpop.f32.mrb[61].mxu0  ;;  %v7666_v6 = vmul.f32 %v8679_v8, %v8679_v8  ;;  %v7662_v47 = vsel %vm7064_vm9, %v8679_v8, 0.0 }
0x34af   :  { %v7659_v0 = vsel %vm7064_vm9, %v7650_v41, 0.0  ;;  %v7665_v16 = vmul.f32 %v7650_v41, %v7650_v41 }
0x34b0   :  { %7660 = vadd.xlane.f32.xlu0 %v7659_v0  ;;  %v7670_v10 = vsel %vm7064_vm9, %v7666_v6, 0.0 }
0x34b1   :  { %v7667_v48 = vsel %vm7064_vm9, %v7665_v16, 0.0 }
0x34b2   :  { %7668 = vadd.xlane.f32.xlu1 %v7667_v48 }
0x34b4   :  { %7663 = vadd.xlane.f32.xlu0 %v7662_v47 }
0x34b6   :  { %7671 = vadd.xlane.f32.xlu1 %v7670_v10 }
0x353d   :  { %v7661_v7 = vpop.xlane.xlu0 %7660 }
0x353f   :  { %v7669_v62 = vpop.xlane.xlu1 %7668 }
0x3541   :  { %v7664_v5 = vpop.xlane.xlu0 %7663 }
0x3542   :  { %v7673_v18 = vadd.f32 %v7664_v5, %v7661_v7 }
0x3543   :  { %v7672_v40 = vpop.xlane.xlu1 %7671 }
0x3544   :  { %v7675_v43 = vmul.f32 0.015625, %v7673_v18  ;;  %v7674_v1 = vadd.f32 %v7672_v40, %v7669_v62 }
0x3546   :  { %v7677_v32 = vmul.f32 %v7675_v43, %v7675_v43  ;;  %v7676_v13 = vmul.f32 0.015625, %v7674_v1 }
0x3548   :  { %v7678_v34 = vsub.f32 %v7676_v13, %v7677_v32 }
0x354a   :  { %v7679_v44 = vmax.f32 %v7678_v34, 0.0 }
0x354c   :  { %v7682_v14 = vadd.f32 1e-05, %v7679_v44 }
0x354e   :  { %9563 = vrsqrt.f32 %v7682_v14 }
0x3558   :  { %v9564_v9 = vpop.eup %9563 }
0x3559   :  { %v7684_v22 = vmul.f32 %v9564_v9, %v8393_v11 }
0x355b   :  { %7691 = vperm.xlu0 %9561, %v7684_v22   ;;  %v7687_v26 = vmul.f32 %v7684_v22, %v7675_v43 }
0x355d   :  { %v7688_v2 = vsub.f32 %v8394_v45, %v7687_v26 }
0x355f   :  { %7698 = vperm.xlu1 %9562, %v7688_v2  }
0x35da   :  { %v7692_v33 = vpop.permute.xlu0 %7691 }
0x35db   :  { %v7694_v23 = vmul.f32 %v7692_v33, %v7650_v41  ;;  %v7695_v3 = vmul.f32 %v8679_v8, %v7692_v33 }
0x35de   :  { %v7699_v42 = vpop.permute.xlu1 %7698 }
0x35df   :  { %v7701_v4 = vadd.f32 %v7699_v42, %v7694_v23  ;;  %v7702_v36 = vadd.f32 %v7699_v42, %v7695_v3 }
0x35e1   :  { %v7703_v19 = vadd.f32 %v7701_v4, %v11296_v39  ;;  %v7704_v49 = vadd.f32 %v7702_v36, %v11298_v38 }
0x35e3   :  { %v7705_v50 = vmin.f32 %v7703_v19, 20.0  ;;  %v7706_v51 = vmin.f32 %v7704_v49, 20.0  ;;  %vm7707_vm10 = vcmp.gt.f32.partialorder %v7703_v19, 20.0  ;;  %vm7708_vm13 = vcmp.gt.f32.partialorder %v7704_v49, 20.0 }
0x35e5   :  { %v7709_v52 = vmul.f32 1.442695, %v7705_v50  ;;  %v7711_v53 = vmul.f32 1.442695, %v7706_v51 }
0x35e7   :  { %9565 = vpow2.f32 %v7709_v52 }
0x35e8   :  { %9567 = vpow2.f32 %v7711_v53 }
0x35f1   :  { %v9566_v54 = vpop.eup %9565 }
0x35f2   :  { %v9568_v55 = vpop.eup %9567  ;;  %v7713_v37 = vadd.f32 1.0, %v9566_v54  ;;  %v7716_v56 = vmul.f32 -0.5, %v9566_v54  ;;  %v7719_v29 = vand.u32 2147483647, %v9566_v54 }
0x35f3   :  { %v7722_v57 = vadd.f32 1.0, %v9568_v55  ;;  %v7725_v24 = vmul.f32 -0.5, %v9568_v55  ;;  %v7728_v39 = vand.u32 2147483647, %v9568_v55 }
0x35f4   :  { %9569 = vlog2.f32 %v7713_v37  ;;  %v7717_v61 = vadd.f32 1.0, %v7716_v56  ;;  %vm7720_vm8 = vcmp.lt.f32.partialorder %v7719_v29, 0.0004427343 }
0x35f5   :  { %9571 = vlog2.f32 %v7722_v57  ;;  %v7726_v20 = vadd.f32 1.0, %v7725_v24  ;;  %vm7729_vm12 = vcmp.lt.f32.partialorder %v7728_v39, 0.0004427343 }
0x35f6   :  { %v7718_v28 = vmul.f32 %v9566_v54, %v7717_v61 }
0x35f7   :  { %v7727_v59 = vmul.f32 %v9568_v55, %v7726_v20 }
0x35fe   :  { %v9570_v58 = vpop.eup %9569 }
0x35ff   :  { %v9572_v38 = vpop.eup %9571  ;;  %v7715_v21 = vmul.f32 0.6931472, %v9570_v58 }
0x3600   :  { %v7724_v35 = vmul.f32 0.6931472, %v9572_v38 }
0x3601   :  { %v7721_v25 = vsel %vm7720_vm8, %v7718_v28, %v7715_v21 }
0x3602   :  { %v7730_v27 = vsel %vm7729_vm12, %v7727_v59, %v7724_v35  ;;  %v7731_v15 = vsel %vm7707_vm10, %v7703_v19, %v7721_v25 }
0x3603   :  { %v7732_v60 = vsel %vm7708_vm13, %v7704_v49, %v7730_v27 }
0x3604   :  { %9813 = dma.done.wait [#allocation18 + $0xf], 256 }
0x3605   :  { %9814 = vsyncadd [#allocation18 + $0xf], 4294967040  ;;  %8680 = vmatprep.subr.bf16.mxu0 %v9849_v17  ;;  %8684 = vmatprep.mubr.msk.bf16.mxu0 %vm9853_vm11, %v9849_v17  ;;  %v7735_v46 = vld [vmem:[#allocation17] sm:$0xff]  ;;  %v7736_v12 = vld [vmem:[#allocation17 + $0x8] sm:$0xff]  ;;  %v7737_v63 = vpack.c.bf16 %v7732_v60, %v7731_v15  ;;  %s9854_s12 = smov [#allocation24]  }
0x3606   :  { %8692 = vmatprep.mubr.msk.f32.mxu1 %vm2706_vm0, %v10392_v30  ;;  %8681 = vmatpush3.bf16.msra.mxu0 %v7735_v46  ;;  %s7892_s29 = sshll.u32 %s9854_s12, 4  ;;  %s7893_s29 = int_to_ptr.vmem [resolvable:$true] %s7892_s29 }
0x3607   :  { %8682 = vmatprep.subr.bf16.mxu0 %v9849_v17  ;;  %s9757_s9 = scalar_lea.vmem %s7893_s29, 256  ;;  %p9762_p9 = scmp.lt.s32.totalorder %s7893_s29, %s7893_s29 }
0x3608   :  { %p9758_p8 = scmp.ne.s32.totalorder %s7893_s29, %s9757_s9  ;;  %p9763_p10 = scmp.lt.s32.totalorder %s9757_s9, %s9757_s9 }
0x360a   :  { %8683 = vmatpush3.bf16.msra.mxu0 %v7736_v12  ;;  %p9764_p11 = por %p9763_p10, %p9762_p9 }
0x360c   :  { %p9765_p12 = pnand %p9764_p11, %p9758_p8 }
0x360d   :  { %8685 = vmatmul.mubr.msk.bf16.vlgmr.msra.gmra.mrb[64].mxu0 %vm7064_vm9, %v7737_v63 }
0x36e0   :  { %v7775_v8 = vpop.f32.mrb[64].mxu0 }
0x36e1   :  { %v8686_v41 = vpop.f32.mrb[65].mxu0 }
0x36e2   :  { %v7778_v0 = vpop.f32.mrb[66].mxu0 }
0x36e3   :  { %v8775_v16 = vpack.c.bf16 %v7778_v0, %v7775_v8  ;;  %v8687_v48 = vpop.f32.mrb[67].mxu0 }
0x36e5   :  { %8776 = vmatprep.subr.bf16.mxu1 %v8775_v16 }
0x36e6   :  { %8778 = vmatpush3.bf16.msra.mxu1 %v8775_v16 }
0x36e9   :  { %8693 = vmatmul.mubr.msk.f32.vlgmr.msra.gmra.mrb[70].mxu1 %vm2706_vm0, %v10399_v31 }
0x37bc   :  { %v8694_v30 = vpop.f32.mrb[70].mxu1 }
0x37bd   :  { %v7858_v6 = vmin.f32 %v8694_v30, 20.0  ;;  %v7848_v47 = vpop.f32.mrb[71].mxu1  ;;  %vm7860_vm11 = vcmp.gt.f32.partialorder %v8694_v30, 20.0 }
0x37be   :  { %v7857_v10 = vmin.f32 %v7848_v47, 20.0  ;;  %vm7859_vm14 = vcmp.gt.f32.partialorder %v7848_v47, 20.0 }
0x37bf   :  { %v7863_v17 = vmul.f32 1.442695, %v7858_v6 }
0x37c0   :  { %v7861_v7 = vmul.f32 1.442695, %v7857_v10 }
0x37c1   :  { %9573 = vpow2.f32 %v7863_v17 }
0x37c2   :  { %9575 = vpow2.f32 %v7861_v7 }
0x37cb   :  { %v9574_v62 = vpop.eup %9573 }
0x37cc   :  { %v9576_v5 = vpop.eup %9575  ;;  %v7874_v18 = vadd.f32 1.0, %v9574_v62  ;;  %v7877_v43 = vmul.f32 -0.5, %v9574_v62  ;;  %v7880_v13 = vand.u32 2147483647, %v9574_v62 }
0x37cd   :  { %v7865_v40 = vadd.f32 1.0, %v9576_v5  ;;  %v7868_v1 = vmul.f32 -0.5, %v9576_v5  ;;  %v7871_v31 = vand.u32 2147483647, %v9576_v5 }
0x37ce   :  { %9577 = vlog2.f32 %v7874_v18  ;;  %v7878_v32 = vadd.f32 1.0, %v7877_v43  ;;  %vm7881_vm0 = vcmp.lt.f32.partialorder %v7880_v13, 0.0004427343 }
0x37cf   :  { %9579 = vlog2.f32 %v7865_v40  ;;  %v7869_v34 = vadd.f32 1.0, %v7868_v1  ;;  %vm7872_vm9 = vcmp.lt.f32.partialorder %v7871_v31, 0.0004427343 }
0x37d0   :  { %v7879_v9 = vmul.f32 %v9574_v62, %v7878_v32 }
0x37d1   :  { %v7870_v45 = vmul.f32 %v9576_v5, %v7869_v34 }
0x37d8   :  { %v9578_v44 = vpop.eup %9577 }
0x37d9   :  { %v9580_v14 = vpop.eup %9579  ;;  %v7876_v11 = vmul.f32 0.6931472, %v9578_v44 }
0x37da   :  { %v7867_v22 = vmul.f32 0.6931472, %v9580_v14 }
0x37db   :  { %v7882_v26 = vsel %vm7881_vm0, %v7879_v9, %v7876_v11 }
0x37dc   :  { %v7884_v2 = vsel %vm7860_vm11, %v8694_v30, %v7882_v26  ;;  %v7873_v33 = vsel %vm7872_vm9, %v7870_v45, %v7867_v22 }
0x37dd   :  { %7886 = vst [vmem:[#allocation24 + $0x8] sm:$0xff] %v7884_v2  ;;  %v7883_v23 = vsel %vm7859_vm14, %v7848_v47, %v7873_v33 }
0x37de   :  { %7885 = vst [vmem:[#allocation24] sm:$0xff] %v7883_v23 }
0x37df   :  { %9768 = shalt.err (!%p9765_p12)
}
0x37e0   :  { %s11468_s27 = sld [smem:[#allocation81_spill]] }
0x37e6   :  { %s9769_s2 = scalar_lea.hbm %s11468_s27, 256 }
0x37e7   :  { %p9770_p13 = scmp.ne.s32.totalorder %s11468_s27, %s9769_s2  ;;  %p9773_p0 = scmp.lt.u32.totalorder %s9769_s2, %s11468_s27 }
0x37e9   :  { %p9775_p1 = pnand %p9773_p0, %p9770_p13 }
0x37eb   :  { %9778 = shalt.err (!%p9775_p1)
}
0x37ec   :  { %s11469_s11 = smov 8  }
0x37ed   :  { %7898 = dma.vmem_to_hbm [thread:$0]  %s7893_s29, 256, %s11468_s27, [#allocation21], %s9818_s22, %s9818_s22, %s11469_s11  }
0x37ee   :  { %9815 = dma.done.wait [#allocation21], 256  }
0x37ef   :  { %9816 = vsyncadd [#allocation21], 4294967040 }
0x37f0   :  { %7902 = vsyncpa [#allocation20], 1 }
0x37f1   :  { %7903 = vsyncpa [#allocation23], 1 }
0x37f2   :  { %7904 = vsyncpa [#allocation21], 1 }
0x37f3   :  { %7905 = vsyncmov [#allocation18] }
0x37f6   :  { %s7906_s21 = vpop.sfrf %7905 }
0x37f7   :  { %p8398_p2 = scmp.ne.s32.totalorder %s7906_s21, 0 }
0x37f9   :  { %7910 = shalt.err (%p8398_p2)  }
0x37fa   :  { %7912 = vsyncmov [#allocation18 + $0x1] }
0x37fd   :  { %s7913_s28 = vpop.sfrf %7912 }
0x37fe   :  { %p8399_p3 = scmp.ne.s32.totalorder %s7913_s28, 0 }
0x3800   :  { %7917 = shalt.err (%p8399_p3)  }
0x3801   :  { %7919 = vsyncmov [#allocation18 + $0x2] }
0x3804   :  { %s7920_s26 = vpop.sfrf %7919 }
0x3805   :  { %p8400_p4 = scmp.ne.s32.totalorder %s7920_s26, 0 }
0x3807   :  { %7924 = shalt.err (%p8400_p4)  }
0x3808   :  { %7926 = vsyncmov [#allocation18 + $0x3] }
0x380b   :  { %s7927_s10 = vpop.sfrf %7926 }
0x380c   :  { %p8401_p5 = scmp.ne.s32.totalorder %s7927_s10, 0 }
0x380e   :  { %7931 = shalt.err (%p8401_p5)  }
0x380f   :  { %7933 = vsyncmov [#allocation18 + $0x4] }
0x3812   :  { %s7934_s22 = vpop.sfrf %7933 }
0x3813   :  { %p8402_p6 = scmp.ne.s32.totalorder %s7934_s22, 0 }
0x3815   :  { %7938 = shalt.err (%p8402_p6)  }
0x3816   :  { %7940 = vsyncmov [#allocation18 + $0x5] }
0x3819   :  { %s7941_s0 = vpop.sfrf %7940 }
0x381a   :  { %p8403_p7 = scmp.ne.s32.totalorder %s7941_s0, 0 }
0x381c   :  { %7945 = shalt.err (%p8403_p7)  }
0x381d   :  { %7947 = vsyncmov [#allocation18 + $0x6] }
0x3820   :  { %s7948_s16 = vpop.sfrf %7947 }
0x3821   :  { %p8404_p8 = scmp.ne.s32.totalorder %s7948_s16, 0 }
0x3823   :  { %7952 = shalt.err (%p8404_p8)  }
0x3824   :  { %7954 = vsyncmov [#allocation18 + $0x7] }
0x3827   :  { %s7955_s17 = vpop.sfrf %7954 }
0x3828   :  { %p8405_p9 = scmp.ne.s32.totalorder %s7955_s17, 0 }
0x382a   :  { %7959 = shalt.err (%p8405_p9)  }
0x382b   :  { %7961 = vsyncmov [#allocation18 + $0x8] }
0x382e   :  { %s7962_s18 = vpop.sfrf %7961 }
0x382f   :  { %p8406_p10 = scmp.ne.s32.totalorder %s7962_s18, 0 }
0x3831   :  { %7966 = shalt.err (%p8406_p10)  }
0x3832   :  { %7968 = vsyncmov [#allocation18 + $0x9] }
0x3835   :  { %s7969_s25 = vpop.sfrf %7968 }
0x3836   :  { %p8407_p11 = scmp.ne.s32.totalorder %s7969_s25, 0 }
0x3838   :  { %7973 = shalt.err (%p8407_p11)  }
0x3839   :  { %7975 = vsyncmov [#allocation18 + $0xa] }
0x383c   :  { %s7976_s30 = vpop.sfrf %7975 }
0x383d   :  { %p8408_p12 = scmp.ne.s32.totalorder %s7976_s30, 0 }
0x383f   :  { %7980 = shalt.err (%p8408_p12)  }
0x3840   :  { %7982 = vsyncmov [#allocation18 + $0xb] }
0x3843   :  { %s7983_s19 = vpop.sfrf %7982 }
0x3844   :  { %p8409_p13 = scmp.ne.s32.totalorder %s7983_s19, 0 }
0x3846   :  { %7987 = shalt.err (%p8409_p13)  }
0x3847   :  { %7989 = vsyncmov [#allocation18 + $0xc] }
0x384a   :  { %s7990_s14 = vpop.sfrf %7989 }
0x384b   :  { %p8410_p0 = scmp.ne.s32.totalorder %s7990_s14, 0 }
0x384d   :  { %7994 = shalt.err (%p8410_p0)  }
0x384e   :  { %7996 = vsyncmov [#allocation18 + $0xd] }
0x3851   :  { %s7997_s5 = vpop.sfrf %7996 }
0x3852   :  { %p8411_p1 = scmp.ne.s32.totalorder %s7997_s5, 0 }
0x3854   :  { %8001 = shalt.err (%p8411_p1)  }
0x3855   :  { %8003 = vsyncmov [#allocation18 + $0xe] }
0x3858   :  { %s8004_s8 = vpop.sfrf %8003 }
0x3859   :  { %p8412_p2 = scmp.ne.s32.totalorder %s8004_s8, 0 }
0x385b   :  { %8008 = shalt.err (%p8412_p2)  }
0x385c   :  { %8010 = vsyncmov [#allocation18 + $0xf] }
0x385f   :  { %s8011_s3 = vpop.sfrf %8010 }
0x3860   :  { %p8413_p3 = scmp.ne.s32.totalorder %s8011_s3, 0 }
0x3862   :  { %8015 = shalt.err (%p8413_p3)  }

</bundles_post_ra>
